<compile_context>
chip_gen: v7x
topology: tpu7x:2x2x1
jax: 0.10.0
libtpu: 0.0.40
codegen_flags: <defaults>
</compile_context>

<pallas_src>
import functools

import jax
import jax.numpy as jnp
from jax import lax
from jax.experimental import pallas as pl
from jax.experimental.pallas import tpu as pltpu

# ---------------- problem sizes (small, consistent with the module: single-channel images) ------
N = 2                 # batch
H = W = 16            # spatial
C1 = 32               # channels of dconv_down1
HP = H + 2            # zero-pad ring for the 3x3 halo
WPA = 24              # row stride padded 18 -> 24 (sublane aligned)
NPAD = HP * WPA       # 432 flattened padded pixels per batch (multiple of 8)
M = 32                # flat margin per slab end (>= WPA + 1, multiple of 8)
NEXT = NPAD + 2 * M   # 496 rows per batch slab (margins included)
BN_EPS = 1e-5

# TODO(synk): op / op_adj are odl/ASTRA cone-beam ray transforms (no Pallas equivalent); they are
# replaced by an identity surrogate, for which opnorm == 1 and therefore eta = 1/opnorm = 1.
ETA = 1.0

# (tap index, flat offset) for the 3x3 stencil (tap t = dy*3 + dx, same ordering as the weights)
TAPS = tuple((dy * 3 + dxi, (dy - 1) * WPA + (dxi - 1)) for dy in range(3) for dxi in range(3))


def iteration_kernel(crows, im1_ref, mask_ref, curb_ref,
                     w1_ref, b1_ref, w2_ref, b2_ref, w3_ref,
                     out_ref, act_ref):
    # ---- conv #1 of dconv_down1: 3x3, 2->32. grad and BN1 scale folded into the weights;
    #      im2col was built by the wrapper -> one MXU matmul + bias + ReLU + interior mask.
    acc1 = jnp.dot(im1_ref[...], w1_ref[...], preferred_element_type=jnp.float32)
    act_ref[...] = jnp.maximum(acc1 + b1_ref[...], 0.0) * mask_ref[...]

    # ---- conv #2 of dconv_down1: 3x3, 32->32. BN2 scale folded into the weights.
    #      9 accumulated matmuls on shifted slices of the activation scratch (no im2col).
    t0, o0 = TAPS[0]
    acc2 = jnp.dot(act_ref[pl.ds(M + o0, crows), :], w2_ref[t0],
                   preferred_element_type=jnp.float32)
    for t, o in TAPS[1:]:
        acc2 = acc2 + jnp.dot(act_ref[pl.ds(M + o, crows), :], w2_ref[t],
                              preferred_element_type=jnp.float32)
    act2 = jnp.maximum(acc2 + b2_ref[...], 0.0)

    # ---- conv_last: 1x1, 32->1 with stepsize folded into w3 (column 0 of the 128-wide pad),
    #      residual (cur + step*b3) pre-packed by the wrapper -> lane-dense unmasked store.
    out_ref[...] = curb_ref[...] + jnp.dot(act2, w3_ref[...],
                                           preferred_element_type=jnp.float32)


def make_params(key):
    ks = jax.random.split(key, 13)
    w1 = 0.2 * jax.random.normal(ks[0], (3, 3, 2, C1), jnp.float32)     # Conv2d(2, 32, 3, pad=1)
    cb1 = 0.1 * jax.random.normal(ks[1], (C1,), jnp.float32)
    g1 = 1.0 + 0.1 * jax.random.normal(ks[2], (C1,), jnp.float32)       # BatchNorm2d(32)
    be1 = 0.1 * jax.random.normal(ks[3], (C1,), jnp.float32)
    mu1 = 0.1 * jax.random.normal(ks[4], (C1,), jnp.float32)
    v1 = jax.random.uniform(ks[5], (C1,), jnp.float32, 0.5, 1.5)

    w2 = 0.05 * jax.random.normal(ks[6], (3, 3, C1, C1), jnp.float32)   # Conv2d(32, 32, 3, pad=1)
    cb2 = 0.1 * jax.random.normal(ks[7], (C1,), jnp.float32)
    g2 = 1.0 + 0.1 * jax.random.normal(ks[8], (C1,), jnp.float32)       # BatchNorm2d(32)
    be2 = 0.1 * jax.random.normal(ks[9], (C1,), jnp.float32)
    mu2 = 0.1 * jax.random.normal(ks[10], (C1,), jnp.float32)
    v2 = jax.random.uniform(ks[11], (C1,), jnp.float32, 0.5, 1.5)

    w3 = 0.1 * jax.random.normal(ks[12], (C1, 1), jnp.float32)          # Conv2d(32, 1, 1)
    b3 = 0.05
    # NOTE: PyTorch initialises stepsize = 0 (output would equal `cur` exactly); a small nonzero
    # deterministic value is used so the conv path actually influences the output.
    step = 0.05

    # TODO(synk): BatchNorm2d is implemented in inference (folded) form, not training-mode stats.
    s1 = g1 / jnp.sqrt(v1 + BN_EPS)
    bb1 = be1 + s1 * (cb1 - mu1)
    s2 = g2 / jnp.sqrt(v2 + BN_EPS)
    bb2 = be2 + s2 * (cb2 - mu2)
    return dict(w1=w1, s1=s1, b1=bb1, w2=w2, s2=s2, b2=bb2, w3=w3, b3=b3, step=step)


@jax.jit
def run_iteration(cur, y, p):
    nb = cur.shape[0]
    tot = nb * NEXT               # total stacked slab rows (with per-slab margins)
    crows = tot - 2 * M           # conv2 / output rows (skip the outermost margins)

    # ---- pack [cur, y], zero-pad ring + stride pad, flatten, add per-slab margins -------------
    x = jnp.stack([cur[:, 0], y[:, 0]], axis=-1)                         # (N, H, W, 2)
    xp = jnp.pad(x, ((0, 0), (1, 1), (1, WPA - W - 1), (0, 0)))          # (N, HP, WPA, 2)
    xg = jnp.pad(xp.reshape(nb, NPAD, 2), ((0, 0), (M, M), (0, 0))).reshape(tot, 2)

    # ---- conv1 im2col built with XLA in the wrapper (9 shifted slices, tap-major columns) ------
    xgp = jnp.pad(xg, ((M, M), (0, 0)))                                  # guard for the +/- shifts
    im1 = jnp.concatenate([xgp[M + o: M + o + tot] for _, o in TAPS], axis=1)   # (tot, 18)

    # ---- interior mask (1 only at true image pixels; 0 at ring / stride pad / margins) ---------
    mask = jnp.pad(jnp.ones((H, W), jnp.float32), ((1, 1), (1, WPA - W - 1))).reshape(NPAD)
    mask = jnp.pad(jnp.broadcast_to(mask, (nb, NPAD)), ((0, 0), (M, M))).reshape(tot, 1)

    # ---- residual term cur + step*b3, laid out on the conv2/output row grid --------------------
    curf = jnp.pad(cur[:, 0], ((0, 0), (1, 1), (1, WPA - W - 1))).reshape(nb, NPAD)
    curb = jnp.pad(curf, ((0, 0), (0, 2 * M))).reshape(tot)[:crows]
    curb = (curb + p["step"] * p["b3"]).reshape(crows, 1).astype(jnp.float32)

    # ---- fold grad into conv1 weights:  cur*(w0 + eta*w1) + y*(-eta*w1); fold BN scales --------
    w1 = p["w1"]
    w1p = (jnp.stack([w1[:, :, 0, :] + ETA * w1[:, :, 1, :],
                      -ETA * w1[:, :, 1, :]], axis=2).reshape(18, C1)
           * p["s1"][None, :])                                           # (18, C1)
    b1 = p["b1"].reshape(1, C1)
    w2p = (p["w2"] * p["s2"][None, None, None, :]).reshape(9, C1, C1)    # (tap, cin, cout)
    b2 = p["b2"].reshape(1, C1)
    # stepsize folded into conv_last; zero-pad to 128 lanes so the output store is unmasked
    w3p = jnp.zeros((C1, 128), jnp.float32).at[:, 0].set(p["step"] * p["w3"][:, 0])

    out_flat = pl.pallas_call(
        functools.partial(iteration_kernel, crows),
        out_shape=jax.ShapeDtypeStruct((crows, 128), jnp.float32),
        scratch_shapes=[pltpu.VMEM((tot, C1), jnp.float32)],             # conv1 activations
    )(im1, mask, curb, w1p, b1, w2p, b2, w3p)

    # column 0 is the real result; drop margins, pad ring and stride padding
    col0 = jnp.pad(out_flat[:, 0], (0, tot - crows))
    out = col0.reshape(nb, NEXT)[:, :NPAD].reshape(nb, HP, WPA)[:, 1:H + 1, 1:W + 1]
    return out[:, None, :, :]                                            # NCHW (N, 1, H, W)


def reference(cur, y, p):
    """Pure-JAX reference with identical (folded) parameters."""
    grad = cur - y                                                       # identity op/op_adj
    x = jnp.concatenate([cur, ETA * grad], axis=1)

    def conv3x3_bn_relu(h, w_hwio, scale, bias):
        w = jnp.transpose(w_hwio, (3, 2, 0, 1))                          # HWIO -> OIHW
        o = lax.conv_general_dilated(h, w, (1, 1), 'SAME',
                                     dimension_numbers=('NCHW', 'OIHW', 'NCHW'),
                                     precision=lax.Precision.HIGHEST)
        return jnp.maximum(o * scale.reshape(1, -1, 1, 1) + bias.reshape(1, -1, 1, 1), 0.0)

    h = conv3x3_bn_relu(x, p["w1"], p["s1"], p["b1"])
    h = conv3x3_bn_relu(h, p["w2"], p["s2"], p["b2"])
    w3 = p["w3"].T.reshape(1, C1, 1, 1)
    dx = lax.conv_general_dilated(h, w3, (1, 1), 'SAME',
                                  dimension_numbers=('NCHW', 'OIHW', 'NCHW'),
                                  precision=lax.Precision.HIGHEST) + p["b3"]
    return cur + p["step"] * dx


if __name__ == "__main__":
    key = jax.random.PRNGKey(0)
    kc, ky, kp = jax.random.split(key, 3)
    cur = jax.random.normal(kc, (N, 1, H, W), jnp.float32)
    # with the identity surrogate operator, y lives in the image space
    y = jax.random.normal(ky, (N, 1, H, W), jnp.float32)
    params = make_params(kp)

    out = run_iteration(cur, y, params)
    jax.block_until_ready(out)

    ref = reference(cur, y, params)
    max_err = float(jnp.max(jnp.abs(out - ref)))
    if out.shape != (N, 1, H, W) or not bool(jnp.allclose(out, ref, atol=1e-2, rtol=1e-2)):
        raise SystemExit(f"KERNEL_MISMATCH: shape={out.shape}, max abs err={max_err}")
    print("KERNEL_OK")
</pallas_src>

<mosaic_0001>
module attributes {stable_mosaic.version = 11 : i64} {
  func.func @iteration_kernel(%arg0: memref<992x18xf32, #tpu.memory_space<vmem>>, %arg1: memref<992x1xf32, #tpu.memory_space<vmem>>, %arg2: memref<928x1xf32, #tpu.memory_space<vmem>>, %arg3: memref<18x32xf32, #tpu.memory_space<vmem>>, %arg4: memref<1x32xf32, #tpu.memory_space<vmem>>, %arg5: memref<9x32x32xf32, #tpu.memory_space<vmem>>, %arg6: memref<1x32xf32, #tpu.memory_space<vmem>>, %arg7: memref<32x128xf32, #tpu.memory_space<vmem>>, %arg8: memref<928x128xf32, #tpu.memory_space<vmem>>, %arg9: memref<992x32xf32, #tpu.memory_space<vmem>>) attributes {dimension_semantics = [], scalar_prefetch = 0 : i64, scratch_operands = 1 : i64, tpu.core_type = #tpu.core_type<tc>} {
    %c0 = arith.constant 0 : index
    %c0_0 = arith.constant 0 : index
    %0 = vector.load %arg0[%c0, %c0_0] : memref<992x18xf32, #tpu.memory_space<vmem>>, vector<992x18xf32>
    %c0_1 = arith.constant 0 : index
    %c0_2 = arith.constant 0 : index
    %1 = vector.load %arg3[%c0_1, %c0_2] : memref<18x32xf32, #tpu.memory_space<vmem>>, vector<18x32xf32>
    %cst = arith.constant dense<0.000000e+00> : vector<992x32xf32>
    %2 = tpu.matmul %0, %1, %cst {dimension_numbers = #tpu.dot_dimension_numbers<[1], [0], [0], [1], [0, 0, 1, 1], [], []>} : vector<992x18xf32>, vector<18x32xf32>, vector<992x32xf32> -> vector<992x32xf32>
    %c0_3 = arith.constant 0 : index
    %c0_4 = arith.constant 0 : index
    %3 = vector.load %arg4[%c0_3, %c0_4] : memref<1x32xf32, #tpu.memory_space<vmem>>, vector<1x32xf32>
    %4 = vector.broadcast %3 : vector<1x32xf32> to vector<992x32xf32>
    %5 = arith.addf %2, %4 : vector<992x32xf32>
    %cst_5 = arith.constant 0.000000e+00 : f32
    %6 = vector.broadcast %cst_5 : f32 to vector<992x32xf32>
    %7 = arith.maximumf %5, %6 : vector<992x32xf32>
    %c0_6 = arith.constant 0 : index
    %c0_7 = arith.constant 0 : index
    %8 = vector.load %arg1[%c0_6, %c0_7] : memref<992x1xf32, #tpu.memory_space<vmem>>, vector<992x1xf32>
    %9 = vector.broadcast %8 : vector<992x1xf32> to vector<992x32xf32>
    %10 = arith.mulf %7, %9 : vector<992x32xf32>
    %c0_8 = arith.constant 0 : index
    %c0_9 = arith.constant 0 : index
    %11 = vector.load %arg9[%c0_8, %c0_9] : memref<992x32xf32, #tpu.memory_space<vmem>>, vector<992x32xf32>
    tpu.vector_store %arg9[%c0_8, %c0_9], %10 {strides = array<i32>} : memref<992x32xf32, #tpu.memory_space<vmem>>, vector<992x32xf32>,
    %c7 = arith.constant 7 : index
    %c0_10 = arith.constant 0 : index
    %12 = vector.load %arg9[%c7, %c0_10] : memref<992x32xf32, #tpu.memory_space<vmem>>, vector<928x32xf32>
    %c0_11 = arith.constant 0 : index
    %c0_12 = arith.constant 0 : index
    %c0_13 = arith.constant 0 : index
    %13 = vector.load %arg5[%c0_11, %c0_12, %c0_13] : memref<9x32x32xf32, #tpu.memory_space<vmem>>, vector<1x32x32xf32>
    %14 = vector.shape_cast %13 : vector<1x32x32xf32> to vector<32x32xf32>
    %cst_14 = arith.constant dense<0.000000e+00> : vector<928x32xf32>
    %15 = tpu.matmul %12, %14, %cst_14 {dimension_numbers = #tpu.dot_dimension_numbers<[1], [0], [0], [1], [0, 0, 1, 1], [], []>} : vector<928x32xf32>, vector<32x32xf32>, vector<928x32xf32> -> vector<928x32xf32>
    %c8 = arith.constant 8 : index
    %c0_15 = arith.constant 0 : index
    %16 = vector.load %arg9[%c8, %c0_15] : memref<992x32xf32, #tpu.memory_space<vmem>>, vector<928x32xf32>
    %c1 = arith.constant 1 : index
    %c0_16 = arith.constant 0 : index
    %c0_17 = arith.constant 0 : index
    %17 = vector.load %arg5[%c1, %c0_16, %c0_17] : memref<9x32x32xf32, #tpu.memory_space<vmem>>, vector<1x32x32xf32>
    %18 = vector.shape_cast %17 : vector<1x32x32xf32> to vector<32x32xf32>
    %cst_18 = arith.constant dense<0.000000e+00> : vector<928x32xf32>
    %19 = tpu.matmul %16, %18, %cst_18 {dimension_numbers = #tpu.dot_dimension_numbers<[1], [0], [0], [1], [0, 0, 1, 1], [], []>} : vector<928x32xf32>, vector<32x32xf32>, vector<928x32xf32> -> vector<928x32xf32>
    %20 = arith.addf %15, %19 : vector<928x32xf32>
    %c9 = arith.constant 9 : index
    %c0_19 = arith.constant 0 : index
    %21 = vector.load %arg9[%c9, %c0_19] : memref<992x32xf32, #tpu.memory_space<vmem>>, vector<928x32xf32>
    %c2 = arith.constant 2 : index
    %c0_20 = arith.constant 0 : index
    %c0_21 = arith.constant 0 : index
    %22 = vector.load %arg5[%c2, %c0_20, %c0_21] : memref<9x32x32xf32, #tpu.memory_space<vmem>>, vector<1x32x32xf32>
    %23 = vector.shape_cast %22 : vector<1x32x32xf32> to vector<32x32xf32>
    %cst_22 = arith.constant dense<0.000000e+00> : vector<928x32xf32>
    %24 = tpu.matmul %21, %23, %cst_22 {dimension_numbers = #tpu.dot_dimension_numbers<[1], [0], [0], [1], [0, 0, 1, 1], [], []>} : vector<928x32xf32>, vector<32x32xf32>, vector<928x32xf32> -> vector<928x32xf32>
    %25 = arith.addf %20, %24 : vector<928x32xf32>
    %c31 = arith.constant 31 : index
    %c0_23 = arith.constant 0 : index
    %26 = vector.load %arg9[%c31, %c0_23] : memref<992x32xf32, #tpu.memory_space<vmem>>, vector<928x32xf32>
    %c3 = arith.constant 3 : index
    %c0_24 = arith.constant 0 : index
    %c0_25 = arith.constant 0 : index
    %27 = vector.load %arg5[%c3, %c0_24, %c0_25] : memref<9x32x32xf32, #tpu.memory_space<vmem>>, vector<1x32x32xf32>
    %28 = vector.shape_cast %27 : vector<1x32x32xf32> to vector<32x32xf32>
    %cst_26 = arith.constant dense<0.000000e+00> : vector<928x32xf32>
    %29 = tpu.matmul %26, %28, %cst_26 {dimension_numbers = #tpu.dot_dimension_numbers<[1], [0], [0], [1], [0, 0, 1, 1], [], []>} : vector<928x32xf32>, vector<32x32xf32>, vector<928x32xf32> -> vector<928x32xf32>
    %30 = arith.addf %25, %29 : vector<928x32xf32>
    %c32 = arith.constant 32 : index
    %c0_27 = arith.constant 0 : index
    %31 = vector.load %arg9[%c32, %c0_27] : memref<992x32xf32, #tpu.memory_space<vmem>>, vector<928x32xf32>
    %c4 = arith.constant 4 : index
    %c0_28 = arith.constant 0 : index
    %c0_29 = arith.constant 0 : index
    %32 = vector.load %arg5[%c4, %c0_28, %c0_29] : memref<9x32x32xf32, #tpu.memory_space<vmem>>, vector<1x32x32xf32>
    %33 = vector.shape_cast %32 : vector<1x32x32xf32> to vector<32x32xf32>
    %cst_30 = arith.constant dense<0.000000e+00> : vector<928x32xf32>
    %34 = tpu.matmul %31, %33, %cst_30 {dimension_numbers = #tpu.dot_dimension_numbers<[1], [0], [0], [1], [0, 0, 1, 1], [], []>} : vector<928x32xf32>, vector<32x32xf32>, vector<928x32xf32> -> vector<928x32xf32>
    %35 = arith.addf %30, %34 : vector<928x32xf32>
    %c33 = arith.constant 33 : index
    %c0_31 = arith.constant 0 : index
    %36 = vector.load %arg9[%c33, %c0_31] : memref<992x32xf32, #tpu.memory_space<vmem>>, vector<928x32xf32>
    %c5 = arith.constant 5 : index
    %c0_32 = arith.constant 0 : index
    %c0_33 = arith.constant 0 : index
    %37 = vector.load %arg5[%c5, %c0_32, %c0_33] : memref<9x32x32xf32, #tpu.memory_space<vmem>>, vector<1x32x32xf32>
    %38 = vector.shape_cast %37 : vector<1x32x32xf32> to vector<32x32xf32>
    %cst_34 = arith.constant dense<0.000000e+00> : vector<928x32xf32>
    %39 = tpu.matmul %36, %38, %cst_34 {dimension_numbers = #tpu.dot_dimension_numbers<[1], [0], [0], [1], [0, 0, 1, 1], [], []>} : vector<928x32xf32>, vector<32x32xf32>, vector<928x32xf32> -> vector<928x32xf32>
    %40 = arith.addf %35, %39 : vector<928x32xf32>
    %c55 = arith.constant 55 : index
    %c0_35 = arith.constant 0 : index
    %41 = vector.load %arg9[%c55, %c0_35] : memref<992x32xf32, #tpu.memory_space<vmem>>, vector<928x32xf32>
    %c6 = arith.constant 6 : index
    %c0_36 = arith.constant 0 : index
    %c0_37 = arith.constant 0 : index
    %42 = vector.load %arg5[%c6, %c0_36, %c0_37] : memref<9x32x32xf32, #tpu.memory_space<vmem>>, vector<1x32x32xf32>
    %43 = vector.shape_cast %42 : vector<1x32x32xf32> to vector<32x32xf32>
    %cst_38 = arith.constant dense<0.000000e+00> : vector<928x32xf32>
    %44 = tpu.matmul %41, %43, %cst_38 {dimension_numbers = #tpu.dot_dimension_numbers<[1], [0], [0], [1], [0, 0, 1, 1], [], []>} : vector<928x32xf32>, vector<32x32xf32>, vector<928x32xf32> -> vector<928x32xf32>
    %45 = arith.addf %40, %44 : vector<928x32xf32>
    %c56 = arith.constant 56 : index
    %c0_39 = arith.constant 0 : index
    %46 = vector.load %arg9[%c56, %c0_39] : memref<992x32xf32, #tpu.memory_space<vmem>>, vector<928x32xf32>
    %c7_40 = arith.constant 7 : index
    %c0_41 = arith.constant 0 : index
    %c0_42 = arith.constant 0 : index
    %47 = vector.load %arg5[%c7_40, %c0_41, %c0_42] : memref<9x32x32xf32, #tpu.memory_space<vmem>>, vector<1x32x32xf32>
    %48 = vector.shape_cast %47 : vector<1x32x32xf32> to vector<32x32xf32>
    %cst_43 = arith.constant dense<0.000000e+00> : vector<928x32xf32>
    %49 = tpu.matmul %46, %48, %cst_43 {dimension_numbers = #tpu.dot_dimension_numbers<[1], [0], [0], [1], [0, 0, 1, 1], [], []>} : vector<928x32xf32>, vector<32x32xf32>, vector<928x32xf32> -> vector<928x32xf32>
    %50 = arith.addf %45, %49 : vector<928x32xf32>
    %c57 = arith.constant 57 : index
    %c0_44 = arith.constant 0 : index
    %51 = vector.load %arg9[%c57, %c0_44] : memref<992x32xf32, #tpu.memory_space<vmem>>, vector<928x32xf32>
    %c8_45 = arith.constant 8 : index
    %c0_46 = arith.constant 0 : index
    %c0_47 = arith.constant 0 : index
    %52 = vector.load %arg5[%c8_45, %c0_46, %c0_47] : memref<9x32x32xf32, #tpu.memory_space<vmem>>, vector<1x32x32xf32>
    %53 = vector.shape_cast %52 : vector<1x32x32xf32> to vector<32x32xf32>
    %cst_48 = arith.constant dense<0.000000e+00> : vector<928x32xf32>
    %54 = tpu.matmul %51, %53, %cst_48 {dimension_numbers = #tpu.dot_dimension_numbers<[1], [0], [0], [1], [0, 0, 1, 1], [], []>} : vector<928x32xf32>, vector<32x32xf32>, vector<928x32xf32> -> vector<928x32xf32>
    %55 = arith.addf %50, %54 : vector<928x32xf32>
    %c0_49 = arith.constant 0 : index
    %c0_50 = arith.constant 0 : index
    %56 = vector.load %arg6[%c0_49, %c0_50] : memref<1x32xf32, #tpu.memory_space<vmem>>, vector<1x32xf32>
    %57 = vector.broadcast %56 : vector<1x32xf32> to vector<928x32xf32>
    %58 = arith.addf %55, %57 : vector<928x32xf32>
    %cst_51 = arith.constant 0.000000e+00 : f32
    %59 = vector.broadcast %cst_51 : f32 to vector<928x32xf32>
    %60 = arith.maximumf %58, %59 : vector<928x32xf32>
    %c0_52 = arith.constant 0 : index
    %c0_53 = arith.constant 0 : index
    %61 = vector.load %arg2[%c0_52, %c0_53] : memref<928x1xf32, #tpu.memory_space<vmem>>, vector<928x1xf32>
    %c0_54 = arith.constant 0 : index
    %c0_55 = arith.constant 0 : index
    %62 = vector.load %arg7[%c0_54, %c0_55] : memref<32x128xf32, #tpu.memory_space<vmem>>, vector<32x128xf32>
    %cst_56 = arith.constant dense<0.000000e+00> : vector<928x128xf32>
    %63 = tpu.matmul %60, %62, %cst_56 {dimension_numbers = #tpu.dot_dimension_numbers<[1], [0], [0], [1], [0, 0, 1, 1], [], []>} : vector<928x32xf32>, vector<32x128xf32>, vector<928x128xf32> -> vector<928x128xf32>
    %64 = vector.broadcast %61 : vector<928x1xf32> to vector<928x128xf32>
    %65 = arith.addf %64, %63 : vector<928x128xf32>
    %c0_57 = arith.constant 0 : index
    %c0_58 = arith.constant 0 : index
    %66 = vector.load %arg8[%c0_57, %c0_58] : memref<928x128xf32, #tpu.memory_space<vmem>>, vector<928x128xf32>
    tpu.vector_store %arg8[%c0_57, %c0_58], %65 {strides = array<i32>} : memref<928x128xf32, #tpu.memory_space<vmem>>, vector<928x128xf32>,
    return
  }
}

</mosaic_0001>

<bundles_post_ra>
// kernel: run_iteration.1
= control target key start
LH: loop header
LB: loop body
LE: loop exit
PB: predicated region body
PF: predicated region fallthrough
CT: control target
= control target key end

     0   :  { %v21027_v0 = vmov 0   ;;  %vm163_vm0 = vcmask 146432   ;;  %vm536_vm1 = vcmask 1041408   ;;  %vm2217_vm2 = vcmask 261120   ;;  %s26377_s1 = inlined_call_operand.vmem [shape: f32[992,1], index: 1, kind: input, shape index: {}]   ;;  %s26378_s3 = inlined_call_operand.vmem [shape: f32[18,32], index: 3, kind: input, shape index: {}]   ;;  %s26379_s0 = inlined_call_operand.vmem [shape: f32[992,18], index: 0, kind: input, shape index: {}]   ;;  %s26380_s5 = inlined_call_operand.vmem [shape: f32[9,32,32], index: 5, kind: input, shape index: {}]   ;;  %s26381_s4 = inlined_call_operand.vmem [shape: f32[1,32], index: 4, kind: input, shape index: {}]   ;;  %s26382_s2 = inlined_call_operand.vmem [shape: f32[928,1], index: 2, kind: input, shape index: {}]   ;;  %s26383_s7 = inlined_call_operand.vmem [shape: f32[32,128], index: 7, kind: input, shape index: {}]   ;;  %s26384_s6 = inlined_call_operand.vmem [shape: f32[1,32], index: 6, kind: input, shape index: {}]   ;;  %s26385_s8 = inlined_call_operand.vmem [shape: f32[928,128], index: 8, kind: output, shape index: {}]  }
   0x1   :  { %21023 = vset.pattern.permute.xlu1 %v21027_v0  ;;  %21022 = vset.pattern.permute.xlu0 %v21027_v0  ;;  %v1408_v1 = vld [vmem:[%s26377_s1 + $0x1d8] sm:$0xff]  ;;  %v1406_v2 = vld [vmem:[%s26377_s1 + $0x1c8] sm:$0xff]  ;;  %v153_v3 = vld [vmem:[%s26378_s3] sm:$0xff] }
   0x2   :  { %1770 = vperm.xlu1 %21023, %v1408_v1   ;;  %1760 = vperm.xlu0 %21022, %v1406_v2   ;;  %v154_v4 = vld [vmem:[%s26378_s3 + $0x8] sm:$0xff]  ;;  %v1409_v6 = vld [vmem:[%s26377_s1 + $0x1e0] sm:$0xff]  ;;  %v1407_v8 = vld [vmem:[%s26377_s1 + $0x1d0] sm:$0xff] }
   0x3   :  { %v20005_v5 = vpack.c.bf16 %v154_v4, %v153_v3  ;;  %v29_v7 = vld [vmem:[%s26379_s0] sm:$0xff]  ;;  %v155_v9 = vld [vmem:[%s26378_s3 + $0x10] sm:$0x3]  ;;  %v1410_v11 = vld [vmem:[%s26377_s1 + $0x1e8] sm:$0xff] }
   0x4   :  { %17999 = vmatprep.mubr.msk.f32.mxu0 %vm163_vm0, %v29_v7  ;;  %v1411_v10 = vld [vmem:[%s26377_s1 + $0x1f0] sm:$0xff]  ;;  %v30_v12 = vld [vmem:[%s26379_s0 + $0x8] sm:$0xff]  ;;  %v1413_v14 = vld [vmem:[%s26377_s1 + $0x200] sm:$0xff] }
   0x5   :  { %20006 = vmatprep.subr.bf16.mxu0 %v20005_v5  ;;  %v31_v13 = vld [vmem:[%s26379_s0 + $0x10] sm:$0xff]  ;;  %v1412_v15 = vld [vmem:[%s26377_s1 + $0x1f8] sm:$0xff]  ;;  %v33_v17 = vld [vmem:[%s26379_s0 + $0x20] sm:$0xff] }
   0x6   :  { %20008 = vmatpush3.bf16.msra.mxu0 %v20005_v5  ;;  %1775 = vperm.xlu1 %21023, %v1409_v6   ;;  %v32_v16 = vld [vmem:[%s26379_s0 + $0x18] sm:$0xff]  ;;  %v1415_v18 = vld [vmem:[%s26377_s1 + $0x210] sm:$0xff]  ;;  %v1414_v19 = vld [vmem:[%s26377_s1 + $0x208] sm:$0xff] }
   0x7   :  { %1765 = vperm.xlu0 %21022, %v1407_v8   ;;  %17997 = vmatprep.subr.msk.mxu0 %vm536_vm1, %v155_v9  ;;  %v34_v20 = vld [vmem:[%s26379_s0 + $0x28] sm:$0xff]  ;;  %v35_v21 = vld [vmem:[%s26379_s0 + $0x30] sm:$0xff]  ;;  %v1417_v22 = vld [vmem:[%s26377_s1 + $0x220] sm:$0xff] }
   0x8   :  { %v1416_v23 = vld [vmem:[%s26377_s1 + $0x218] sm:$0xff]  ;;  %v37_v25 = vld [vmem:[%s26379_s0 + $0x40] sm:$0xff]  ;;  %v1419_v26 = vld [vmem:[%s26377_s1 + $0x230] sm:$0xff] }
   0x9   :  { %v36_v24 = vld [vmem:[%s26379_s0 + $0x38] sm:$0xff]  ;;  %v1418_v27 = vld [vmem:[%s26377_s1 + $0x228] sm:$0xff]  ;;  %v39_v29 = vld [vmem:[%s26379_s0 + $0x50] sm:$0xff] }
   0xa   :  { %17998 = vmatpush3.msk.msra.mxu0 %vm536_vm1, %v155_v9  ;;  %1785 = vperm.xlu1 %21023, %v1411_v10   ;;  %v38_v28 = vld [vmem:[%s26379_s0 + $0x48] sm:$0xff]  ;;  %v1421_v30 = vld [vmem:[%s26377_s1 + $0x240] sm:$0xff]  ;;  %v1420_v31 = vld [vmem:[%s26377_s1 + $0x238] sm:$0xff] }
   0xb   :  { %1780 = vperm.xlu0 %21022, %v1410_v11   ;;  %18000 = vmatmul.mubr.msk.f32.vlgmr.msra.gmra.mrb[0].mxu0 %vm163_vm0, %v30_v12  ;;  %v40_v32 = vld [vmem:[%s26379_s0 + $0x58] sm:$0xff]  ;;  %v41_v33 = vld [vmem:[%s26379_s0 + $0x60] sm:$0xff]  ;;  %v1423_v34 = vld [vmem:[%s26377_s1 + $0x250] sm:$0xff] }
   0xc   :  { %18002 = vmatprep.mubr.msk.f32.mxu0 %vm163_vm0, %v31_v13  ;;  %v1422_v35 = vld [vmem:[%s26377_s1 + $0x248] sm:$0xff]  ;;  %v43_v37 = vld [vmem:[%s26379_s0 + $0x70] sm:$0xff]  ;;  %v1425_v38 = vld [vmem:[%s26377_s1 + $0x260] sm:$0xff] }
   0xd   :  { %v42_v36 = vld [vmem:[%s26379_s0 + $0x68] sm:$0xff]  ;;  %v1424_v39 = vld [vmem:[%s26377_s1 + $0x258] sm:$0xff]  ;;  %v45_v41 = vld [vmem:[%s26379_s0 + $0x80] sm:$0xff] }
   0xe   :  { %1795 = vperm.xlu1 %21023, %v1413_v14   ;;  %v44_v40 = vld [vmem:[%s26379_s0 + $0x78] sm:$0xff]  ;;  %v1427_v42 = vld [vmem:[%s26377_s1 + $0x270] sm:$0xff]  ;;  %v1426_v43 = vld [vmem:[%s26377_s1 + $0x268] sm:$0xff] }
   0xf   :  { %1790 = vperm.xlu0 %21022, %v1412_v15   ;;  %18003 = vmatmul.mubr.msk.f32.gmra.mrb[2].mxu0 %vm163_vm0, %v32_v16  ;;  %v46_v44 = vld [vmem:[%s26379_s0 + $0x88] sm:$0xff]  ;;  %v47_v45 = vld [vmem:[%s26379_s0 + $0x90] sm:$0xff]  ;;  %v1429_v46 = vld [vmem:[%s26377_s1 + $0x280] sm:$0xff] }
  0x10   :  { %18005 = vmatprep.mubr.msk.f32.mxu0 %vm163_vm0, %v33_v17  ;;  %v1428_v47 = vld [vmem:[%s26377_s1 + $0x278] sm:$0xff]  ;;  %v49_v49 = vld [vmem:[%s26379_s0 + $0xa0] sm:$0xff]  ;;  %v1431_v50 = vld [vmem:[%s26377_s1 + $0x290] sm:$0xff] }
  0x11   :  { %v48_v48 = vld [vmem:[%s26379_s0 + $0x98] sm:$0xff]  ;;  %v1430_v51 = vld [vmem:[%s26377_s1 + $0x288] sm:$0xff]  ;;  %v51_v53 = vld [vmem:[%s26379_s0 + $0xb0] sm:$0xff] }
  0x12   :  { %1805 = vperm.xlu1 %21023, %v1415_v18   ;;  %v50_v52 = vld [vmem:[%s26379_s0 + $0xa8] sm:$0xff]  ;;  %v1433_v54 = vld [vmem:[%s26377_s1 + $0x2a0] sm:$0xff]  ;;  %v1432_v55 = vld [vmem:[%s26377_s1 + $0x298] sm:$0xff] }
  0x13   :  { %1800 = vperm.xlu0 %21022, %v1414_v19   ;;  %18006 = vmatmul.mubr.msk.f32.gmra.mrb[4].mxu0 %vm163_vm0, %v34_v20  ;;  %v52_v56 = vld [vmem:[%s26379_s0 + $0xb8] sm:$0xff]  ;;  %v53_v57 = vld [vmem:[%s26379_s0 + $0xc0] sm:$0xff]  ;;  %v1435_v58 = vld [vmem:[%s26377_s1 + $0x2b0] sm:$0xff] }
  0x14   :  { %18008 = vmatprep.mubr.msk.f32.mxu0 %vm163_vm0, %v35_v21  ;;  %v1434_v59 = vld [vmem:[%s26377_s1 + $0x2a8] sm:$0xff]  ;;  %v55_v61 = vld [vmem:[%s26379_s0 + $0xd0] sm:$0xff]  ;;  %v1437_v62 = vld [vmem:[%s26377_s1 + $0x2c0] sm:$0xff] }
  0x15   :  { %v54_v60 = vld [vmem:[%s26379_s0 + $0xc8] sm:$0xff]  ;;  %v1436_v63 = vld [vmem:[%s26377_s1 + $0x2b8] sm:$0xff]  ;;  %v57_v1 = vld [vmem:[%s26379_s0 + $0xe0] sm:$0xff] }
  0x16   :  { %1815 = vperm.xlu1 %21023, %v1417_v22   ;;  %v56_v0 = vld [vmem:[%s26379_s0 + $0xd8] sm:$0xff]  ;;  %v1439_v2 = vld [vmem:[%s26377_s1 + $0x2d0] sm:$0xff]  ;;  %v1438_v3 = vld [vmem:[%s26377_s1 + $0x2c8] sm:$0xff] }
  0x17   :  { %1810 = vperm.xlu0 %21022, %v1416_v23   ;;  %18009 = vmatmul.mubr.msk.f32.gmra.mrb[6].mxu0 %vm163_vm0, %v36_v24  ;;  %v58_v4 = vld [vmem:[%s26379_s0 + $0xe8] sm:$0xff]  ;;  %v59_v5 = vld [vmem:[%s26379_s0 + $0xf0] sm:$0xff]  ;;  %v1441_v6 = vld [vmem:[%s26377_s1 + $0x2e0] sm:$0xff] }
  0x18   :  { %18011 = vmatprep.mubr.msk.f32.mxu0 %vm163_vm0, %v37_v25  ;;  %v1440_v7 = vld [vmem:[%s26377_s1 + $0x2d8] sm:$0xff]  ;;  %v61_v9 = vld [vmem:[%s26379_s0 + $0x100] sm:$0xff]  ;;  %v1443_v10 = vld [vmem:[%s26377_s1 + $0x2f0] sm:$0xff] }
  0x19   :  { %v60_v8 = vld [vmem:[%s26379_s0 + $0xf8] sm:$0xff]  ;;  %v1442_v11 = vld [vmem:[%s26377_s1 + $0x2e8] sm:$0xff]  ;;  %v63_v13 = vld [vmem:[%s26379_s0 + $0x110] sm:$0xff] }
  0x1a   :  { %1825 = vperm.xlu1 %21023, %v1419_v26   ;;  %v62_v12 = vld [vmem:[%s26379_s0 + $0x108] sm:$0xff]  ;;  %v1445_v14 = vld [vmem:[%s26377_s1 + $0x300] sm:$0xff]  ;;  %v1444_v15 = vld [vmem:[%s26377_s1 + $0x2f8] sm:$0xff] }
  0x1b   :  { %1820 = vperm.xlu0 %21022, %v1418_v27   ;;  %18012 = vmatmul.mubr.msk.f32.gmra.mrb[8].mxu0 %vm163_vm0, %v38_v28  ;;  %v64_v16 = vld [vmem:[%s26379_s0 + $0x118] sm:$0xff]  ;;  %v65_v17 = vld [vmem:[%s26379_s0 + $0x120] sm:$0xff]  ;;  %v1447_v18 = vld [vmem:[%s26377_s1 + $0x310] sm:$0xff] }
  0x1c   :  { %18014 = vmatprep.mubr.msk.f32.mxu0 %vm163_vm0, %v39_v29  ;;  %v1446_v19 = vld [vmem:[%s26377_s1 + $0x308] sm:$0xff]  ;;  %v67_v21 = vld [vmem:[%s26379_s0 + $0x130] sm:$0xff]  ;;  %v1449_v22 = vld [vmem:[%s26377_s1 + $0x320] sm:$0xff] }
  0x1d   :  { %v66_v20 = vld [vmem:[%s26379_s0 + $0x128] sm:$0xff]  ;;  %v1448_v23 = vld [vmem:[%s26377_s1 + $0x318] sm:$0xff]  ;;  %v69_v25 = vld [vmem:[%s26379_s0 + $0x140] sm:$0xff] }
  0x1e   :  { %1835 = vperm.xlu1 %21023, %v1421_v30   ;;  %v68_v24 = vld [vmem:[%s26379_s0 + $0x138] sm:$0xff]  ;;  %v1451_v26 = vld [vmem:[%s26377_s1 + $0x330] sm:$0xff]  ;;  %v1450_v27 = vld [vmem:[%s26377_s1 + $0x328] sm:$0xff] }
  0x1f   :  { %1830 = vperm.xlu0 %21022, %v1420_v31   ;;  %18015 = vmatmul.mubr.msk.f32.gmra.mrb[10].mxu0 %vm163_vm0, %v40_v32  ;;  %v70_v28 = vld [vmem:[%s26379_s0 + $0x148] sm:$0xff]  ;;  %v71_v29 = vld [vmem:[%s26379_s0 + $0x150] sm:$0xff]  ;;  %v1453_v30 = vld [vmem:[%s26377_s1 + $0x340] sm:$0xff] }
  0x20   :  { %18017 = vmatprep.mubr.msk.f32.mxu0 %vm163_vm0, %v41_v33  ;;  %v1452_v31 = vld [vmem:[%s26377_s1 + $0x338] sm:$0xff]  ;;  %v73_v33 = vld [vmem:[%s26379_s0 + $0x160] sm:$0xff] }
  0x21   :  { %v72_v32 = vld [vmem:[%s26379_s0 + $0x158] sm:$0xff] }
  0x22   :  { %1845 = vperm.xlu1 %21023, %v1423_v34   ;;  %v1455_v34 = vld [vmem:[%s26377_s1 + $0x350] sm:$0xff] }
  0x23   :  { %1840 = vperm.xlu0 %21022, %v1422_v35   ;;  %18018 = vmatmul.mubr.msk.f32.gmra.mrb[12].mxu0 %vm163_vm0, %v42_v36  ;;  %v1454_v35 = vld [vmem:[%s26377_s1 + $0x348] sm:$0xff] }
  0x24   :  { %18020 = vmatprep.mubr.msk.f32.mxu0 %vm163_vm0, %v43_v37  ;;  %v74_v36 = vld [vmem:[%s26379_s0 + $0x168] sm:$0xff]  ;;  %v75_v37 = vld [vmem:[%s26379_s0 + $0x170] sm:$0xff] }
  0x26   :  { %1855 = vperm.xlu1 %21023, %v1425_v38   ;;  %v1457_v38 = vld [vmem:[%s26377_s1 + $0x360] sm:$0xff] }
  0x27   :  { %1850 = vperm.xlu0 %21022, %v1424_v39   ;;  %18021 = vmatmul.mubr.msk.f32.gmra.mrb[14].mxu0 %vm163_vm0, %v44_v40  ;;  %v1456_v39 = vld [vmem:[%s26377_s1 + $0x358] sm:$0xff] }
  0x28   :  { %18023 = vmatprep.mubr.msk.f32.mxu0 %vm163_vm0, %v45_v41  ;;  %v76_v40 = vld [vmem:[%s26379_s0 + $0x178] sm:$0xff]  ;;  %v77_v41 = vld [vmem:[%s26379_s0 + $0x180] sm:$0xff] }
  0x2a   :  { %1865 = vperm.xlu1 %21023, %v1427_v42   ;;  %v1459_v42 = vld [vmem:[%s26377_s1 + $0x370] sm:$0xff] }
  0x2b   :  { %1860 = vperm.xlu0 %21022, %v1426_v43   ;;  %18024 = vmatmul.mubr.msk.f32.gmra.mrb[16].mxu0 %vm163_vm0, %v46_v44  ;;  %v1458_v43 = vld [vmem:[%s26377_s1 + $0x368] sm:$0xff] }
  0x2c   :  { %18026 = vmatprep.mubr.msk.f32.mxu0 %vm163_vm0, %v47_v45  ;;  %v78_v44 = vld [vmem:[%s26379_s0 + $0x188] sm:$0xff]  ;;  %v79_v45 = vld [vmem:[%s26379_s0 + $0x190] sm:$0xff] }
  0x2e   :  { %1875 = vperm.xlu1 %21023, %v1429_v46   ;;  %v1461_v46 = vld [vmem:[%s26377_s1 + $0x380] sm:$0xff] }
  0x2f   :  { %1870 = vperm.xlu0 %21022, %v1428_v47   ;;  %18027 = vmatmul.mubr.msk.f32.gmra.mrb[18].mxu0 %vm163_vm0, %v48_v48  ;;  %v1460_v47 = vld [vmem:[%s26377_s1 + $0x378] sm:$0xff] }
  0x30   :  { %18029 = vmatprep.mubr.msk.f32.mxu0 %vm163_vm0, %v49_v49  ;;  %v80_v48 = vld [vmem:[%s26379_s0 + $0x198] sm:$0xff]  ;;  %v81_v49 = vld [vmem:[%s26379_s0 + $0x1a0] sm:$0xff] }
  0x32   :  { %1885 = vperm.xlu1 %21023, %v1431_v50   ;;  %v1463_v50 = vld [vmem:[%s26377_s1 + $0x390] sm:$0xff] }
  0x33   :  { %1880 = vperm.xlu0 %21022, %v1430_v51   ;;  %18030 = vmatmul.mubr.msk.f32.gmra.mrb[20].mxu0 %vm163_vm0, %v50_v52  ;;  %v1462_v51 = vld [vmem:[%s26377_s1 + $0x388] sm:$0xff] }
  0x34   :  { %18032 = vmatprep.mubr.msk.f32.mxu0 %vm163_vm0, %v51_v53  ;;  %v82_v52 = vld [vmem:[%s26379_s0 + $0x1a8] sm:$0xff]  ;;  %v83_v53 = vld [vmem:[%s26379_s0 + $0x1b0] sm:$0xff] }
  0x36   :  { %1895 = vperm.xlu1 %21023, %v1433_v54   ;;  %v1465_v54 = vld [vmem:[%s26377_s1 + $0x3a0] sm:$0xff] }
  0x37   :  { %1890 = vperm.xlu0 %21022, %v1432_v55   ;;  %18033 = vmatmul.mubr.msk.f32.gmra.mrb[22].mxu0 %vm163_vm0, %v52_v56  ;;  %v1464_v55 = vld [vmem:[%s26377_s1 + $0x398] sm:$0xff] }
  0x38   :  { %18035 = vmatprep.mubr.msk.f32.mxu0 %vm163_vm0, %v53_v57  ;;  %v84_v56 = vld [vmem:[%s26379_s0 + $0x1b8] sm:$0xff]  ;;  %v85_v57 = vld [vmem:[%s26379_s0 + $0x1c0] sm:$0xff] }
  0x3a   :  { %1905 = vperm.xlu1 %21023, %v1435_v58   ;;  %v1467_v58 = vld [vmem:[%s26377_s1 + $0x3b0] sm:$0xff] }
  0x3b   :  { %1900 = vperm.xlu0 %21022, %v1434_v59   ;;  %18036 = vmatmul.mubr.msk.f32.gmra.mrb[24].mxu0 %vm163_vm0, %v54_v60  ;;  %v1466_v59 = vld [vmem:[%s26377_s1 + $0x3a8] sm:$0xff] }
  0x3c   :  { %18038 = vmatprep.mubr.msk.f32.mxu0 %vm163_vm0, %v55_v61  ;;  %v86_v60 = vld [vmem:[%s26379_s0 + $0x1c8] sm:$0xff]  ;;  %v87_v61 = vld [vmem:[%s26379_s0 + $0x1d0] sm:$0xff] }
  0x3e   :  { %1915 = vperm.xlu1 %21023, %v1437_v62   ;;  %v1353_v62 = vld [vmem:[%s26377_s1 + $0x20] sm:$0xff] }
  0x3f   :  { %1910 = vperm.xlu0 %21022, %v1436_v63   ;;  %18039 = vmatmul.mubr.msk.f32.gmra.mrb[26].mxu0 %vm163_vm0, %v56_v0  ;;  %v1468_v63 = vld [vmem:[%s26377_s1 + $0x3b8] sm:$0xff] }
  0x40   :  { %18041 = vmatprep.mubr.msk.f32.mxu0 %vm163_vm0, %v57_v1  ;;  %v88_v0 = vld [vmem:[%s26379_s0 + $0x1d8] sm:$0xff]  ;;  %v89_v1 = vld [vmem:[%s26379_s0 + $0x1e0] sm:$0xff] }
  0x42   :  { %1925 = vperm.xlu1 %21023, %v1439_v2   ;;  %v1355_v2 = vld [vmem:[%s26377_s1 + $0x30] sm:$0xff] }
  0x43   :  { %1920 = vperm.xlu0 %21022, %v1438_v3   ;;  %18042 = vmatmul.mubr.msk.f32.gmra.mrb[28].mxu0 %vm163_vm0, %v58_v4  ;;  %v1354_v3 = vld [vmem:[%s26377_s1 + $0x28] sm:$0xff] }
  0x44   :  { %18044 = vmatprep.mubr.msk.f32.mxu0 %vm163_vm0, %v59_v5  ;;  %v90_v4 = vld [vmem:[%s26379_s0 + $0x1e8] sm:$0xff] }
  0x46   :  { %1935 = vperm.xlu1 %21023, %v1441_v6  }
  0x47   :  { %1930 = vperm.xlu0 %21022, %v1440_v7   ;;  %18045 = vmatmul.mubr.msk.f32.gmra.mrb[30].mxu0 %vm163_vm0, %v60_v8  ;;  %v91_v7 = vld [vmem:[%s26379_s0 + $0x1f0] sm:$0xff]  ;;  %v1357_v8 = vld [vmem:[%s26377_s1 + $0x40] sm:$0xff] }
  0x48   :  { %18047 = vmatprep.mubr.msk.f32.mxu0 %vm163_vm0, %v61_v9  ;;  %v1356_v9 = vld [vmem:[%s26377_s1 + $0x38] sm:$0xff] }
  0x4a   :  { %1945 = vperm.xlu1 %21023, %v1443_v10   ;;  %v92_v10 = vld [vmem:[%s26379_s0 + $0x1f8] sm:$0xff] }
  0x4b   :  { %1940 = vperm.xlu0 %21022, %v1442_v11   ;;  %18048 = vmatmul.mubr.msk.f32.gmra.mrb[32].mxu0 %vm163_vm0, %v62_v12  ;;  %v93_v12 = vld [vmem:[%s26379_s0 + $0x200] sm:$0xff] }
  0x4c   :  { %18050 = vmatprep.mubr.msk.f32.mxu0 %vm163_vm0, %v63_v13 }
  0x4e   :  { %1955 = vperm.xlu1 %21023, %v1445_v14   ;;  %v1359_v14 = vld [vmem:[%s26377_s1 + $0x50] sm:$0xff] }
  0x4f   :  { %1950 = vperm.xlu0 %21022, %v1444_v15   ;;  %18051 = vmatmul.mubr.msk.f32.gmra.mrb[34].mxu0 %vm163_vm0, %v64_v16  ;;  %v1358_v15 = vld [vmem:[%s26377_s1 + $0x48] sm:$0xff] }
  0x50   :  { %18053 = vmatprep.mubr.msk.f32.mxu0 %vm163_vm0, %v65_v17  ;;  %v94_v16 = vld [vmem:[%s26379_s0 + $0x208] sm:$0xff] }
  0x52   :  { %1965 = vperm.xlu1 %21023, %v1447_v18   ;;  %v95_v18 = vld [vmem:[%s26379_s0 + $0x210] sm:$0xff] }
  0x53   :  { %1960 = vperm.xlu0 %21022, %v1446_v19   ;;  %18054 = vmatmul.mubr.msk.f32.gmra.mrb[36].mxu0 %vm163_vm0, %v66_v20  ;;  %v1361_v20 = vld [vmem:[%s26377_s1 + $0x60] sm:$0xff] }
  0x54   :  { %18056 = vmatprep.mubr.msk.f32.mxu0 %vm163_vm0, %v67_v21  ;;  %v1360_v21 = vld [vmem:[%s26377_s1 + $0x58] sm:$0xff] }
  0x56   :  { %1975 = vperm.xlu1 %21023, %v1449_v22   ;;  %v96_v22 = vld [vmem:[%s26379_s0 + $0x218] sm:$0xff] }
  0x57   :  { %1970 = vperm.xlu0 %21022, %v1448_v23   ;;  %18057 = vmatmul.mubr.msk.f32.gmra.mrb[38].mxu0 %vm163_vm0, %v68_v24  ;;  %v97_v24 = vld [vmem:[%s26379_s0 + $0x220] sm:$0xff] }
  0x58   :  { %18059 = vmatprep.mubr.msk.f32.mxu0 %vm163_vm0, %v69_v25 }
  0x5a   :  { %1985 = vperm.xlu1 %21023, %v1451_v26   ;;  %v1363_v26 = vld [vmem:[%s26377_s1 + $0x70] sm:$0xff] }
  0x5b   :  { %1980 = vperm.xlu0 %21022, %v1450_v27   ;;  %18060 = vmatmul.mubr.msk.f32.gmra.mrb[40].mxu0 %vm163_vm0, %v70_v28  ;;  %v1362_v27 = vld [vmem:[%s26377_s1 + $0x68] sm:$0xff] }
  0x5c   :  { %18062 = vmatprep.mubr.msk.f32.mxu0 %vm163_vm0, %v71_v29  ;;  %v98_v28 = vld [vmem:[%s26379_s0 + $0x228] sm:$0xff] }
  0x5e   :  { %1995 = vperm.xlu1 %21023, %v1453_v30   ;;  %v99_v30 = vld [vmem:[%s26379_s0 + $0x230] sm:$0xff] }
  0x5f   :  { %1990 = vperm.xlu0 %21022, %v1452_v31   ;;  %18063 = vmatmul.mubr.msk.f32.gmra.mrb[42].mxu0 %vm163_vm0, %v72_v32  ;;  %v1365_v32 = vld [vmem:[%s26377_s1 + $0x80] sm:$0xff] }
  0x60   :  { %18065 = vmatprep.mubr.msk.f32.mxu0 %vm163_vm0, %v73_v33  ;;  %v1364_v33 = vld [vmem:[%s26377_s1 + $0x78] sm:$0xff] }
  0x62   :  { %2005 = vperm.xlu1 %21023, %v1455_v34   ;;  %v100_v34 = vld [vmem:[%s26379_s0 + $0x238] sm:$0xff] }
  0x63   :  { %2000 = vperm.xlu0 %21022, %v1454_v35   ;;  %18066 = vmatmul.mubr.msk.f32.gmra.mrb[44].mxu0 %vm163_vm0, %v74_v36  ;;  %v101_v36 = vld [vmem:[%s26379_s0 + $0x240] sm:$0xff] }
  0x64   :  { %18068 = vmatprep.mubr.msk.f32.mxu0 %vm163_vm0, %v75_v37 }
  0x66   :  { %2015 = vperm.xlu1 %21023, %v1457_v38   ;;  %v1367_v38 = vld [vmem:[%s26377_s1 + $0x90] sm:$0xff] }
  0x67   :  { %2010 = vperm.xlu0 %21022, %v1456_v39   ;;  %18069 = vmatmul.mubr.msk.f32.gmra.mrb[46].mxu0 %vm163_vm0, %v76_v40  ;;  %v1366_v39 = vld [vmem:[%s26377_s1 + $0x88] sm:$0xff] }
  0x68   :  { %18071 = vmatprep.mubr.msk.f32.mxu0 %vm163_vm0, %v77_v41  ;;  %v102_v40 = vld [vmem:[%s26379_s0 + $0x248] sm:$0xff] }
  0x6a   :  { %2025 = vperm.xlu1 %21023, %v1459_v42   ;;  %v103_v42 = vld [vmem:[%s26379_s0 + $0x250] sm:$0xff] }
  0x6b   :  { %2020 = vperm.xlu0 %21022, %v1458_v43   ;;  %18072 = vmatmul.mubr.msk.f32.gmra.mrb[48].mxu0 %vm163_vm0, %v78_v44  ;;  %v1369_v44 = vld [vmem:[%s26377_s1 + $0xa0] sm:$0xff] }
  0x6c   :  { %18074 = vmatprep.mubr.msk.f32.mxu0 %vm163_vm0, %v79_v45  ;;  %v1368_v45 = vld [vmem:[%s26377_s1 + $0x98] sm:$0xff] }
  0x6e   :  { %2035 = vperm.xlu1 %21023, %v1461_v46   ;;  %v104_v46 = vld [vmem:[%s26379_s0 + $0x258] sm:$0xff] }
  0x6f   :  { %2030 = vperm.xlu0 %21022, %v1460_v47   ;;  %18075 = vmatmul.mubr.msk.f32.gmra.mrb[50].mxu0 %vm163_vm0, %v80_v48  ;;  %v105_v48 = vld [vmem:[%s26379_s0 + $0x260] sm:$0xff] }
  0x70   :  { %18077 = vmatprep.mubr.msk.f32.mxu0 %vm163_vm0, %v81_v49 }
  0x72   :  { %2045 = vperm.xlu1 %21023, %v1463_v50   ;;  %v1371_v50 = vld [vmem:[%s26377_s1 + $0xb0] sm:$0xff] }
  0x73   :  { %2040 = vperm.xlu0 %21022, %v1462_v51   ;;  %18078 = vmatmul.mubr.msk.f32.gmra.mrb[52].mxu0 %vm163_vm0, %v82_v52  ;;  %v1370_v51 = vld [vmem:[%s26377_s1 + $0xa8] sm:$0xff] }
  0x74   :  { %18080 = vmatprep.mubr.msk.f32.mxu0 %vm163_vm0, %v83_v53  ;;  %v106_v52 = vld [vmem:[%s26379_s0 + $0x268] sm:$0xff] }
  0x76   :  { %2055 = vperm.xlu1 %21023, %v1465_v54   ;;  %v107_v54 = vld [vmem:[%s26379_s0 + $0x270] sm:$0xff] }
  0x77   :  { %2050 = vperm.xlu0 %21022, %v1464_v55   ;;  %18081 = vmatmul.mubr.msk.f32.gmra.mrb[54].mxu0 %vm163_vm0, %v84_v56  ;;  %v1373_v56 = vld [vmem:[%s26377_s1 + $0xc0] sm:$0xff] }
  0x78   :  { %18083 = vmatprep.mubr.msk.f32.mxu0 %vm163_vm0, %v85_v57  ;;  %v1372_v57 = vld [vmem:[%s26377_s1 + $0xb8] sm:$0xff] }
  0x7a   :  { %2065 = vperm.xlu1 %21023, %v1467_v58   ;;  %v108_v58 = vld [vmem:[%s26379_s0 + $0x278] sm:$0xff] }
  0x7b   :  { %2060 = vperm.xlu0 %21022, %v1466_v59   ;;  %18084 = vmatmul.mubr.msk.f32.gmra.mrb[56].mxu0 %vm163_vm0, %v86_v60  ;;  %v109_v60 = vld [vmem:[%s26379_s0 + $0x280] sm:$0xff] }
  0x7c   :  { %18086 = vmatprep.mubr.msk.f32.mxu0 %vm163_vm0, %v87_v61 }
  0x7e   :  { %1495 = vperm.xlu1 %21023, %v1353_v62   ;;  %v1375_v62 = vld [vmem:[%s26377_s1 + $0xd0] sm:$0xff] }
  0x7f   :  { %2070 = vperm.xlu0 %21022, %v1468_v63   ;;  %18087 = vmatmul.mubr.msk.f32.gmra.mrb[58].mxu0 %vm163_vm0, %v88_v0  ;;  %v1374_v63 = vld [vmem:[%s26377_s1 + $0xc8] sm:$0xff] }
  0x80   :  { %18089 = vmatprep.mubr.msk.f32.mxu0 %vm163_vm0, %v89_v1  ;;  %v110_v0 = vld [vmem:[%s26379_s0 + $0x288] sm:$0xff] }
  0x81   :  { %v21527_v5 = vpop.permute.xlu1 %1770  ;;  %v21529_v6 = vpop.permute.xlu0 %1760 }
  0x82   :  { %1505 = vperm.xlu1 %21023, %v1355_v2   ;;  %v111_v2 = vld [vmem:[%s26379_s0 + $0x290] sm:$0xff] }
  0x83   :  { %1500 = vperm.xlu0 %21022, %v1354_v3   ;;  %18090 = vmatmul.mubr.msk.f32.gmra.mrb[60].mxu0 %vm163_vm0, %v90_v4  ;;  %v1377_v4 = vld [vmem:[%s26377_s1 + $0xe0] sm:$0xff] }
  0x84   :  { %18092 = vmatprep.mubr.msk.f32.mxu0 %vm163_vm0, %v91_v7  ;;  %v1376_v7 = vld [vmem:[%s26377_s1 + $0xd8] sm:$0xff] }
  0x85   :  { %v21545_v11 = vpop.permute.xlu1 %1775 }
  0x86   :  { %v21550_v13 = vpop.permute.xlu0 %1765  ;;  %1515 = vperm.xlu1 %21023, %v1357_v8   ;;  %v112_v8 = vld [vmem:[%s26379_s0 + $0x298] sm:$0xff] }
  0x87   :  { %1510 = vperm.xlu0 %21022, %v1356_v9   ;;  %18093 = vmatmul.mubr.msk.f32.gmra.mrb[62].mxu0 %vm163_vm0, %v92_v10  ;;  %v113_v10 = vld [vmem:[%s26379_s0 + $0x2a0] sm:$0xff] }
  0x88   :  { %18095 = vmatprep.mubr.msk.f32.mxu0 %vm163_vm0, %v93_v12 }
  0x89   :  { %v21563_v17 = vpop.permute.xlu1 %1785 }
  0x8a   :  { %v21568_v19 = vpop.permute.xlu0 %1780  ;;  %1525 = vperm.xlu1 %21023, %v1359_v14   ;;  %v1379_v14 = vld [vmem:[%s26377_s1 + $0xf0] sm:$0xff] }
  0x8b   :  { %1520 = vperm.xlu0 %21022, %v1358_v15   ;;  %18096 = vmatmul.mubr.msk.f32.gmra.mrb[64].mxu0 %vm163_vm0, %v94_v16  ;;  %v1378_v15 = vld [vmem:[%s26377_s1 + $0xe8] sm:$0xff] }
  0x8c   :  { %18098 = vmatprep.mubr.msk.f32.mxu0 %vm163_vm0, %v95_v18  ;;  %v114_v16 = vld [vmem:[%s26379_s0 + $0x2a8] sm:$0xff] }
  0x8d   :  { %v21581_v23 = vpop.permute.xlu1 %1795 }
  0x8e   :  { %v21586_v25 = vpop.permute.xlu0 %1790  ;;  %1535 = vperm.xlu1 %21023, %v1361_v20   ;;  %v115_v20 = vld [vmem:[%s26379_s0 + $0x2b0] sm:$0xff] }
  0x8f   :  { %1530 = vperm.xlu0 %21022, %v1360_v21   ;;  %18099 = vmatmul.mubr.msk.f32.gmra.mrb[66].mxu0 %vm163_vm0, %v96_v22  ;;  %v1381_v22 = vld [vmem:[%s26377_s1 + $0x100] sm:$0xff] }
  0x90   :  { %18101 = vmatprep.mubr.msk.f32.mxu0 %vm163_vm0, %v97_v24  ;;  %v1380_v24 = vld [vmem:[%s26377_s1 + $0xf8] sm:$0xff] }
  0x91   :  { %v21599_v29 = vpop.permute.xlu1 %1805 }
  0x92   :  { %v21604_v31 = vpop.permute.xlu0 %1800  ;;  %1545 = vperm.xlu1 %21023, %v1363_v26   ;;  %v116_v26 = vld [vmem:[%s26379_s0 + $0x2b8] sm:$0xff] }
  0x93   :  { %1540 = vperm.xlu0 %21022, %v1362_v27   ;;  %18102 = vmatmul.mubr.msk.f32.gmra.mrb[68].mxu0 %vm163_vm0, %v98_v28  ;;  %v117_v28 = vld [vmem:[%s26379_s0 + $0x2c0] sm:$0xff] }
  0x94   :  { %18104 = vmatprep.mubr.msk.f32.mxu0 %vm163_vm0, %v99_v30 }
  0x95   :  { %v21617_v35 = vpop.permute.xlu1 %1815 }
  0x96   :  { %v21622_v37 = vpop.permute.xlu0 %1810  ;;  %1555 = vperm.xlu1 %21023, %v1365_v32   ;;  %v1383_v32 = vld [vmem:[%s26377_s1 + $0x110] sm:$0xff] }
  0x97   :  { %1550 = vperm.xlu0 %21022, %v1364_v33   ;;  %18105 = vmatmul.mubr.msk.f32.gmra.mrb[70].mxu0 %vm163_vm0, %v100_v34  ;;  %v1382_v33 = vld [vmem:[%s26377_s1 + $0x108] sm:$0xff] }
  0x98   :  { %18107 = vmatprep.mubr.msk.f32.mxu0 %vm163_vm0, %v101_v36  ;;  %v118_v34 = vld [vmem:[%s26379_s0 + $0x2c8] sm:$0xff] }
  0x99   :  { %v21635_v41 = vpop.permute.xlu1 %1825 }
  0x9a   :  { %v21640_v43 = vpop.permute.xlu0 %1820  ;;  %1565 = vperm.xlu1 %21023, %v1367_v38   ;;  %v119_v38 = vld [vmem:[%s26379_s0 + $0x2d0] sm:$0xff] }
  0x9b   :  { %1560 = vperm.xlu0 %21022, %v1366_v39   ;;  %18108 = vmatmul.mubr.msk.f32.gmra.mrb[72].mxu0 %vm163_vm0, %v102_v40  ;;  %v1385_v40 = vld [vmem:[%s26377_s1 + $0x120] sm:$0xff] }
  0x9c   :  { %18110 = vmatprep.mubr.msk.f32.mxu0 %vm163_vm0, %v103_v42  ;;  %v1384_v42 = vld [vmem:[%s26377_s1 + $0x118] sm:$0xff] }
  0x9d   :  { %v21653_v47 = vpop.permute.xlu1 %1835 }
  0x9e   :  { %v21658_v49 = vpop.permute.xlu0 %1830  ;;  %1575 = vperm.xlu1 %21023, %v1369_v44   ;;  %v120_v44 = vld [vmem:[%s26379_s0 + $0x2d8] sm:$0xff] }
  0x9f   :  { %1570 = vperm.xlu0 %21022, %v1368_v45   ;;  %18111 = vmatmul.mubr.msk.f32.gmra.mrb[74].mxu0 %vm163_vm0, %v104_v46  ;;  %v121_v46 = vld [vmem:[%s26379_s0 + $0x2e0] sm:$0xff] }
  0xa0   :  { %18113 = vmatprep.mubr.msk.f32.mxu0 %vm163_vm0, %v105_v48 }
  0xa1   :  { %v21671_v53 = vpop.permute.xlu1 %1845 }
  0xa2   :  { %v21676_v55 = vpop.permute.xlu0 %1840  ;;  %1585 = vperm.xlu1 %21023, %v1371_v50   ;;  %v1387_v50 = vld [vmem:[%s26377_s1 + $0x130] sm:$0xff] }
  0xa3   :  { %1580 = vperm.xlu0 %21022, %v1370_v51   ;;  %18114 = vmatmul.mubr.msk.f32.gmra.mrb[76].mxu0 %vm163_vm0, %v106_v52  ;;  %v1386_v51 = vld [vmem:[%s26377_s1 + $0x128] sm:$0xff] }
  0xa4   :  { %18116 = vmatprep.mubr.msk.f32.mxu0 %vm163_vm0, %v107_v54  ;;  %v122_v52 = vld [vmem:[%s26379_s0 + $0x2e8] sm:$0xff] }
  0xa5   :  { %v21689_v59 = vpop.permute.xlu1 %1855 }
  0xa6   :  { %v21694_v61 = vpop.permute.xlu0 %1850  ;;  %1595 = vperm.xlu1 %21023, %v1373_v56   ;;  %v123_v56 = vld [vmem:[%s26379_s0 + $0x2f0] sm:$0xff] }
  0xa7   :  { %1590 = vperm.xlu0 %21022, %v1372_v57   ;;  %18117 = vmatmul.mubr.msk.f32.gmra.mrb[78].mxu0 %vm163_vm0, %v108_v58  ;;  %v1389_v58 = vld [vmem:[%s26377_s1 + $0x140] sm:$0xff] }
  0xa8   :  { %18119 = vmatprep.mubr.msk.f32.mxu0 %vm163_vm0, %v109_v60  ;;  %v1388_v60 = vld [vmem:[%s26377_s1 + $0x138] sm:$0xff] }
  0xa9   :  { %v21707_v1 = vpop.permute.xlu1 %1865 }
  0xaa   :  { %v21712_v3 = vpop.permute.xlu0 %1860  ;;  %1605 = vperm.xlu1 %21023, %v1375_v62   ;;  %v124_v62 = vld [vmem:[%s26379_s0 + $0x2f8] sm:$0xff] }
  0xab   :  { %1600 = vperm.xlu0 %21022, %v1374_v63   ;;  %18120 = vmatmul.mubr.msk.f32.gmra.mrb[80].mxu0 %vm163_vm0, %v110_v0  ;;  %v125_v0 = vld [vmem:[%s26379_s0 + $0x300] sm:$0xff] }
  0xac   :  { %18122 = vmatprep.mubr.msk.f32.mxu0 %vm163_vm0, %v111_v2 }
  0xad   :  { %v21725_v9 = vpop.permute.xlu1 %1875 }
  0xae   :  { %v21730_v12 = vpop.permute.xlu0 %1870  ;;  %1615 = vperm.xlu1 %21023, %v1377_v4   ;;  %v1391_v4 = vld [vmem:[%s26377_s1 + $0x150] sm:$0xff] }
  0xaf   :  { %1610 = vperm.xlu0 %21022, %v1376_v7   ;;  %18123 = vmatmul.mubr.msk.f32.gmra.mrb[82].mxu0 %vm163_vm0, %v112_v8  ;;  %v1390_v7 = vld [vmem:[%s26377_s1 + $0x148] sm:$0xff] }
  0xb0   :  { %18125 = vmatprep.mubr.msk.f32.mxu0 %vm163_vm0, %v113_v10  ;;  %v126_v8 = vld [vmem:[%s26379_s0 + $0x308] sm:$0xff] }
  0xb1   :  { %v21743_v18 = vpop.permute.xlu1 %1885 }
  0xb2   :  { %v21748_v21 = vpop.permute.xlu0 %1880  ;;  %1625 = vperm.xlu1 %21023, %v1379_v14   ;;  %v127_v14 = vld [vmem:[%s26379_s0 + $0x310] sm:$0xff] }
  0xb3   :  { %1620 = vperm.xlu0 %21022, %v1378_v15   ;;  %18126 = vmatmul.mubr.msk.f32.gmra.mrb[84].mxu0 %vm163_vm0, %v114_v16  ;;  %v1393_v16 = vld [vmem:[%s26377_s1 + $0x160] sm:$0xff] }
  0xb4   :  { %18128 = vmatprep.mubr.msk.f32.mxu0 %vm163_vm0, %v115_v20  ;;  %v1392_v20 = vld [vmem:[%s26377_s1 + $0x158] sm:$0xff] }
  0xb5   :  { %v21761_v27 = vpop.permute.xlu1 %1895 }
  0xb6   :  { %v21766_v30 = vpop.permute.xlu0 %1890  ;;  %1635 = vperm.xlu1 %21023, %v1381_v22   ;;  %v128_v22 = vld [vmem:[%s26379_s0 + $0x318] sm:$0xff] }
  0xb7   :  { %1630 = vperm.xlu0 %21022, %v1380_v24   ;;  %18129 = vmatmul.mubr.msk.f32.gmra.mrb[86].mxu0 %vm163_vm0, %v116_v26  ;;  %v129_v26 = vld [vmem:[%s26379_s0 + $0x320] sm:$0xff] }
  0xb8   :  { %18131 = vmatprep.mubr.msk.f32.mxu0 %vm163_vm0, %v117_v28 }
  0xb9   :  { %v21779_v36 = vpop.permute.xlu1 %1905 }
  0xba   :  { %v21784_v39 = vpop.permute.xlu0 %1900  ;;  %1645 = vperm.xlu1 %21023, %v1383_v32   ;;  %v1395_v32 = vld [vmem:[%s26377_s1 + $0x170] sm:$0xff] }
  0xbb   :  { %1640 = vperm.xlu0 %21022, %v1382_v33   ;;  %18132 = vmatmul.mubr.msk.f32.gmra.mrb[88].mxu0 %vm163_vm0, %v118_v34  ;;  %v1394_v33 = vld [vmem:[%s26377_s1 + $0x168] sm:$0xff] }
  0xbc   :  { %18134 = vmatprep.mubr.msk.f32.mxu0 %vm163_vm0, %v119_v38  ;;  %v130_v34 = vld [vmem:[%s26379_s0 + $0x328] sm:$0xff] }
  0xbd   :  { %v21797_v45 = vpop.permute.xlu1 %1915 }
  0xbe   :  { %26402 = vst [vmem:[#allocation3_spill] sm:$0xff] %v21797_v45  ;;  %v21802_v48 = vpop.permute.xlu0 %1910  ;;  %1655 = vperm.xlu1 %21023, %v1385_v40   ;;  %v131_v40 = vld [vmem:[%s26379_s0 + $0x330] sm:$0xff] }
  0xbf   :  { %1650 = vperm.xlu0 %21022, %v1384_v42   ;;  %18135 = vmatmul.mubr.msk.f32.gmra.mrb[90].mxu0 %vm163_vm0, %v120_v44  ;;  %v1397_v44 = vld [vmem:[%s26377_s1 + $0x180] sm:$0xff] }
  0xc0   :  { %18137 = vmatprep.mubr.msk.f32.mxu0 %vm163_vm0, %v121_v46  ;;  %v1396_v46 = vld [vmem:[%s26377_s1 + $0x178] sm:$0xff] }
  0xc1   :  { %v21815_v54 = vpop.permute.xlu1 %1925 }
  0xc2   :  { %26403 = vst [vmem:[#allocation4_spill] sm:$0xff] %v21815_v54  ;;  %v21820_v57 = vpop.permute.xlu0 %1920  ;;  %1665 = vperm.xlu1 %21023, %v1387_v50   ;;  %v132_v50 = vld [vmem:[%s26379_s0 + $0x338] sm:$0xff] }
  0xc3   :  { %26404 = vst [vmem:[#allocation5_spill] sm:$0xff] %v21820_v57  ;;  %1660 = vperm.xlu0 %21022, %v1386_v51   ;;  %18138 = vmatmul.mubr.msk.f32.gmra.mrb[92].mxu0 %vm163_vm0, %v122_v52  ;;  %v133_v52 = vld [vmem:[%s26379_s0 + $0x340] sm:$0xff] }
  0xc4   :  { %18140 = vmatprep.mubr.msk.f32.mxu0 %vm163_vm0, %v123_v56 }
  0xc5   :  { %v21833_v63 = vpop.permute.xlu1 %1935 }
  0xc6   :  { %26405 = vst [vmem:[#allocation6_spill] sm:$0xff] %v21833_v63  ;;  %v21838_v2 = vpop.permute.xlu0 %1930  ;;  %1675 = vperm.xlu1 %21023, %v1389_v58   ;;  %v1398_v58 = vld [vmem:[%s26377_s1 + $0x188] sm:$0xff] }
  0xc7   :  { %26406 = vst [vmem:[#allocation7_spill] sm:$0xff] %v21838_v2  ;;  %1670 = vperm.xlu0 %21022, %v1388_v60   ;;  %18141 = vmatmul.mubr.msk.f32.gmra.mrb[94].mxu0 %vm163_vm0, %v124_v62  ;;  %v1399_v60 = vld [vmem:[%s26377_s1 + $0x190] sm:$0xff]  ;;  %v134_v62 = vld [vmem:[%s26379_s0 + $0x348] sm:$0xff] }
  0xc8   :  { %18143 = vmatprep.mubr.msk.f32.mxu0 %vm163_vm0, %v125_v0  ;;  %v15829_v0 = vld [vmem:[%s26380_s5 + $0x60] sm:$0xff] }
  0xc9   :  { %v21851_v10 = vpop.permute.xlu1 %1945 }
  0xca   :  { %26407 = vst [vmem:[#allocation8_spill] sm:$0xff] %v21851_v10  ;;  %v21856_v15 = vpop.permute.xlu0 %1940  ;;  %1685 = vperm.xlu1 %21023, %v1391_v4   ;;  %v15830_v4 = vld [vmem:[%s26380_s5 + $0x68] sm:$0xff] }
  0xcb   :  { %26408 = vst [vmem:[#allocation9_spill] sm:$0xff] %v21856_v15  ;;  %1680 = vperm.xlu0 %21022, %v1390_v7   ;;  %18144 = vmatmul.mubr.msk.f32.gmra.mrb[96].mxu0 %vm163_vm0, %v126_v8  ;;  %v135_v8 = vld [vmem:[%s26379_s0 + $0x350] sm:$0xff] }
  0xcc   :  { %18146 = vmatprep.mubr.msk.f32.mxu0 %vm163_vm0, %v127_v14  ;;  %v21934_v14 = vpack.c.bf16 %v15830_v4, %v15829_v0  ;;  %v139_v4 = vld [vmem:[%s26379_s0 + $0x370] sm:$0xff] }
  0xcd   :  { %v21869_v24 = vpop.permute.xlu1 %1955 }
  0xce   :  { %26409 = vst [vmem:[#allocation10_spill] sm:$0xff] %v21869_v24  ;;  %v21874_v28 = vpop.permute.xlu0 %1950  ;;  %1695 = vperm.xlu1 %21023, %v1393_v16   ;;  %26416 = vst [vmem:[#allocation17_spill] sm:$0xff] %v21934_v14  ;;  %20089 = vmatprep.subr.bf16.mxu1 %v21934_v14 }
  0xcf   :  { %26410 = vst [vmem:[#allocation11_spill] sm:$0xff] %v21874_v28  ;;  %1690 = vperm.xlu0 %21022, %v1392_v20   ;;  %18147 = vmatmul.mubr.msk.f32.gmra.mrb[98].mxu0 %vm163_vm0, %v128_v22  ;;  %v1400_v20 = vld [vmem:[%s26377_s1 + $0x198] sm:$0xff]  ;;  %v1401_v22 = vld [vmem:[%s26377_s1 + $0x1a0] sm:$0xff] }
  0xd0   :  { %18149 = vmatprep.mubr.msk.f32.mxu0 %vm163_vm0, %v129_v26  ;;  %v136_v26 = vld [vmem:[%s26379_s0 + $0x358] sm:$0xff]  ;;  %20091 = vmatpush3.bf16.msra.mxu1 %v21934_v14 }
  0xd1   :  { %v21887_v38 = vpop.permute.xlu1 %1965 }
  0xd2   :  { %26411 = vst [vmem:[#allocation12_spill] sm:$0xff] %v21887_v38  ;;  %v21892_v42 = vpop.permute.xlu0 %1960  ;;  %1705 = vperm.xlu1 %21023, %v1395_v32   ;;  %v15831_v32 = vld [vmem:[%s26380_s5 + $0x70] sm:$0xff] }
  0xd3   :  { %26412 = vst [vmem:[#allocation13_spill] sm:$0xff] %v21892_v42  ;;  %1700 = vperm.xlu0 %21022, %v1394_v33   ;;  %18150 = vmatmul.mubr.msk.f32.gmra.mrb[100].mxu0 %vm163_vm0, %v130_v34  ;;  %v15832_v33 = vld [vmem:[%s26380_s5 + $0x78] sm:$0xff] }
  0xd4   :  { %18152 = vmatprep.mubr.msk.f32.mxu0 %vm163_vm0, %v131_v40  ;;  %v137_v40 = vld [vmem:[%s26379_s0 + $0x360] sm:$0xff] }
  0xd5   :  { %v21905_v51 = vpop.permute.xlu1 %1975 }
  0xd6   :  { %26413 = vst [vmem:[#allocation14_spill] sm:$0xff] %v21905_v51  ;;  %v21910_v56 = vpop.permute.xlu0 %1970  ;;  %1715 = vperm.xlu1 %21023, %v1397_v44   ;;  %v21962_v44 = vpack.c.bf16 %v15832_v33, %v15831_v32  ;;  %v1404_v32 = vld [vmem:[%s26377_s1 + $0x1b8] sm:$0xff] }
  0xd7   :  { %26414 = vst [vmem:[#allocation15_spill] sm:$0xff] %v21910_v56  ;;  %1710 = vperm.xlu0 %21022, %v1396_v46   ;;  %18153 = vmatmul.mubr.msk.f32.gmra.mrb[102].mxu0 %vm163_vm0, %v132_v50  ;;  %v140_v33 = vld [vmem:[%s26379_s0 + $0x378] sm:$0xff] }
  0xd8   :  { %18155 = vmatprep.mubr.msk.f32.mxu0 %vm163_vm0, %v133_v52  ;;  %26419 = vst [vmem:[#allocation20_spill] sm:$0xff] %v21962_v44  ;;  %20090 = vmatprep.subr.bf16.mxu1 %v21962_v44 }
  0xd9   :  { %v21929_v7 = vpop.permute.xlu1 %1985  ;;  %20092 = vmatpush3.bf16.msra.mxu1 %v21962_v44  ;;  %v15950_v44 = vld [vmem:[%s26380_s5 + $0x88] sm:$0xff] }
  0xda   :  { %26415 = vst [vmem:[#allocation16_spill] sm:$0xff] %v21929_v7  ;;  %v21936_v16 = vpop.permute.xlu0 %1980  ;;  %1725 = vperm.xlu1 %21023, %v1399_v60   ;;  %v1402_v60 = vld [vmem:[%s26377_s1 + $0x1a8] sm:$0xff]  ;;  %v145_v7 = vld [vmem:[%s26379_s0 + $0x3a0] sm:$0xff] }
  0xdb   :  { %26417 = vst [vmem:[#allocation18_spill] sm:$0xff] %v21936_v16  ;;  %1720 = vperm.xlu0 %21022, %v1398_v58   ;;  %18156 = vmatmul.mubr.msk.f32.gmra.mrb[104].mxu0 %vm163_vm0, %v134_v62  ;;  %v1403_v58 = vld [vmem:[%s26377_s1 + $0x1b0] sm:$0xff]  ;;  %v138_v62 = vld [vmem:[%s26379_s0 + $0x368] sm:$0xff] }
  0xdc   :  { %18158 = vmatprep.mubr.msk.f32.mxu0 %vm163_vm0, %v135_v8  ;;  %v147_v16 = vld [vmem:[%s26379_s0 + $0x3b0] sm:$0xff] }
  0xdd   :  { %v21956_v34 = vpop.permute.xlu1 %1995 }
  0xde   :  { %26418 = vst [vmem:[#allocation19_spill] sm:$0xff] %v21956_v34  ;;  %v21964_v46 = vpop.permute.xlu0 %1990  ;;  %v21966_v50 = vpop.f32.mrb[0].mxu0  ;;  %1735 = vperm.xlu1 %21023, %v1401_v22   ;;  %v15473_v34 = vld [vmem:[%s26380_s5 + $0x20] sm:$0xff] }
  0xdf   :  { %26420 = vst [vmem:[#allocation21_spill] sm:$0xff] %v21964_v46  ;;  %1730 = vperm.xlu0 %21022, %v1400_v20   ;;  %v21968_v52 = vpop.f32.mrb[1].mxu0  ;;  %18159 = vmatmul.mubr.msk.f32.gmra.mrb[106].mxu0 %vm163_vm0, %v136_v26  ;;  %v1405_v26 = vld [vmem:[%s26377_s1 + $0x1c0] sm:$0xff] }
  0xe0   :  { %18161 = vmatprep.mubr.msk.f32.mxu0 %vm163_vm0, %v137_v40 }
  0xe1   :  { %v21982_v0 = vpop.permute.xlu1 %2005 }
  0xe2   :  { %26421 = vst [vmem:[#allocation22_spill] sm:$0xff] %v21982_v0  ;;  %v21988_v8 = vpop.permute.xlu0 %2000  ;;  %v21990_v20 = vpop.f32.mrb[2].mxu0  ;;  %1745 = vperm.xlu1 %21023, %v1403_v58   ;;  %v141_v58 = vld [vmem:[%s26379_s0 + $0x380] sm:$0xff] }
  0xe3   :  { %26422 = vst [vmem:[#allocation23_spill] sm:$0xff] %v21988_v8  ;;  %1740 = vperm.xlu0 %21022, %v1402_v60   ;;  %v21992_v22 = vpop.f32.mrb[3].mxu0  ;;  %18162 = vmatmul.mubr.msk.f32.gmra.mrb[108].mxu0 %vm163_vm0, %v138_v62 }
  0xe4   :  { %18164 = vmatprep.mubr.msk.f32.mxu0 %vm163_vm0, %v139_v4  ;;  %v15949_v4 = vld [vmem:[%s26380_s5 + $0x80] sm:$0xff] }
  0xe5   :  { %v22005_v40 = vpop.permute.xlu1 %2015  ;;  %v22026_v0 = vpack.c.bf16 %v15950_v44, %v15949_v4 }
  0xe6   :  { %26423 = vst [vmem:[#allocation24_spill] sm:$0xff] %v22005_v40  ;;  %v22010_v60 = vpop.permute.xlu0 %2010  ;;  %v22012_v62 = vpop.f32.mrb[4].mxu0  ;;  %1755 = vperm.xlu1 %21023, %v1405_v26   ;;  %v1351_v40 = vld [vmem:[%s26377_s1 + $0x10] sm:$0xff]  ;;  %v1350_v26 = vld [vmem:[%s26377_s1 + $0x8] sm:$0xff] }
  0xe7   :  { %26424 = vst [vmem:[#allocation25_spill] sm:$0xff] %v22010_v60  ;;  %1750 = vperm.xlu0 %21022, %v1404_v32   ;;  %v22020_v14 = vpop.f32.mrb[5].mxu0  ;;  %18165 = vmatmul.mubr.msk.f32.gmra.mrb[110].mxu0 %vm163_vm0, %v140_v33  ;;  %v142_v32 = vld [vmem:[%s26379_s0 + $0x388] sm:$0xff]  ;;  %v143_v33 = vld [vmem:[%s26379_s0 + $0x390] sm:$0xff] }
  0xe8   :  { %18167 = vmatprep.mubr.msk.f32.mxu0 %vm163_vm0, %v141_v58  ;;  %20042 = vmatprep.subr.bf16.mxu1 %v22026_v0 }
  0xe9   :  { %v22035_v60 = vpop.permute.xlu1 %2025 }
  0xea   :  { %26425 = vst [vmem:[#allocation26_spill] sm:$0xff] %v22035_v60  ;;  %v22041_v44 = vpop.permute.xlu0 %2020  ;;  %v22043_v4 = vpop.f32.mrb[6].mxu0  ;;  %1485 = vperm.xlu1 %21023, %v1351_v40   ;;  %v1469_v60 = vld [vmem:[%s26377_s1 + $0x3c0] sm:$0xff]  ;;  %v1352_v40 = vld [vmem:[%s26377_s1 + $0x18] sm:$0xff] }
  0xeb   :  { %26426 = vst [vmem:[#allocation27_spill] sm:$0xff] %v22041_v44  ;;  %1480 = vperm.xlu0 %21022, %v1350_v26   ;;  %v22045_v58 = vpop.f32.mrb[7].mxu0  ;;  %18168 = vmatmul.mubr.msk.f32.gmra.mrb[112].mxu0 %vm163_vm0, %v142_v32  ;;  %v15474_v44 = vld [vmem:[%s26380_s5 + $0x28] sm:$0xff]  ;;  %v144_v26 = vld [vmem:[%s26379_s0 + $0x398] sm:$0xff] }
  0xec   :  { %18170 = vmatprep.mubr.msk.f32.mxu0 %vm163_vm0, %v143_v33  ;;  %v20009_v32 = vpack.c.bf16 %v15474_v44, %v15473_v34  ;;  %v1470_v34 = vld [vmem:[%s26377_s1 + $0x3c8] sm:$0xff]  ;;  %v15475_v44 = vld [vmem:[%s26380_s5 + $0x30] sm:$0xff] }
  0xed   :  { %v22064_v8 = vpop.permute.xlu1 %2035 }
  0xee   :  { %26427 = vst [vmem:[#allocation28_spill] sm:$0xff] %v22064_v8  ;;  %v22069_v46 = vpop.permute.xlu0 %2030  ;;  %v22071_v51 = vpop.f32.mrb[8].mxu0  ;;  %2075 = vperm.xlu1 %21023, %v1469_v60   ;;  %20010 = vmatprep.subr.bf16.mxu0 %v20009_v32  ;;  %v15476_v8 = vld [vmem:[%s26380_s5 + $0x38] sm:$0xff]  ;;  %v1349_v60 = vld [vmem:[%s26377_s1] sm:$0xff] }
  0xef   :  { %26428 = vst [vmem:[#allocation29_spill] sm:$0xff] %v22069_v46  ;;  %1490 = vperm.xlu0 %21022, %v1352_v40   ;;  %v22073_v33 = vpop.f32.mrb[9].mxu0  ;;  %18171 = vmatmul.mubr.msk.f32.gmra.mrb[114].mxu0 %vm163_vm0, %v144_v26  ;;  %v146_v40 = vld [vmem:[%s26379_s0 + $0x3a8] sm:$0xff]  ;;  %v20013_v26 = vpack.c.bf16 %v15476_v8, %v15475_v44  ;;  %v1472_v8 = vld [vmem:[%s26377_s1 + $0x3d8] sm:$0xff] }
  0xf0   :  { %18173 = vmatprep.mubr.msk.f32.mxu0 %vm163_vm0, %v145_v7  ;;  %20012 = vmatpush3.bf16.msra.mxu0 %v20009_v32  ;;  %v1471_v32 = vld [vmem:[%s26377_s1 + $0x3d0] sm:$0xff] }
  0xf1   :  { %v22092_v46 = vpop.permute.xlu1 %2045  ;;  %20014 = vmatprep.subr.bf16.mxu0 %v20013_v26 }
  0xf2   :  { %26429 = vst [vmem:[#allocation30_spill] sm:$0xff] %v22092_v46  ;;  %v22097_v38 = vpop.permute.xlu0 %2040  ;;  %v22099_v56 = vpop.f32.mrb[10].mxu0  ;;  %2080 = vperm.xlu1 %21023, %v1470_v34   ;;  %v148_v34 = vld [vmem:[%s26379_s0 + $0x3b8] sm:$0xff] }
  0xf3   :  { %26430 = vst [vmem:[#allocation31_spill] sm:$0xff] %v22097_v38  ;;  %1475 = vperm.xlu0 %21022, %v1349_v60   ;;  %v22101_v7 = vpop.f32.mrb[11].mxu0  ;;  %18174 = vmatmul.mubr.msk.f32.gmra.mrb[116].mxu0 %vm163_vm0, %v146_v40  ;;  %v149_v60 = vld [vmem:[%s26379_s0 + $0x3c0] sm:$0xff] }
  0xf4   :  { %18176 = vmatprep.mubr.msk.f32.mxu0 %vm163_vm0, %v147_v16  ;;  %20016 = vmatpush3.bf16.msra.mxu0 %v20013_v26  ;;  %v22126_v16 = vld [vmem:[%s26381_s4] ss:$0 sm:$0xff]  ;;  %v13419_v26 = vld [vmem:[%s26382_s2 + $0x8] sm:$0xff] }
  0xf5   :  { %v22114_v44 = vpop.permute.xlu1 %2055 }
  0xf6   :  { %26431 = vst [vmem:[#allocation32_spill] sm:$0xff] %v22114_v44  ;;  %v22119_v40 = vpop.permute.xlu0 %2050  ;;  %v22121_v46 = vpop.f32.mrb[12].mxu0  ;;  %2090 = vperm.xlu1 %21023, %v1472_v8   ;;  %v627_v44 = vadd.f32 %v22126_v16, %v22020_v14  ;;  %v13418_v8 = vld [vmem:[%s26382_s2] sm:$0xff] }
  0xf7   :  { %26432 = vst [vmem:[#allocation33_spill] sm:$0xff] %v22119_v40  ;;  %2085 = vperm.xlu0 %21022, %v1471_v32   ;;  %v22128_v38 = vpop.f32.mrb[13].mxu0  ;;  %18177 = vmatmul.mubr.msk.f32.gmra.mrb[118].mxu0 %vm163_vm0, %v148_v34  ;;  %v150_v32 = vld [vmem:[%s26379_s0 + $0x3c8] sm:$0xff]  ;;  %v151_v34 = vld [vmem:[%s26379_s0 + $0x3d0] sm:$0xff] }
  0xf8   :  { %18179 = vmatprep.mubr.msk.f32.mxu0 %vm163_vm0, %v149_v60  ;;  %v13421_v60 = vld [vmem:[%s26382_s2 + $0x18] sm:$0xff]  ;;  %v1229_v10 = vmax.f32 %v627_v44, 0.0 }
  0xf9   :  { %v22143_v40 = vpop.permute.xlu1 %2065 }
  0xfa   :  { %26433 = vst [vmem:[#allocation34_spill] sm:$0xff] %v22143_v40  ;;  %v22148_v24 = vpop.permute.xlu0 %2060  ;;  %v22150_v42 = vpop.f32.mrb[14].mxu0  ;;  %14538 = vperm.xlu1 %21023, %v13419_v26   ;;  %v637_v40 = vadd.f32 %v22126_v16, %v22045_v58  ;;  %v152_v26 = vld [vmem:[%s26379_s0 + $0x3d8] sm:$0xff] }
  0xfb   :  { %26434 = vst [vmem:[#allocation35_spill] sm:$0xff] %v22148_v24  ;;  %14533 = vperm.xlu0 %21022, %v13418_v8   ;;  %v22152_v14 = vpop.f32.mrb[15].mxu0  ;;  %18180 = vmatmul.mubr.msk.f32.gmra.mrb[120].mxu0 %vm163_vm0, %v150_v32  ;;  %v13420_v24 = vld [vmem:[%s26382_s2 + $0x10] sm:$0xff]  ;;  %v632_v8 = vadd.f32 %v22012_v62, %v22126_v16  ;;  %v647_v62 = vadd.f32 %v22126_v16, %v22073_v33 }
  0xfc   :  { %18182 = vmatprep.mubr.msk.f32.mxu0 %vm163_vm0, %v151_v34  ;;  %v13423_v34 = vld [vmem:[%s26382_s2 + $0x28] sm:$0xff]  ;;  %v1231_v15 = vmax.f32 %v637_v40, 0.0  ;;  %v657_v40 = vadd.f32 %v22126_v16, %v22101_v7 }
  0xfd   :  { %v1496_v32 = vpop.permute.xlu1 %1495 }
  0xfe   :  { %v22169_v28 = vpop.permute.xlu0 %2070  ;;  %v2097_v63 = vmul.f32 %v1496_v32, %v1229_v10  ;;  %v22171_v58 = vpop.f32.mrb[16].mxu0  ;;  %14548 = vperm.xlu1 %21023, %v13421_v60   ;;  %v13422_v10 = vld [vmem:[%s26382_s2 + $0x20] sm:$0xff]  ;;  %v1230_v60 = vmax.f32 %v632_v8, 0.0  ;;  %v652_v8 = vadd.f32 %v22071_v51, %v22126_v16  ;;  %v667_v51 = vadd.f32 %v22126_v16, %v22128_v38 }
  0xff   :  { %26435 = vst [vmem:[#allocation36_spill] sm:$0xff] %v22169_v28  ;;  %14543 = vperm.xlu0 %21022, %v13420_v24   ;;  %v22173_v44 = vpop.f32.mrb[17].mxu0  ;;  %18183 = vmatmul.mubr.msk.f32.gmra.mrb[122].mxu0 %vm163_vm0, %v152_v26  ;;  %v642_v24 = vadd.f32 %v22043_v4, %v22126_v16  ;;  %v1233_v4 = vmax.f32 %v647_v62, 0.0  ;;  %v13427_v62 = vld [vmem:[%s26382_s2 + $0x48] sm:$0xff] }
 0x100   :  { %2222 = vst.msk [vmem:[#allocation2 + $0x20] sm:$0xff] %vm2217_vm2, %v2097_v63  ;;  %v13425_v63 = vld [vmem:[%s26382_s2 + $0x38] sm:$0xff] }
 0x101   :  { %v1506_v32 = vpop.permute.xlu1 %1505 }
 0x102   :  { %v1501_v26 = vpop.permute.xlu0 %1500  ;;  %v2099_v28 = vmul.f32 %v1506_v32, %v1231_v15  ;;  %v22187_v54 = vpop.f32.mrb[18].mxu0  ;;  %14558 = vperm.xlu1 %21023, %v13423_v34   ;;  %v13424_v15 = vld [vmem:[%s26382_s2 + $0x30] sm:$0xff]  ;;  %v1232_v34 = vmax.f32 %v642_v24, 0.0  ;;  %v13426_v24 = vld [vmem:[%s26382_s2 + $0x40] sm:$0xff] }
 0x103   :  { %v2098_v2 = vmul.f32 %v1501_v26, %v1230_v60  ;;  %14553 = vperm.xlu0 %21022, %v13422_v10   ;;  %v22189_v33 = vpop.f32.mrb[19].mxu0 }
 0x104   :  { %2224 = vst.msk [vmem:[#allocation2 + $0x30] sm:$0xff] %vm2217_vm2, %v2099_v28 }
 0x105   :  { %2223 = vst.msk [vmem:[#allocation2 + $0x28] sm:$0xff] %vm2217_vm2, %v2098_v2  ;;  %v1516_v10 = vpop.permute.xlu1 %1515  ;;  %v1235_v2 = vmax.f32 %v657_v40, 0.0  ;;  %v13429_v40 = vld [vmem:[%s26382_s2 + $0x58] sm:$0xff] }
 0x106   :  { %v1511_v60 = vpop.permute.xlu0 %1510  ;;  %v2101_v32 = vmul.f32 %v1516_v10, %v1233_v4  ;;  %v22203_v26 = vpop.f32.mrb[20].mxu0  ;;  %14568 = vperm.xlu1 %21023, %v13425_v63   ;;  %v662_v63 = vadd.f32 %v22099_v56, %v22126_v16  ;;  %v1234_v4 = vmax.f32 %v652_v8, 0.0  ;;  %v677_v56 = vadd.f32 %v22126_v16, %v22152_v14 }
 0x107   :  { %v2100_v7 = vmul.f32 %v1511_v60, %v1232_v34  ;;  %14563 = vperm.xlu0 %21022, %v13424_v15   ;;  %v22205_v28 = vpop.f32.mrb[21].mxu0  ;;  %v1237_v8 = vmax.f32 %v667_v51, 0.0  ;;  %v13431_v51 = vld [vmem:[%s26382_s2 + $0x68] sm:$0xff] }
 0x108   :  { %2226 = vst.msk [vmem:[#allocation2 + $0x40] sm:$0xff] %vm2217_vm2, %v2101_v32 }
 0x109   :  { %2225 = vst.msk [vmem:[#allocation2 + $0x38] sm:$0xff] %vm2217_vm2, %v2100_v7  ;;  %v1526_v15 = vpop.permute.xlu1 %1525  ;;  %v13428_v7 = vld [vmem:[%s26382_s2 + $0x50] sm:$0xff] }
 0x10a   :  { %v1521_v34 = vpop.permute.xlu0 %1520  ;;  %v2103_v10 = vmul.f32 %v1526_v15, %v1235_v2  ;;  %v22219_v60 = vpop.f32.mrb[22].mxu0  ;;  %14578 = vperm.xlu1 %21023, %v13427_v62   ;;  %v672_v62 = vadd.f32 %v22121_v46, %v22126_v16  ;;  %v1236_v2 = vmax.f32 %v662_v63, 0.0  ;;  %v687_v46 = vadd.f32 %v22126_v16, %v22173_v44 }
 0x10b   :  { %v2102_v38 = vmul.f32 %v1521_v34, %v1234_v4  ;;  %14573 = vperm.xlu0 %21022, %v13426_v24   ;;  %v22221_v32 = vpop.f32.mrb[23].mxu0  ;;  %v1239_v63 = vmax.f32 %v677_v56, 0.0  ;;  %v13433_v56 = vld [vmem:[%s26382_s2 + $0x78] sm:$0xff] }
 0x10c   :  { %2228 = vst.msk [vmem:[#allocation2 + $0x50] sm:$0xff] %vm2217_vm2, %v2103_v10 }
 0x10d   :  { %2227 = vst.msk [vmem:[#allocation2 + $0x48] sm:$0xff] %vm2217_vm2, %v2102_v38  ;;  %v1536_v24 = vpop.permute.xlu1 %1535  ;;  %v13430_v38 = vld [vmem:[%s26382_s2 + $0x60] sm:$0xff] }
 0x10e   :  { %v1531_v4 = vpop.permute.xlu0 %1530  ;;  %v2105_v15 = vmul.f32 %v1536_v24, %v1237_v8  ;;  %v22235_v34 = vpop.f32.mrb[24].mxu0  ;;  %14588 = vperm.xlu1 %21023, %v13429_v40   ;;  %v682_v40 = vadd.f32 %v22150_v42, %v22126_v16  ;;  %v1238_v8 = vmax.f32 %v672_v62, 0.0  ;;  %v697_v42 = vadd.f32 %v22126_v16, %v22189_v33 }
 0x10f   :  { %v2104_v14 = vmul.f32 %v1531_v4, %v1236_v2  ;;  %14583 = vperm.xlu0 %21022, %v13428_v7   ;;  %v22237_v10 = vpop.f32.mrb[25].mxu0  ;;  %v1241_v62 = vmax.f32 %v687_v46, 0.0  ;;  %v13435_v46 = vld [vmem:[%s26382_s2 + $0x88] sm:$0xff] }
 0x110   :  { %2230 = vst.msk [vmem:[#allocation2 + $0x60] sm:$0xff] %vm2217_vm2, %v2105_v15 }
 0x111   :  { %2229 = vst.msk [vmem:[#allocation2 + $0x58] sm:$0xff] %vm2217_vm2, %v2104_v14  ;;  %v1546_v7 = vpop.permute.xlu1 %1545  ;;  %v13432_v14 = vld [vmem:[%s26382_s2 + $0x70] sm:$0xff] }
 0x112   :  { %v1541_v2 = vpop.permute.xlu0 %1540  ;;  %v2107_v24 = vmul.f32 %v1546_v7, %v1239_v63  ;;  %v22251_v4 = vpop.f32.mrb[26].mxu0  ;;  %14598 = vperm.xlu1 %21023, %v13431_v51   ;;  %v692_v51 = vadd.f32 %v22171_v58, %v22126_v16  ;;  %v1240_v63 = vmax.f32 %v682_v40, 0.0  ;;  %v707_v58 = vadd.f32 %v22126_v16, %v22205_v28 }
 0x113   :  { %v2106_v44 = vmul.f32 %v1541_v2, %v1238_v8  ;;  %14593 = vperm.xlu0 %21022, %v13430_v38   ;;  %v22253_v15 = vpop.f32.mrb[27].mxu0  ;;  %v1243_v40 = vmax.f32 %v697_v42, 0.0  ;;  %v13437_v42 = vld [vmem:[%s26382_s2 + $0x98] sm:$0xff] }
 0x114   :  { %2232 = vst.msk [vmem:[#allocation2 + $0x70] sm:$0xff] %vm2217_vm2, %v2107_v24 }
 0x115   :  { %2231 = vst.msk [vmem:[#allocation2 + $0x68] sm:$0xff] %vm2217_vm2, %v2106_v44  ;;  %v1556_v38 = vpop.permute.xlu1 %1555  ;;  %v13434_v44 = vld [vmem:[%s26382_s2 + $0x80] sm:$0xff] }
 0x116   :  { %v1551_v8 = vpop.permute.xlu0 %1550  ;;  %v2109_v7 = vmul.f32 %v1556_v38, %v1241_v62  ;;  %v22267_v2 = vpop.f32.mrb[28].mxu0  ;;  %14608 = vperm.xlu1 %21023, %v13433_v56   ;;  %v702_v56 = vadd.f32 %v22187_v54, %v22126_v16  ;;  %v1242_v62 = vmax.f32 %v692_v51, 0.0  ;;  %v717_v54 = vadd.f32 %v22126_v16, %v22221_v32 }
 0x117   :  { %v2108_v33 = vmul.f32 %v1551_v8, %v1240_v63  ;;  %14603 = vperm.xlu0 %21022, %v13432_v14   ;;  %v22269_v24 = vpop.f32.mrb[29].mxu0  ;;  %v1245_v51 = vmax.f32 %v707_v58, 0.0  ;;  %v13439_v58 = vld [vmem:[%s26382_s2 + $0xa8] sm:$0xff] }
 0x118   :  { %2234 = vst.msk [vmem:[#allocation2 + $0x80] sm:$0xff] %vm2217_vm2, %v2109_v7 }
 0x119   :  { %2233 = vst.msk [vmem:[#allocation2 + $0x78] sm:$0xff] %vm2217_vm2, %v2108_v33  ;;  %v1566_v14 = vpop.permute.xlu1 %1565  ;;  %v13436_v33 = vld [vmem:[%s26382_s2 + $0x90] sm:$0xff] }
 0x11a   :  { %v1561_v63 = vpop.permute.xlu0 %1560  ;;  %v2111_v38 = vmul.f32 %v1566_v14, %v1243_v40  ;;  %v22283_v8 = vpop.f32.mrb[30].mxu0  ;;  %14618 = vperm.xlu1 %21023, %v13435_v46   ;;  %v712_v46 = vadd.f32 %v22203_v26, %v22126_v16  ;;  %v1244_v40 = vmax.f32 %v702_v56, 0.0  ;;  %v727_v26 = vadd.f32 %v22126_v16, %v22237_v10 }
 0x11b   :  { %v2110_v28 = vmul.f32 %v1561_v63, %v1242_v62  ;;  %14613 = vperm.xlu0 %21022, %v13434_v44   ;;  %v22285_v7 = vpop.f32.mrb[31].mxu0  ;;  %v1247_v56 = vmax.f32 %v717_v54, 0.0  ;;  %v13441_v54 = vld [vmem:[%s26382_s2 + $0xb8] sm:$0xff] }
 0x11c   :  { %2236 = vst.msk [vmem:[#allocation2 + $0x90] sm:$0xff] %vm2217_vm2, %v2111_v38 }
 0x11d   :  { %2235 = vst.msk [vmem:[#allocation2 + $0x88] sm:$0xff] %vm2217_vm2, %v2110_v28  ;;  %v1576_v44 = vpop.permute.xlu1 %1575  ;;  %v13438_v28 = vld [vmem:[%s26382_s2 + $0xa0] sm:$0xff] }
 0x11e   :  { %v1571_v62 = vpop.permute.xlu0 %1570  ;;  %v2113_v14 = vmul.f32 %v1576_v44, %v1245_v51  ;;  %v22299_v63 = vpop.f32.mrb[32].mxu0  ;;  %14628 = vperm.xlu1 %21023, %v13437_v42   ;;  %v722_v42 = vadd.f32 %v22219_v60, %v22126_v16  ;;  %v1246_v51 = vmax.f32 %v712_v46, 0.0  ;;  %v737_v60 = vadd.f32 %v22126_v16, %v22253_v15 }
 0x11f   :  { %v2112_v32 = vmul.f32 %v1571_v62, %v1244_v40  ;;  %14623 = vperm.xlu0 %21022, %v13436_v33   ;;  %v22301_v38 = vpop.f32.mrb[33].mxu0  ;;  %v1249_v46 = vmax.f32 %v727_v26, 0.0  ;;  %v13443_v26 = vld [vmem:[%s26382_s2 + $0xc8] sm:$0xff] }
 0x120   :  { %2238 = vst.msk [vmem:[#allocation2 + $0xa0] sm:$0xff] %vm2217_vm2, %v2113_v14 }
 0x121   :  { %2237 = vst.msk [vmem:[#allocation2 + $0x98] sm:$0xff] %vm2217_vm2, %v2112_v32  ;;  %v1586_v33 = vpop.permute.xlu1 %1585  ;;  %v13440_v32 = vld [vmem:[%s26382_s2 + $0xb0] sm:$0xff] }
 0x122   :  { %v1581_v40 = vpop.permute.xlu0 %1580  ;;  %v2115_v44 = vmul.f32 %v1586_v33, %v1247_v56  ;;  %v22315_v62 = vpop.f32.mrb[34].mxu0  ;;  %14638 = vperm.xlu1 %21023, %v13439_v58   ;;  %v732_v58 = vadd.f32 %v22235_v34, %v22126_v16  ;;  %v1248_v56 = vmax.f32 %v722_v42, 0.0  ;;  %v747_v34 = vadd.f32 %v22126_v16, %v22269_v24 }
 0x123   :  { %v2114_v10 = vmul.f32 %v1581_v40, %v1246_v51  ;;  %14633 = vperm.xlu0 %21022, %v13438_v28   ;;  %v22317_v14 = vpop.f32.mrb[35].mxu0  ;;  %v1251_v42 = vmax.f32 %v737_v60, 0.0  ;;  %v13445_v60 = vld [vmem:[%s26382_s2 + $0xd8] sm:$0xff] }
 0x124   :  { %2240 = vst.msk [vmem:[#allocation2 + $0xb0] sm:$0xff] %vm2217_vm2, %v2115_v44 }
 0x125   :  { %2239 = vst.msk [vmem:[#allocation2 + $0xa8] sm:$0xff] %vm2217_vm2, %v2114_v10  ;;  %v1596_v28 = vpop.permute.xlu1 %1595  ;;  %v13442_v10 = vld [vmem:[%s26382_s2 + $0xc0] sm:$0xff] }
 0x126   :  { %v1591_v51 = vpop.permute.xlu0 %1590  ;;  %v2117_v33 = vmul.f32 %v1596_v28, %v1249_v46  ;;  %v22331_v40 = vpop.f32.mrb[36].mxu0  ;;  %14648 = vperm.xlu1 %21023, %v13441_v54   ;;  %v742_v54 = vadd.f32 %v22251_v4, %v22126_v16  ;;  %v1250_v46 = vmax.f32 %v732_v58, 0.0  ;;  %v757_v4 = vadd.f32 %v22126_v16, %v22285_v7 }
 0x127   :  { %v2116_v15 = vmul.f32 %v1591_v51, %v1248_v56  ;;  %14643 = vperm.xlu0 %21022, %v13440_v32   ;;  %v22333_v44 = vpop.f32.mrb[37].mxu0  ;;  %v1253_v58 = vmax.f32 %v747_v34, 0.0  ;;  %v13447_v34 = vld [vmem:[%s26382_s2 + $0xe8] sm:$0xff] }
 0x128   :  { %2242 = vst.msk [vmem:[#allocation2 + $0xc0] sm:$0xff] %vm2217_vm2, %v2117_v33 }
 0x129   :  { %2241 = vst.msk [vmem:[#allocation2 + $0xb8] sm:$0xff] %vm2217_vm2, %v2116_v15  ;;  %v1606_v32 = vpop.permute.xlu1 %1605  ;;  %v13444_v15 = vld [vmem:[%s26382_s2 + $0xd0] sm:$0xff] }
 0x12a   :  { %v1601_v56 = vpop.permute.xlu0 %1600  ;;  %v2119_v28 = vmul.f32 %v1606_v32, %v1251_v42  ;;  %v22347_v51 = vpop.f32.mrb[38].mxu0  ;;  %14658 = vperm.xlu1 %21023, %v13443_v26   ;;  %v752_v26 = vadd.f32 %v22267_v2, %v22126_v16  ;;  %v1252_v42 = vmax.f32 %v742_v54, 0.0  ;;  %v767_v2 = vadd.f32 %v22126_v16, %v22301_v38 }
 0x12b   :  { %v2118_v24 = vmul.f32 %v1601_v56, %v1250_v46  ;;  %14653 = vperm.xlu0 %21022, %v13442_v10   ;;  %v22349_v33 = vpop.f32.mrb[39].mxu0  ;;  %v1255_v54 = vmax.f32 %v757_v4, 0.0  ;;  %v13449_v4 = vld [vmem:[%s26382_s2 + $0xf8] sm:$0xff] }
 0x12c   :  { %2244 = vst.msk [vmem:[#allocation2 + $0xd0] sm:$0xff] %vm2217_vm2, %v2119_v28 }
 0x12d   :  { %2243 = vst.msk [vmem:[#allocation2 + $0xc8] sm:$0xff] %vm2217_vm2, %v2118_v24  ;;  %v1616_v10 = vpop.permute.xlu1 %1615  ;;  %v13446_v24 = vld [vmem:[%s26382_s2 + $0xe0] sm:$0xff] }
 0x12e   :  { %v1611_v46 = vpop.permute.xlu0 %1610  ;;  %v2121_v32 = vmul.f32 %v1616_v10, %v1253_v58  ;;  %v22363_v56 = vpop.f32.mrb[40].mxu0  ;;  %14668 = vperm.xlu1 %21023, %v13445_v60   ;;  %v762_v60 = vadd.f32 %v22283_v8, %v22126_v16  ;;  %v1254_v58 = vmax.f32 %v752_v26, 0.0  ;;  %v777_v8 = vadd.f32 %v22126_v16, %v22317_v14 }
 0x12f   :  { %v2120_v7 = vmul.f32 %v1611_v46, %v1252_v42  ;;  %14663 = vperm.xlu0 %21022, %v13444_v15   ;;  %v22365_v28 = vpop.f32.mrb[41].mxu0  ;;  %v1257_v26 = vmax.f32 %v767_v2, 0.0  ;;  %v13451_v2 = vld [vmem:[%s26382_s2 + $0x108] sm:$0xff] }
 0x130   :  { %2246 = vst.msk [vmem:[#allocation2 + $0xe0] sm:$0xff] %vm2217_vm2, %v2121_v32 }
 0x131   :  { %2245 = vst.msk [vmem:[#allocation2 + $0xd8] sm:$0xff] %vm2217_vm2, %v2120_v7  ;;  %v1626_v15 = vpop.permute.xlu1 %1625  ;;  %v13448_v7 = vld [vmem:[%s26382_s2 + $0xf0] sm:$0xff] }
 0x132   :  { %v1621_v42 = vpop.permute.xlu0 %1620  ;;  %v2123_v10 = vmul.f32 %v1626_v15, %v1255_v54  ;;  %v22379_v46 = vpop.f32.mrb[42].mxu0  ;;  %14678 = vperm.xlu1 %21023, %v13447_v34   ;;  %v772_v34 = vadd.f32 %v22299_v63, %v22126_v16  ;;  %v1256_v54 = vmax.f32 %v762_v60, 0.0  ;;  %v787_v63 = vadd.f32 %v22126_v16, %v22333_v44 }
 0x133   :  { %v2122_v38 = vmul.f32 %v1621_v42, %v1254_v58  ;;  %14673 = vperm.xlu0 %21022, %v13446_v24   ;;  %v22381_v32 = vpop.f32.mrb[43].mxu0  ;;  %v1259_v60 = vmax.f32 %v777_v8, 0.0  ;;  %v13453_v8 = vld [vmem:[%s26382_s2 + $0x118] sm:$0xff] }
 0x134   :  { %2248 = vst.msk [vmem:[#allocation2 + $0xf0] sm:$0xff] %vm2217_vm2, %v2123_v10 }
 0x135   :  { %2247 = vst.msk [vmem:[#allocation2 + $0xe8] sm:$0xff] %vm2217_vm2, %v2122_v38  ;;  %v1636_v24 = vpop.permute.xlu1 %1635  ;;  %v13450_v38 = vld [vmem:[%s26382_s2 + $0x100] sm:$0xff] }
 0x136   :  { %v1631_v58 = vpop.permute.xlu0 %1630  ;;  %v2125_v15 = vmul.f32 %v1636_v24, %v1257_v26  ;;  %v22395_v42 = vpop.f32.mrb[44].mxu0  ;;  %14688 = vperm.xlu1 %21023, %v13449_v4   ;;  %v782_v4 = vadd.f32 %v22315_v62, %v22126_v16  ;;  %v1258_v26 = vmax.f32 %v772_v34, 0.0  ;;  %v797_v62 = vadd.f32 %v22126_v16, %v22349_v33 }
 0x137   :  { %v2124_v14 = vmul.f32 %v1631_v58, %v1256_v54  ;;  %14683 = vperm.xlu0 %21022, %v13448_v7   ;;  %v22397_v10 = vpop.f32.mrb[45].mxu0  ;;  %v1261_v34 = vmax.f32 %v787_v63, 0.0  ;;  %v13455_v63 = vld [vmem:[%s26382_s2 + $0x128] sm:$0xff] }
 0x138   :  { %2250 = vst.msk [vmem:[#allocation2 + $0x100] sm:$0xff] %vm2217_vm2, %v2125_v15 }
 0x139   :  { %2249 = vst.msk [vmem:[#allocation2 + $0xf8] sm:$0xff] %vm2217_vm2, %v2124_v14  ;;  %v1646_v7 = vpop.permute.xlu1 %1645  ;;  %v13452_v14 = vld [vmem:[%s26382_s2 + $0x110] sm:$0xff] }
 0x13a   :  { %v1641_v54 = vpop.permute.xlu0 %1640  ;;  %v2127_v24 = vmul.f32 %v1646_v7, %v1259_v60  ;;  %v22411_v58 = vpop.f32.mrb[46].mxu0  ;;  %14698 = vperm.xlu1 %21023, %v13451_v2   ;;  %v792_v2 = vadd.f32 %v22331_v40, %v22126_v16  ;;  %v1260_v60 = vmax.f32 %v782_v4, 0.0  ;;  %v807_v40 = vadd.f32 %v22126_v16, %v22365_v28 }
 0x13b   :  { %v2126_v44 = vmul.f32 %v1641_v54, %v1258_v26  ;;  %14693 = vperm.xlu0 %21022, %v13450_v38   ;;  %v22413_v15 = vpop.f32.mrb[47].mxu0  ;;  %v1263_v4 = vmax.f32 %v797_v62, 0.0  ;;  %v13457_v62 = vld [vmem:[%s26382_s2 + $0x138] sm:$0xff] }
 0x13c   :  { %2252 = vst.msk [vmem:[#allocation2 + $0x110] sm:$0xff] %vm2217_vm2, %v2127_v24 }
 0x13d   :  { %2251 = vst.msk [vmem:[#allocation2 + $0x108] sm:$0xff] %vm2217_vm2, %v2126_v44  ;;  %v1656_v38 = vpop.permute.xlu1 %1655  ;;  %v13454_v44 = vld [vmem:[%s26382_s2 + $0x120] sm:$0xff] }
 0x13e   :  { %v1651_v26 = vpop.permute.xlu0 %1650  ;;  %v2129_v7 = vmul.f32 %v1656_v38, %v1261_v34  ;;  %v22427_v54 = vpop.f32.mrb[48].mxu0  ;;  %14708 = vperm.xlu1 %21023, %v13453_v8   ;;  %v802_v8 = vadd.f32 %v22347_v51, %v22126_v16  ;;  %v1262_v34 = vmax.f32 %v792_v2, 0.0  ;;  %v817_v51 = vadd.f32 %v22126_v16, %v22381_v32 }
 0x13f   :  { %v2128_v33 = vmul.f32 %v1651_v26, %v1260_v60  ;;  %14703 = vperm.xlu0 %21022, %v13452_v14   ;;  %v22429_v24 = vpop.f32.mrb[49].mxu0  ;;  %v1265_v2 = vmax.f32 %v807_v40, 0.0  ;;  %v13459_v40 = vld [vmem:[%s26382_s2 + $0x148] sm:$0xff] }
 0x140   :  { %2254 = vst.msk [vmem:[#allocation2 + $0x120] sm:$0xff] %vm2217_vm2, %v2129_v7 }
 0x141   :  { %2253 = vst.msk [vmem:[#allocation2 + $0x118] sm:$0xff] %vm2217_vm2, %v2128_v33  ;;  %v1666_v14 = vpop.permute.xlu1 %1665  ;;  %v13456_v33 = vld [vmem:[%s26382_s2 + $0x130] sm:$0xff] }
 0x142   :  { %v1661_v60 = vpop.permute.xlu0 %1660  ;;  %v2131_v38 = vmul.f32 %v1666_v14, %v1263_v4  ;;  %v22443_v26 = vpop.f32.mrb[50].mxu0  ;;  %14718 = vperm.xlu1 %21023, %v13455_v63   ;;  %v812_v63 = vadd.f32 %v22363_v56, %v22126_v16  ;;  %v1264_v4 = vmax.f32 %v802_v8, 0.0  ;;  %v827_v56 = vadd.f32 %v22126_v16, %v22397_v10 }
 0x143   :  { %v2130_v28 = vmul.f32 %v1661_v60, %v1262_v34  ;;  %14713 = vperm.xlu0 %21022, %v13454_v44   ;;  %v22445_v7 = vpop.f32.mrb[51].mxu0  ;;  %v1267_v8 = vmax.f32 %v817_v51, 0.0  ;;  %v13461_v51 = vld [vmem:[%s26382_s2 + $0x158] sm:$0xff] }
 0x144   :  { %2256 = vst.msk [vmem:[#allocation2 + $0x130] sm:$0xff] %vm2217_vm2, %v2131_v38 }
 0x145   :  { %2255 = vst.msk [vmem:[#allocation2 + $0x128] sm:$0xff] %vm2217_vm2, %v2130_v28  ;;  %v1676_v44 = vpop.permute.xlu1 %1675  ;;  %v13458_v28 = vld [vmem:[%s26382_s2 + $0x140] sm:$0xff] }
 0x146   :  { %v1671_v34 = vpop.permute.xlu0 %1670  ;;  %v2133_v14 = vmul.f32 %v1676_v44, %v1265_v2  ;;  %v22459_v60 = vpop.f32.mrb[52].mxu0  ;;  %14728 = vperm.xlu1 %21023, %v13457_v62   ;;  %v822_v62 = vadd.f32 %v22379_v46, %v22126_v16  ;;  %v1266_v2 = vmax.f32 %v812_v63, 0.0  ;;  %v837_v46 = vadd.f32 %v22126_v16, %v22413_v15 }
 0x147   :  { %v2132_v32 = vmul.f32 %v1671_v34, %v1264_v4  ;;  %14723 = vperm.xlu0 %21022, %v13456_v33   ;;  %v22461_v38 = vpop.f32.mrb[53].mxu0  ;;  %v1269_v63 = vmax.f32 %v827_v56, 0.0 }
 0x148   :  { %2258 = vst.msk [vmem:[#allocation2 + $0x140] sm:$0xff] %vm2217_vm2, %v2133_v14 }
 0x149   :  { %2257 = vst.msk [vmem:[#allocation2 + $0x138] sm:$0xff] %vm2217_vm2, %v2132_v32  ;;  %v1686_v33 = vpop.permute.xlu1 %1685  ;;  %v13460_v32 = vld [vmem:[%s26382_s2 + $0x150] sm:$0xff] }
 0x14a   :  { %v1681_v4 = vpop.permute.xlu0 %1680  ;;  %v2135_v44 = vmul.f32 %v1686_v33, %v1267_v8  ;;  %v22475_v34 = vpop.f32.mrb[54].mxu0  ;;  %14738 = vperm.xlu1 %21023, %v13459_v40   ;;  %v832_v40 = vadd.f32 %v22395_v42, %v22126_v16  ;;  %v1268_v8 = vmax.f32 %v822_v62, 0.0  ;;  %v847_v42 = vadd.f32 %v22126_v16, %v22429_v24 }
 0x14b   :  { %v2134_v10 = vmul.f32 %v1681_v4, %v1266_v2  ;;  %14733 = vperm.xlu0 %21022, %v13458_v28   ;;  %v22477_v14 = vpop.f32.mrb[55].mxu0  ;;  %v1271_v62 = vmax.f32 %v837_v46, 0.0 }
 0x14c   :  { %2260 = vst.msk [vmem:[#allocation2 + $0x150] sm:$0xff] %vm2217_vm2, %v2135_v44  ;;  %v13463_v44 = vld [vmem:[%s26382_s2 + $0x168] sm:$0xff] }
 0x14d   :  { %2259 = vst.msk [vmem:[#allocation2 + $0x148] sm:$0xff] %vm2217_vm2, %v2134_v10  ;;  %v1696_v28 = vpop.permute.xlu1 %1695  ;;  %v13462_v10 = vld [vmem:[%s26382_s2 + $0x160] sm:$0xff] }
 0x14e   :  { %v1691_v2 = vpop.permute.xlu0 %1690  ;;  %v2137_v33 = vmul.f32 %v1696_v28, %v1269_v63  ;;  %v18085_v4 = vpop.f32.mrb[56].mxu0  ;;  %14748 = vperm.xlu1 %21023, %v13461_v51   ;;  %v842_v51 = vadd.f32 %v22411_v58, %v22126_v16  ;;  %v13465_v58 = vld [vmem:[%s26382_s2 + $0x178] sm:$0xff] }
 0x14f   :  { %v2136_v45 = vmul.f32 %v1691_v2, %v1268_v8  ;;  %v892_v15 = vadd.f32 %v18085_v4, %v22126_v16  ;;  %14743 = vperm.xlu0 %21022, %v13460_v32   ;;  %v22492_v56 = vpop.f32.mrb[57].mxu0  ;;  %v1270_v32 = vmax.f32 %v832_v40, 0.0 }
 0x150   :  { %2262 = vst.msk [vmem:[#allocation2 + $0x160] sm:$0xff] %vm2217_vm2, %v2137_v33 }
 0x151   :  { %2261 = vst.msk [vmem:[#allocation2 + $0x158] sm:$0xff] %vm2217_vm2, %v2136_v45  ;;  %v1282_v63 = vmax.f32 %v892_v15, 0.0  ;;  %v1706_v8 = vpop.permute.xlu1 %1705  ;;  %v857_v45 = vadd.f32 %v22126_v16, %v22445_v7  ;;  %v1273_v15 = vmax.f32 %v847_v42, 0.0 }
 0x152   :  { %v1701_v28 = vpop.permute.xlu0 %1700  ;;  %v2139_v2 = vmul.f32 %v1706_v8, %v1271_v62  ;;  %v18088_v4 = vpop.f32.mrb[58].mxu0  ;;  %14758 = vperm.xlu1 %21023, %v13463_v44   ;;  %v852_v44 = vadd.f32 %v22427_v54, %v22126_v16  ;;  %v13467_v54 = vld [vmem:[%s26382_s2 + $0x188] sm:$0xff] }
 0x153   :  { %v2150_v24 = vmul.f32 %v21529_v6, %v1282_v63  ;;  %v2138_v33 = vmul.f32 %v1701_v28, %v1270_v32  ;;  %v902_v46 = vadd.f32 %v18088_v4, %v22126_v16  ;;  %14753 = vperm.xlu0 %21022, %v13462_v10   ;;  %v896_v57 = vpop.f32.mrb[59].mxu0  ;;  %v13464_v6 = vld [vmem:[%s26382_s2 + $0x170] sm:$0xff]  ;;  %v1272_v10 = vmax.f32 %v842_v51, 0.0 }
 0x154   :  { %2264 = vst.msk [vmem:[#allocation2 + $0x170] sm:$0xff] %vm2217_vm2, %v2139_v2  ;;  %v897_v40 = vadd.f32 %v22126_v16, %v896_v57  ;;  %v867_v51 = vadd.f32 %v22126_v16, %v22461_v38  ;;  %v1274_v38 = vmax.f32 %v852_v44, 0.0  ;;  %v877_v44 = vadd.f32 %v22126_v16, %v22477_v14 }
 0x155   :  { %2275 = vst.msk [vmem:[#allocation2 + $0x1c8] sm:$0xff] %vm2217_vm2, %v2150_v24  ;;  %2263 = vst.msk [vmem:[#allocation2 + $0x168] sm:$0xff] %vm2217_vm2, %v2138_v33  ;;  %v1284_v62 = vmax.f32 %v902_v46, 0.0  ;;  %v1716_v63 = vpop.permute.xlu1 %1715  ;;  %v1275_v46 = vmax.f32 %v857_v45, 0.0 }
 0x156   :  { %v1283_v7 = vmax.f32 %v897_v40, 0.0  ;;  %v1711_v32 = vpop.permute.xlu0 %1710  ;;  %v2141_v8 = vmul.f32 %v1716_v63, %v1273_v15  ;;  %v18091_v28 = vpop.f32.mrb[60].mxu0  ;;  %14768 = vperm.xlu1 %21023, %v13465_v58   ;;  %v862_v58 = vadd.f32 %v22443_v26, %v22126_v16 }
 0x157   :  { %v2152_v57 = vmul.f32 %v21527_v5, %v1284_v62  ;;  %v2140_v42 = vmul.f32 %v1711_v32, %v1272_v10  ;;  %v912_v2 = vadd.f32 %v18091_v28, %v22126_v16  ;;  %14763 = vperm.xlu0 %21022, %v13464_v6   ;;  %v906_v4 = vpop.f32.mrb[61].mxu0  ;;  %v13466_v5 = vld [vmem:[%s26382_s2 + $0x180] sm:$0xff]  ;;  %v13469_v32 = vld [vmem:[%s26382_s2 + $0x198] sm:$0xff] }
 0x158   :  { %v2151_v24 = vmul.f32 %v21550_v13, %v1283_v7  ;;  %2266 = vst.msk [vmem:[#allocation2 + $0x180] sm:$0xff] %vm2217_vm2, %v2141_v8  ;;  %v907_v33 = vadd.f32 %v22126_v16, %v906_v4  ;;  %v1276_v14 = vmax.f32 %v862_v58, 0.0 }
 0x159   :  { %2277 = vst.msk [vmem:[#allocation2 + $0x1d8] sm:$0xff] %vm2217_vm2, %v2152_v57  ;;  %2265 = vst.msk [vmem:[#allocation2 + $0x178] sm:$0xff] %vm2217_vm2, %v2140_v42  ;;  %v1286_v40 = vmax.f32 %v912_v2, 0.0  ;;  %v1726_v15 = vpop.permute.xlu1 %1725  ;;  %v1277_v57 = vmax.f32 %v867_v51, 0.0  ;;  %v872_v42 = vadd.f32 %v22459_v60, %v22126_v16  ;;  %v15952_v60 = vld [vmem:[%s26380_s5 + $0x98] sm:$0xff] }
 0x15a   :  { %2276 = vst.msk [vmem:[#allocation2 + $0x1d0] sm:$0xff] %vm2217_vm2, %v2151_v24  ;;  %v1285_v13 = vmax.f32 %v907_v33, 0.0  ;;  %v1721_v6 = vpop.permute.xlu0 %1720  ;;  %v2143_v62 = vmul.f32 %v1726_v15, %v1275_v46  ;;  %v18094_v45 = vpop.f32.mrb[62].mxu0  ;;  %14778 = vperm.xlu1 %21023, %v13467_v54   ;;  %v15951_v33 = vld [vmem:[%s26380_s5 + $0x90] sm:$0xff]  ;;  %v887_v15 = vadd.f32 %v22126_v16, %v22492_v56 }
 0x15b   :  { %v2154_v10 = vmul.f32 %v21568_v19, %v1286_v40  ;;  %v2142_v63 = vmul.f32 %v1721_v6, %v1274_v38  ;;  %v922_v7 = vadd.f32 %v18094_v45, %v22126_v16  ;;  %14773 = vperm.xlu0 %21022, %v13466_v5   ;;  %v916_v26 = vpop.f32.mrb[63].mxu0  ;;  %v13468_v19 = vld [vmem:[%s26382_s2 + $0x190] sm:$0xff]  ;;  %v13471_v38 = vld [vmem:[%s26382_s2 + $0x1a8] sm:$0xff]  ;;  %v882_v45 = vadd.f32 %v22475_v34, %v22126_v16  ;;  %v16069_v34 = vld [vmem:[%s26380_s5 + $0xa0] sm:$0xff] }
 0x15c   :  { %v2153_v8 = vmul.f32 %v21545_v11, %v1285_v13  ;;  %2268 = vst.msk [vmem:[#allocation2 + $0x190] sm:$0xff] %vm2217_vm2, %v2143_v62  ;;  %v917_v28 = vadd.f32 %v22126_v16, %v916_v26  ;;  %v1279_v62 = vmax.f32 %v877_v44, 0.0  ;;  %v1278_v56 = vmax.f32 %v872_v42, 0.0 }
 0x15d   :  { %2279 = vst.msk [vmem:[#allocation2 + $0x1e8] sm:$0xff] %vm2217_vm2, %v2154_v10  ;;  %2267 = vst.msk [vmem:[#allocation2 + $0x188] sm:$0xff] %vm2217_vm2, %v2142_v63  ;;  %v1288_v2 = vmax.f32 %v922_v7, 0.0  ;;  %v1736_v4 = vpop.permute.xlu1 %1735  ;;  %v20045_v26 = vpack.c.bf16 %v15952_v60, %v15951_v33  ;;  %v612_v33 = vadd.f32 %v21966_v50, %v22126_v16 }
 0x15e   :  { %2278 = vst.msk [vmem:[#allocation2 + $0x1e0] sm:$0xff] %vm2217_vm2, %v2153_v8  ;;  %v1287_v11 = vmax.f32 %v917_v28, 0.0  ;;  %v1731_v54 = vpop.permute.xlu0 %1730  ;;  %v2145_v24 = vmul.f32 %v1736_v4, %v1277_v57  ;;  %v18097_v51 = vpop.f32.mrb[64].mxu0  ;;  %14788 = vperm.xlu1 %21023, %v13469_v32   ;;  %v16070_v57 = vld [vmem:[%s26380_s5 + $0xa8] sm:$0xff]  ;;  %v13473_v4 = vld [vmem:[%s26382_s2 + $0x1b8] sm:$0xff] }
 0x15f   :  { %v2156_v46 = vmul.f32 %v21586_v25, %v1288_v2  ;;  %v2144_v5 = vmul.f32 %v1731_v54, %v1276_v14  ;;  %v932_v58 = vadd.f32 %v18097_v51, %v22126_v16  ;;  %14783 = vperm.xlu0 %21022, %v13468_v19   ;;  %v926_v40 = vpop.f32.mrb[65].mxu0  ;;  %v13470_v25 = vld [vmem:[%s26382_s2 + $0x1a0] sm:$0xff]  ;;  %v13472_v51 = vld [vmem:[%s26382_s2 + $0x1b0] sm:$0xff] }
 0x160   :  { %v2155_v13 = vmul.f32 %v21563_v17, %v1287_v11  ;;  %2270 = vst.msk [vmem:[#allocation2 + $0x1a0] sm:$0xff] %vm2217_vm2, %v2145_v24  ;;  %v927_v6 = vadd.f32 %v22126_v16, %v926_v40  ;;  %v617_v11 = vadd.f32 %v22126_v16, %v21992_v22  ;;  %v1281_v24 = vmax.f32 %v887_v15, 0.0 }
 0x161   :  { %2281 = vst.msk [vmem:[#allocation2 + $0x1f8] sm:$0xff] %vm2217_vm2, %v2156_v46  ;;  %2269 = vst.msk [vmem:[#allocation2 + $0x198] sm:$0xff] %vm2217_vm2, %v2144_v5  ;;  %v1290_v10 = vmax.f32 %v932_v58, 0.0  ;;  %v1746_v63 = vpop.permute.xlu1 %1745  ;;  %v5853_v17 = vld [vmem:[#allocation2 + $0x1cf] sm:$0xff]  ;;  %v5854_v7 = vld [vmem:[#allocation2 + $0x1d7] sm:$0xff]  ;;  %v22608_v58 = vpack.c.bf16 %v16070_v57, %v16069_v34 }
 0x162   :  { %2280 = vst.msk [vmem:[#allocation2 + $0x1f0] sm:$0xff] %vm2217_vm2, %v2155_v13  ;;  %v1289_v32 = vmax.f32 %v927_v6, 0.0  ;;  %v1741_v44 = vpop.permute.xlu0 %1740  ;;  %v2147_v8 = vmul.f32 %v1746_v63, %v1279_v62  ;;  %v18100_v28 = vpop.f32.mrb[66].mxu0  ;;  %18820 = vmatprep.mubr.msk.f32.mxu1 %vm2217_vm2, %v5853_v17  ;;  %14798 = vperm.xlu1 %21023, %v13471_v38   ;;  %v22627_v63 = vld [vmem:[%s26381_s4] ss:$0 sm:$0xff] }
 0x163   :  { %v2158_v19 = vmul.f32 %v21604_v31, %v1290_v10  ;;  %v2146_v42 = vmul.f32 %v1741_v44, %v1278_v56  ;;  %v942_v2 = vadd.f32 %v18100_v28, %v22126_v16  ;;  %14793 = vperm.xlu0 %21022, %v13470_v25   ;;  %v936_v14 = vpop.f32.mrb[67].mxu0  ;;  %18821 = vmatmul.mubr.msk.f32.vlgmr.msra.gmra.mrb[0].mxu1 %vm2217_vm2, %v5854_v7  ;;  %v13475_v25 = vld [vmem:[%s26382_s2 + $0x1c8] sm:$0xff]  ;;  %v1227_v56 = vmax.f32 %v617_v11, 0.0 }
 0x164   :  { %v2157_v54 = vmul.f32 %v21581_v23, %v1289_v32  ;;  %2272 = vst.msk [vmem:[#allocation2 + $0x1b0] sm:$0xff] %vm2217_vm2, %v2147_v8  ;;  %v937_v31 = vadd.f32 %v22126_v16, %v936_v14  ;;  %20044 = vmatpush3.bf16.msra.mxu1 %v22026_v0  ;;  %v1280_v23 = vmax.f32 %v882_v45, 0.0  ;;  %v622_v17 = vadd.f32 %v22627_v63, %v21990_v20 }
 0x165   :  { %2283 = vst.msk [vmem:[#allocation2 + $0x208] sm:$0xff] %vm2217_vm2, %v2158_v19  ;;  %2271 = vst.msk [vmem:[#allocation2 + $0x1a8] sm:$0xff] %vm2217_vm2, %v2146_v42  ;;  %v1292_v22 = vmax.f32 %v942_v2, 0.0  ;;  %v1756_v60 = vpop.permute.xlu1 %1755  ;;  %v5855_v46 = vld [vmem:[#allocation2 + $0x1df] sm:$0xff]  ;;  %v5856_v5 = vld [vmem:[#allocation2 + $0x1e7] sm:$0xff]  ;;  %20046 = vmatprep.subr.bf16.mxu1 %v20045_v26  ;;  %v1226_v7 = vmax.f32 %v612_v33, 0.0  ;;  %v607_v11 = vadd.f32 %v22627_v63, %v21968_v52 }
 0x166   :  { %2282 = vst.msk [vmem:[#allocation2 + $0x200] sm:$0xff] %vm2217_vm2, %v2157_v54  ;;  %v1291_v0 = vmax.f32 %v937_v31, 0.0  ;;  %v1751_v40 = vpop.permute.xlu0 %1750  ;;  %v2149_v38 = vmul.f32 %v1756_v60, %v1281_v24  ;;  %v18103_v15 = vpop.f32.mrb[68].mxu0  ;;  %18823 = vmatprep.mubr.msk.f32.mxu1 %vm2217_vm2, %v5855_v46  ;;  %14808 = vperm.xlu1 %21023, %v13473_v4   ;;  %v13477_v2 = vld [vmem:[%s26382_s2 + $0x1d8] sm:$0xff]  ;;  %v1228_v31 = vmax.f32 %v622_v17, 0.0 }
 0x167   :  { %v2160_v50 = vmul.f32 %v21622_v37, %v1292_v22  ;;  %v2148_v13 = vmul.f32 %v1751_v40, %v1280_v23  ;;  %v952_v6 = vadd.f32 %v18103_v15, %v22126_v16  ;;  %14803 = vperm.xlu0 %21022, %v13472_v51   ;;  %v946_v62 = vpop.f32.mrb[69].mxu0  ;;  %18824 = vmatmul.mubr.msk.f32.gmra.mrb[2].mxu1 %vm2217_vm2, %v5856_v5  ;;  %v13474_v37 = vld [vmem:[%s26382_s2 + $0x1c0] sm:$0xff]  ;;  %v13479_v5 = vld [vmem:[%s26382_s2 + $0x1e8] sm:$0xff]  ;;  %v1225_v15 = vmax.f32 %v607_v11, 0.0 }
 0x168   :  { %v2159_v45 = vmul.f32 %v21599_v29, %v1291_v0  ;;  %2274 = vst.msk [vmem:[#allocation2 + $0x1c0] sm:$0xff] %vm2217_vm2, %v2149_v38  ;;  %v947_v10 = vadd.f32 %v22126_v16, %v946_v62  ;;  %20048 = vmatpush3.bf16.msra.mxu1 %v20045_v26  ;;  %v13478_v38 = vld [vmem:[%s26382_s2 + $0x1e0] sm:$0xff] }
 0x169   :  { %2285 = vst.msk [vmem:[#allocation2 + $0x218] sm:$0xff] %vm2217_vm2, %v2160_v50  ;;  %2273 = vst.msk [vmem:[#allocation2 + $0x1b8] sm:$0xff] %vm2217_vm2, %v2148_v13  ;;  %v1294_v29 = vmax.f32 %v952_v6, 0.0  ;;  %v1486_v16 = vpop.permute.xlu1 %1485  ;;  %v5857_v32 = vld [vmem:[#allocation2 + $0x1ef] sm:$0xff]  ;;  %v5858_v44 = vld [vmem:[#allocation2 + $0x1f7] sm:$0xff]  ;;  %20050 = vmatprep.subr.bf16.mxu1 %v22608_v58 }
 0x16a   :  { %2284 = vst.msk [vmem:[#allocation2 + $0x210] sm:$0xff] %vm2217_vm2, %v2159_v45  ;;  %v1293_v26 = vmax.f32 %v947_v10, 0.0  ;;  %v2095_v8 = vmul.f32 %v1486_v16, %v1227_v56  ;;  %v1481_v28 = vpop.permute.xlu0 %1480  ;;  %v18106_v34 = vpop.f32.mrb[70].mxu0  ;;  %18826 = vmatprep.mubr.msk.f32.mxu1 %vm2217_vm2, %v5857_v32  ;;  %14818 = vperm.xlu1 %21023, %v13475_v25  }
 0x16b   :  { %v2162_v20 = vmul.f32 %v21640_v43, %v1294_v29  ;;  %v2094_v57 = vmul.f32 %v1481_v28, %v1226_v7  ;;  %v962_v19 = vadd.f32 %v22627_v63, %v18106_v34  ;;  %14813 = vperm.xlu0 %21022, %v13474_v37   ;;  %v956_v42 = vpop.f32.mrb[71].mxu0  ;;  %18827 = vmatmul.mubr.msk.f32.gmra.mrb[4].mxu1 %vm2217_vm2, %v5858_v44  ;;  %v13476_v43 = vld [vmem:[%s26382_s2 + $0x1d0] sm:$0xff]  ;;  %v13481_v7 = vld [vmem:[%s26382_s2 + $0x1f8] sm:$0xff] }
 0x16c   :  { %v2161_v14 = vmul.f32 %v21617_v35, %v1293_v26  ;;  %2220 = vst.msk [vmem:[#allocation2 + $0x10] sm:$0xff] %vm2217_vm2, %v2095_v8  ;;  %v957_v4 = vadd.f32 %v22627_v63, %v956_v42 }
 0x16d   :  { %2287 = vst.msk [vmem:[#allocation2 + $0x228] sm:$0xff] %vm2217_vm2, %v2162_v20  ;;  %2219 = vst.msk [vmem:[#allocation2 + $0x8] sm:$0xff] %vm2217_vm2, %v2094_v57  ;;  %v1296_v54 = vmax.f32 %v962_v19, 0.0  ;;  %v5859_v24 = vld [vmem:[#allocation2 + $0x1ff] sm:$0xff]  ;;  %v5860_v51 = vld [vmem:[#allocation2 + $0x207] sm:$0xff] }
 0x16e   :  { %2286 = vst.msk [vmem:[#allocation2 + $0x220] sm:$0xff] %vm2217_vm2, %v2161_v14  ;;  %v1295_v35 = vmax.f32 %v957_v4, 0.0  ;;  %v1491_v33 = vpop.permute.xlu0 %1490  ;;  %v18109_v22 = vpop.f32.mrb[72].mxu0  ;;  %18829 = vmatprep.mubr.msk.f32.mxu1 %vm2217_vm2, %v5859_v24  ;;  %14828 = vperm.xlu1 %21023, %v13477_v2   ;;  %v13483_v2 = vld [vmem:[%s26382_s2 + $0x208] sm:$0xff]  ;;  %v2465_v4 = vld [vmem:[#allocation2 + $0x20] sm:$0xff] }
 0x16f   :  { %v2164_v23 = vmul.f32 %v21658_v49, %v1296_v54  ;;  %v2096_v60 = vmul.f32 %v1491_v33, %v1228_v31  ;;  %v972_v52 = vadd.f32 %v22627_v63, %v18109_v22  ;;  %14823 = vperm.xlu0 %21022, %v13476_v43   ;;  %v966_v46 = vpop.f32.mrb[73].mxu0  ;;  %18830 = vmatmul.mubr.msk.f32.gmra.mrb[6].mxu1 %vm2217_vm2, %v5860_v51 }
 0x170   :  { %v2163_v0 = vmul.f32 %v21635_v41, %v1295_v35  ;;  %v967_v40 = vadd.f32 %v22627_v63, %v966_v46  ;;  %v2466_v35 = vld [vmem:[#allocation2 + $0x28] sm:$0xff] }
 0x171   :  { %2289 = vst.msk [vmem:[#allocation2 + $0x238] sm:$0xff] %vm2217_vm2, %v2164_v23  ;;  %2221 = vst.msk [vmem:[#allocation2 + $0x18] sm:$0xff] %vm2217_vm2, %v2096_v60  ;;  %v1298_v49 = vmax.f32 %v972_v52, 0.0  ;;  %v5861_v50 = vld [vmem:[#allocation2 + $0x20f] sm:$0xff]  ;;  %v5862_v13 = vld [vmem:[#allocation2 + $0x217] sm:$0xff] }
 0x172   :  { %2288 = vst.msk [vmem:[#allocation2 + $0x230] sm:$0xff] %vm2217_vm2, %v2163_v0  ;;  %v1297_v6 = vmax.f32 %v967_v40, 0.0  ;;  %v1476_v62 = vpop.permute.xlu0 %1475  ;;  %v18112_v25 = vpop.f32.mrb[74].mxu0  ;;  %18832 = vmatprep.mubr.msk.f32.mxu1 %vm2217_vm2, %v5861_v50  ;;  %14838 = vperm.xlu1 %21023, %v13479_v5   ;;  %v13485_v23 = vld [vmem:[%s26382_s2 + $0x218] sm:$0xff]  ;;  %v2467_v52 = vld [vmem:[#allocation2 + $0x30] sm:$0xff] }
 0x173   :  { %v2166_v41 = vmul.f32 %v21676_v55, %v1298_v49  ;;  %v2093_v45 = vmul.f32 %v1476_v62, %v1225_v15  ;;  %v982_v10 = vadd.f32 %v22627_v63, %v18112_v25  ;;  %14833 = vperm.xlu0 %21022, %v13478_v38   ;;  %v976_v56 = vpop.f32.mrb[75].mxu0  ;;  %18833 = vmatmul.mubr.msk.f32.gmra.mrb[8].mxu1 %vm2217_vm2, %v5862_v13  ;;  %v2463_v37 = vld [vmem:[#allocation2 + $0x10] sm:$0xff]  ;;  %v2468_v15 = vld [vmem:[#allocation2 + $0x38] sm:$0xff]  ;;  %v2469_v25 = vld [vmem:[#allocation2 + $0x40] sm:$0xff] }
 0x174   :  { %v2165_v17 = vmul.f32 %v21653_v47, %v1297_v6  ;;  %v977_v29 = vadd.f32 %v22627_v63, %v976_v56  ;;  %v2462_v16 = vld [vmem:[#allocation2 + $0x8] sm:$0xff]  ;;  %v13480_v55 = vld [vmem:[%s26382_s2 + $0x1f0] sm:$0xff] }
 0x175   :  { %2291 = vst.msk [vmem:[#allocation2 + $0x248] sm:$0xff] %vm2217_vm2, %v2166_v41  ;;  %2218 = vst.msk [vmem:[#allocation2] sm:$0xff] %vm2217_vm2, %v2093_v45  ;;  %v1300_v32 = vmax.f32 %v982_v10, 0.0  ;;  %18193 = vmatprep.mubr.msk.f32.mxu0 %vm2217_vm2, %v2462_v16  ;;  %v5863_v44 = vld [vmem:[#allocation2 + $0x21f] sm:$0xff]  ;;  %v5864_v47 = vld [vmem:[#allocation2 + $0x227] sm:$0xff] }
 0x176   :  { %2290 = vst.msk [vmem:[#allocation2 + $0x240] sm:$0xff] %vm2217_vm2, %v2165_v17  ;;  %v1299_v26 = vmax.f32 %v977_v29, 0.0  ;;  %v18115_v8 = vpop.f32.mrb[76].mxu0  ;;  %18194 = vmatmul.mubr.msk.f32.vlgmr.msra.gmra.mrb[124].mxu0 %vm2217_vm2, %v2463_v37  ;;  %18835 = vmatprep.mubr.msk.f32.mxu1 %vm2217_vm2, %v5863_v44  ;;  %v13487_v6 = vld [vmem:[%s26382_s2 + $0x228] sm:$0xff]  ;;  %v2471_v44 = vld [vmem:[#allocation2 + $0x50] sm:$0xff] }
 0x177   :  { %v2168_v28 = vmul.f32 %v21694_v61, %v1300_v32  ;;  %v992_v34 = vadd.f32 %v22627_v63, %v18115_v8  ;;  %14848 = vperm.xlu1 %21023, %v13481_v7   ;;  %14843 = vperm.xlu0 %21022, %v13480_v55   ;;  %v986_v20 = vpop.f32.mrb[77].mxu0  ;;  %v13482_v61 = vld [vmem:[%s26382_s2 + $0x200] sm:$0xff]  ;;  %v2470_v29 = vld [vmem:[#allocation2 + $0x48] sm:$0xff]  ;;  %v13489_v55 = vld [vmem:[%s26382_s2 + $0x238] sm:$0xff] }
 0x178   :  { %v2167_v57 = vmul.f32 %v21671_v53, %v1299_v26  ;;  %v987_v19 = vadd.f32 %v22627_v63, %v986_v20  ;;  %18836 = vmatmul.mubr.msk.f32.gmra.mrb[10].mxu1 %vm2217_vm2, %v5864_v47  ;;  %v2464_v42 = vld [vmem:[#allocation2 + $0x18] sm:$0xff] }
 0x179   :  { %2293 = vst.msk [vmem:[#allocation2 + $0x258] sm:$0xff] %vm2217_vm2, %v2168_v28  ;;  %v1302_v14 = vmax.f32 %v992_v34, 0.0  ;;  %18196 = vmatprep.mubr.msk.f32.mxu0 %vm2217_vm2, %v2464_v42  ;;  %v5865_v53 = vld [vmem:[#allocation2 + $0x22f] sm:$0xff]  ;;  %v5866_v43 = vld [vmem:[#allocation2 + $0x237] sm:$0xff] }
 0x17a   :  { %2292 = vst.msk [vmem:[#allocation2 + $0x250] sm:$0xff] %vm2217_vm2, %v2167_v57  ;;  %v1301_v11 = vmax.f32 %v987_v19, 0.0  ;;  %v18118_v54 = vpop.f32.mrb[78].mxu0  ;;  %18197 = vmatmul.mubr.msk.f32.gmra.mrb[126].mxu0 %vm2217_vm2, %v2465_v4  ;;  %18838 = vmatprep.mubr.msk.f32.mxu1 %vm2217_vm2, %v5865_v53  ;;  %v2472_v57 = vld [vmem:[#allocation2 + $0x58] sm:$0xff] }
 0x17b   :  { %v2170_v31 = vmul.f32 %v21712_v3, %v1302_v14  ;;  %v1002_v24 = vadd.f32 %v22627_v63, %v18118_v54  ;;  %14858 = vperm.xlu1 %21023, %v13483_v2   ;;  %14853 = vperm.xlu0 %21022, %v13482_v61   ;;  %v996_v51 = vpop.f32.mrb[79].mxu0  ;;  %v13484_v3 = vld [vmem:[%s26382_s2 + $0x210] sm:$0xff]  ;;  %v13491_v2 = vld [vmem:[%s26382_s2 + $0x248] sm:$0xff]  ;;  %v2473_v14 = vld [vmem:[#allocation2 + $0x60] sm:$0xff] }
 0x17c   :  { %v2169_v33 = vmul.f32 %v21689_v59, %v1301_v11  ;;  %v997_v22 = vadd.f32 %v22627_v63, %v996_v51  ;;  %18199 = vmatprep.mubr.msk.f32.mxu0 %vm2217_vm2, %v2466_v35  ;;  %18839 = vmatmul.mubr.msk.f32.gmra.mrb[12].mxu1 %vm2217_vm2, %v5866_v43 }
 0x17d   :  { %2295 = vst.msk [vmem:[#allocation2 + $0x268] sm:$0xff] %vm2217_vm2, %v2170_v31  ;;  %v1304_v60 = vmax.f32 %v1002_v24, 0.0  ;;  %v5867_v46 = vld [vmem:[#allocation2 + $0x23f] sm:$0xff]  ;;  %v5868_v59 = vld [vmem:[#allocation2 + $0x247] sm:$0xff] }
 0x17e   :  { %2294 = vst.msk [vmem:[#allocation2 + $0x260] sm:$0xff] %vm2217_vm2, %v2169_v33  ;;  %v1303_v5 = vmax.f32 %v997_v22, 0.0  ;;  %v18121_v0 = vpop.f32.mrb[80].mxu0  ;;  %18200 = vmatmul.mubr.msk.f32.gmra.mrb[128].mxu0 %vm2217_vm2, %v2467_v52  ;;  %18841 = vmatprep.mubr.msk.f32.mxu1 %vm2217_vm2, %v5867_v46  ;;  %v2474_v24 = vld [vmem:[#allocation2 + $0x68] sm:$0xff]  ;;  %v13493_v33 = vld [vmem:[%s26382_s2 + $0x258] sm:$0xff] }
 0x17f   :  { %v2172_v40 = vmul.f32 %v21730_v12, %v1304_v60  ;;  %v1012_v38 = vadd.f32 %v22627_v63, %v18121_v0  ;;  %14868 = vperm.xlu1 %21023, %v13485_v23   ;;  %14863 = vperm.xlu0 %21022, %v13484_v3   ;;  %v1006_v49 = vpop.f32.mrb[81].mxu0  ;;  %v13486_v12 = vld [vmem:[%s26382_s2 + $0x220] sm:$0xff]  ;;  %v2475_v23 = vld [vmem:[#allocation2 + $0x70] sm:$0xff]  ;;  %v22784_v0 = vld [vmem:[#allocation2 + $0x78] sm:$0xff] }
 0x180   :  { %v2171_v50 = vmul.f32 %v21707_v1, %v1303_v5  ;;  %v1007_v13 = vadd.f32 %v22627_v63, %v1006_v49  ;;  %18202 = vmatprep.mubr.msk.f32.mxu0 %vm2217_vm2, %v2468_v15  ;;  %18842 = vmatmul.mubr.msk.f32.gmra.mrb[14].mxu1 %vm2217_vm2, %v5868_v59  ;;  %v13494_v49 = vld [vmem:[%s26382_s2 + $0x260] sm:$0xff] }
 0x181   :  { %2297 = vst.msk [vmem:[#allocation2 + $0x278] sm:$0xff] %vm2217_vm2, %v2172_v40  ;;  %v1306_v62 = vmax.f32 %v1012_v38, 0.0  ;;  %v5869_v41 = vld [vmem:[#allocation2 + $0x24f] sm:$0xff]  ;;  %v5870_v1 = vld [vmem:[#allocation2 + $0x257] sm:$0xff] }
 0x182   :  { %2296 = vst.msk [vmem:[#allocation2 + $0x270] sm:$0xff] %vm2217_vm2, %v2171_v50  ;;  %v1305_v45 = vmax.f32 %v1007_v13, 0.0  ;;  %v18124_v10 = vpop.f32.mrb[82].mxu0  ;;  %18203 = vmatmul.mubr.msk.f32.gmra.mrb[130].mxu0 %vm2217_vm2, %v2469_v25  ;;  %18844 = vmatprep.mubr.msk.f32.mxu1 %vm2217_vm2, %v5869_v41  ;;  %v22798_v50 = vld [vmem:[#allocation2 + $0x80] sm:$0xff] }
 0x183   :  { %v2174_v56 = vmul.f32 %v21748_v21, %v1306_v62  ;;  %v1022_v37 = vadd.f32 %v22627_v63, %v18124_v10  ;;  %14878 = vperm.xlu1 %21023, %v13487_v6   ;;  %14873 = vperm.xlu0 %21022, %v13486_v12   ;;  %v1016_v17 = vpop.f32.mrb[83].mxu0  ;;  %v13488_v21 = vld [vmem:[%s26382_s2 + $0x230] sm:$0xff]  ;;  %v26437_v10 = vld [vmem:[#allocation3_spill] sm:$0xff] }
 0x184   :  { %v2173_v16 = vmul.f32 %v21725_v9, %v1305_v45  ;;  %v1017_v7 = vadd.f32 %v22627_v63, %v1016_v17  ;;  %18205 = vmatprep.mubr.msk.f32.mxu0 %vm2217_vm2, %v2470_v29  ;;  %18845 = vmatmul.mubr.msk.f32.gmra.mrb[16].mxu1 %vm2217_vm2, %v5870_v1  ;;  %v26436_v62 = vld [vmem:[#allocation5_spill] sm:$0xff]  ;;  %v22806_v45 = vld [vmem:[#allocation2 + $0x88] sm:$0xff]  ;;  %v13497_v17 = vld [vmem:[%s26382_s2 + $0x278] sm:$0xff] }
 0x185   :  { %2299 = vst.msk [vmem:[#allocation2 + $0x288] sm:$0xff] %vm2217_vm2, %v2174_v56  ;;  %v1308_v32 = vmax.f32 %v1022_v37, 0.0  ;;  %v5871_v47 = vld [vmem:[#allocation2 + $0x25f] sm:$0xff]  ;;  %v5872_v9 = vld [vmem:[#allocation2 + $0x267] sm:$0xff]  ;;  %v13496_v29 = vld [vmem:[%s26382_s2 + $0x270] sm:$0xff] }
 0x186   :  { %2298 = vst.msk [vmem:[#allocation2 + $0x280] sm:$0xff] %vm2217_vm2, %v2173_v16  ;;  %v1307_v26 = vmax.f32 %v1017_v7, 0.0  ;;  %v18127_v8 = vpop.f32.mrb[84].mxu0  ;;  %18206 = vmatmul.mubr.msk.f32.gmra.mrb[132].mxu0 %vm2217_vm2, %v2471_v44  ;;  %18847 = vmatprep.mubr.msk.f32.mxu1 %vm2217_vm2, %v5871_v47  ;;  %v22820_v7 = vld [vmem:[#allocation2 + $0x90] sm:$0xff]  ;;  %v26438_v47 = vld [vmem:[#allocation7_spill] sm:$0xff] }
 0x187   :  { %v2176_v28 = vmul.f32 %v21766_v30, %v1308_v32  ;;  %v1032_v34 = vadd.f32 %v22627_v63, %v18127_v8  ;;  %14888 = vperm.xlu1 %21023, %v13489_v55   ;;  %14883 = vperm.xlu0 %21022, %v13488_v21   ;;  %v1026_v20 = vpop.f32.mrb[85].mxu0  ;;  %v13490_v30 = vld [vmem:[%s26382_s2 + $0x240] sm:$0xff] }
 0x188   :  { %v2175_v19 = vmul.f32 %v21743_v18, %v1307_v26  ;;  %v1027_v42 = vadd.f32 %v22627_v63, %v1026_v20  ;;  %18208 = vmatprep.mubr.msk.f32.mxu0 %vm2217_vm2, %v2472_v57  ;;  %18848 = vmatmul.mubr.msk.f32.gmra.mrb[18].mxu1 %vm2217_vm2, %v5872_v9 }
 0x189   :  { %2301 = vst.msk [vmem:[#allocation2 + $0x298] sm:$0xff] %vm2217_vm2, %v2176_v28  ;;  %v1310_v61 = vmax.f32 %v1032_v34, 0.0  ;;  %v5873_v4 = vld [vmem:[#allocation2 + $0x26f] sm:$0xff]  ;;  %v5874_v18 = vld [vmem:[#allocation2 + $0x277] sm:$0xff] }
 0x18a   :  { %2300 = vst.msk [vmem:[#allocation2 + $0x290] sm:$0xff] %vm2217_vm2, %v2175_v19  ;;  %v1309_v53 = vmax.f32 %v1027_v42, 0.0  ;;  %v18130_v43 = vpop.f32.mrb[86].mxu0  ;;  %18209 = vmatmul.mubr.msk.f32.gmra.mrb[134].mxu0 %vm2217_vm2, %v2473_v14  ;;  %18850 = vmatprep.mubr.msk.f32.mxu1 %vm2217_vm2, %v5873_v4  ;;  %v22828_v28 = vld [vmem:[#allocation2 + $0x98] sm:$0xff]  ;;  %v26439_v34 = vld [vmem:[#allocation4_spill] sm:$0xff]  ;;  %v13498_v42 = vld [vmem:[%s26382_s2 + $0x280] sm:$0xff] }
 0x18b   :  { %v2178_v11 = vmul.f32 %v21784_v39, %v1310_v61  ;;  %v1042_v54 = vadd.f32 %v22627_v63, %v18130_v43  ;;  %14898 = vperm.xlu1 %21023, %v13491_v2   ;;  %14893 = vperm.xlu0 %21022, %v13490_v30   ;;  %v1036_v31 = vpop.f32.mrb[87].mxu0  ;;  %v13492_v39 = vld [vmem:[%s26382_s2 + $0x250] sm:$0xff]  ;;  %v13499_v19 = vld [vmem:[%s26382_s2 + $0x288] sm:$0xff]  ;;  %v22842_v30 = vld [vmem:[#allocation2 + $0xa0] sm:$0xff] }
 0x18c   :  { %v2177_v51 = vmul.f32 %v21761_v27, %v1309_v53  ;;  %v1037_v35 = vadd.f32 %v22627_v63, %v1036_v31  ;;  %18211 = vmatprep.mubr.msk.f32.mxu0 %vm2217_vm2, %v2474_v24  ;;  %18851 = vmatmul.mubr.msk.f32.gmra.mrb[20].mxu1 %vm2217_vm2, %v5874_v18  ;;  %v26440_v53 = vld [vmem:[#allocation9_spill] sm:$0xff]  ;;  %v22850_v31 = vld [vmem:[#allocation2 + $0xa8] sm:$0xff]  ;;  %v22852_v24 = vpop.permute.xlu1 %2075 }
 0x18d   :  { %2303 = vst.msk [vmem:[#allocation2 + $0x2a8] sm:$0xff] %vm2217_vm2, %v2178_v11  ;;  %v1312_v22 = vmax.f32 %v1042_v54, 0.0  ;;  %v5875_v3 = vld [vmem:[#allocation2 + $0x27f] sm:$0xff]  ;;  %v5876_v27 = vld [vmem:[#allocation2 + $0x287] sm:$0xff] }
 0x18e   :  { %2302 = vst.msk [vmem:[#allocation2 + $0x2a0] sm:$0xff] %vm2217_vm2, %v2177_v51  ;;  %v1311_v60 = vmax.f32 %v1037_v35, 0.0  ;;  %v18133_v52 = vpop.f32.mrb[88].mxu0  ;;  %18212 = vmatmul.mubr.msk.f32.gmra.mrb[136].mxu0 %vm2217_vm2, %v2475_v23  ;;  %18853 = vmatprep.mubr.msk.f32.mxu1 %vm2217_vm2, %v5875_v3  ;;  %v26441_v51 = vld [vmem:[#allocation6_spill] sm:$0xff]  ;;  %v22866_v3 = vld [vmem:[#allocation2 + $0xb0] sm:$0xff] }
 0x18f   :  { %v2180_v46 = vmul.f32 %v21802_v48, %v1312_v22  ;;  %v1052_v59 = vadd.f32 %v22627_v63, %v18133_v52  ;;  %14908 = vperm.xlu1 %21023, %v13493_v33   ;;  %14903 = vperm.xlu0 %21022, %v13492_v39   ;;  %v1046_v5 = vpop.f32.mrb[89].mxu0  ;;  %v13495_v48 = vld [vmem:[%s26382_s2 + $0x268] sm:$0xff]  ;;  %v13501_v39 = vld [vmem:[%s26382_s2 + $0x298] sm:$0xff]  ;;  %v13500_v22 = vld [vmem:[%s26382_s2 + $0x290] sm:$0xff] }
 0x190   :  { %v2179_v40 = vmul.f32 %v21779_v36, %v1311_v60  ;;  %v1047_v38 = vadd.f32 %v22627_v63, %v1046_v5  ;;  %18214 = vmatprep.mubr.msk.f32.mxu0 %vm2217_vm2, %v22784_v0  ;;  %18854 = vmatmul.mubr.msk.f32.gmra.mrb[22].mxu1 %vm2217_vm2, %v5876_v27 }
 0x191   :  { %2305 = vst.msk [vmem:[#allocation2 + $0x2b8] sm:$0xff] %vm2217_vm2, %v2180_v46  ;;  %v1314_v15 = vmax.f32 %v1052_v59, 0.0  ;;  %v5877_v36 = vld [vmem:[#allocation2 + $0x28f] sm:$0xff]  ;;  %v5878_v13 = vld [vmem:[#allocation2 + $0x297] sm:$0xff]  ;;  %v26442_v59 = vld [vmem:[#allocation11_spill] sm:$0xff] }
 0x192   :  { %2304 = vst.msk [vmem:[#allocation2 + $0x2b0] sm:$0xff] %vm2217_vm2, %v2179_v40  ;;  %v1313_v6 = vmax.f32 %v1047_v38, 0.0  ;;  %v18136_v12 = vpop.f32.mrb[90].mxu0  ;;  %18215 = vmatmul.mubr.msk.f32.gmra.mrb[138].mxu0 %vm2217_vm2, %v22798_v50  ;;  %18856 = vmatprep.mubr.msk.f32.mxu1 %vm2217_vm2, %v5877_v36 }
 0x193   :  { %v2182_v25 = vmul.f32 %v26436_v62, %v1314_v15  ;;  %v1062_v41 = vadd.f32 %v22627_v63, %v18136_v12  ;;  %14918 = vperm.xlu1 %21023, %v13495_v48   ;;  %14913 = vperm.xlu0 %21022, %v13494_v49   ;;  %v1056_v1 = vpop.f32.mrb[91].mxu0  ;;  %v22874_v48 = vld [vmem:[#allocation2 + $0xb8] sm:$0xff]  ;;  %v26443_v49 = vld [vmem:[#allocation8_spill] sm:$0xff]  ;;  %v22888_v62 = vld [vmem:[#allocation2 + $0xc0] sm:$0xff] }
 0x194   :  { %v2181_v56 = vmul.f32 %v26437_v10, %v1313_v6  ;;  %v1057_v37 = vadd.f32 %v22627_v63, %v1056_v1  ;;  %18217 = vmatprep.mubr.msk.f32.mxu0 %vm2217_vm2, %v22806_v45  ;;  %18857 = vmatmul.mubr.msk.f32.gmra.mrb[24].mxu1 %vm2217_vm2, %v5878_v13  ;;  %v13503_v13 = vld [vmem:[%s26382_s2 + $0x2a8] sm:$0xff]  ;;  %v13502_v6 = vld [vmem:[%s26382_s2 + $0x2a0] sm:$0xff]  ;;  %v22890_v1 = vpop.permute.xlu1 %2080 }
 0x195   :  { %2307 = vst.msk [vmem:[#allocation2 + $0x2c8] sm:$0xff] %vm2217_vm2, %v2182_v25  ;;  %v1316_v16 = vmax.f32 %v1062_v41, 0.0  ;;  %v5879_v55 = vld [vmem:[#allocation2 + $0x29f] sm:$0xff]  ;;  %v5880_v21 = vld [vmem:[#allocation2 + $0x2a7] sm:$0xff] }
 0x196   :  { %2306 = vst.msk [vmem:[#allocation2 + $0x2c0] sm:$0xff] %vm2217_vm2, %v2181_v56  ;;  %v1315_v32 = vmax.f32 %v1057_v37, 0.0  ;;  %v18139_v44 = vpop.f32.mrb[92].mxu0  ;;  %18218 = vmatmul.mubr.msk.f32.gmra.mrb[140].mxu0 %vm2217_vm2, %v22820_v7  ;;  %18859 = vmatprep.mubr.msk.f32.mxu1 %vm2217_vm2, %v5879_v55  ;;  %v26444_v37 = vld [vmem:[#allocation13_spill] sm:$0xff]  ;;  %v22898_v55 = vld [vmem:[#allocation2 + $0xc8] sm:$0xff] }
 0x197   :  { %v2184_v9 = vmul.f32 %v26438_v47, %v1316_v16  ;;  %v1072_v26 = vadd.f32 %v22627_v63, %v18139_v44  ;;  %14928 = vperm.xlu1 %21023, %v13497_v17   ;;  %14923 = vperm.xlu0 %21022, %v13496_v29   ;;  %v1066_v8 = vpop.f32.mrb[93].mxu0  ;;  %v13505_v47 = vld [vmem:[%s26382_s2 + $0x2b8] sm:$0xff] }
 0x198   :  { %v2183_v20 = vmul.f32 %v26439_v34, %v1315_v32  ;;  %v1067_v57 = vadd.f32 %v22627_v63, %v1066_v8  ;;  %18220 = vmatprep.mubr.msk.f32.mxu0 %vm2217_vm2, %v22828_v28  ;;  %18860 = vmatmul.mubr.msk.f32.gmra.mrb[26].mxu1 %vm2217_vm2, %v5880_v21  ;;  %v26445_v21 = vld [vmem:[#allocation10_spill] sm:$0xff]  ;;  %v22912_v8 = vld [vmem:[#allocation2 + $0xd0] sm:$0xff] }
 0x199   :  { %2309 = vst.msk [vmem:[#allocation2 + $0x2d8] sm:$0xff] %vm2217_vm2, %v2184_v9  ;;  %v1318_v2 = vmax.f32 %v1072_v26, 0.0  ;;  %v5881_v61 = vld [vmem:[#allocation2 + $0x2af] sm:$0xff]  ;;  %v5882_v14 = vld [vmem:[#allocation2 + $0x2b7] sm:$0xff] }
 0x19a   :  { %2308 = vst.msk [vmem:[#allocation2 + $0x2d0] sm:$0xff] %vm2217_vm2, %v2183_v20  ;;  %v1317_v4 = vmax.f32 %v1067_v57, 0.0  ;;  %v18142_v18 = vpop.f32.mrb[94].mxu0  ;;  %18221 = vmatmul.mubr.msk.f32.gmra.mrb[142].mxu0 %vm2217_vm2, %v22842_v30  ;;  %18862 = vmatprep.mubr.msk.f32.mxu1 %vm2217_vm2, %v5881_v61  ;;  %v13504_v9 = vld [vmem:[%s26382_s2 + $0x2b0] sm:$0xff] }
 0x19b   :  { %v2186_v43 = vmul.f32 %v26440_v53, %v1318_v2  ;;  %v1082_v11 = vadd.f32 %v22627_v63, %v18142_v18  ;;  %14938 = vperm.xlu1 %21023, %v13499_v19   ;;  %14933 = vperm.xlu0 %21022, %v13498_v42   ;;  %v1076_v54 = vpop.f32.mrb[95].mxu0  ;;  %v26446_v42 = vld [vmem:[#allocation15_spill] sm:$0xff]  ;;  %v22922_v18 = vpop.permute.xlu1 %2090  ;;  %v26447_v53 = vld [vmem:[#allocation12_spill] sm:$0xff] }
 0x19c   :  { %v2185_v35 = vmul.f32 %v26441_v51, %v1317_v4  ;;  %v1077_v33 = vadd.f32 %v22627_v63, %v1076_v54  ;;  %18223 = vmatprep.mubr.msk.f32.mxu0 %vm2217_vm2, %v22850_v31  ;;  %18863 = vmatmul.mubr.msk.f32.gmra.mrb[28].mxu1 %vm2217_vm2, %v5882_v14  ;;  %v22920_v4 = vld [vmem:[#allocation2 + $0xd8] sm:$0xff]  ;;  %v13507_v54 = vld [vmem:[%s26382_s2 + $0x2c8] sm:$0xff]  ;;  %v13506_v51 = vld [vmem:[%s26382_s2 + $0x2c0] sm:$0xff] }
 0x19d   :  { %2311 = vst.msk [vmem:[#allocation2 + $0x2e8] sm:$0xff] %vm2217_vm2, %v2186_v43  ;;  %v1320_v23 = vmax.f32 %v1082_v11, 0.0  ;;  %v5883_v27 = vld [vmem:[#allocation2 + $0x2bf] sm:$0xff]  ;;  %v5884_v60 = vld [vmem:[#allocation2 + $0x2c7] sm:$0xff] }
 0x19e   :  { %2310 = vst.msk [vmem:[#allocation2 + $0x2e0] sm:$0xff] %vm2217_vm2, %v2185_v35  ;;  %v1319_v52 = vmax.f32 %v1077_v33, 0.0  ;;  %v18145_v46 = vpop.f32.mrb[96].mxu0  ;;  %18224 = vmatmul.mubr.msk.f32.gmra.mrb[144].mxu0 %vm2217_vm2, %v22866_v3  ;;  %18865 = vmatprep.mubr.msk.f32.mxu1 %vm2217_vm2, %v5883_v27  ;;  %v22935_v35 = vpop.permute.xlu0 %2085 }
 0x19f   :  { %v2188_v5 = vmul.f32 %v26442_v59, %v1320_v23  ;;  %v1092_v40 = vadd.f32 %v22627_v63, %v18145_v46  ;;  %14948 = vperm.xlu1 %21023, %v13501_v39   ;;  %14943 = vperm.xlu0 %21022, %v13500_v22   ;;  %v1086_v38 = vpop.f32.mrb[97].mxu0  ;;  %v22938_v39 = vld [vmem:[#allocation2 + $0xe0] sm:$0xff] }
 0x1a0   :  { %v2187_v15 = vmul.f32 %v26443_v49, %v1319_v52  ;;  %v1087_v36 = vadd.f32 %v22627_v63, %v1086_v38  ;;  %18226 = vmatprep.mubr.msk.f32.mxu0 %vm2217_vm2, %v22874_v48  ;;  %18866 = vmatmul.mubr.msk.f32.gmra.mrb[30].mxu1 %vm2217_vm2, %v5884_v60  ;;  %v26448_v52 = vld [vmem:[#allocation18_spill] sm:$0xff] }
 0x1a1   :  { %2313 = vst.msk [vmem:[#allocation2 + $0x2f8] sm:$0xff] %vm2217_vm2, %v2188_v5  ;;  %v1322_v12 = vmax.f32 %v1092_v40, 0.0  ;;  %v5885_v25 = vld [vmem:[#allocation2 + $0x2cf] sm:$0xff]  ;;  %v5886_v41 = vld [vmem:[#allocation2 + $0x2d7] sm:$0xff] }
 0x1a2   :  { %2312 = vst.msk [vmem:[#allocation2 + $0x2f0] sm:$0xff] %vm2217_vm2, %v2187_v15  ;;  %v1321_v10 = vmax.f32 %v1087_v36, 0.0  ;;  %v18148_v56 = vpop.f32.mrb[98].mxu0  ;;  %18227 = vmatmul.mubr.msk.f32.gmra.mrb[146].mxu0 %vm2217_vm2, %v22888_v62  ;;  %18868 = vmatprep.mubr.msk.f32.mxu1 %vm2217_vm2, %v5885_v25  ;;  %v22946_v40 = vld [vmem:[#allocation2 + $0xe8] sm:$0xff]  ;;  %v26449_v38 = vld [vmem:[#allocation14_spill] sm:$0xff] }
 0x1a3   :  { %v2190_v17 = vmul.f32 %v26444_v37, %v1322_v12  ;;  %v1102_v29 = vadd.f32 %v22627_v63, %v18148_v56  ;;  %14958 = vperm.xlu1 %21023, %v13503_v13   ;;  %14953 = vperm.xlu0 %21022, %v13502_v6   ;;  %v1096_v16 = vpop.f32.mrb[99].mxu0  ;;  %v13509_v36 = vld [vmem:[%s26382_s2 + $0x2d8] sm:$0xff]  ;;  %v13508_v13 = vld [vmem:[%s26382_s2 + $0x2d0] sm:$0xff] }
 0x1a4   :  { %v2189_v32 = vmul.f32 %v26445_v21, %v1321_v10  ;;  %v1097_v44 = vadd.f32 %v22627_v63, %v1096_v16  ;;  %18229 = vmatprep.mubr.msk.f32.mxu0 %vm2217_vm2, %v22898_v55  ;;  %18869 = vmatmul.mubr.msk.f32.gmra.mrb[32].mxu1 %vm2217_vm2, %v5886_v41  ;;  %v22960_v12 = vld [vmem:[#allocation2 + $0xf0] sm:$0xff]  ;;  %v22962_v10 = vpop.permute.xlu1 %14538 }
 0x1a5   :  { %2315 = vst.msk [vmem:[#allocation2 + $0x308] sm:$0xff] %vm2217_vm2, %v2190_v17  ;;  %v1324_v26 = vmax.f32 %v1102_v29, 0.0  ;;  %v5887_v34 = vld [vmem:[#allocation2 + $0x2df] sm:$0xff]  ;;  %v5888_v20 = vld [vmem:[#allocation2 + $0x2e7] sm:$0xff]  ;;  %26450 = vst [vmem:[#allocation5_spill] sm:$0xff] %v22962_v10  ;;  %v22968_v17 = vpop.permute.xlu0 %14533 }
 0x1a6   :  { %2314 = vst.msk [vmem:[#allocation2 + $0x300] sm:$0xff] %vm2217_vm2, %v2189_v32  ;;  %v1323_v57 = vmax.f32 %v1097_v44, 0.0  ;;  %v18151_v19 = vpop.f32.mrb[100].mxu0  ;;  %18230 = vmatmul.mubr.msk.f32.gmra.mrb[148].mxu0 %vm2217_vm2, %v22912_v8  ;;  %18871 = vmatprep.mubr.msk.f32.mxu1 %vm2217_vm2, %v5887_v34  ;;  %26451 = vst [vmem:[#allocation3_spill] sm:$0xff] %v22968_v17  ;;  %v26452_v29 = vld [vmem:[#allocation21_spill] sm:$0xff]  ;;  %v22972_v44 = vld [vmem:[#allocation2 + $0xf8] sm:$0xff] }
 0x1a7   :  { %v2192_v2 = vmul.f32 %v26446_v42, %v1324_v26  ;;  %v1112_v61 = vadd.f32 %v22627_v63, %v18151_v19  ;;  %14968 = vperm.xlu1 %21023, %v13505_v47   ;;  %14963 = vperm.xlu0 %21022, %v13504_v9   ;;  %v1106_v14 = vpop.f32.mrb[101].mxu0  ;;  %v26453_v47 = vld [vmem:[#allocation16_spill] sm:$0xff]  ;;  %v22986_v19 = vld [vmem:[#allocation2 + $0x100] sm:$0xff] }
 0x1a8   :  { %v2191_v43 = vmul.f32 %v26447_v53, %v1323_v57  ;;  %v1107_v11 = vadd.f32 %v22627_v63, %v1106_v14  ;;  %18232 = vmatprep.mubr.msk.f32.mxu0 %vm2217_vm2, %v22920_v4  ;;  %18872 = vmatmul.mubr.msk.f32.gmra.mrb[34].mxu1 %vm2217_vm2, %v5888_v20  ;;  %v13511_v34 = vld [vmem:[%s26382_s2 + $0x2e8] sm:$0xff]  ;;  %v13510_v20 = vld [vmem:[%s26382_s2 + $0x2e0] sm:$0xff] }
 0x1a9   :  { %2317 = vst.msk [vmem:[#allocation2 + $0x318] sm:$0xff] %vm2217_vm2, %v2192_v2  ;;  %v1326_v33 = vmax.f32 %v1112_v61, 0.0  ;;  %v5889_v22 = vld [vmem:[#allocation2 + $0x2ef] sm:$0xff]  ;;  %v5890_v23 = vld [vmem:[#allocation2 + $0x2f7] sm:$0xff]  ;;  %v26454_v53 = vld [vmem:[#allocation23_spill] sm:$0xff] }
 0x1aa   :  { %2316 = vst.msk [vmem:[#allocation2 + $0x310] sm:$0xff] %vm2217_vm2, %v2191_v43  ;;  %v1325_v27 = vmax.f32 %v1107_v11, 0.0  ;;  %v18154_v60 = vpop.f32.mrb[102].mxu0  ;;  %18233 = vmatmul.mubr.msk.f32.gmra.mrb[150].mxu0 %vm2217_vm2, %v22938_v39  ;;  %18874 = vmatprep.mubr.msk.f32.mxu1 %vm2217_vm2, %v5889_v22  ;;  %v26456_v22 = vld [vmem:[#allocation19_spill] sm:$0xff] }
 0x1ab   :  { %v2194_v46 = vmul.f32 %v26448_v52, %v1326_v33  ;;  %v1122_v59 = vadd.f32 %v22627_v63, %v18154_v60  ;;  %14978 = vperm.xlu1 %21023, %v13507_v54   ;;  %14973 = vperm.xlu0 %21022, %v13506_v51   ;;  %v1116_v5 = vpop.f32.mrb[103].mxu0  ;;  %v22994_v51 = vld [vmem:[#allocation2 + $0x108] sm:$0xff]  ;;  %v22996_v33 = vpop.permute.xlu1 %14548  ;;  %v13513_v60 = vld [vmem:[%s26382_s2 + $0x2f8] sm:$0xff]  ;;  %v13512_v52 = vld [vmem:[%s26382_s2 + $0x2f0] sm:$0xff] }
 0x1ac   :  { %v2193_v49 = vmul.f32 %v26449_v38, %v1325_v27  ;;  %v1117_v15 = vadd.f32 %v22627_v63, %v1116_v5  ;;  %18235 = vmatprep.mubr.msk.f32.mxu0 %vm2217_vm2, %v22946_v40  ;;  %18875 = vmatmul.mubr.msk.f32.gmra.mrb[36].mxu1 %vm2217_vm2, %v5890_v23  ;;  %26455 = vst [vmem:[#allocation7_spill] sm:$0xff] %v22996_v33  ;;  %v23012_v5 = vld [vmem:[#allocation2 + $0x110] sm:$0xff] }
 0x1ad   :  { %2319 = vst.msk [vmem:[#allocation2 + $0x328] sm:$0xff] %vm2217_vm2, %v2194_v46  ;;  %v1328_v6 = vmax.f32 %v1122_v59, 0.0  ;;  %v5891_v25 = vld [vmem:[#allocation2 + $0x2ff] sm:$0xff]  ;;  %v5892_v41 = vld [vmem:[#allocation2 + $0x307] sm:$0xff]  ;;  %v23009_v46 = vpop.permute.xlu0 %14543 }
 0x1ae   :  { %2318 = vst.msk [vmem:[#allocation2 + $0x320] sm:$0xff] %vm2217_vm2, %v2193_v49  ;;  %v1327_v56 = vmax.f32 %v1117_v15, 0.0  ;;  %v18157_v37 = vpop.f32.mrb[104].mxu0  ;;  %18236 = vmatmul.mubr.msk.f32.gmra.mrb[152].mxu0 %vm2217_vm2, %v22960_v12  ;;  %18877 = vmatprep.mubr.msk.f32.mxu1 %vm2217_vm2, %v5891_v25  ;;  %26457 = vst [vmem:[#allocation4_spill] sm:$0xff] %v23009_v46  ;;  %v24107_v46 = vld [vmem:[#allocation2 + $0x1d1] sm:$0xff] }
 0x1af   :  { %v2196_v16 = vmul.f32 %v26452_v29, %v1328_v6  ;;  %v1132_v21 = vadd.f32 %v22627_v63, %v18157_v37  ;;  %14988 = vperm.xlu1 %21023, %v13509_v36   ;;  %14983 = vperm.xlu0 %21022, %v13508_v13   ;;  %v1126_v32 = vpop.f32.mrb[105].mxu0  ;;  %v26458_v13 = vld [vmem:[#allocation25_spill] sm:$0xff]  ;;  %v26459_v37 = vld [vmem:[#allocation22_spill] sm:$0xff] }
 0x1b0   :  { %v2195_v9 = vmul.f32 %v26453_v47, %v1327_v56  ;;  %v1127_v26 = vadd.f32 %v22627_v63, %v1126_v32  ;;  %18238 = vmatprep.mubr.msk.f32.mxu0 %vm2217_vm2, %v22972_v44  ;;  %18878 = vmatmul.mubr.msk.f32.gmra.mrb[38].mxu1 %vm2217_vm2, %v5892_v41  ;;  %v23020_v56 = vld [vmem:[#allocation2 + $0x118] sm:$0xff]  ;;  %v13514_v32 = vld [vmem:[%s26382_s2 + $0x300] sm:$0xff] }
 0x1b1   :  { %2321 = vst.msk [vmem:[#allocation2 + $0x338] sm:$0xff] %vm2217_vm2, %v2196_v16  ;;  %v1330_v57 = vmax.f32 %v1132_v21, 0.0  ;;  %v5893_v42 = vld [vmem:[#allocation2 + $0x30f] sm:$0xff]  ;;  %v5894_v2 = vld [vmem:[#allocation2 + $0x317] sm:$0xff] }
 0x1b2   :  { %2320 = vst.msk [vmem:[#allocation2 + $0x330] sm:$0xff] %vm2217_vm2, %v2195_v9  ;;  %v1329_v61 = vmax.f32 %v1127_v26, 0.0  ;;  %v18160_v14 = vpop.f32.mrb[106].mxu0  ;;  %18239 = vmatmul.mubr.msk.f32.gmra.mrb[154].mxu0 %vm2217_vm2, %v22986_v19  ;;  %18880 = vmatprep.mubr.msk.f32.mxu1 %vm2217_vm2, %v5893_v42  ;;  %v13515_v21 = vld [vmem:[%s26382_s2 + $0x308] sm:$0xff]  ;;  %v23034_v9 = vld [vmem:[#allocation2 + $0x120] sm:$0xff] }
 0x1b3   :  { %v2198_v43 = vmul.f32 %v26454_v53, %v1330_v57  ;;  %v1142_v11 = vadd.f32 %v22627_v63, %v18160_v14  ;;  %14998 = vperm.xlu1 %21023, %v13511_v34   ;;  %14993 = vperm.xlu0 %21022, %v13510_v20   ;;  %v1136_v54 = vpop.f32.mrb[107].mxu0  ;;  %v23036_v20 = vpop.permute.xlu1 %14558 }
 0x1b4   :  { %v2197_v23 = vmul.f32 %v26456_v22, %v1329_v61  ;;  %v1137_v27 = vadd.f32 %v22627_v63, %v1136_v54  ;;  %18241 = vmatprep.mubr.msk.f32.mxu0 %vm2217_vm2, %v22994_v51  ;;  %18881 = vmatmul.mubr.msk.f32.gmra.mrb[40].mxu1 %vm2217_vm2, %v5894_v2  ;;  %26460 = vst [vmem:[#allocation9_spill] sm:$0xff] %v23036_v20  ;;  %v23042_v2 = vpop.permute.xlu0 %14553  ;;  %v26462_v61 = vld [vmem:[#allocation27_spill] sm:$0xff]  ;;  %v26463_v54 = vld [vmem:[#allocation24_spill] sm:$0xff] }
 0x1b5   :  { %2323 = vst.msk [vmem:[#allocation2 + $0x348] sm:$0xff] %vm2217_vm2, %v2198_v43  ;;  %v1332_v59 = vmax.f32 %v1142_v11, 0.0  ;;  %v5895_v38 = vld [vmem:[#allocation2 + $0x31f] sm:$0xff]  ;;  %v5896_v49 = vld [vmem:[#allocation2 + $0x327] sm:$0xff]  ;;  %26461 = vst [vmem:[#allocation6_spill] sm:$0xff] %v23042_v2 }
 0x1b6   :  { %2322 = vst.msk [vmem:[#allocation2 + $0x340] sm:$0xff] %vm2217_vm2, %v2197_v23  ;;  %v1331_v15 = vmax.f32 %v1137_v27, 0.0  ;;  %v18163_v36 = vpop.f32.mrb[108].mxu0  ;;  %18242 = vmatmul.mubr.msk.f32.gmra.mrb[156].mxu0 %vm2217_vm2, %v23012_v5  ;;  %18883 = vmatprep.mubr.msk.f32.mxu1 %vm2217_vm2, %v5895_v38  ;;  %v23046_v11 = vld [vmem:[#allocation2 + $0x128] sm:$0xff]  ;;  %v13517_v27 = vld [vmem:[%s26382_s2 + $0x318] sm:$0xff] }
 0x1b7   :  { %v2200_v6 = vmul.f32 %v26458_v13, %v1332_v59  ;;  %v1152_v25 = vadd.f32 %v22627_v63, %v18163_v36  ;;  %15008 = vperm.xlu1 %21023, %v13513_v60   ;;  %15003 = vperm.xlu0 %21022, %v13512_v52   ;;  %v1146_v41 = vpop.f32.mrb[109].mxu0  ;;  %v13516_v60 = vld [vmem:[%s26382_s2 + $0x310] sm:$0xff] }
 0x1b8   :  { %v2199_v29 = vmul.f32 %v26459_v37, %v1331_v15  ;;  %v1147_v16 = vadd.f32 %v22627_v63, %v1146_v41  ;;  %18244 = vmatprep.mubr.msk.f32.mxu0 %vm2217_vm2, %v23020_v56  ;;  %18884 = vmatmul.mubr.msk.f32.gmra.mrb[42].mxu1 %vm2217_vm2, %v5896_v49  ;;  %v23060_v59 = vld [vmem:[#allocation2 + $0x130] sm:$0xff]  ;;  %v23068_v37 = vld [vmem:[#allocation2 + $0x138] sm:$0xff] }
 0x1b9   :  { %2325 = vst.msk [vmem:[#allocation2 + $0x358] sm:$0xff] %vm2217_vm2, %v2200_v6  ;;  %v1334_v47 = vmax.f32 %v1152_v25, 0.0  ;;  %v5897_v26 = vld [vmem:[#allocation2 + $0x32f] sm:$0xff]  ;;  %v5898_v34 = vld [vmem:[#allocation2 + $0x337] sm:$0xff] }
 0x1ba   :  { %2324 = vst.msk [vmem:[#allocation2 + $0x350] sm:$0xff] %vm2217_vm2, %v2199_v29  ;;  %v1333_v57 = vmax.f32 %v1147_v16, 0.0  ;;  %v18166_v42 = vpop.f32.mrb[110].mxu0  ;;  %18245 = vmatmul.mubr.msk.f32.gmra.mrb[158].mxu0 %vm2217_vm2, %v23034_v9  ;;  %18886 = vmatprep.mubr.msk.f32.mxu1 %vm2217_vm2, %v5897_v26  ;;  %v26464_v13 = vld [vmem:[#allocation29_spill] sm:$0xff]  ;;  %v23070_v29 = vpop.permute.xlu1 %14568  ;;  %v26466_v16 = vld [vmem:[#allocation26_spill] sm:$0xff]  ;;  %v13518_v26 = vld [vmem:[%s26382_s2 + $0x320] sm:$0xff] }
 0x1bb   :  { %v2202_v14 = vmul.f32 %v26462_v61, %v1334_v47  ;;  %v1162_v53 = vadd.f32 %v22627_v63, %v18166_v42  ;;  %15018 = vperm.xlu1 %21023, %v13515_v21   ;;  %15013 = vperm.xlu0 %21022, %v13514_v32   ;;  %v1156_v43 = vpop.f32.mrb[111].mxu0  ;;  %26465 = vst [vmem:[#allocation11_spill] sm:$0xff] %v23070_v29  ;;  %v13519_v47 = vld [vmem:[%s26382_s2 + $0x328] sm:$0xff]  ;;  %v23086_v42 = vld [vmem:[#allocation2 + $0x140] sm:$0xff] }
 0x1bc   :  { %v2201_v22 = vmul.f32 %v26463_v54, %v1333_v57  ;;  %v1157_v23 = vadd.f32 %v22627_v63, %v1156_v43  ;;  %18247 = vmatprep.mubr.msk.f32.mxu0 %vm2217_vm2, %v23046_v11  ;;  %18887 = vmatmul.mubr.msk.f32.gmra.mrb[44].mxu1 %vm2217_vm2, %v5898_v34  ;;  %v23083_v34 = vpop.permute.xlu0 %14563  ;;  %v26468_v43 = vld [vmem:[#allocation31_spill] sm:$0xff]  ;;  %v24101_v2 = vld [vmem:[#allocation2 + $0x1c9] sm:$0xff] }
 0x1bd   :  { %2327 = vst.msk [vmem:[#allocation2 + $0x368] sm:$0xff] %vm2217_vm2, %v2202_v14  ;;  %v1336_v52 = vmax.f32 %v1162_v53, 0.0  ;;  %v5899_v38 = vld [vmem:[#allocation2 + $0x33f] sm:$0xff]  ;;  %v5900_v49 = vld [vmem:[#allocation2 + $0x347] sm:$0xff]  ;;  %26467 = vst [vmem:[#allocation8_spill] sm:$0xff] %v23083_v34 }
 0x1be   :  { %2326 = vst.msk [vmem:[#allocation2 + $0x360] sm:$0xff] %vm2217_vm2, %v2201_v22  ;;  %v1335_v15 = vmax.f32 %v1157_v23, 0.0  ;;  %v18169_v36 = vpop.f32.mrb[112].mxu0  ;;  %18248 = vmatmul.mubr.msk.f32.gmra.mrb[160].mxu0 %vm2217_vm2, %v23060_v59  ;;  %18889 = vmatprep.mubr.msk.f32.mxu1 %vm2217_vm2, %v5899_v38  ;;  %v23096_v22 = vld [vmem:[%s26381_s4] ss:$0 sm:$0xff] }
 0x1bf   :  { %v2204_v6 = vmul.f32 %v26464_v13, %v1336_v52  ;;  %v1172_v25 = vadd.f32 %v22627_v63, %v18169_v36  ;;  %15028 = vperm.xlu1 %21023, %v13517_v27   ;;  %15023 = vperm.xlu0 %21022, %v13516_v60   ;;  %v1166_v41 = vpop.f32.mrb[113].mxu0  ;;  %v23099_v60 = vld [vmem:[#allocation2 + $0x148] sm:$0xff]  ;;  %v13520_v36 = vld [vmem:[%s26382_s2 + $0x330] sm:$0xff] }
 0x1c0   :  { %v2203_v21 = vmul.f32 %v26466_v16, %v1335_v15  ;;  %v1167_v32 = vadd.f32 %v22627_v63, %v1166_v41  ;;  %18250 = vmatprep.mubr.msk.f32.mxu0 %vm2217_vm2, %v23068_v37  ;;  %18890 = vmatmul.mubr.msk.f32.gmra.mrb[46].mxu1 %vm2217_vm2, %v5900_v49  ;;  %v26469_v52 = vld [vmem:[#allocation28_spill] sm:$0xff]  ;;  %v13521_v15 = vld [vmem:[%s26382_s2 + $0x338] sm:$0xff]  ;;  %v23115_v16 = vpop.permute.xlu1 %14578 }
 0x1c1   :  { %2329 = vst.msk [vmem:[#allocation2 + $0x378] sm:$0xff] %vm2217_vm2, %v2204_v6  ;;  %v1338_v57 = vmax.f32 %v1172_v25, 0.0  ;;  %v5901_v63 = vld [vmem:[#allocation2 + $0x34f] sm:$0xff]  ;;  %v5902_v61 = vld [vmem:[#allocation2 + $0x357] sm:$0xff]  ;;  %26470 = vst [vmem:[#allocation13_spill] sm:$0xff] %v23115_v16 }
 0x1c2   :  { %2328 = vst.msk [vmem:[#allocation2 + $0x370] sm:$0xff] %vm2217_vm2, %v2203_v21  ;;  %v1337_v14 = vmax.f32 %v1167_v32, 0.0  ;;  %v18172_v53 = vpop.f32.mrb[114].mxu0  ;;  %18251 = vmatmul.mubr.msk.f32.gmra.mrb[162].mxu0 %vm2217_vm2, %v23086_v42  ;;  %18892 = vmatprep.mubr.msk.f32.mxu1 %vm2217_vm2, %v5901_v63  ;;  %v23113_v6 = vld [vmem:[#allocation2 + $0x150] sm:$0xff] }
 0x1c3   :  { %v2206_v54 = vmul.f32 %v26468_v43, %v1338_v57  ;;  %v1182_v23 = vadd.f32 %v23096_v22, %v18172_v53  ;;  %15038 = vperm.xlu1 %21023, %v13519_v47   ;;  %15033 = vperm.xlu0 %21022, %v13518_v26   ;;  %v1176_v27 = vpop.f32.mrb[115].mxu0  ;;  %v23121_v47 = vpop.permute.xlu0 %14573  ;;  %v26472_v26 = vld [vmem:[#allocation33_spill] sm:$0xff]  ;;  %v26473_v53 = vld [vmem:[#allocation30_spill] sm:$0xff] }
 0x1c4   :  { %v2205_v38 = vmul.f32 %v26469_v52, %v1337_v14  ;;  %v1177_v49 = vadd.f32 %v23096_v22, %v1176_v27  ;;  %18253 = vmatprep.mubr.msk.f32.mxu0 %vm2217_vm2, %v23099_v60  ;;  %18893 = vmatmul.mubr.msk.f32.gmra.mrb[48].mxu1 %vm2217_vm2, %v5902_v61  ;;  %26471 = vst [vmem:[#allocation10_spill] sm:$0xff] %v23121_v47  ;;  %v23125_v14 = vld [vmem:[#allocation2 + $0x158] sm:$0xff]  ;;  %v13522_v27 = vld [vmem:[%s26382_s2 + $0x340] sm:$0xff]  ;;  %v23199_v47 = vld [vmem:[#allocation2 + $0x188] sm:$0xff] }
 0x1c5   :  { %2331 = vst.msk [vmem:[#allocation2 + $0x388] sm:$0xff] %vm2217_vm2, %v2206_v54  ;;  %v1340_v13 = vmax.f32 %v1182_v23, 0.0  ;;  %v5903_v25 = vld [vmem:[#allocation2 + $0x35f] sm:$0xff]  ;;  %v5904_v41 = vld [vmem:[#allocation2 + $0x367] sm:$0xff]  ;;  %v2447_v34 = vld [vmem:[#allocation2 + $0x34f] sm:$0xff] }
 0x1c6   :  { %2330 = vst.msk [vmem:[#allocation2 + $0x380] sm:$0xff] %vm2217_vm2, %v2205_v38  ;;  %v1339_v21 = vmax.f32 %v1177_v49, 0.0  ;;  %v18175_v32 = vpop.f32.mrb[116].mxu0  ;;  %18254 = vmatmul.mubr.msk.f32.gmra.mrb[164].mxu0 %vm2217_vm2, %v23113_v6  ;;  %18895 = vmatprep.mubr.msk.f32.mxu1 %vm2217_vm2, %v5903_v25  ;;  %v13523_v23 = vld [vmem:[%s26382_s2 + $0x348] sm:$0xff]  ;;  %v23139_v38 = vld [vmem:[#allocation2 + $0x160] sm:$0xff]  ;;  %v2448_v29 = vld [vmem:[#allocation2 + $0x357] sm:$0xff] }
 0x1c7   :  { %v2208_v57 = vmul.f32 %v26472_v26, %v1340_v13  ;;  %v1192_v63 = vadd.f32 %v23096_v22, %v18175_v32  ;;  %15048 = vperm.xlu1 %21023, %v13521_v15   ;;  %15043 = vperm.xlu0 %21022, %v13520_v36   ;;  %v1186_v61 = vpop.f32.mrb[117].mxu0  ;;  %v26474_v25 = vld [vmem:[#allocation35_spill] sm:$0xff]  ;;  %v23147_v26 = vld [vmem:[#allocation2 + $0x168] sm:$0xff] }
 0x1c8   :  { %v2207_v43 = vmul.f32 %v26473_v53, %v1339_v21  ;;  %v1187_v54 = vadd.f32 %v23096_v22, %v1186_v61  ;;  %18256 = vmatprep.mubr.msk.f32.mxu0 %vm2217_vm2, %v23125_v14  ;;  %18896 = vmatmul.mubr.msk.f32.gmra.mrb[50].mxu1 %vm2217_vm2, %v5904_v41  ;;  %v23605_v16 = vld [vmem:[#allocation2 + $0x368] sm:$0xff] }
 0x1c9   :  { %2333 = vst.msk [vmem:[#allocation2 + $0x398] sm:$0xff] %vm2217_vm2, %v2208_v57  ;;  %v1342_v52 = vmax.f32 %v1192_v63, 0.0  ;;  %v5905_v49 = vld [vmem:[#allocation2 + $0x36f] sm:$0xff]  ;;  %v5906_v15 = vld [vmem:[#allocation2 + $0x377] sm:$0xff]  ;;  %v23149_v57 = vpop.permute.xlu1 %14588  ;;  %v2450_v33 = vld [vmem:[#allocation2 + $0x367] sm:$0xff] }
 0x1ca   :  { %2332 = vst.msk [vmem:[#allocation2 + $0x390] sm:$0xff] %vm2217_vm2, %v2207_v43  ;;  %v1341_v36 = vmax.f32 %v1187_v54, 0.0  ;;  %v18178_v13 = vpop.f32.mrb[118].mxu0  ;;  %18257 = vmatmul.mubr.msk.f32.gmra.mrb[166].mxu0 %vm2217_vm2, %v23139_v38  ;;  %18898 = vmatprep.mubr.msk.f32.mxu1 %vm2217_vm2, %v5905_v49  ;;  %26475 = vst [vmem:[#allocation15_spill] sm:$0xff] %v23149_v57  ;;  %v26476_v63 = vld [vmem:[#allocation32_spill] sm:$0xff]  ;;  %v13525_v43 = vld [vmem:[%s26382_s2 + $0x358] sm:$0xff] }
 0x1cb   :  { %v2210_v41 = vmul.f32 %v26474_v25, %v1342_v52  ;;  %v1202_v21 = vadd.f32 %v23096_v22, %v18178_v13  ;;  %15058 = vperm.xlu1 %21023, %v13523_v23   ;;  %15053 = vperm.xlu0 %21022, %v13522_v27   ;;  %v1196_v32 = vpop.f32.mrb[119].mxu0  ;;  %v13524_v54 = vld [vmem:[%s26382_s2 + $0x350] sm:$0xff]  ;;  %v23162_v23 = vpop.permute.xlu0 %14583  ;;  %v26478_v25 = vld [vmem:[#allocation36_spill] sm:$0xff] }
 0x1cc   :  { %v2209_v61 = vmul.f32 %v26476_v63, %v1341_v36  ;;  %v1197_v53 = vadd.f32 %v23096_v22, %v1196_v32  ;;  %18259 = vmatprep.mubr.msk.f32.mxu0 %vm2217_vm2, %v23147_v26  ;;  %18899 = vmatmul.mubr.msk.f32.gmra.mrb[52].mxu1 %vm2217_vm2, %v5906_v15  ;;  %26477 = vst [vmem:[#allocation12_spill] sm:$0xff] %v23162_v23  ;;  %v23165_v52 = vld [vmem:[#allocation2 + $0x170] sm:$0xff]  ;;  %v26479_v23 = vld [vmem:[#allocation34_spill] sm:$0xff] }
 0x1cd   :  { %2335 = vst.msk [vmem:[#allocation2 + $0x3a8] sm:$0xff] %vm2217_vm2, %v2210_v41  ;;  %v1344_v27 = vmax.f32 %v1202_v21, 0.0  ;;  %v5907_v49 = vld [vmem:[#allocation2 + $0x37f] sm:$0xff]  ;;  %v5908_v36 = vld [vmem:[#allocation2 + $0x387] sm:$0xff]  ;;  %v2452_v17 = vld [vmem:[#allocation2 + $0x377] sm:$0xff] }
 0x1ce   :  { %2334 = vst.msk [vmem:[#allocation2 + $0x3a0] sm:$0xff] %vm2217_vm2, %v2209_v61  ;;  %v1343_v15 = vmax.f32 %v1197_v53, 0.0  ;;  %v18181_v13 = vpop.f32.mrb[120].mxu0  ;;  %18260 = vmatmul.mubr.msk.f32.gmra.mrb[168].mxu0 %vm2217_vm2, %v23165_v52  ;;  %18901 = vmatprep.mubr.msk.f32.mxu1 %vm2217_vm2, %v5907_v49  ;;  %v23173_v21 = vld [vmem:[#allocation2 + $0x178] sm:$0xff]  ;;  %v13527_v53 = vld [vmem:[%s26382_s2 + $0x368] sm:$0xff] }
 0x1cf   :  { %v2212_v32 = vmul.f32 %v26478_v25, %v1344_v27  ;;  %v1212_v63 = vadd.f32 %v23096_v22, %v18181_v13  ;;  %15068 = vperm.xlu1 %21023, %v13525_v43   ;;  %15063 = vperm.xlu0 %21022, %v13524_v54   ;;  %v1206_v41 = vpop.f32.mrb[121].mxu0  ;;  %v13526_v43 = vld [vmem:[%s26382_s2 + $0x360] sm:$0xff]  ;;  %v23195_v25 = vpop.permute.xlu0 %14593 }
 0x1d0   :  { %v2211_v57 = vmul.f32 %v26479_v23, %v1343_v15  ;;  %v1207_v61 = vadd.f32 %v23096_v22, %v1206_v41  ;;  %18262 = vmatprep.mubr.msk.f32.mxu0 %vm2217_vm2, %v23173_v21  ;;  %18902 = vmatmul.mubr.msk.f32.gmra.mrb[54].mxu1 %vm2217_vm2, %v5908_v36  ;;  %v23187_v27 = vld [vmem:[#allocation2 + $0x180] sm:$0xff]  ;;  %v23189_v15 = vpop.permute.xlu1 %14598  ;;  %26481 = vst [vmem:[#allocation14_spill] sm:$0xff] %v23195_v25  ;;  %v16190_v25 = vld [vmem:[%s26380_s5 + $0xc8] sm:$0xff] }
 0x1d1   :  { %2337 = vst.msk [vmem:[#allocation2 + $0x3b8] sm:$0xff] %vm2217_vm2, %v2212_v32  ;;  %v1346_v54 = vmax.f32 %v1212_v63, 0.0  ;;  %v5909_v23 = vld [vmem:[#allocation2 + $0x38f] sm:$0xff]  ;;  %v5910_v49 = vld [vmem:[#allocation2 + $0x397] sm:$0xff]  ;;  %26480 = vst [vmem:[#allocation18_spill] sm:$0xff] %v23189_v15 }
 0x1d2   :  { %2336 = vst.msk [vmem:[#allocation2 + $0x3b0] sm:$0xff] %vm2217_vm2, %v2211_v57  ;;  %v1345_v36 = vmax.f32 %v1207_v61, 0.0  ;;  %v18184_v13 = vpop.f32.mrb[122].mxu0  ;;  %18263 = vmatmul.mubr.msk.f32.gmra.mrb[170].mxu0 %vm2217_vm2, %v23187_v27  ;;  %18904 = vmatprep.mubr.msk.f32.mxu1 %vm2217_vm2, %v5909_v23  ;;  %v13529_v57 = vld [vmem:[%s26382_s2 + $0x378] sm:$0xff] }
 0x1d3   :  { %v2214_v32 = vmul.f32 %v22890_v1, %v1346_v54  ;;  %v1222_v63 = vadd.f32 %v23096_v22, %v18184_v13  ;;  %15078 = vperm.xlu1 %21023, %v13527_v53   ;;  %15073 = vperm.xlu0 %21022, %v13526_v43   ;;  %v1216_v41 = vpop.f32.mrb[123].mxu0  ;;  %v13528_v1 = vld [vmem:[%s26382_s2 + $0x370] sm:$0xff]  ;;  %v2458_v53 = vld [vmem:[%s26380_s5] sm:$0xff]  ;;  %v2459_v43 = vld [vmem:[%s26380_s5 + $0x8] sm:$0xff] }
 0x1d4   :  { %v2213_v61 = vmul.f32 %v22852_v24, %v1345_v36  ;;  %v1217_v15 = vadd.f32 %v23096_v22, %v1216_v41  ;;  %18265 = vmatprep.mubr.msk.f32.mxu0 %vm2217_vm2, %v23199_v47  ;;  %18905 = vmatmul.mubr.msk.f32.gmra.mrb[56].mxu1 %vm2217_vm2, %v5910_v49  ;;  %v23219_v22 = vld [vmem:[#allocation2 + $0x190] sm:$0xff]  ;;  %v20017_v49 = vpack.c.bf16 %v2459_v43, %v2458_v53  ;;  %v23226_v41 = vld [vmem:[#allocation2 + $0x198] sm:$0xff] }
 0x1d5   :  { %2339 = vst.msk [vmem:[#allocation2 + $0x3c8] sm:$0xff] %vm2217_vm2, %v2214_v32  ;;  %v1348_v24 = vmax.f32 %v1222_v63, 0.0  ;;  %v5911_v54 = vld [vmem:[#allocation2 + $0x39f] sm:$0xff]  ;;  %v5912_v23 = vld [vmem:[#allocation2 + $0x3a7] sm:$0xff] }
 0x1d6   :  { %2338 = vst.msk [vmem:[#allocation2 + $0x3c0] sm:$0xff] %vm2217_vm2, %v2213_v61  ;;  %v1347_v36 = vmax.f32 %v1217_v15, 0.0  ;;  %18266 = vmatmul.mubr.msk.f32.gmra.mrb[172].mxu0 %vm2217_vm2, %v23219_v22  ;;  %18907 = vmatprep.mubr.msk.f32.mxu1 %vm2217_vm2, %v5911_v54  ;;  %v13531_v32 = vld [vmem:[%s26382_s2 + $0x388] sm:$0xff]  ;;  %v13530_v15 = vld [vmem:[%s26382_s2 + $0x380] sm:$0xff]  ;;  %v23244_v61 = vpop.permute.xlu1 %14608 }
 0x1d7   :  { %v2216_v13 = vmul.f32 %v22922_v18, %v1348_v24  ;;  %15088 = vperm.xlu1 %21023, %v13529_v57   ;;  %15083 = vperm.xlu0 %21022, %v13528_v1   ;;  %v2460_v18 = vld [vmem:[%s26380_s5 + $0x10] sm:$0xff]  ;;  %v2461_v57 = vld [vmem:[%s26380_s5 + $0x18] sm:$0xff]  ;;  %26482 = vst [vmem:[#allocation21_spill] sm:$0xff] %v23244_v61  ;;  %v23249_v1 = vld [vmem:[#allocation2 + $0x1a0] sm:$0xff] }
 0x1d8   :  { %v2215_v63 = vmul.f32 %v22935_v35, %v1347_v36  ;;  %18268 = vmatprep.mubr.msk.f32.mxu0 %vm2217_vm2, %v23226_v41  ;;  %18908 = vmatmul.mubr.msk.f32.gmra.mrb[58].mxu1 %vm2217_vm2, %v5912_v23  ;;  %v23246_v35 = vpop.permute.xlu0 %14603  ;;  %v20021_v24 = vpack.c.bf16 %v2461_v57, %v2460_v18  ;;  %v23255_v54 = vld [vmem:[#allocation2 + $0x1a8] sm:$0xff]  ;;  %v16071_v23 = vld [vmem:[%s26380_s5 + $0xb0] sm:$0xff]  ;;  %v16072_v36 = vld [vmem:[%s26380_s5 + $0xb8] sm:$0xff] }
 0x1d9   :  { %26483 = vst [vmem:[#allocation16_spill] sm:$0xff] %v23246_v35  ;;  %2341 = vst.msk [vmem:[#allocation2 + $0x3d8] sm:$0xff] %vm2217_vm2, %v2216_v13  ;;  %v5913_v53 = vld [vmem:[#allocation2 + $0x3af] sm:$0xff]  ;;  %v5914_v43 = vld [vmem:[#allocation2 + $0x3b7] sm:$0xff]  ;;  %20018 = vmatprep.subr.bf16.mxu0 %v20017_v49  ;;  %v20053_v18 = vpack.c.bf16 %v16072_v36, %v16071_v23 }
 0x1da   :  { %2340 = vst.msk [vmem:[#allocation2 + $0x3d0] sm:$0xff] %vm2217_vm2, %v2215_v63  ;;  %18269 = vmatmul.mubr.msk.f32.gmra.mrb[174].mxu0 %vm2217_vm2, %v23249_v1  ;;  %18910 = vmatprep.mubr.msk.f32.mxu1 %vm2217_vm2, %v5913_v53  ;;  %v7029_v13 = vld [vmem:[#allocation2 + $0x20] sm:$0xff]  ;;  %v13532_v63 = vld [vmem:[%s26382_s2 + $0x390] sm:$0xff]  ;;  %v23277_v57 = vpop.permute.xlu1 %14618  ;;  %v7030_v35 = vld [vmem:[#allocation2 + $0x28] sm:$0xff] }
 0x1db   :  { %15098 = vperm.xlu1 %21023, %v13531_v32   ;;  %15093 = vperm.xlu0 %21022, %v13530_v15   ;;  %v13533_v32 = vld [vmem:[%s26382_s2 + $0x398] sm:$0xff]  ;;  %v23273_v15 = vld [vmem:[#allocation2 + $0x1b0] sm:$0xff]  ;;  %26484 = vst [vmem:[#allocation23_spill] sm:$0xff] %v23277_v57  ;;  %v23288_v23 = vld [vmem:[#allocation2 + $0x1c0] sm:$0xff] }
 0x1dc   :  { %18271 = vmatprep.mubr.msk.f32.mxu0 %vm2217_vm2, %v23255_v54  ;;  %18911 = vmatmul.mubr.msk.f32.gmra.mrb[60].mxu1 %vm2217_vm2, %v5914_v43  ;;  %v23279_v53 = vpop.permute.xlu0 %14613  ;;  %v23281_v43 = vld [vmem:[#allocation2 + $0x1b8] sm:$0xff]  ;;  %v23292_v36 = vld [vmem:[#allocation2 + $0x1c8] sm:$0xff]  ;;  %v7039_v57 = vld [vmem:[#allocation2 + $0x70] sm:$0xff] }
 0x1dd   :  { %18921 = vmatprep.mubr.msk.f32.mxu1 %vm2217_vm2, %v7029_v13  ;;  %20020 = vmatpush3.bf16.msra.mxu0 %v20017_v49  ;;  %26485 = vst [vmem:[#allocation19_spill] sm:$0xff] %v23279_v53  ;;  %v7031_v49 = vld [vmem:[#allocation2 + $0x30] sm:$0xff]  ;;  %v7032_v13 = vld [vmem:[#allocation2 + $0x38] sm:$0xff]  ;;  %v7038_v53 = vld [vmem:[#allocation2 + $0x68] sm:$0xff] }
 0x1de   :  { %18272 = vmatmul.mubr.msk.f32.gmra.mrb[176].mxu0 %vm2217_vm2, %v23273_v15  ;;  %20022 = vmatprep.subr.bf16.mxu0 %v20021_v24  ;;  %v16189_v61 = vld [vmem:[%s26380_s5 + $0xc0] sm:$0xff] }
 0x1df   :  { %15108 = vperm.xlu1 %21023, %v13533_v32   ;;  %15103 = vperm.xlu0 %21022, %v13532_v63   ;;  %v23302_v32 = vld [vmem:[#allocation2 + $0x1d8] sm:$0xff]  ;;  %v7034_v63 = vld [vmem:[#allocation2 + $0x48] sm:$0xff] }
 0x1e0   :  { %18274 = vmatprep.mubr.msk.f32.mxu0 %vm2217_vm2, %v23281_v43  ;;  %18922 = vmatmul.mubr.msk.f32.vlgmr.msra.gmra.mrb[62].mxu1 %vm2217_vm2, %v7030_v35  ;;  %v7033_v35 = vld [vmem:[#allocation2 + $0x40] sm:$0xff] }
 0x1e1   :  { %20052 = vmatpush3.bf16.msra.mxu1 %v22608_v58  ;;  %18924 = vmatprep.mubr.msk.f32.mxu1 %vm2217_vm2, %v7031_v49  ;;  %v23298_v58 = vld [vmem:[#allocation2 + $0x1d0] sm:$0xff]  ;;  %v23308_v49 = vld [vmem:[#allocation2 + $0x1e0] sm:$0xff] }
 0x1e2   :  { %18275 = vmatmul.mubr.msk.f32.gmra.mrb[178].mxu0 %vm2217_vm2, %v23288_v23  ;;  %20054 = vmatprep.subr.bf16.mxu1 %v20053_v18  ;;  %v2453_v10 = vld [vmem:[#allocation2 + $0x37f] sm:$0xff] }
 0x1e3   :  { %18277 = vmatprep.mubr.msk.f32.mxu0 %vm2217_vm2, %v23292_v36  ;;  %20024 = vmatpush3.bf16.msra.mxu0 %v20021_v24  ;;  %v7035_v24 = vld [vmem:[#allocation2 + $0x50] sm:$0xff] }
 0x1e4   :  { %18925 = vmatmul.mubr.msk.f32.gmra.mrb[64].mxu1 %vm2217_vm2, %v7032_v13  ;;  %v7036_v13 = vld [vmem:[#allocation2 + $0x58] sm:$0xff] }
 0x1e5   :  { %18927 = vmatprep.mubr.msk.f32.mxu1 %vm2217_vm2, %v7033_v35  ;;  %20056 = vmatpush3.bf16.msra.mxu1 %v20053_v18  ;;  %v23312_v18 = vld [vmem:[#allocation2 + $0x1e8] sm:$0xff]  ;;  %v7037_v35 = vld [vmem:[#allocation2 + $0x60] sm:$0xff] }
 0x1e6   :  { %18278 = vmatmul.mubr.msk.f32.gmra.mrb[180].mxu0 %vm2217_vm2, %v23298_v58 }
 0x1e7   :  { %18280 = vmatprep.mubr.msk.f32.mxu0 %vm2217_vm2, %v23302_v32 }
 0x1e8   :  { %18928 = vmatmul.mubr.msk.f32.gmra.mrb[66].mxu1 %vm2217_vm2, %v7034_v63  ;;  %v23318_v63 = vld [vmem:[#allocation2 + $0x1f0] sm:$0xff] }
 0x1e9   :  { %18930 = vmatprep.mubr.msk.f32.mxu1 %vm2217_vm2, %v7035_v24  ;;  %v23322_v24 = vld [vmem:[#allocation2 + $0x1f8] sm:$0xff] }
 0x1ea   :  { %18281 = vmatmul.mubr.msk.f32.gmra.mrb[182].mxu0 %vm2217_vm2, %v23308_v49 }
 0x1eb   :  { %18283 = vmatprep.mubr.msk.f32.mxu0 %vm2217_vm2, %v23312_v18 }
 0x1ec   :  { %18931 = vmatmul.mubr.msk.f32.gmra.mrb[68].mxu1 %vm2217_vm2, %v7036_v13  ;;  %v23328_v13 = vld [vmem:[#allocation2 + $0x200] sm:$0xff] }
 0x1ed   :  { %18933 = vmatprep.mubr.msk.f32.mxu1 %vm2217_vm2, %v7037_v35  ;;  %v23332_v35 = vld [vmem:[#allocation2 + $0x208] sm:$0xff] }
 0x1ee   :  { %18284 = vmatmul.mubr.msk.f32.gmra.mrb[184].mxu0 %vm2217_vm2, %v23318_v63 }
 0x1ef   :  { %18286 = vmatprep.mubr.msk.f32.mxu0 %vm2217_vm2, %v23322_v24 }
 0x1f0   :  { %18934 = vmatmul.mubr.msk.f32.gmra.mrb[70].mxu1 %vm2217_vm2, %v7038_v53  ;;  %v23340_v53 = vld [vmem:[#allocation2 + $0x210] sm:$0xff] }
 0x1f1   :  { %18936 = vmatprep.mubr.msk.f32.mxu1 %vm2217_vm2, %v7039_v57  ;;  %v23344_v57 = vld [vmem:[#allocation2 + $0x218] sm:$0xff] }
 0x1f2   :  { %18287 = vmatmul.mubr.msk.f32.gmra.mrb[186].mxu0 %vm2217_vm2, %v23328_v13 }
 0x1f3   :  { %18289 = vmatprep.mubr.msk.f32.mxu0 %vm2217_vm2, %v23332_v35 }
 0x1f4   :  { %18937 = vmatmul.mubr.msk.f32.gmra.mrb[72].mxu1 %vm2217_vm2, %v22784_v0  ;;  %v23352_v0 = vld [vmem:[#allocation2 + $0x220] sm:$0xff] }
 0x1f5   :  { %18939 = vmatprep.mubr.msk.f32.mxu1 %vm2217_vm2, %v22798_v50  ;;  %v23356_v50 = vld [vmem:[#allocation2 + $0x228] sm:$0xff] }
 0x1f6   :  { %18290 = vmatmul.mubr.msk.f32.gmra.mrb[188].mxu0 %vm2217_vm2, %v23340_v53 }
 0x1f7   :  { %18292 = vmatprep.mubr.msk.f32.mxu0 %vm2217_vm2, %v23344_v57 }
 0x1f8   :  { %18940 = vmatmul.mubr.msk.f32.gmra.mrb[74].mxu1 %vm2217_vm2, %v22806_v45  ;;  %v23364_v45 = vld [vmem:[#allocation2 + $0x230] sm:$0xff] }
 0x1f9   :  { %18942 = vmatprep.mubr.msk.f32.mxu1 %vm2217_vm2, %v22820_v7  ;;  %v23368_v7 = vld [vmem:[#allocation2 + $0x238] sm:$0xff] }
 0x1fa   :  { %18293 = vmatmul.mubr.msk.f32.gmra.mrb[190].mxu0 %vm2217_vm2, %v23352_v0 }
 0x1fb   :  { %18295 = vmatprep.mubr.msk.f32.mxu0 %vm2217_vm2, %v23356_v50 }
 0x1fc   :  { %18943 = vmatmul.mubr.msk.f32.gmra.mrb[76].mxu1 %vm2217_vm2, %v22828_v28  ;;  %v23376_v28 = vld [vmem:[#allocation2 + $0x240] sm:$0xff] }
 0x1fd   :  { %18945 = vmatprep.mubr.msk.f32.mxu1 %vm2217_vm2, %v22842_v30  ;;  %v23380_v30 = vld [vmem:[#allocation2 + $0x248] sm:$0xff] }
 0x1fe   :  { %18296 = vmatmul.mubr.msk.f32.gmra.mrb[192].mxu0 %vm2217_vm2, %v23364_v45 }
 0x1ff   :  { %18298 = vmatprep.mubr.msk.f32.mxu0 %vm2217_vm2, %v23368_v7 }
 0x200   :  { %18946 = vmatmul.mubr.msk.f32.gmra.mrb[78].mxu1 %vm2217_vm2, %v22850_v31  ;;  %v23388_v31 = vld [vmem:[#allocation2 + $0x250] sm:$0xff] }
 0x201   :  { %18948 = vmatprep.mubr.msk.f32.mxu1 %vm2217_vm2, %v22866_v3  ;;  %v23392_v3 = vld [vmem:[#allocation2 + $0x258] sm:$0xff] }
 0x202   :  { %18299 = vmatmul.mubr.msk.f32.gmra.mrb[194].mxu0 %vm2217_vm2, %v23376_v28 }
 0x203   :  { %18301 = vmatprep.mubr.msk.f32.mxu0 %vm2217_vm2, %v23380_v30 }
 0x204   :  { %18949 = vmatmul.mubr.msk.f32.gmra.mrb[80].mxu1 %vm2217_vm2, %v22874_v48  ;;  %v23400_v48 = vld [vmem:[#allocation2 + $0x260] sm:$0xff] }
 0x205   :  { %18951 = vmatprep.mubr.msk.f32.mxu1 %vm2217_vm2, %v22888_v62  ;;  %v23404_v62 = vld [vmem:[#allocation2 + $0x268] sm:$0xff] }
 0x206   :  { %18302 = vmatmul.mubr.msk.f32.gmra.mrb[196].mxu0 %vm2217_vm2, %v23388_v31 }
 0x207   :  { %18304 = vmatprep.mubr.msk.f32.mxu0 %vm2217_vm2, %v23392_v3 }
 0x208   :  { %18952 = vmatmul.mubr.msk.f32.gmra.mrb[82].mxu1 %vm2217_vm2, %v22898_v55  ;;  %v23412_v55 = vld [vmem:[#allocation2 + $0x270] sm:$0xff] }
 0x209   :  { %18954 = vmatprep.mubr.msk.f32.mxu1 %vm2217_vm2, %v22912_v8  ;;  %v23416_v8 = vld [vmem:[#allocation2 + $0x278] sm:$0xff] }
 0x20a   :  { %18305 = vmatmul.mubr.msk.f32.gmra.mrb[198].mxu0 %vm2217_vm2, %v23400_v48 }
 0x20b   :  { %18307 = vmatprep.mubr.msk.f32.mxu0 %vm2217_vm2, %v23404_v62 }
 0x20c   :  { %18955 = vmatmul.mubr.msk.f32.gmra.mrb[84].mxu1 %vm2217_vm2, %v22920_v4  ;;  %v23424_v4 = vld [vmem:[#allocation2 + $0x280] sm:$0xff] }
 0x20d   :  { %18957 = vmatprep.mubr.msk.f32.mxu1 %vm2217_vm2, %v22938_v39  ;;  %v23428_v39 = vld [vmem:[#allocation2 + $0x288] sm:$0xff] }
 0x20e   :  { %18308 = vmatmul.mubr.msk.f32.gmra.mrb[200].mxu0 %vm2217_vm2, %v23412_v55 }
 0x20f   :  { %18310 = vmatprep.mubr.msk.f32.mxu0 %vm2217_vm2, %v23416_v8 }
 0x210   :  { %18958 = vmatmul.mubr.msk.f32.gmra.mrb[86].mxu1 %vm2217_vm2, %v22946_v40  ;;  %v23436_v40 = vld [vmem:[#allocation2 + $0x290] sm:$0xff] }
 0x211   :  { %18960 = vmatprep.mubr.msk.f32.mxu1 %vm2217_vm2, %v22960_v12  ;;  %v23440_v12 = vld [vmem:[#allocation2 + $0x298] sm:$0xff] }
 0x212   :  { %18311 = vmatmul.mubr.msk.f32.gmra.mrb[202].mxu0 %vm2217_vm2, %v23424_v4 }
 0x213   :  { %18313 = vmatprep.mubr.msk.f32.mxu0 %vm2217_vm2, %v23428_v39 }
 0x214   :  { %18961 = vmatmul.mubr.msk.f32.gmra.mrb[88].mxu1 %vm2217_vm2, %v22972_v44  ;;  %v23448_v44 = vld [vmem:[#allocation2 + $0x2a0] sm:$0xff] }
 0x215   :  { %18963 = vmatprep.mubr.msk.f32.mxu1 %vm2217_vm2, %v22986_v19  ;;  %v23452_v19 = vld [vmem:[#allocation2 + $0x2a8] sm:$0xff] }
 0x216   :  { %18314 = vmatmul.mubr.msk.f32.gmra.mrb[204].mxu0 %vm2217_vm2, %v23436_v40 }
 0x217   :  { %18316 = vmatprep.mubr.msk.f32.mxu0 %vm2217_vm2, %v23440_v12 }
 0x218   :  { %18964 = vmatmul.mubr.msk.f32.gmra.mrb[90].mxu1 %vm2217_vm2, %v22994_v51  ;;  %v23460_v51 = vld [vmem:[#allocation2 + $0x2b0] sm:$0xff] }
 0x219   :  { %18966 = vmatprep.mubr.msk.f32.mxu1 %vm2217_vm2, %v23012_v5  ;;  %v23464_v5 = vld [vmem:[#allocation2 + $0x2b8] sm:$0xff] }
 0x21a   :  { %18317 = vmatmul.mubr.msk.f32.gmra.mrb[206].mxu0 %vm2217_vm2, %v23448_v44 }
 0x21b   :  { %18319 = vmatprep.mubr.msk.f32.mxu0 %vm2217_vm2, %v23452_v19 }
 0x21c   :  { %18967 = vmatmul.mubr.msk.f32.gmra.mrb[92].mxu1 %vm2217_vm2, %v23020_v56  ;;  %v23472_v56 = vld [vmem:[#allocation2 + $0x2c0] sm:$0xff] }
 0x21d   :  { %18969 = vmatprep.mubr.msk.f32.mxu1 %vm2217_vm2, %v23034_v9  ;;  %v23476_v9 = vld [vmem:[#allocation2 + $0x2c8] sm:$0xff] }
 0x21e   :  { %18320 = vmatmul.mubr.msk.f32.gmra.mrb[208].mxu0 %vm2217_vm2, %v23460_v51 }
 0x21f   :  { %18322 = vmatprep.mubr.msk.f32.mxu0 %vm2217_vm2, %v23464_v5 }
 0x220   :  { %18970 = vmatmul.mubr.msk.f32.gmra.mrb[94].mxu1 %vm2217_vm2, %v23046_v11  ;;  %v23484_v11 = vld [vmem:[#allocation2 + $0x2d0] sm:$0xff] }
 0x221   :  { %18972 = vmatprep.mubr.msk.f32.mxu1 %vm2217_vm2, %v23060_v59  ;;  %v23488_v59 = vld [vmem:[#allocation2 + $0x2d8] sm:$0xff] }
 0x222   :  { %18323 = vmatmul.mubr.msk.f32.gmra.mrb[210].mxu0 %vm2217_vm2, %v23472_v56 }
 0x223   :  { %18325 = vmatprep.mubr.msk.f32.mxu0 %vm2217_vm2, %v23476_v9 }
 0x224   :  { %18973 = vmatmul.mubr.msk.f32.gmra.mrb[96].mxu1 %vm2217_vm2, %v23068_v37  ;;  %v23496_v37 = vld [vmem:[#allocation2 + $0x2e0] sm:$0xff] }
 0x225   :  { %18975 = vmatprep.mubr.msk.f32.mxu1 %vm2217_vm2, %v23086_v42  ;;  %v23500_v42 = vld [vmem:[#allocation2 + $0x2e8] sm:$0xff] }
 0x226   :  { %18326 = vmatmul.mubr.msk.f32.gmra.mrb[212].mxu0 %vm2217_vm2, %v23484_v11 }
 0x227   :  { %18328 = vmatprep.mubr.msk.f32.mxu0 %vm2217_vm2, %v23488_v59 }
 0x228   :  { %18976 = vmatmul.mubr.msk.f32.gmra.mrb[98].mxu1 %vm2217_vm2, %v23099_v60  ;;  %v23508_v60 = vld [vmem:[#allocation2 + $0x2f0] sm:$0xff] }
 0x229   :  { %18978 = vmatprep.mubr.msk.f32.mxu1 %vm2217_vm2, %v23113_v6  ;;  %v23512_v6 = vld [vmem:[#allocation2 + $0x2f8] sm:$0xff] }
 0x22a   :  { %18329 = vmatmul.mubr.msk.f32.gmra.mrb[214].mxu0 %vm2217_vm2, %v23496_v37 }
 0x22b   :  { %18331 = vmatprep.mubr.msk.f32.mxu0 %vm2217_vm2, %v23500_v42 }
 0x22c   :  { %18979 = vmatmul.mubr.msk.f32.gmra.mrb[100].mxu1 %vm2217_vm2, %v23125_v14  ;;  %v23520_v14 = vld [vmem:[#allocation2 + $0x300] sm:$0xff] }
 0x22d   :  { %18981 = vmatprep.mubr.msk.f32.mxu1 %vm2217_vm2, %v23139_v38  ;;  %v23524_v38 = vld [vmem:[#allocation2 + $0x308] sm:$0xff] }
 0x22e   :  { %18332 = vmatmul.mubr.msk.f32.gmra.mrb[216].mxu0 %vm2217_vm2, %v23508_v60 }
 0x22f   :  { %18334 = vmatprep.mubr.msk.f32.mxu0 %vm2217_vm2, %v23512_v6 }
 0x230   :  { %18982 = vmatmul.mubr.msk.f32.gmra.mrb[102].mxu1 %vm2217_vm2, %v23147_v26  ;;  %v23532_v26 = vld [vmem:[#allocation2 + $0x310] sm:$0xff] }
 0x231   :  { %18984 = vmatprep.mubr.msk.f32.mxu1 %vm2217_vm2, %v23165_v52  ;;  %v23536_v52 = vld [vmem:[#allocation2 + $0x318] sm:$0xff] }
 0x232   :  { %18335 = vmatmul.mubr.msk.f32.gmra.mrb[218].mxu0 %vm2217_vm2, %v23520_v14 }
 0x233   :  { %18337 = vmatprep.mubr.msk.f32.mxu0 %vm2217_vm2, %v23524_v38 }
 0x234   :  { %18985 = vmatmul.mubr.msk.f32.gmra.mrb[104].mxu1 %vm2217_vm2, %v23173_v21  ;;  %v23544_v21 = vld [vmem:[#allocation2 + $0x320] sm:$0xff] }
 0x235   :  { %18987 = vmatprep.mubr.msk.f32.mxu1 %vm2217_vm2, %v23187_v27  ;;  %v23548_v27 = vld [vmem:[#allocation2 + $0x328] sm:$0xff] }
 0x236   :  { %18338 = vmatmul.mubr.msk.f32.gmra.mrb[220].mxu0 %vm2217_vm2, %v23532_v26 }
 0x237   :  { %18340 = vmatprep.mubr.msk.f32.mxu0 %vm2217_vm2, %v23536_v52 }
 0x238   :  { %18988 = vmatmul.mubr.msk.f32.gmra.mrb[106].mxu1 %vm2217_vm2, %v23199_v47  ;;  %v23556_v47 = vld [vmem:[#allocation2 + $0x330] sm:$0xff] }
 0x239   :  { %18990 = vmatprep.mubr.msk.f32.mxu1 %vm2217_vm2, %v23219_v22  ;;  %v23560_v22 = vld [vmem:[#allocation2 + $0x338] sm:$0xff] }
 0x23a   :  { %18341 = vmatmul.mubr.msk.f32.gmra.mrb[222].mxu0 %vm2217_vm2, %v23544_v21 }
 0x23b   :  { %18343 = vmatprep.mubr.msk.f32.mxu0 %vm2217_vm2, %v23548_v27 }
 0x23c   :  { %18991 = vmatmul.mubr.msk.f32.gmra.mrb[108].mxu1 %vm2217_vm2, %v23226_v41  ;;  %v23568_v41 = vld [vmem:[#allocation2 + $0x340] sm:$0xff] }
 0x23d   :  { %18993 = vmatprep.mubr.msk.f32.mxu1 %vm2217_vm2, %v23249_v1  ;;  %v23572_v1 = vld [vmem:[#allocation2 + $0x348] sm:$0xff] }
 0x23e   :  { %18344 = vmatmul.mubr.msk.f32.gmra.mrb[224].mxu0 %vm2217_vm2, %v23556_v47 }
 0x23f   :  { %18346 = vmatprep.mubr.msk.f32.mxu0 %vm2217_vm2, %v23560_v22 }
 0x240   :  { %18994 = vmatmul.mubr.msk.f32.gmra.mrb[110].mxu1 %vm2217_vm2, %v23255_v54  ;;  %v23580_v54 = vld [vmem:[#allocation2 + $0x350] sm:$0xff] }
 0x241   :  { %18996 = vmatprep.mubr.msk.f32.mxu1 %vm2217_vm2, %v23273_v15  ;;  %v23584_v15 = vld [vmem:[#allocation2 + $0x358] sm:$0xff] }
 0x242   :  { %18347 = vmatmul.mubr.msk.f32.gmra.mrb[226].mxu0 %vm2217_vm2, %v23568_v41 }
 0x243   :  { %18349 = vmatprep.mubr.msk.f32.mxu0 %vm2217_vm2, %v23572_v1 }
 0x244   :  { %18997 = vmatmul.mubr.msk.f32.gmra.mrb[112].mxu1 %vm2217_vm2, %v23281_v43  ;;  %v23594_v43 = vpack.c.bf16 %v16190_v25, %v16189_v61  ;;  %v23613_v25 = vld [vmem:[#allocation2 + $0x370] sm:$0xff]  ;;  %v23617_v61 = vld [vmem:[#allocation2 + $0x378] sm:$0xff] }
 0x245   :  { %18999 = vmatprep.mubr.msk.f32.mxu1 %vm2217_vm2, %v23288_v23  ;;  %v23600_v23 = vld [vmem:[#allocation2 + $0x360] sm:$0xff] }
 0x246   :  { %18350 = vmatmul.mubr.msk.f32.gmra.mrb[228].mxu0 %vm2217_vm2, %v23580_v54  ;;  %20058 = vmatprep.subr.bf16.mxu1 %v23594_v43 }
 0x247   :  { %18352 = vmatprep.mubr.msk.f32.mxu0 %vm2217_vm2, %v23584_v15 }
 0x248   :  { %19000 = vmatmul.mubr.msk.f32.gmra.mrb[114].mxu1 %vm2217_vm2, %v23292_v36  ;;  %v23625_v36 = vld [vmem:[#allocation2 + $0x380] sm:$0xff] }
 0x249   :  { %19002 = vmatprep.mubr.msk.f32.mxu1 %vm2217_vm2, %v23298_v58  ;;  %v23629_v58 = vld [vmem:[#allocation2 + $0x388] sm:$0xff] }
 0x24a   :  { %18353 = vmatmul.mubr.msk.f32.gmra.mrb[230].mxu0 %vm2217_vm2, %v23600_v23 }
 0x24b   :  { %18355 = vmatprep.mubr.msk.f32.mxu0 %vm2217_vm2, %v23605_v16 }
 0x24c   :  { %19003 = vmatmul.mubr.msk.f32.gmra.mrb[0].mxu1 %vm2217_vm2, %v23302_v32  ;;  %v23637_v32 = vld [vmem:[#allocation2 + $0x390] sm:$0xff] }
 0x24d   :  { %19005 = vmatprep.mubr.msk.f32.mxu1 %vm2217_vm2, %v23308_v49  ;;  %v23641_v49 = vld [vmem:[#allocation2 + $0x398] sm:$0xff] }
 0x24e   :  { %18356 = vmatmul.mubr.msk.f32.gmra.mrb[232].mxu0 %vm2217_vm2, %v23613_v25 }
 0x24f   :  { %18358 = vmatprep.mubr.msk.f32.mxu0 %vm2217_vm2, %v23617_v61 }
 0x250   :  { %19006 = vmatmul.mubr.msk.f32.gmra.mrb[2].mxu1 %vm2217_vm2, %v23312_v18  ;;  %v23649_v18 = vld [vmem:[#allocation2 + $0x3a0] sm:$0xff] }
 0x251   :  { %19008 = vmatprep.mubr.msk.f32.mxu1 %vm2217_vm2, %v23318_v63  ;;  %v2342_v63 = vld [vmem:[#allocation2 + $0x7] sm:$0xff] }
 0x252   :  { %18359 = vmatmul.mubr.msk.f32.gmra.mrb[234].mxu0 %vm2217_vm2, %v23625_v36 }
 0x253   :  { %18361 = vmatprep.mubr.msk.f32.mxu0 %vm2217_vm2, %v23629_v58 }
 0x254   :  { %19009 = vmatmul.mubr.msk.f32.gmra.mrb[4].mxu1 %vm2217_vm2, %v23322_v24  ;;  %v2343_v24 = vld [vmem:[#allocation2 + $0xf] sm:$0xff] }
 0x255   :  { %19011 = vmatprep.mubr.msk.f32.mxu1 %vm2217_vm2, %v23328_v13  ;;  %v2344_v13 = vld [vmem:[#allocation2 + $0x17] sm:$0xff] }
 0x256   :  { %18362 = vmatmul.mubr.msk.f32.gmra.mrb[236].mxu0 %vm2217_vm2, %v23637_v32 }
 0x257   :  { %18364 = vmatprep.mubr.msk.f32.mxu0 %vm2217_vm2, %v23641_v49 }
 0x258   :  { %19012 = vmatmul.mubr.msk.f32.gmra.mrb[6].mxu1 %vm2217_vm2, %v23332_v35  ;;  %v2345_v35 = vld [vmem:[#allocation2 + $0x1f] sm:$0xff] }
 0x259   :  { %19014 = vmatprep.mubr.msk.f32.mxu1 %vm2217_vm2, %v23340_v53  ;;  %v2346_v53 = vld [vmem:[#allocation2 + $0x27] sm:$0xff] }
 0x25a   :  { %18365 = vmatmul.mubr.msk.f32.gmra.mrb[238].mxu0 %vm2217_vm2, %v23649_v18 }
 0x25b   :  { %18375 = vmatprep.mubr.msk.f32.mxu0 %vm2217_vm2, %v2342_v63  ;;  %v7142_v63 = vld [vmem:[#allocation2 + $0x3a8] sm:$0xff] }
 0x25c   :  { %19015 = vmatmul.mubr.msk.f32.gmra.mrb[8].mxu1 %vm2217_vm2, %v23344_v57  ;;  %v2347_v57 = vld [vmem:[#allocation2 + $0x2f] sm:$0xff] }
 0x25d   :  { %19017 = vmatprep.mubr.msk.f32.mxu1 %vm2217_vm2, %v23352_v0  ;;  %v2348_v0 = vld [vmem:[#allocation2 + $0x37] sm:$0xff] }
 0x25e   :  { %18376 = vmatmul.mubr.msk.f32.vlgmr.msra.gmra.mrb[124].mxu0 %vm2217_vm2, %v2343_v24 }
 0x25f   :  { %18378 = vmatprep.mubr.msk.f32.mxu0 %vm2217_vm2, %v2344_v13  ;;  %v2394_v13 = vld [vmem:[#allocation2 + $0x1a7] sm:$0xff] }
 0x260   :  { %19018 = vmatmul.mubr.msk.f32.gmra.mrb[10].mxu1 %vm2217_vm2, %v23356_v50  ;;  %v2349_v50 = vld [vmem:[#allocation2 + $0x3f] sm:$0xff] }
 0x261   :  { %19020 = vmatprep.mubr.msk.f32.mxu1 %vm2217_vm2, %v23364_v45  ;;  %v2350_v45 = vld [vmem:[#allocation2 + $0x47] sm:$0xff] }
 0x262   :  { %18379 = vmatmul.mubr.msk.f32.gmra.mrb[126].mxu0 %vm2217_vm2, %v2345_v35  ;;  %v15711_v35 = vld [vmem:[%s26380_s5 + $0x50] sm:$0xff] }
 0x263   :  { %18381 = vmatprep.mubr.msk.f32.mxu0 %vm2217_vm2, %v2346_v53  ;;  %v15712_v53 = vld [vmem:[%s26380_s5 + $0x58] sm:$0xff] }
 0x264   :  { %19021 = vmatmul.mubr.msk.f32.gmra.mrb[12].mxu1 %vm2217_vm2, %v23368_v7  ;;  %v2351_v7 = vld [vmem:[#allocation2 + $0x4f] sm:$0xff] }
 0x265   :  { %19023 = vmatprep.mubr.msk.f32.mxu1 %vm2217_vm2, %v23376_v28  ;;  %v2352_v28 = vld [vmem:[#allocation2 + $0x57] sm:$0xff] }
 0x266   :  { %18382 = vmatmul.mubr.msk.f32.gmra.mrb[128].mxu0 %vm2217_vm2, %v2347_v57  ;;  %v7144_v57 = vld [vmem:[#allocation2 + $0x3b8] sm:$0xff] }
 0x267   :  { %18384 = vmatprep.mubr.msk.f32.mxu0 %vm2217_vm2, %v2348_v0  ;;  %v16191_v0 = vld [vmem:[%s26380_s5 + $0xd0] sm:$0xff] }
 0x268   :  { %19024 = vmatmul.mubr.msk.f32.gmra.mrb[14].mxu1 %vm2217_vm2, %v23380_v30  ;;  %v2353_v30 = vld [vmem:[#allocation2 + $0x5f] sm:$0xff] }
 0x269   :  { %19026 = vmatprep.mubr.msk.f32.mxu1 %vm2217_vm2, %v23388_v31  ;;  %v2354_v31 = vld [vmem:[#allocation2 + $0x67] sm:$0xff] }
 0x26a   :  { %18385 = vmatmul.mubr.msk.f32.gmra.mrb[130].mxu0 %vm2217_vm2, %v2349_v50  ;;  %v16192_v50 = vld [vmem:[%s26380_s5 + $0xd8] sm:$0xff] }
 0x26b   :  { %18387 = vmatprep.mubr.msk.f32.mxu0 %vm2217_vm2, %v2350_v45  ;;  %v20029_v45 = vpack.c.bf16 %v15712_v53, %v15711_v35  ;;  %v23949_v35 = vld [vmem:[#allocation2 + $0xe1] sm:$0xff]  ;;  %v2419_v53 = vld [vmem:[#allocation2 + $0x26f] sm:$0xff] }
 0x26c   :  { %19027 = vmatmul.mubr.msk.f32.gmra.mrb[16].mxu1 %vm2217_vm2, %v23392_v3  ;;  %v2355_v3 = vld [vmem:[#allocation2 + $0x6f] sm:$0xff] }
 0x26d   :  { %19029 = vmatprep.mubr.msk.f32.mxu1 %vm2217_vm2, %v23400_v48  ;;  %v2356_v48 = vld [vmem:[#allocation2 + $0x77] sm:$0xff] }
 0x26e   :  { %18388 = vmatmul.mubr.msk.f32.gmra.mrb[132].mxu0 %vm2217_vm2, %v2351_v7  ;;  %v23827_v7 = vld [vmem:[#allocation2 + $0x21] sm:$0xff] }
 0x26f   :  { %18390 = vmatprep.mubr.msk.f32.mxu0 %vm2217_vm2, %v2352_v28  ;;  %v2395_v28 = vld [vmem:[#allocation2 + $0x1af] sm:$0xff] }
 0x270   :  { %19030 = vmatmul.mubr.msk.f32.gmra.mrb[18].mxu1 %vm2217_vm2, %v23404_v62  ;;  %v2357_v62 = vld [vmem:[#allocation2 + $0x7f] sm:$0xff] }
 0x271   :  { %19032 = vmatprep.mubr.msk.f32.mxu1 %vm2217_vm2, %v23412_v55  ;;  %v2358_v55 = vld [vmem:[#allocation2 + $0x87] sm:$0xff] }
 0x272   :  { %18391 = vmatmul.mubr.msk.f32.gmra.mrb[134].mxu0 %vm2217_vm2, %v2353_v30  ;;  %v2396_v30 = vld [vmem:[#allocation2 + $0x1b7] sm:$0xff] }
 0x273   :  { %18393 = vmatprep.mubr.msk.f32.mxu0 %vm2217_vm2, %v2354_v31  ;;  %v20061_v31 = vpack.c.bf16 %v16192_v50, %v16191_v0  ;;  %v23955_v0 = vld [vmem:[#allocation2 + $0xe9] sm:$0xff]  ;;  %v23959_v50 = vld [vmem:[#allocation2 + $0xf1] sm:$0xff] }
 0x274   :  { %19033 = vmatmul.mubr.msk.f32.gmra.mrb[20].mxu1 %vm2217_vm2, %v23416_v8  ;;  %v2359_v8 = vld [vmem:[#allocation2 + $0x8f] sm:$0xff] }
 0x275   :  { %19035 = vmatprep.mubr.msk.f32.mxu1 %vm2217_vm2, %v23424_v4  ;;  %v2360_v4 = vld [vmem:[#allocation2 + $0x97] sm:$0xff] }
 0x276   :  { %18394 = vmatmul.mubr.msk.f32.gmra.mrb[136].mxu0 %vm2217_vm2, %v2355_v3  ;;  %v23833_v3 = vld [vmem:[#allocation2 + $0x29] sm:$0xff] }
 0x277   :  { %18396 = vmatprep.mubr.msk.f32.mxu0 %vm2217_vm2, %v2356_v48  ;;  %v23837_v48 = vld [vmem:[#allocation2 + $0x31] sm:$0xff] }
 0x278   :  { %19036 = vmatmul.mubr.msk.f32.gmra.mrb[22].mxu1 %vm2217_vm2, %v23428_v39  ;;  %v2361_v39 = vld [vmem:[#allocation2 + $0x9f] sm:$0xff] }
 0x279   :  { %19038 = vmatprep.mubr.msk.f32.mxu1 %vm2217_vm2, %v23436_v40  ;;  %v2362_v40 = vld [vmem:[#allocation2 + $0xa7] sm:$0xff] }
 0x27a   :  { %18397 = vmatmul.mubr.msk.f32.gmra.mrb[138].mxu0 %vm2217_vm2, %v2357_v62  ;;  %v26486_v62 = vld [vmem:[#allocation17_spill] sm:$0xff] }
 0x27b   :  { %18399 = vmatprep.mubr.msk.f32.mxu0 %vm2217_vm2, %v2358_v55  ;;  %v2397_v55 = vld [vmem:[#allocation2 + $0x1bf] sm:$0xff] }
 0x27c   :  { %19039 = vmatmul.mubr.msk.f32.gmra.mrb[24].mxu1 %vm2217_vm2, %v23440_v12  ;;  %v2363_v12 = vld [vmem:[#allocation2 + $0xaf] sm:$0xff] }
 0x27d   :  { %19041 = vmatprep.mubr.msk.f32.mxu1 %vm2217_vm2, %v23448_v44  ;;  %v2364_v44 = vld [vmem:[#allocation2 + $0xb7] sm:$0xff] }
 0x27e   :  { %18400 = vmatmul.mubr.msk.f32.gmra.mrb[140].mxu0 %vm2217_vm2, %v2359_v8  ;;  %v2398_v8 = vld [vmem:[#allocation2 + $0x1c7] sm:$0xff] }
 0x27f   :  { %18402 = vmatprep.mubr.msk.f32.mxu0 %vm2217_vm2, %v2360_v4  ;;  %v23845_v4 = vld [vmem:[#allocation2 + $0x39] sm:$0xff] }
 0x280   :  { %19042 = vmatmul.mubr.msk.f32.gmra.mrb[26].mxu1 %vm2217_vm2, %v23452_v19  ;;  %v2365_v19 = vld [vmem:[#allocation2 + $0xbf] sm:$0xff] }
 0x281   :  { %19044 = vmatprep.mubr.msk.f32.mxu1 %vm2217_vm2, %v23460_v51  ;;  %v2366_v51 = vld [vmem:[#allocation2 + $0xc7] sm:$0xff] }
 0x282   :  { %18403 = vmatmul.mubr.msk.f32.gmra.mrb[142].mxu0 %vm2217_vm2, %v2361_v39  ;;  %v23849_v39 = vld [vmem:[#allocation2 + $0x41] sm:$0xff] }
 0x283   :  { %18405 = vmatprep.mubr.msk.f32.mxu0 %vm2217_vm2, %v2362_v40  ;;  %v2400_v40 = vld [vmem:[#allocation2 + $0x1d7] sm:$0xff] }
 0x284   :  { %19045 = vmatmul.mubr.msk.f32.gmra.mrb[28].mxu1 %vm2217_vm2, %v23464_v5  ;;  %v2367_v5 = vld [vmem:[#allocation2 + $0xcf] sm:$0xff] }
 0x285   :  { %19047 = vmatprep.mubr.msk.f32.mxu1 %vm2217_vm2, %v23472_v56  ;;  %v2368_v56 = vld [vmem:[#allocation2 + $0xd7] sm:$0xff] }
 0x286   :  { %18406 = vmatmul.mubr.msk.f32.gmra.mrb[144].mxu0 %vm2217_vm2, %v2363_v12  ;;  %v23855_v12 = vld [vmem:[#allocation2 + $0x49] sm:$0xff] }
 0x287   :  { %18408 = vmatprep.mubr.msk.f32.mxu0 %vm2217_vm2, %v2364_v44  ;;  %v23859_v44 = vld [vmem:[#allocation2 + $0x51] sm:$0xff] }
 0x288   :  { %19048 = vmatmul.mubr.msk.f32.gmra.mrb[30].mxu1 %vm2217_vm2, %v23476_v9  ;;  %v2369_v9 = vld [vmem:[#allocation2 + $0xdf] sm:$0xff] }
 0x289   :  { %19050 = vmatprep.mubr.msk.f32.mxu1 %vm2217_vm2, %v23484_v11  ;;  %v2370_v11 = vld [vmem:[#allocation2 + $0xe7] sm:$0xff] }
 0x28a   :  { %18409 = vmatmul.mubr.msk.f32.gmra.mrb[146].mxu0 %vm2217_vm2, %v2365_v19  ;;  %v2401_v19 = vld [vmem:[#allocation2 + $0x1df] sm:$0xff] }
 0x28b   :  { %18411 = vmatprep.mubr.msk.f32.mxu0 %vm2217_vm2, %v2366_v51  ;;  %v2402_v51 = vld [vmem:[#allocation2 + $0x1e7] sm:$0xff] }
 0x28c   :  { %19051 = vmatmul.mubr.msk.f32.gmra.mrb[32].mxu1 %vm2217_vm2, %v23488_v59  ;;  %v2371_v59 = vld [vmem:[#allocation2 + $0xef] sm:$0xff] }
 0x28d   :  { %19053 = vmatprep.mubr.msk.f32.mxu1 %vm2217_vm2, %v23496_v37  ;;  %v2372_v37 = vld [vmem:[#allocation2 + $0xf7] sm:$0xff] }
 0x28e   :  { %18412 = vmatmul.mubr.msk.f32.gmra.mrb[148].mxu0 %vm2217_vm2, %v2367_v5  ;;  %v23865_v5 = vld [vmem:[#allocation2 + $0x59] sm:$0xff] }
 0x28f   :  { %18414 = vmatprep.mubr.msk.f32.mxu0 %vm2217_vm2, %v2368_v56  ;;  %v23869_v56 = vld [vmem:[#allocation2 + $0x61] sm:$0xff] }
 0x290   :  { %19054 = vmatmul.mubr.msk.f32.gmra.mrb[34].mxu1 %vm2217_vm2, %v23500_v42  ;;  %v2373_v42 = vld [vmem:[#allocation2 + $0xff] sm:$0xff] }
 0x291   :  { %19056 = vmatprep.mubr.msk.f32.mxu1 %vm2217_vm2, %v23508_v60  ;;  %v2374_v60 = vld [vmem:[#allocation2 + $0x107] sm:$0xff] }
 0x292   :  { %18415 = vmatmul.mubr.msk.f32.gmra.mrb[150].mxu0 %vm2217_vm2, %v2369_v9  ;;  %v2403_v9 = vld [vmem:[#allocation2 + $0x1ef] sm:$0xff] }
 0x293   :  { %18417 = vmatprep.mubr.msk.f32.mxu0 %vm2217_vm2, %v2370_v11  ;;  %v2404_v11 = vld [vmem:[#allocation2 + $0x1f7] sm:$0xff] }
 0x294   :  { %19057 = vmatmul.mubr.msk.f32.gmra.mrb[36].mxu1 %vm2217_vm2, %v23512_v6  ;;  %v2375_v6 = vld [vmem:[#allocation2 + $0x10f] sm:$0xff] }
 0x295   :  { %19059 = vmatprep.mubr.msk.f32.mxu1 %vm2217_vm2, %v23520_v14  ;;  %v2376_v14 = vld [vmem:[#allocation2 + $0x117] sm:$0xff] }
 0x296   :  { %18418 = vmatmul.mubr.msk.f32.gmra.mrb[152].mxu0 %vm2217_vm2, %v2371_v59  ;;  %v23875_v59 = vld [vmem:[#allocation2 + $0x69] sm:$0xff] }
 0x297   :  { %18420 = vmatprep.mubr.msk.f32.mxu0 %vm2217_vm2, %v2372_v37  ;;  %v23879_v37 = vld [vmem:[#allocation2 + $0x71] sm:$0xff] }
 0x298   :  { %19060 = vmatmul.mubr.msk.f32.gmra.mrb[38].mxu1 %vm2217_vm2, %v23524_v38  ;;  %v2377_v38 = vld [vmem:[#allocation2 + $0x11f] sm:$0xff] }
 0x299   :  { %19062 = vmatprep.mubr.msk.f32.mxu1 %vm2217_vm2, %v23532_v26  ;;  %v2378_v26 = vld [vmem:[#allocation2 + $0x127] sm:$0xff] }
 0x29a   :  { %18421 = vmatmul.mubr.msk.f32.gmra.mrb[154].mxu0 %vm2217_vm2, %v2373_v42  ;;  %v2405_v42 = vld [vmem:[#allocation2 + $0x1ff] sm:$0xff] }
 0x29b   :  { %18423 = vmatprep.mubr.msk.f32.mxu0 %vm2217_vm2, %v2374_v60  ;;  %v2406_v60 = vld [vmem:[#allocation2 + $0x207] sm:$0xff] }
 0x29c   :  { %19063 = vmatmul.mubr.msk.f32.gmra.mrb[40].mxu1 %vm2217_vm2, %v23536_v52  ;;  %v2379_v52 = vld [vmem:[#allocation2 + $0x12f] sm:$0xff] }
 0x29d   :  { %19065 = vmatprep.mubr.msk.f32.mxu1 %vm2217_vm2, %v23544_v21  ;;  %v2380_v21 = vld [vmem:[#allocation2 + $0x137] sm:$0xff] }
 0x29e   :  { %18424 = vmatmul.mubr.msk.f32.gmra.mrb[156].mxu0 %vm2217_vm2, %v2375_v6  ;;  %v23885_v6 = vld [vmem:[#allocation2 + $0x79] sm:$0xff] }
 0x29f   :  { %18426 = vmatprep.mubr.msk.f32.mxu0 %vm2217_vm2, %v2376_v14  ;;  %v23889_v14 = vld [vmem:[#allocation2 + $0x81] sm:$0xff] }
 0x2a0   :  { %19066 = vmatmul.mubr.msk.f32.gmra.mrb[42].mxu1 %vm2217_vm2, %v23548_v27  ;;  %v2381_v27 = vld [vmem:[#allocation2 + $0x13f] sm:$0xff] }
 0x2a1   :  { %19068 = vmatprep.mubr.msk.f32.mxu1 %vm2217_vm2, %v23556_v47  ;;  %v2382_v47 = vld [vmem:[#allocation2 + $0x147] sm:$0xff] }
 0x2a2   :  { %18427 = vmatmul.mubr.msk.f32.gmra.mrb[158].mxu0 %vm2217_vm2, %v2377_v38  ;;  %v2407_v38 = vld [vmem:[#allocation2 + $0x20f] sm:$0xff] }
 0x2a3   :  { %18429 = vmatprep.mubr.msk.f32.mxu0 %vm2217_vm2, %v2378_v26  ;;  %v2408_v26 = vld [vmem:[#allocation2 + $0x217] sm:$0xff] }
 0x2a4   :  { %19069 = vmatmul.mubr.msk.f32.gmra.mrb[44].mxu1 %vm2217_vm2, %v23560_v22  ;;  %v2383_v22 = vld [vmem:[#allocation2 + $0x14f] sm:$0xff] }
 0x2a5   :  { %19071 = vmatprep.mubr.msk.f32.mxu1 %vm2217_vm2, %v23568_v41  ;;  %v2384_v41 = vld [vmem:[#allocation2 + $0x157] sm:$0xff] }
 0x2a6   :  { %18430 = vmatmul.mubr.msk.f32.gmra.mrb[160].mxu0 %vm2217_vm2, %v2379_v52  ;;  %v23895_v52 = vld [vmem:[#allocation2 + $0x89] sm:$0xff] }
 0x2a7   :  { %18432 = vmatprep.mubr.msk.f32.mxu0 %vm2217_vm2, %v2380_v21  ;;  %v23899_v21 = vld [vmem:[#allocation2 + $0x91] sm:$0xff] }
 0x2a8   :  { %19072 = vmatmul.mubr.msk.f32.gmra.mrb[46].mxu1 %vm2217_vm2, %v23572_v1  ;;  %v2385_v1 = vld [vmem:[#allocation2 + $0x15f] sm:$0xff] }
 0x2a9   :  { %19074 = vmatprep.mubr.msk.f32.mxu1 %vm2217_vm2, %v23580_v54  ;;  %v2386_v54 = vld [vmem:[#allocation2 + $0x167] sm:$0xff] }
 0x2aa   :  { %18433 = vmatmul.mubr.msk.f32.gmra.mrb[162].mxu0 %vm2217_vm2, %v2381_v27  ;;  %v2409_v27 = vld [vmem:[#allocation2 + $0x21f] sm:$0xff] }
 0x2ab   :  { %18435 = vmatprep.mubr.msk.f32.mxu0 %vm2217_vm2, %v2382_v47  ;;  %v2410_v47 = vld [vmem:[#allocation2 + $0x227] sm:$0xff] }
 0x2ac   :  { %19075 = vmatmul.mubr.msk.f32.gmra.mrb[48].mxu1 %vm2217_vm2, %v23584_v15  ;;  %v2387_v15 = vld [vmem:[#allocation2 + $0x16f] sm:$0xff] }
 0x2ad   :  { %19077 = vmatprep.mubr.msk.f32.mxu1 %vm2217_vm2, %v23600_v23  ;;  %v2388_v23 = vld [vmem:[#allocation2 + $0x177] sm:$0xff] }
 0x2ae   :  { %18436 = vmatmul.mubr.msk.f32.gmra.mrb[164].mxu0 %vm2217_vm2, %v2383_v22  ;;  %v23905_v22 = vld [vmem:[#allocation2 + $0x99] sm:$0xff] }
 0x2af   :  { %18438 = vmatprep.mubr.msk.f32.mxu0 %vm2217_vm2, %v2384_v41  ;;  %v23909_v41 = vld [vmem:[#allocation2 + $0xa1] sm:$0xff] }
 0x2b0   :  { %19078 = vmatmul.mubr.msk.f32.gmra.mrb[50].mxu1 %vm2217_vm2, %v23605_v16  ;;  %v2389_v16 = vld [vmem:[#allocation2 + $0x17f] sm:$0xff] }
 0x2b1   :  { %19080 = vmatprep.mubr.msk.f32.mxu1 %vm2217_vm2, %v23613_v25  ;;  %v2390_v25 = vld [vmem:[#allocation2 + $0x187] sm:$0xff] }
 0x2b2   :  { %18439 = vmatmul.mubr.msk.f32.gmra.mrb[166].mxu0 %vm2217_vm2, %v2385_v1  ;;  %v2411_v1 = vld [vmem:[#allocation2 + $0x22f] sm:$0xff] }
 0x2b3   :  { %18441 = vmatprep.mubr.msk.f32.mxu0 %vm2217_vm2, %v2386_v54  ;;  %v2412_v54 = vld [vmem:[#allocation2 + $0x237] sm:$0xff] }
 0x2b4   :  { %19081 = vmatmul.mubr.msk.f32.gmra.mrb[52].mxu1 %vm2217_vm2, %v23617_v61  ;;  %v2391_v61 = vld [vmem:[#allocation2 + $0x18f] sm:$0xff] }
 0x2b5   :  { %19083 = vmatprep.mubr.msk.f32.mxu1 %vm2217_vm2, %v23625_v36  ;;  %v2392_v36 = vld [vmem:[#allocation2 + $0x197] sm:$0xff] }
 0x2b6   :  { %18442 = vmatmul.mubr.msk.f32.gmra.mrb[168].mxu0 %vm2217_vm2, %v2387_v15  ;;  %v23915_v15 = vld [vmem:[#allocation2 + $0xa9] sm:$0xff] }
 0x2b7   :  { %18444 = vmatprep.mubr.msk.f32.mxu0 %vm2217_vm2, %v2388_v23  ;;  %v23919_v23 = vld [vmem:[#allocation2 + $0xb1] sm:$0xff] }
 0x2b8   :  { %19084 = vmatmul.mubr.msk.f32.gmra.mrb[54].mxu1 %vm2217_vm2, %v23629_v58  ;;  %v15709_v58 = vld [vmem:[%s26380_s5 + $0x40] sm:$0xff] }
 0x2b9   :  { %19086 = vmatprep.mubr.msk.f32.mxu1 %vm2217_vm2, %v23637_v32  ;;  %v15710_v32 = vld [vmem:[%s26380_s5 + $0x48] sm:$0xff] }
 0x2ba   :  { %18445 = vmatmul.mubr.msk.f32.gmra.mrb[170].mxu0 %vm2217_vm2, %v2389_v16  ;;  %v20025_v24 = vpack.c.bf16 %v15710_v32, %v15709_v58  ;;  %v2413_v16 = vld [vmem:[#allocation2 + $0x23f] sm:$0xff]  ;;  %v2415_v58 = vld [vmem:[#allocation2 + $0x24f] sm:$0xff]  ;;  %v2416_v32 = vld [vmem:[#allocation2 + $0x257] sm:$0xff] }
 0x2bb   :  { %18447 = vmatprep.mubr.msk.f32.mxu0 %vm2217_vm2, %v2390_v25  ;;  %v2414_v25 = vld [vmem:[#allocation2 + $0x247] sm:$0xff] }
 0x2bc   :  { %19087 = vmatmul.mubr.msk.f32.gmra.mrb[56].mxu1 %vm2217_vm2, %v23641_v49  ;;  %v7143_v49 = vld [vmem:[#allocation2 + $0x3b0] sm:$0xff]  ;;  %20026 = vmatprep.subr.bf16.mxu0 %v20025_v24 }
 0x2bd   :  { %19089 = vmatprep.mubr.msk.f32.mxu1 %vm2217_vm2, %v23649_v18  ;;  %v2393_v18 = vld [vmem:[#allocation2 + $0x19f] sm:$0xff]  ;;  %20028 = vmatpush3.bf16.msra.mxu0 %v20025_v24  ;;  %v23939_v24 = vld [vmem:[#allocation2 + $0xd1] sm:$0xff] }
 0x2be   :  { %18448 = vmatmul.mubr.msk.f32.gmra.mrb[172].mxu0 %vm2217_vm2, %v2391_v61  ;;  %20030 = vmatprep.subr.bf16.mxu0 %v20029_v45  ;;  %v23925_v61 = vld [vmem:[#allocation2 + $0xb9] sm:$0xff] }
 0x2bf   :  { %18450 = vmatprep.mubr.msk.f32.mxu0 %vm2217_vm2, %v2392_v36  ;;  %v23929_v36 = vld [vmem:[#allocation2 + $0xc1] sm:$0xff] }
 0x2c0   :  { %19090 = vmatmul.mubr.msk.f32.gmra.mrb[58].mxu1 %vm2217_vm2, %v7142_v63  ;;  %v23935_v63 = vld [vmem:[#allocation2 + $0xc9] sm:$0xff] }
 0x2c1   :  { %19092 = vmatprep.mubr.msk.f32.mxu1 %vm2217_vm2, %v7143_v49  ;;  %20032 = vmatpush3.bf16.msra.mxu0 %v20029_v45  ;;  %v2417_v49 = vld [vmem:[#allocation2 + $0x25f] sm:$0xff] }
 0x2c2   :  { %18451 = vmatmul.mubr.msk.f32.gmra.mrb[174].mxu0 %vm2217_vm2, %v2393_v18  ;;  %20034 = vmatprep.subr.bf16.mxu0 %v26486_v62  ;;  %v2418_v18 = vld [vmem:[#allocation2 + $0x267] sm:$0xff]  ;;  %v2421_v45 = vld [vmem:[#allocation2 + $0x27f] sm:$0xff] }
 0x2c3   :  { %18453 = vmatprep.mubr.msk.f32.mxu0 %vm2217_vm2, %v2394_v13  ;;  %v23945_v13 = vld [vmem:[#allocation2 + $0xd9] sm:$0xff] }
 0x2c4   :  { %19093 = vmatmul.mubr.msk.f32.gmra.mrb[60].mxu1 %vm2217_vm2, %v7144_v57  ;;  %v2420_v57 = vld [vmem:[#allocation2 + $0x277] sm:$0xff] }
 0x2c5   :  { %19103 = vmatprep.mubr.msk.f32.mxu1 %vm2217_vm2, %v23827_v7 }
 0x2c6   :  { %18454 = vmatmul.mubr.msk.f32.gmra.mrb[176].mxu0 %vm2217_vm2, %v2395_v28  ;;  %v2422_v28 = vld [vmem:[#allocation2 + $0x287] sm:$0xff] }
 0x2c7   :  { %18456 = vmatprep.mubr.msk.f32.mxu0 %vm2217_vm2, %v2396_v30  ;;  %v23965_v30 = vld [vmem:[#allocation2 + $0xf9] sm:$0xff] }
 0x2c8   :  { %19104 = vmatmul.mubr.msk.f32.vlgmr.msra.gmra.mrb[62].mxu1 %vm2217_vm2, %v23833_v3 }
 0x2c9   :  { %20060 = vmatpush3.bf16.msra.mxu1 %v23594_v43  ;;  %19106 = vmatprep.mubr.msk.f32.mxu1 %vm2217_vm2, %v23837_v48  ;;  %v2399_v43 = vld [vmem:[#allocation2 + $0x1cf] sm:$0xff] }
 0x2ca   :  { %18457 = vmatmul.mubr.msk.f32.gmra.mrb[178].mxu0 %vm2217_vm2, %v2397_v55  ;;  %20062 = vmatprep.subr.bf16.mxu1 %v20061_v31  ;;  %v2423_v55 = vld [vmem:[#allocation2 + $0x28f] sm:$0xff] }
 0x2cb   :  { %18459 = vmatprep.mubr.msk.f32.mxu0 %vm2217_vm2, %v2398_v8  ;;  %v2424_v8 = vld [vmem:[#allocation2 + $0x297] sm:$0xff] }
 0x2cc   :  { %19107 = vmatmul.mubr.msk.f32.gmra.mrb[64].mxu1 %vm2217_vm2, %v23845_v4 }
 0x2cd   :  { %19109 = vmatprep.mubr.msk.f32.mxu1 %vm2217_vm2, %v23849_v39  ;;  %20064 = vmatpush3.bf16.msra.mxu1 %v20061_v31  ;;  %v23969_v31 = vld [vmem:[#allocation2 + $0x101] sm:$0xff] }
 0x2ce   :  { %18460 = vmatmul.mubr.msk.f32.gmra.mrb[180].mxu0 %vm2217_vm2, %v2399_v43  ;;  %v23975_v43 = vld [vmem:[#allocation2 + $0x109] sm:$0xff] }
 0x2cf   :  { %18462 = vmatprep.mubr.msk.f32.mxu0 %vm2217_vm2, %v2400_v40  ;;  %v23979_v40 = vld [vmem:[#allocation2 + $0x111] sm:$0xff] }
 0x2d0   :  { %19110 = vmatmul.mubr.msk.f32.gmra.mrb[66].mxu1 %vm2217_vm2, %v23855_v12 }
 0x2d1   :  { %19112 = vmatprep.mubr.msk.f32.mxu1 %vm2217_vm2, %v23859_v44 }
 0x2d2   :  { %18463 = vmatmul.mubr.msk.f32.gmra.mrb[182].mxu0 %vm2217_vm2, %v2401_v19  ;;  %v2425_v19 = vld [vmem:[#allocation2 + $0x29f] sm:$0xff] }
 0x2d3   :  { %18465 = vmatprep.mubr.msk.f32.mxu0 %vm2217_vm2, %v2402_v51  ;;  %v2426_v51 = vld [vmem:[#allocation2 + $0x2a7] sm:$0xff] }
 0x2d4   :  { %19113 = vmatmul.mubr.msk.f32.gmra.mrb[68].mxu1 %vm2217_vm2, %v23865_v5 }
 0x2d5   :  { %19115 = vmatprep.mubr.msk.f32.mxu1 %vm2217_vm2, %v23869_v56 }
 0x2d6   :  { %18466 = vmatmul.mubr.msk.f32.gmra.mrb[184].mxu0 %vm2217_vm2, %v2403_v9  ;;  %v23985_v9 = vld [vmem:[#allocation2 + $0x119] sm:$0xff] }
 0x2d7   :  { %18468 = vmatprep.mubr.msk.f32.mxu0 %vm2217_vm2, %v2404_v11  ;;  %v23989_v11 = vld [vmem:[#allocation2 + $0x121] sm:$0xff] }
 0x2d8   :  { %19116 = vmatmul.mubr.msk.f32.gmra.mrb[70].mxu1 %vm2217_vm2, %v23875_v59 }
 0x2d9   :  { %19118 = vmatprep.mubr.msk.f32.mxu1 %vm2217_vm2, %v23879_v37 }
 0x2da   :  { %18469 = vmatmul.mubr.msk.f32.gmra.mrb[186].mxu0 %vm2217_vm2, %v2405_v42  ;;  %v2427_v42 = vld [vmem:[#allocation2 + $0x2af] sm:$0xff] }
 0x2db   :  { %18471 = vmatprep.mubr.msk.f32.mxu0 %vm2217_vm2, %v2406_v60  ;;  %v2428_v60 = vld [vmem:[#allocation2 + $0x2b7] sm:$0xff] }
 0x2dc   :  { %19119 = vmatmul.mubr.msk.f32.gmra.mrb[72].mxu1 %vm2217_vm2, %v23885_v6 }
 0x2dd   :  { %19121 = vmatprep.mubr.msk.f32.mxu1 %vm2217_vm2, %v23889_v14 }
 0x2de   :  { %18472 = vmatmul.mubr.msk.f32.gmra.mrb[188].mxu0 %vm2217_vm2, %v2407_v38  ;;  %v23995_v38 = vld [vmem:[#allocation2 + $0x129] sm:$0xff] }
 0x2df   :  { %18474 = vmatprep.mubr.msk.f32.mxu0 %vm2217_vm2, %v2408_v26  ;;  %v23999_v26 = vld [vmem:[#allocation2 + $0x131] sm:$0xff] }
 0x2e0   :  { %19122 = vmatmul.mubr.msk.f32.gmra.mrb[74].mxu1 %vm2217_vm2, %v23895_v52 }
 0x2e1   :  { %19124 = vmatprep.mubr.msk.f32.mxu1 %vm2217_vm2, %v23899_v21 }
 0x2e2   :  { %18475 = vmatmul.mubr.msk.f32.gmra.mrb[190].mxu0 %vm2217_vm2, %v2409_v27  ;;  %v2429_v27 = vld [vmem:[#allocation2 + $0x2bf] sm:$0xff] }
 0x2e3   :  { %18477 = vmatprep.mubr.msk.f32.mxu0 %vm2217_vm2, %v2410_v47  ;;  %v2430_v47 = vld [vmem:[#allocation2 + $0x2c7] sm:$0xff] }
 0x2e4   :  { %19125 = vmatmul.mubr.msk.f32.gmra.mrb[76].mxu1 %vm2217_vm2, %v23905_v22 }
 0x2e5   :  { %19127 = vmatprep.mubr.msk.f32.mxu1 %vm2217_vm2, %v23909_v41 }
 0x2e6   :  { %18478 = vmatmul.mubr.msk.f32.gmra.mrb[192].mxu0 %vm2217_vm2, %v2411_v1  ;;  %v24005_v1 = vld [vmem:[#allocation2 + $0x139] sm:$0xff] }
 0x2e7   :  { %18480 = vmatprep.mubr.msk.f32.mxu0 %vm2217_vm2, %v2412_v54  ;;  %v24009_v54 = vld [vmem:[#allocation2 + $0x141] sm:$0xff] }
 0x2e8   :  { %19128 = vmatmul.mubr.msk.f32.gmra.mrb[78].mxu1 %vm2217_vm2, %v23915_v15 }
 0x2e9   :  { %19130 = vmatprep.mubr.msk.f32.mxu1 %vm2217_vm2, %v23919_v23 }
 0x2ea   :  { %18481 = vmatmul.mubr.msk.f32.gmra.mrb[194].mxu0 %vm2217_vm2, %v2413_v16  ;;  %v2431_v16 = vld [vmem:[#allocation2 + $0x2cf] sm:$0xff] }
 0x2eb   :  { %18483 = vmatprep.mubr.msk.f32.mxu0 %vm2217_vm2, %v2414_v25  ;;  %v2432_v25 = vld [vmem:[#allocation2 + $0x2d7] sm:$0xff] }
 0x2ec   :  { %19131 = vmatmul.mubr.msk.f32.gmra.mrb[80].mxu1 %vm2217_vm2, %v23925_v61 }
 0x2ed   :  { %19133 = vmatprep.mubr.msk.f32.mxu1 %vm2217_vm2, %v23929_v36 }
 0x2ee   :  { %18484 = vmatmul.mubr.msk.f32.gmra.mrb[196].mxu0 %vm2217_vm2, %v2415_v58  ;;  %v24015_v58 = vld [vmem:[#allocation2 + $0x149] sm:$0xff] }
 0x2ef   :  { %18486 = vmatprep.mubr.msk.f32.mxu0 %vm2217_vm2, %v2416_v32  ;;  %v24019_v32 = vld [vmem:[#allocation2 + $0x151] sm:$0xff] }
 0x2f0   :  { %19134 = vmatmul.mubr.msk.f32.gmra.mrb[82].mxu1 %vm2217_vm2, %v23935_v63 }
 0x2f1   :  { %19136 = vmatprep.mubr.msk.f32.mxu1 %vm2217_vm2, %v23939_v24 }
 0x2f2   :  { %18487 = vmatmul.mubr.msk.f32.gmra.mrb[198].mxu0 %vm2217_vm2, %v2417_v49  ;;  %v2433_v49 = vld [vmem:[#allocation2 + $0x2df] sm:$0xff] }
 0x2f3   :  { %18489 = vmatprep.mubr.msk.f32.mxu0 %vm2217_vm2, %v2418_v18  ;;  %v2434_v18 = vld [vmem:[#allocation2 + $0x2e7] sm:$0xff] }
 0x2f4   :  { %19137 = vmatmul.mubr.msk.f32.gmra.mrb[84].mxu1 %vm2217_vm2, %v23945_v13 }
 0x2f5   :  { %19139 = vmatprep.mubr.msk.f32.mxu1 %vm2217_vm2, %v23949_v35 }
 0x2f6   :  { %18490 = vmatmul.mubr.msk.f32.gmra.mrb[200].mxu0 %vm2217_vm2, %v2419_v53  ;;  %v24025_v53 = vld [vmem:[#allocation2 + $0x159] sm:$0xff] }
 0x2f7   :  { %18492 = vmatprep.mubr.msk.f32.mxu0 %vm2217_vm2, %v2420_v57  ;;  %v24029_v57 = vld [vmem:[#allocation2 + $0x161] sm:$0xff] }
 0x2f8   :  { %19140 = vmatmul.mubr.msk.f32.gmra.mrb[86].mxu1 %vm2217_vm2, %v23955_v0 }
 0x2f9   :  { %19142 = vmatprep.mubr.msk.f32.mxu1 %vm2217_vm2, %v23959_v50 }
 0x2fa   :  { %18493 = vmatmul.mubr.msk.f32.gmra.mrb[202].mxu0 %vm2217_vm2, %v2421_v45  ;;  %v2435_v45 = vld [vmem:[#allocation2 + $0x2ef] sm:$0xff] }
 0x2fb   :  { %18495 = vmatprep.mubr.msk.f32.mxu0 %vm2217_vm2, %v2422_v28  ;;  %v2436_v28 = vld [vmem:[#allocation2 + $0x2f7] sm:$0xff] }
 0x2fc   :  { %19143 = vmatmul.mubr.msk.f32.gmra.mrb[88].mxu1 %vm2217_vm2, %v23965_v30 }
 0x2fd   :  { %19145 = vmatprep.mubr.msk.f32.mxu1 %vm2217_vm2, %v23969_v31 }
 0x2fe   :  { %18496 = vmatmul.mubr.msk.f32.gmra.mrb[204].mxu0 %vm2217_vm2, %v2423_v55  ;;  %v24035_v55 = vld [vmem:[#allocation2 + $0x169] sm:$0xff] }
 0x2ff   :  { %18498 = vmatprep.mubr.msk.f32.mxu0 %vm2217_vm2, %v2424_v8  ;;  %v24039_v8 = vld [vmem:[#allocation2 + $0x171] sm:$0xff] }
 0x300   :  { %19146 = vmatmul.mubr.msk.f32.gmra.mrb[90].mxu1 %vm2217_vm2, %v23975_v43 }
 0x301   :  { %19148 = vmatprep.mubr.msk.f32.mxu1 %vm2217_vm2, %v23979_v40 }
 0x302   :  { %18499 = vmatmul.mubr.msk.f32.gmra.mrb[206].mxu0 %vm2217_vm2, %v2425_v19  ;;  %v2437_v19 = vld [vmem:[#allocation2 + $0x2ff] sm:$0xff] }
 0x303   :  { %18501 = vmatprep.mubr.msk.f32.mxu0 %vm2217_vm2, %v2426_v51  ;;  %v2438_v51 = vld [vmem:[#allocation2 + $0x307] sm:$0xff] }
 0x304   :  { %19149 = vmatmul.mubr.msk.f32.gmra.mrb[92].mxu1 %vm2217_vm2, %v23985_v9 }
 0x305   :  { %19151 = vmatprep.mubr.msk.f32.mxu1 %vm2217_vm2, %v23989_v11 }
 0x306   :  { %18502 = vmatmul.mubr.msk.f32.gmra.mrb[208].mxu0 %vm2217_vm2, %v2427_v42  ;;  %v24045_v42 = vld [vmem:[#allocation2 + $0x179] sm:$0xff] }
 0x307   :  { %18504 = vmatprep.mubr.msk.f32.mxu0 %vm2217_vm2, %v2428_v60  ;;  %v24049_v60 = vld [vmem:[#allocation2 + $0x181] sm:$0xff] }
 0x308   :  { %19152 = vmatmul.mubr.msk.f32.gmra.mrb[94].mxu1 %vm2217_vm2, %v23995_v38 }
 0x309   :  { %19154 = vmatprep.mubr.msk.f32.mxu1 %vm2217_vm2, %v23999_v26 }
 0x30a   :  { %18505 = vmatmul.mubr.msk.f32.gmra.mrb[210].mxu0 %vm2217_vm2, %v2429_v27  ;;  %v2439_v27 = vld [vmem:[#allocation2 + $0x30f] sm:$0xff] }
 0x30b   :  { %18507 = vmatprep.mubr.msk.f32.mxu0 %vm2217_vm2, %v2430_v47  ;;  %v2440_v47 = vld [vmem:[#allocation2 + $0x317] sm:$0xff] }
 0x30c   :  { %19155 = vmatmul.mubr.msk.f32.gmra.mrb[96].mxu1 %vm2217_vm2, %v24005_v1 }
 0x30d   :  { %19157 = vmatprep.mubr.msk.f32.mxu1 %vm2217_vm2, %v24009_v54 }
 0x30e   :  { %18508 = vmatmul.mubr.msk.f32.gmra.mrb[212].mxu0 %vm2217_vm2, %v2431_v16  ;;  %v24055_v16 = vld [vmem:[#allocation2 + $0x189] sm:$0xff] }
 0x30f   :  { %18510 = vmatprep.mubr.msk.f32.mxu0 %vm2217_vm2, %v2432_v25  ;;  %v24059_v25 = vld [vmem:[#allocation2 + $0x191] sm:$0xff] }
 0x310   :  { %19158 = vmatmul.mubr.msk.f32.gmra.mrb[98].mxu1 %vm2217_vm2, %v24015_v58 }
 0x311   :  { %19160 = vmatprep.mubr.msk.f32.mxu1 %vm2217_vm2, %v24019_v32 }
 0x312   :  { %18511 = vmatmul.mubr.msk.f32.gmra.mrb[214].mxu0 %vm2217_vm2, %v2433_v49  ;;  %v2441_v49 = vld [vmem:[#allocation2 + $0x31f] sm:$0xff] }
 0x313   :  { %18513 = vmatprep.mubr.msk.f32.mxu0 %vm2217_vm2, %v2434_v18  ;;  %v2442_v18 = vld [vmem:[#allocation2 + $0x327] sm:$0xff] }
 0x314   :  { %19161 = vmatmul.mubr.msk.f32.gmra.mrb[100].mxu1 %vm2217_vm2, %v24025_v53 }
 0x315   :  { %19163 = vmatprep.mubr.msk.f32.mxu1 %vm2217_vm2, %v24029_v57 }
 0x316   :  { %18514 = vmatmul.mubr.msk.f32.gmra.mrb[216].mxu0 %vm2217_vm2, %v2435_v45  ;;  %v24065_v45 = vld [vmem:[#allocation2 + $0x199] sm:$0xff] }
 0x317   :  { %18516 = vmatprep.mubr.msk.f32.mxu0 %vm2217_vm2, %v2436_v28  ;;  %v24069_v28 = vld [vmem:[#allocation2 + $0x1a1] sm:$0xff] }
 0x318   :  { %19164 = vmatmul.mubr.msk.f32.gmra.mrb[102].mxu1 %vm2217_vm2, %v24035_v55 }
 0x319   :  { %19166 = vmatprep.mubr.msk.f32.mxu1 %vm2217_vm2, %v24039_v8 }
 0x31a   :  { %18517 = vmatmul.mubr.msk.f32.gmra.mrb[218].mxu0 %vm2217_vm2, %v2437_v19  ;;  %v2443_v19 = vld [vmem:[#allocation2 + $0x32f] sm:$0xff] }
 0x31b   :  { %18519 = vmatprep.mubr.msk.f32.mxu0 %vm2217_vm2, %v2438_v51  ;;  %v2444_v51 = vld [vmem:[#allocation2 + $0x337] sm:$0xff] }
 0x31c   :  { %19167 = vmatmul.mubr.msk.f32.gmra.mrb[104].mxu1 %vm2217_vm2, %v24045_v42 }
 0x31d   :  { %19169 = vmatprep.mubr.msk.f32.mxu1 %vm2217_vm2, %v24049_v60 }
 0x31e   :  { %18520 = vmatmul.mubr.msk.f32.gmra.mrb[220].mxu0 %vm2217_vm2, %v2439_v27  ;;  %v24075_v27 = vld [vmem:[#allocation2 + $0x1a9] sm:$0xff] }
 0x31f   :  { %18522 = vmatprep.mubr.msk.f32.mxu0 %vm2217_vm2, %v2440_v47  ;;  %v24079_v47 = vld [vmem:[#allocation2 + $0x1b1] sm:$0xff] }
 0x320   :  { %19170 = vmatmul.mubr.msk.f32.gmra.mrb[106].mxu1 %vm2217_vm2, %v24055_v16 }
 0x321   :  { %19172 = vmatprep.mubr.msk.f32.mxu1 %vm2217_vm2, %v24059_v25 }
 0x322   :  { %18523 = vmatmul.mubr.msk.f32.gmra.mrb[222].mxu0 %vm2217_vm2, %v2441_v49  ;;  %v2445_v49 = vld [vmem:[#allocation2 + $0x33f] sm:$0xff] }
 0x323   :  { %18525 = vmatprep.mubr.msk.f32.mxu0 %vm2217_vm2, %v2442_v18  ;;  %v2446_v18 = vld [vmem:[#allocation2 + $0x347] sm:$0xff] }
 0x324   :  { %19173 = vmatmul.mubr.msk.f32.gmra.mrb[108].mxu1 %vm2217_vm2, %v24065_v45 }
 0x325   :  { %19175 = vmatprep.mubr.msk.f32.mxu1 %vm2217_vm2, %v24069_v28 }
 0x326   :  { %18526 = vmatmul.mubr.msk.f32.gmra.mrb[224].mxu0 %vm2217_vm2, %v2443_v19  ;;  %v24085_v19 = vld [vmem:[#allocation2 + $0x1b9] sm:$0xff] }
 0x327   :  { %18528 = vmatprep.mubr.msk.f32.mxu0 %vm2217_vm2, %v2444_v51  ;;  %v24089_v51 = vld [vmem:[#allocation2 + $0x1c1] sm:$0xff] }
 0x328   :  { %19176 = vmatmul.mubr.msk.f32.gmra.mrb[110].mxu1 %vm2217_vm2, %v24075_v27 }
 0x329   :  { %19178 = vmatprep.mubr.msk.f32.mxu1 %vm2217_vm2, %v24079_v47 }
 0x32a   :  { %18529 = vmatmul.mubr.msk.f32.gmra.mrb[226].mxu0 %vm2217_vm2, %v2445_v49  ;;  %v16309_v49 = vld [vmem:[%s26380_s5 + $0xe0] sm:$0xff] }
 0x32b   :  { %18531 = vmatprep.mubr.msk.f32.mxu0 %vm2217_vm2, %v2446_v18  ;;  %v16310_v18 = vld [vmem:[%s26380_s5 + $0xe8] sm:$0xff] }
 0x32c   :  { %19179 = vmatmul.mubr.msk.f32.gmra.mrb[112].mxu1 %vm2217_vm2, %v24085_v19  ;;  %v24103_v20 = vpack.c.bf16 %v16310_v18, %v16309_v49  ;;  %v24118_v49 = vld [vmem:[#allocation2 + $0x1e1] sm:$0xff]  ;;  %v2451_v18 = vld [vmem:[#allocation2 + $0x36f] sm:$0xff] }
 0x32d   :  { %19181 = vmatprep.mubr.msk.f32.mxu1 %vm2217_vm2, %v24089_v51  ;;  %26487 = vst [vmem:[#allocation25_spill] sm:$0xff] %v24118_v49 }
 0x32e   :  { %18532 = vmatmul.mubr.msk.f32.gmra.mrb[228].mxu0 %vm2217_vm2, %v2447_v34  ;;  %v2449_v34 = vld [vmem:[#allocation2 + $0x35f] sm:$0xff]  ;;  %20066 = vmatprep.subr.bf16.mxu1 %v24103_v20 }
 0x32f   :  { %18534 = vmatprep.mubr.msk.f32.mxu0 %vm2217_vm2, %v2448_v29  ;;  %v24114_v29 = vld [vmem:[#allocation2 + $0x1d9] sm:$0xff] }
 0x330   :  { %19182 = vmatmul.mubr.msk.f32.gmra.mrb[114].mxu1 %vm2217_vm2, %v24101_v2 }
 0x331   :  { %19184 = vmatprep.mubr.msk.f32.mxu1 %vm2217_vm2, %v24107_v46 }
 0x332   :  { %18535 = vmatmul.mubr.msk.f32.gmra.mrb[230].mxu0 %vm2217_vm2, %v2449_v34  ;;  %v24124_v34 = vld [vmem:[#allocation2 + $0x1e9] sm:$0xff] }
 0x333   :  { %18537 = vmatprep.mubr.msk.f32.mxu0 %vm2217_vm2, %v2450_v33  ;;  %26488 = vst [vmem:[#allocation22_spill] sm:$0xff] %v24124_v34  ;;  %v24128_v33 = vld [vmem:[#allocation2 + $0x1f1] sm:$0xff] }
 0x334   :  { %19185 = vmatmul.mubr.msk.f32.gmra.mrb[0].mxu1 %vm2217_vm2, %v24114_v29  ;;  %26489 = vst [vmem:[#allocation27_spill] sm:$0xff] %v24128_v33 }
 0x335   :  { %19187 = vmatprep.mubr.msk.f32.mxu1 %vm2217_vm2, %v24118_v49  ;;  %v2454_v49 = vld [vmem:[#allocation2 + $0x387] sm:$0xff] }
 0x336   :  { %18538 = vmatmul.mubr.msk.f32.gmra.mrb[232].mxu0 %vm2217_vm2, %v2451_v18  ;;  %v24134_v18 = vld [vmem:[#allocation2 + $0x1f9] sm:$0xff] }
 0x337   :  { %18540 = vmatprep.mubr.msk.f32.mxu0 %vm2217_vm2, %v2452_v17  ;;  %26490 = vst [vmem:[#allocation24_spill] sm:$0xff] %v24134_v18  ;;  %v24138_v17 = vld [vmem:[#allocation2 + $0x201] sm:$0xff] }
 0x338   :  { %19188 = vmatmul.mubr.msk.f32.gmra.mrb[2].mxu1 %vm2217_vm2, %v24124_v34  ;;  %26491 = vst [vmem:[#allocation29_spill] sm:$0xff] %v24138_v17  ;;  %v2455_v34 = vld [vmem:[#allocation2 + $0x38f] sm:$0xff] }
 0x339   :  { %19190 = vmatprep.mubr.msk.f32.mxu1 %vm2217_vm2, %v24128_v33  ;;  %v2456_v33 = vld [vmem:[#allocation2 + $0x397] sm:$0xff] }
 0x33a   :  { %18541 = vmatmul.mubr.msk.f32.gmra.mrb[234].mxu0 %vm2217_vm2, %v2453_v10  ;;  %v24144_v10 = vld [vmem:[#allocation2 + $0x209] sm:$0xff] }
 0x33b   :  { %18543 = vmatprep.mubr.msk.f32.mxu0 %vm2217_vm2, %v2454_v49  ;;  %26492 = vst [vmem:[#allocation26_spill] sm:$0xff] %v24144_v10  ;;  %v24148_v49 = vld [vmem:[#allocation2 + $0x211] sm:$0xff] }
 0x33c   :  { %19191 = vmatmul.mubr.msk.f32.gmra.mrb[4].mxu1 %vm2217_vm2, %v24134_v18  ;;  %26493 = vst [vmem:[#allocation31_spill] sm:$0xff] %v24148_v49  ;;  %v2457_v18 = vld [vmem:[#allocation2 + $0x39f] sm:$0xff] }
 0x33d   :  { %19193 = vmatprep.mubr.msk.f32.mxu1 %vm2217_vm2, %v24138_v17  ;;  %v4569_v17 = vld [vmem:[#allocation2 + $0x9] sm:$0xff] }
 0x33e   :  { %18544 = vmatmul.mubr.msk.f32.gmra.mrb[236].mxu0 %vm2217_vm2, %v2455_v34  ;;  %v24154_v34 = vld [vmem:[#allocation2 + $0x219] sm:$0xff] }
 0x33f   :  { %18546 = vmatprep.mubr.msk.f32.mxu0 %vm2217_vm2, %v2456_v33  ;;  %26494 = vst [vmem:[#allocation28_spill] sm:$0xff] %v24154_v34  ;;  %v24158_v33 = vld [vmem:[#allocation2 + $0x221] sm:$0xff] }
 0x340   :  { %19194 = vmatmul.mubr.msk.f32.gmra.mrb[6].mxu1 %vm2217_vm2, %v24144_v10  ;;  %v4570_v10 = vld [vmem:[#allocation2 + $0x11] sm:$0xff] }
 0x341   :  { %19196 = vmatprep.mubr.msk.f32.mxu1 %vm2217_vm2, %v24148_v49  ;;  %v4571_v49 = vld [vmem:[#allocation2 + $0x19] sm:$0xff] }
 0x342   :  { %18547 = vmatmul.mubr.msk.f32.gmra.mrb[238].mxu0 %vm2217_vm2, %v2457_v18  ;;  %v24164_v18 = vld [vmem:[#allocation2 + $0x229] sm:$0xff] }
 0x343   :  { %18557 = vmatprep.mubr.msk.f32.mxu0 %vm2217_vm2, %v4569_v17  ;;  %v24169_v17 = vld [vmem:[#allocation2 + $0x231] sm:$0xff] }
 0x344   :  { %19197 = vmatmul.mubr.msk.f32.gmra.mrb[8].mxu1 %vm2217_vm2, %v24154_v34  ;;  %v26495_v34 = vld [vmem:[#allocation20_spill] sm:$0xff] }
 0x345   :  { %19199 = vmatprep.mubr.msk.f32.mxu1 %vm2217_vm2, %v24158_v33 }
 0x346   :  { %18558 = vmatmul.mubr.msk.f32.vlgmr.msra.gmra.mrb[124].mxu0 %vm2217_vm2, %v4570_v10  ;;  %v24178_v10 = vld [vmem:[#allocation2 + $0x239] sm:$0xff] }
 0x347   :  { %18560 = vmatprep.mubr.msk.f32.mxu0 %vm2217_vm2, %v4571_v49  ;;  %20036 = vmatpush3.bf16.msra.mxu0 %v26486_v62  ;;  %v24183_v62 = vld [vmem:[#allocation2 + $0x241] sm:$0xff]  ;;  %v8374_v49 = vld [vmem:[#allocation2 + $0x3b9] sm:$0xff] }
 0x348   :  { %19200 = vmatmul.mubr.msk.f32.gmra.mrb[10].mxu1 %vm2217_vm2, %v24164_v18  ;;  %20038 = vmatprep.subr.bf16.mxu0 %v26495_v34 }
 0x349   :  { %19202 = vmatprep.mubr.msk.f32.mxu1 %vm2217_vm2, %v24169_v17 }
 0x34a   :  { %18561 = vmatmul.mubr.msk.f32.gmra.mrb[126].mxu0 %vm2217_vm2, %v23827_v7  ;;  %v24191_v7 = vld [vmem:[#allocation2 + $0x249] sm:$0xff] }
 0x34b   :  { %18563 = vmatprep.mubr.msk.f32.mxu0 %vm2217_vm2, %v23833_v3  ;;  %20040 = vmatpush3.bf16.msra.mxu0 %v26495_v34  ;;  %v24195_v3 = vld [vmem:[#allocation2 + $0x251] sm:$0xff] }
 0x34c   :  { %19203 = vmatmul.mubr.msk.f32.gmra.mrb[12].mxu1 %vm2217_vm2, %v24178_v10  ;;  %v24468_v34 = vld [vmem:[#allocation2 + $0x37] sm:$0xff] }
 0x34d   :  { %19205 = vmatprep.mubr.msk.f32.mxu1 %vm2217_vm2, %v24183_v62 }
 0x34e   :  { %18564 = vmatmul.mubr.msk.f32.gmra.mrb[128].mxu0 %vm2217_vm2, %v23837_v48  ;;  %v24203_v48 = vld [vmem:[#allocation2 + $0x259] sm:$0xff] }
 0x34f   :  { %18566 = vmatprep.mubr.msk.f32.mxu0 %vm2217_vm2, %v23845_v4  ;;  %v24207_v4 = vld [vmem:[#allocation2 + $0x261] sm:$0xff] }
 0x350   :  { %19206 = vmatmul.mubr.msk.f32.gmra.mrb[14].mxu1 %vm2217_vm2, %v24191_v7 }
 0x351   :  { %19208 = vmatprep.mubr.msk.f32.mxu1 %vm2217_vm2, %v24195_v3 }
 0x352   :  { %18567 = vmatmul.mubr.msk.f32.gmra.mrb[130].mxu0 %vm2217_vm2, %v23849_v39  ;;  %v24215_v39 = vld [vmem:[#allocation2 + $0x269] sm:$0xff] }
 0x353   :  { %18569 = vmatprep.mubr.msk.f32.mxu0 %vm2217_vm2, %v23855_v12  ;;  %v24219_v12 = vld [vmem:[#allocation2 + $0x271] sm:$0xff] }
 0x354   :  { %19209 = vmatmul.mubr.msk.f32.gmra.mrb[16].mxu1 %vm2217_vm2, %v24203_v48 }
 0x355   :  { %19211 = vmatprep.mubr.msk.f32.mxu1 %vm2217_vm2, %v24207_v4 }
 0x356   :  { %18570 = vmatmul.mubr.msk.f32.gmra.mrb[132].mxu0 %vm2217_vm2, %v23859_v44  ;;  %v24227_v44 = vld [vmem:[#allocation2 + $0x279] sm:$0xff] }
 0x357   :  { %18572 = vmatprep.mubr.msk.f32.mxu0 %vm2217_vm2, %v23865_v5  ;;  %v24231_v5 = vld [vmem:[#allocation2 + $0x281] sm:$0xff] }
 0x358   :  { %19212 = vmatmul.mubr.msk.f32.gmra.mrb[18].mxu1 %vm2217_vm2, %v24215_v39 }
 0x359   :  { %19214 = vmatprep.mubr.msk.f32.mxu1 %vm2217_vm2, %v24219_v12 }
 0x35a   :  { %18573 = vmatmul.mubr.msk.f32.gmra.mrb[134].mxu0 %vm2217_vm2, %v23869_v56  ;;  %v24239_v56 = vld [vmem:[#allocation2 + $0x289] sm:$0xff] }
 0x35b   :  { %18575 = vmatprep.mubr.msk.f32.mxu0 %vm2217_vm2, %v23875_v59  ;;  %v24243_v59 = vld [vmem:[#allocation2 + $0x291] sm:$0xff] }
 0x35c   :  { %19215 = vmatmul.mubr.msk.f32.gmra.mrb[20].mxu1 %vm2217_vm2, %v24227_v44 }
 0x35d   :  { %19217 = vmatprep.mubr.msk.f32.mxu1 %vm2217_vm2, %v24231_v5 }
 0x35e   :  { %18576 = vmatmul.mubr.msk.f32.gmra.mrb[136].mxu0 %vm2217_vm2, %v23879_v37  ;;  %v24251_v37 = vld [vmem:[#allocation2 + $0x299] sm:$0xff] }
 0x35f   :  { %18578 = vmatprep.mubr.msk.f32.mxu0 %vm2217_vm2, %v23885_v6  ;;  %v24255_v6 = vld [vmem:[#allocation2 + $0x2a1] sm:$0xff] }
 0x360   :  { %19218 = vmatmul.mubr.msk.f32.gmra.mrb[22].mxu1 %vm2217_vm2, %v24239_v56 }
 0x361   :  { %19220 = vmatprep.mubr.msk.f32.mxu1 %vm2217_vm2, %v24243_v59 }
 0x362   :  { %18579 = vmatmul.mubr.msk.f32.gmra.mrb[138].mxu0 %vm2217_vm2, %v23889_v14  ;;  %v24263_v14 = vld [vmem:[#allocation2 + $0x2a9] sm:$0xff] }
 0x363   :  { %18581 = vmatprep.mubr.msk.f32.mxu0 %vm2217_vm2, %v23895_v52  ;;  %v24267_v52 = vld [vmem:[#allocation2 + $0x2b1] sm:$0xff] }
 0x364   :  { %19221 = vmatmul.mubr.msk.f32.gmra.mrb[24].mxu1 %vm2217_vm2, %v24251_v37 }
 0x365   :  { %19223 = vmatprep.mubr.msk.f32.mxu1 %vm2217_vm2, %v24255_v6 }
 0x366   :  { %18582 = vmatmul.mubr.msk.f32.gmra.mrb[140].mxu0 %vm2217_vm2, %v23899_v21  ;;  %v24275_v21 = vld [vmem:[#allocation2 + $0x2b9] sm:$0xff] }
 0x367   :  { %18584 = vmatprep.mubr.msk.f32.mxu0 %vm2217_vm2, %v23905_v22  ;;  %v24279_v22 = vld [vmem:[#allocation2 + $0x2c1] sm:$0xff] }
 0x368   :  { %19224 = vmatmul.mubr.msk.f32.gmra.mrb[26].mxu1 %vm2217_vm2, %v24263_v14 }
 0x369   :  { %19226 = vmatprep.mubr.msk.f32.mxu1 %vm2217_vm2, %v24267_v52 }
 0x36a   :  { %18585 = vmatmul.mubr.msk.f32.gmra.mrb[142].mxu0 %vm2217_vm2, %v23909_v41  ;;  %v24287_v41 = vld [vmem:[#allocation2 + $0x2c9] sm:$0xff] }
 0x36b   :  { %18587 = vmatprep.mubr.msk.f32.mxu0 %vm2217_vm2, %v23915_v15  ;;  %v24291_v15 = vld [vmem:[#allocation2 + $0x2d1] sm:$0xff] }
 0x36c   :  { %19227 = vmatmul.mubr.msk.f32.gmra.mrb[28].mxu1 %vm2217_vm2, %v24275_v21 }
 0x36d   :  { %19229 = vmatprep.mubr.msk.f32.mxu1 %vm2217_vm2, %v24279_v22 }
 0x36e   :  { %18588 = vmatmul.mubr.msk.f32.gmra.mrb[144].mxu0 %vm2217_vm2, %v23919_v23  ;;  %v24299_v23 = vld [vmem:[#allocation2 + $0x2d9] sm:$0xff] }
 0x36f   :  { %18590 = vmatprep.mubr.msk.f32.mxu0 %vm2217_vm2, %v23925_v61  ;;  %v24303_v61 = vld [vmem:[#allocation2 + $0x2e1] sm:$0xff] }
 0x370   :  { %19230 = vmatmul.mubr.msk.f32.gmra.mrb[30].mxu1 %vm2217_vm2, %v24287_v41 }
 0x371   :  { %19232 = vmatprep.mubr.msk.f32.mxu1 %vm2217_vm2, %v24291_v15 }
 0x372   :  { %18591 = vmatmul.mubr.msk.f32.gmra.mrb[146].mxu0 %vm2217_vm2, %v23929_v36  ;;  %v24311_v36 = vld [vmem:[#allocation2 + $0x2e9] sm:$0xff] }
 0x373   :  { %18593 = vmatprep.mubr.msk.f32.mxu0 %vm2217_vm2, %v23935_v63  ;;  %v24315_v63 = vld [vmem:[#allocation2 + $0x2f1] sm:$0xff] }
 0x374   :  { %19233 = vmatmul.mubr.msk.f32.gmra.mrb[32].mxu1 %vm2217_vm2, %v24299_v23 }
 0x375   :  { %19235 = vmatprep.mubr.msk.f32.mxu1 %vm2217_vm2, %v24303_v61 }
 0x376   :  { %18594 = vmatmul.mubr.msk.f32.gmra.mrb[148].mxu0 %vm2217_vm2, %v23939_v24  ;;  %v24323_v24 = vld [vmem:[#allocation2 + $0x2f9] sm:$0xff] }
 0x377   :  { %18596 = vmatprep.mubr.msk.f32.mxu0 %vm2217_vm2, %v23945_v13  ;;  %v24327_v13 = vld [vmem:[#allocation2 + $0x301] sm:$0xff] }
 0x378   :  { %19236 = vmatmul.mubr.msk.f32.gmra.mrb[34].mxu1 %vm2217_vm2, %v24311_v36 }
 0x379   :  { %19238 = vmatprep.mubr.msk.f32.mxu1 %vm2217_vm2, %v24315_v63 }
 0x37a   :  { %18597 = vmatmul.mubr.msk.f32.gmra.mrb[150].mxu0 %vm2217_vm2, %v23949_v35  ;;  %v24335_v35 = vld [vmem:[#allocation2 + $0x309] sm:$0xff] }
 0x37b   :  { %18599 = vmatprep.mubr.msk.f32.mxu0 %vm2217_vm2, %v23955_v0  ;;  %v24339_v0 = vld [vmem:[#allocation2 + $0x311] sm:$0xff] }
 0x37c   :  { %19239 = vmatmul.mubr.msk.f32.gmra.mrb[36].mxu1 %vm2217_vm2, %v24323_v24 }
 0x37d   :  { %19241 = vmatprep.mubr.msk.f32.mxu1 %vm2217_vm2, %v24327_v13 }
 0x37e   :  { %18600 = vmatmul.mubr.msk.f32.gmra.mrb[152].mxu0 %vm2217_vm2, %v23959_v50  ;;  %v24347_v50 = vld [vmem:[#allocation2 + $0x319] sm:$0xff] }
 0x37f   :  { %18602 = vmatprep.mubr.msk.f32.mxu0 %vm2217_vm2, %v23965_v30  ;;  %v24351_v30 = vld [vmem:[#allocation2 + $0x321] sm:$0xff] }
 0x380   :  { %19242 = vmatmul.mubr.msk.f32.gmra.mrb[38].mxu1 %vm2217_vm2, %v24335_v35 }
 0x381   :  { %19244 = vmatprep.mubr.msk.f32.mxu1 %vm2217_vm2, %v24339_v0 }
 0x382   :  { %18603 = vmatmul.mubr.msk.f32.gmra.mrb[154].mxu0 %vm2217_vm2, %v23969_v31  ;;  %v24359_v31 = vld [vmem:[#allocation2 + $0x329] sm:$0xff] }
 0x383   :  { %18605 = vmatprep.mubr.msk.f32.mxu0 %vm2217_vm2, %v23975_v43  ;;  %v24363_v43 = vld [vmem:[#allocation2 + $0x331] sm:$0xff] }
 0x384   :  { %19245 = vmatmul.mubr.msk.f32.gmra.mrb[40].mxu1 %vm2217_vm2, %v24347_v50 }
 0x385   :  { %19247 = vmatprep.mubr.msk.f32.mxu1 %vm2217_vm2, %v24351_v30 }
 0x386   :  { %18606 = vmatmul.mubr.msk.f32.gmra.mrb[156].mxu0 %vm2217_vm2, %v23979_v40  ;;  %v24371_v40 = vld [vmem:[#allocation2 + $0x339] sm:$0xff] }
 0x387   :  { %18608 = vmatprep.mubr.msk.f32.mxu0 %vm2217_vm2, %v23985_v9  ;;  %v24375_v9 = vld [vmem:[#allocation2 + $0x341] sm:$0xff] }
 0x388   :  { %19248 = vmatmul.mubr.msk.f32.gmra.mrb[42].mxu1 %vm2217_vm2, %v24359_v31 }
 0x389   :  { %19250 = vmatprep.mubr.msk.f32.mxu1 %vm2217_vm2, %v24363_v43 }
 0x38a   :  { %18609 = vmatmul.mubr.msk.f32.gmra.mrb[158].mxu0 %vm2217_vm2, %v23989_v11  ;;  %v24383_v11 = vld [vmem:[#allocation2 + $0x349] sm:$0xff] }
 0x38b   :  { %18611 = vmatprep.mubr.msk.f32.mxu0 %vm2217_vm2, %v23995_v38  ;;  %v24387_v38 = vld [vmem:[#allocation2 + $0x351] sm:$0xff] }
 0x38c   :  { %19251 = vmatmul.mubr.msk.f32.gmra.mrb[44].mxu1 %vm2217_vm2, %v24371_v40 }
 0x38d   :  { %19253 = vmatprep.mubr.msk.f32.mxu1 %vm2217_vm2, %v24375_v9 }
 0x38e   :  { %18612 = vmatmul.mubr.msk.f32.gmra.mrb[160].mxu0 %vm2217_vm2, %v23999_v26  ;;  %v24395_v26 = vld [vmem:[#allocation2 + $0x359] sm:$0xff] }
 0x38f   :  { %18614 = vmatprep.mubr.msk.f32.mxu0 %vm2217_vm2, %v24005_v1  ;;  %v24399_v1 = vld [vmem:[#allocation2 + $0x361] sm:$0xff] }
 0x390   :  { %19254 = vmatmul.mubr.msk.f32.gmra.mrb[46].mxu1 %vm2217_vm2, %v24383_v11 }
 0x391   :  { %19256 = vmatprep.mubr.msk.f32.mxu1 %vm2217_vm2, %v24387_v38 }
 0x392   :  { %18615 = vmatmul.mubr.msk.f32.gmra.mrb[162].mxu0 %vm2217_vm2, %v24009_v54  ;;  %v24407_v54 = vld [vmem:[#allocation2 + $0x369] sm:$0xff] }
 0x393   :  { %18617 = vmatprep.mubr.msk.f32.mxu0 %vm2217_vm2, %v24015_v58  ;;  %v24411_v58 = vld [vmem:[#allocation2 + $0x371] sm:$0xff] }
 0x394   :  { %19257 = vmatmul.mubr.msk.f32.gmra.mrb[48].mxu1 %vm2217_vm2, %v24395_v26 }
 0x395   :  { %19259 = vmatprep.mubr.msk.f32.mxu1 %vm2217_vm2, %v24399_v1 }
 0x396   :  { %18618 = vmatmul.mubr.msk.f32.gmra.mrb[164].mxu0 %vm2217_vm2, %v24019_v32  ;;  %v24419_v32 = vld [vmem:[#allocation2 + $0x379] sm:$0xff] }
 0x397   :  { %18620 = vmatprep.mubr.msk.f32.mxu0 %vm2217_vm2, %v24025_v53  ;;  %v24423_v53 = vld [vmem:[#allocation2 + $0x381] sm:$0xff] }
 0x398   :  { %19260 = vmatmul.mubr.msk.f32.gmra.mrb[50].mxu1 %vm2217_vm2, %v24407_v54 }
 0x399   :  { %19262 = vmatprep.mubr.msk.f32.mxu1 %vm2217_vm2, %v24411_v58 }
 0x39a   :  { %18621 = vmatmul.mubr.msk.f32.gmra.mrb[166].mxu0 %vm2217_vm2, %v24029_v57  ;;  %v24431_v57 = vld [vmem:[#allocation2 + $0x389] sm:$0xff] }
 0x39b   :  { %18623 = vmatprep.mubr.msk.f32.mxu0 %vm2217_vm2, %v24035_v55  ;;  %v24435_v55 = vld [vmem:[#allocation2 + $0x391] sm:$0xff] }
 0x39c   :  { %19263 = vmatmul.mubr.msk.f32.gmra.mrb[52].mxu1 %vm2217_vm2, %v24419_v32 }
 0x39d   :  { %19265 = vmatprep.mubr.msk.f32.mxu1 %vm2217_vm2, %v24423_v53 }
 0x39e   :  { %18624 = vmatmul.mubr.msk.f32.gmra.mrb[168].mxu0 %vm2217_vm2, %v24039_v8  ;;  %v24443_v8 = vld [vmem:[#allocation2 + $0x399] sm:$0xff] }
 0x39f   :  { %18626 = vmatprep.mubr.msk.f32.mxu0 %vm2217_vm2, %v24045_v42  ;;  %v24447_v42 = vld [vmem:[#allocation2 + $0x3a1] sm:$0xff] }
 0x3a0   :  { %19266 = vmatmul.mubr.msk.f32.gmra.mrb[54].mxu1 %vm2217_vm2, %v24431_v57 }
 0x3a1   :  { %19268 = vmatprep.mubr.msk.f32.mxu1 %vm2217_vm2, %v24435_v55 }
 0x3a2   :  { %18627 = vmatmul.mubr.msk.f32.gmra.mrb[170].mxu0 %vm2217_vm2, %v24049_v60  ;;  %v8372_v60 = vld [vmem:[#allocation2 + $0x3a9] sm:$0xff] }
 0x3a3   :  { %18629 = vmatprep.mubr.msk.f32.mxu0 %vm2217_vm2, %v24055_v16  ;;  %v8373_v16 = vld [vmem:[#allocation2 + $0x3b1] sm:$0xff] }
 0x3a4   :  { %19269 = vmatmul.mubr.msk.f32.gmra.mrb[56].mxu1 %vm2217_vm2, %v24443_v8 }
 0x3a5   :  { %19271 = vmatprep.mubr.msk.f32.mxu1 %vm2217_vm2, %v24447_v42 }
 0x3a6   :  { %18630 = vmatmul.mubr.msk.f32.gmra.mrb[172].mxu0 %vm2217_vm2, %v24059_v25  ;;  %v16311_v25 = vld [vmem:[%s26380_s5 + $0xf0] sm:$0xff] }
 0x3a7   :  { %18632 = vmatprep.mubr.msk.f32.mxu0 %vm2217_vm2, %v24065_v45  ;;  %v16312_v45 = vld [vmem:[%s26380_s5 + $0xf8] sm:$0xff] }
 0x3a8   :  { %19272 = vmatmul.mubr.msk.f32.gmra.mrb[58].mxu1 %vm2217_vm2, %v8372_v60  ;;  %v24480_v60 = vld [vmem:[#allocation2 + $0x47] sm:$0xff] }
 0x3a9   :  { %19274 = vmatprep.mubr.msk.f32.mxu1 %vm2217_vm2, %v8373_v16  ;;  %v26497_v16 = vld [vmem:[#allocation22_spill] sm:$0xff] }
 0x3aa   :  { %18633 = vmatmul.mubr.msk.f32.gmra.mrb[174].mxu0 %vm2217_vm2, %v24069_v28  ;;  %v20069_v28 = vpack.c.bf16 %v16312_v45, %v16311_v25  ;;  %v26499_v25 = vld [vmem:[#allocation24_spill] sm:$0xff]  ;;  %v24525_v45 = vld [vmem:[#allocation2 + $0x7f] sm:$0xff] }
 0x3ab   :  { %18635 = vmatprep.mubr.msk.f32.mxu0 %vm2217_vm2, %v24075_v27  ;;  %v24476_v27 = vld [vmem:[#allocation2 + $0x3f] sm:$0xff]  ;;  %26500 = vst [vmem:[#allocation33_spill] sm:$0xff] %v24525_v45 }
 0x3ac   :  { %19275 = vmatmul.mubr.msk.f32.gmra.mrb[60].mxu1 %vm2217_vm2, %v8374_v49  ;;  %v26498_v49 = vld [vmem:[#allocation27_spill] sm:$0xff] }
 0x3ad   :  { %19285 = vmatprep.mubr.msk.f32.mxu1 %vm2217_vm2, %v24468_v34 }
 0x3ae   :  { %18636 = vmatmul.mubr.msk.f32.gmra.mrb[176].mxu0 %vm2217_vm2, %v24079_v47  ;;  %v24489_v47 = vld [vmem:[#allocation2 + $0x4f] sm:$0xff] }
 0x3af   :  { %18638 = vmatprep.mubr.msk.f32.mxu0 %vm2217_vm2, %v24085_v19  ;;  %v24493_v19 = vld [vmem:[#allocation2 + $0x57] sm:$0xff] }
 0x3b0   :  { %19286 = vmatmul.mubr.msk.f32.vlgmr.msra.gmra.mrb[62].mxu1 %vm2217_vm2, %v24476_v27 }
 0x3b1   :  { %20068 = vmatpush3.bf16.msra.mxu1 %v24103_v20  ;;  %19288 = vmatprep.mubr.msk.f32.mxu1 %vm2217_vm2, %v24480_v60  ;;  %v24501_v20 = vld [vmem:[#allocation2 + $0x5f] sm:$0xff] }
 0x3b2   :  { %18639 = vmatmul.mubr.msk.f32.gmra.mrb[178].mxu0 %vm2217_vm2, %v24089_v51  ;;  %20070 = vmatprep.subr.bf16.mxu1 %v20069_v28  ;;  %v26496_v51 = vld [vmem:[#allocation25_spill] sm:$0xff] }
 0x3b3   :  { %18641 = vmatprep.mubr.msk.f32.mxu0 %vm2217_vm2, %v24101_v2  ;;  %v24505_v2 = vld [vmem:[#allocation2 + $0x67] sm:$0xff] }
 0x3b4   :  { %19289 = vmatmul.mubr.msk.f32.gmra.mrb[64].mxu1 %vm2217_vm2, %v24489_v47 }
 0x3b5   :  { %19291 = vmatprep.mubr.msk.f32.mxu1 %vm2217_vm2, %v24493_v19  ;;  %20072 = vmatpush3.bf16.msra.mxu1 %v20069_v28  ;;  %v24529_v28 = vld [vmem:[#allocation2 + $0x87] sm:$0xff] }
 0x3b6   :  { %18642 = vmatmul.mubr.msk.f32.gmra.mrb[180].mxu0 %vm2217_vm2, %v24107_v46  ;;  %v24513_v46 = vld [vmem:[#allocation2 + $0x6f] sm:$0xff]  ;;  %26501 = vst [vmem:[#allocation30_spill] sm:$0xff] %v24529_v28 }
 0x3b7   :  { %18644 = vmatprep.mubr.msk.f32.mxu0 %vm2217_vm2, %v24114_v29  ;;  %v24517_v29 = vld [vmem:[#allocation2 + $0x77] sm:$0xff] }
 0x3b8   :  { %19292 = vmatmul.mubr.msk.f32.gmra.mrb[66].mxu1 %vm2217_vm2, %v24501_v20 }
 0x3b9   :  { %19294 = vmatprep.mubr.msk.f32.mxu1 %vm2217_vm2, %v24505_v2 }
 0x3ba   :  { %18645 = vmatmul.mubr.msk.f32.gmra.mrb[182].mxu0 %vm2217_vm2, %v26496_v51  ;;  %v26502_v51 = vld [vmem:[#allocation29_spill] sm:$0xff] }
 0x3bb   :  { %18647 = vmatprep.mubr.msk.f32.mxu0 %vm2217_vm2, %v26497_v16  ;;  %v26503_v16 = vld [vmem:[#allocation26_spill] sm:$0xff] }
 0x3bc   :  { %19295 = vmatmul.mubr.msk.f32.gmra.mrb[68].mxu1 %vm2217_vm2, %v24513_v46 }
 0x3bd   :  { %19297 = vmatprep.mubr.msk.f32.mxu1 %vm2217_vm2, %v24517_v29 }
 0x3be   :  { %18648 = vmatmul.mubr.msk.f32.gmra.mrb[184].mxu0 %vm2217_vm2, %v26498_v49  ;;  %v24537_v49 = vld [vmem:[#allocation2 + $0x8f] sm:$0xff] }
 0x3bf   :  { %18650 = vmatprep.mubr.msk.f32.mxu0 %vm2217_vm2, %v26499_v25  ;;  %v24541_v25 = vld [vmem:[#allocation2 + $0x97] sm:$0xff] }
 0x3c0   :  { %19298 = vmatmul.mubr.msk.f32.gmra.mrb[70].mxu1 %vm2217_vm2, %v24525_v45  ;;  %v26504_v45 = vld [vmem:[#allocation31_spill] sm:$0xff] }
 0x3c1   :  { %19300 = vmatprep.mubr.msk.f32.mxu1 %vm2217_vm2, %v24529_v28  ;;  %v26505_v28 = vld [vmem:[#allocation28_spill] sm:$0xff] }
 0x3c2   :  { %18651 = vmatmul.mubr.msk.f32.gmra.mrb[186].mxu0 %vm2217_vm2, %v26502_v51  ;;  %v24549_v51 = vld [vmem:[#allocation2 + $0x9f] sm:$0xff] }
 0x3c3   :  { %18653 = vmatprep.mubr.msk.f32.mxu0 %vm2217_vm2, %v26503_v16  ;;  %v24553_v16 = vld [vmem:[#allocation2 + $0xa7] sm:$0xff] }
 0x3c4   :  { %19301 = vmatmul.mubr.msk.f32.gmra.mrb[72].mxu1 %vm2217_vm2, %v24537_v49 }
 0x3c5   :  { %19303 = vmatprep.mubr.msk.f32.mxu1 %vm2217_vm2, %v24541_v25 }
 0x3c6   :  { %18654 = vmatmul.mubr.msk.f32.gmra.mrb[188].mxu0 %vm2217_vm2, %v26504_v45  ;;  %v24561_v45 = vld [vmem:[#allocation2 + $0xaf] sm:$0xff] }
 0x3c7   :  { %18656 = vmatprep.mubr.msk.f32.mxu0 %vm2217_vm2, %v26505_v28  ;;  %v24565_v28 = vld [vmem:[#allocation2 + $0xb7] sm:$0xff] }
 0x3c8   :  { %19304 = vmatmul.mubr.msk.f32.gmra.mrb[74].mxu1 %vm2217_vm2, %v24549_v51 }
 0x3c9   :  { %19306 = vmatprep.mubr.msk.f32.mxu1 %vm2217_vm2, %v24553_v16 }
 0x3ca   :  { %18657 = vmatmul.mubr.msk.f32.gmra.mrb[190].mxu0 %vm2217_vm2, %v24158_v33  ;;  %v24573_v33 = vld [vmem:[#allocation2 + $0xbf] sm:$0xff] }
 0x3cb   :  { %18659 = vmatprep.mubr.msk.f32.mxu0 %vm2217_vm2, %v24164_v18  ;;  %v24577_v18 = vld [vmem:[#allocation2 + $0xc7] sm:$0xff] }
 0x3cc   :  { %19307 = vmatmul.mubr.msk.f32.gmra.mrb[76].mxu1 %vm2217_vm2, %v24561_v45 }
 0x3cd   :  { %19309 = vmatprep.mubr.msk.f32.mxu1 %vm2217_vm2, %v24565_v28 }
 0x3ce   :  { %18660 = vmatmul.mubr.msk.f32.gmra.mrb[192].mxu0 %vm2217_vm2, %v24169_v17  ;;  %v24585_v17 = vld [vmem:[#allocation2 + $0xcf] sm:$0xff] }
 0x3cf   :  { %18662 = vmatprep.mubr.msk.f32.mxu0 %vm2217_vm2, %v24178_v10  ;;  %v24589_v10 = vld [vmem:[#allocation2 + $0xd7] sm:$0xff] }
 0x3d0   :  { %19310 = vmatmul.mubr.msk.f32.gmra.mrb[78].mxu1 %vm2217_vm2, %v24573_v33 }
 0x3d1   :  { %19312 = vmatprep.mubr.msk.f32.mxu1 %vm2217_vm2, %v24577_v18 }
 0x3d2   :  { %18663 = vmatmul.mubr.msk.f32.gmra.mrb[194].mxu0 %vm2217_vm2, %v24183_v62  ;;  %v24597_v62 = vld [vmem:[#allocation2 + $0xdf] sm:$0xff] }
 0x3d3   :  { %18665 = vmatprep.mubr.msk.f32.mxu0 %vm2217_vm2, %v24191_v7  ;;  %v24601_v7 = vld [vmem:[#allocation2 + $0xe7] sm:$0xff] }
 0x3d4   :  { %19313 = vmatmul.mubr.msk.f32.gmra.mrb[80].mxu1 %vm2217_vm2, %v24585_v17 }
 0x3d5   :  { %19315 = vmatprep.mubr.msk.f32.mxu1 %vm2217_vm2, %v24589_v10 }
 0x3d6   :  { %18666 = vmatmul.mubr.msk.f32.gmra.mrb[196].mxu0 %vm2217_vm2, %v24195_v3  ;;  %v24609_v3 = vld [vmem:[#allocation2 + $0xef] sm:$0xff] }
 0x3d7   :  { %18668 = vmatprep.mubr.msk.f32.mxu0 %vm2217_vm2, %v24203_v48  ;;  %v24613_v48 = vld [vmem:[#allocation2 + $0xf7] sm:$0xff] }
 0x3d8   :  { %19316 = vmatmul.mubr.msk.f32.gmra.mrb[82].mxu1 %vm2217_vm2, %v24597_v62 }
 0x3d9   :  { %19318 = vmatprep.mubr.msk.f32.mxu1 %vm2217_vm2, %v24601_v7 }
 0x3da   :  { %18669 = vmatmul.mubr.msk.f32.gmra.mrb[198].mxu0 %vm2217_vm2, %v24207_v4  ;;  %v24621_v4 = vld [vmem:[#allocation2 + $0xff] sm:$0xff] }
 0x3db   :  { %18671 = vmatprep.mubr.msk.f32.mxu0 %vm2217_vm2, %v24215_v39  ;;  %v24625_v39 = vld [vmem:[#allocation2 + $0x107] sm:$0xff] }
 0x3dc   :  { %19319 = vmatmul.mubr.msk.f32.gmra.mrb[84].mxu1 %vm2217_vm2, %v24609_v3 }
 0x3dd   :  { %19321 = vmatprep.mubr.msk.f32.mxu1 %vm2217_vm2, %v24613_v48 }
 0x3de   :  { %18672 = vmatmul.mubr.msk.f32.gmra.mrb[200].mxu0 %vm2217_vm2, %v24219_v12  ;;  %v24633_v12 = vld [vmem:[#allocation2 + $0x10f] sm:$0xff] }
 0x3df   :  { %18674 = vmatprep.mubr.msk.f32.mxu0 %vm2217_vm2, %v24227_v44  ;;  %v24637_v44 = vld [vmem:[#allocation2 + $0x117] sm:$0xff] }
 0x3e0   :  { %19322 = vmatmul.mubr.msk.f32.gmra.mrb[86].mxu1 %vm2217_vm2, %v24621_v4 }
 0x3e1   :  { %19324 = vmatprep.mubr.msk.f32.mxu1 %vm2217_vm2, %v24625_v39 }
 0x3e2   :  { %18675 = vmatmul.mubr.msk.f32.gmra.mrb[202].mxu0 %vm2217_vm2, %v24231_v5  ;;  %v24645_v5 = vld [vmem:[#allocation2 + $0x11f] sm:$0xff] }
 0x3e3   :  { %18677 = vmatprep.mubr.msk.f32.mxu0 %vm2217_vm2, %v24239_v56  ;;  %v24649_v56 = vld [vmem:[#allocation2 + $0x127] sm:$0xff] }
 0x3e4   :  { %19325 = vmatmul.mubr.msk.f32.gmra.mrb[88].mxu1 %vm2217_vm2, %v24633_v12 }
 0x3e5   :  { %19327 = vmatprep.mubr.msk.f32.mxu1 %vm2217_vm2, %v24637_v44 }
 0x3e6   :  { %18678 = vmatmul.mubr.msk.f32.gmra.mrb[204].mxu0 %vm2217_vm2, %v24243_v59  ;;  %v24657_v59 = vld [vmem:[#allocation2 + $0x12f] sm:$0xff] }
 0x3e7   :  { %18680 = vmatprep.mubr.msk.f32.mxu0 %vm2217_vm2, %v24251_v37  ;;  %v24661_v37 = vld [vmem:[#allocation2 + $0x137] sm:$0xff] }
 0x3e8   :  { %19328 = vmatmul.mubr.msk.f32.gmra.mrb[90].mxu1 %vm2217_vm2, %v24645_v5 }
 0x3e9   :  { %19330 = vmatprep.mubr.msk.f32.mxu1 %vm2217_vm2, %v24649_v56 }
 0x3ea   :  { %18681 = vmatmul.mubr.msk.f32.gmra.mrb[206].mxu0 %vm2217_vm2, %v24255_v6  ;;  %v24669_v6 = vld [vmem:[#allocation2 + $0x13f] sm:$0xff] }
 0x3eb   :  { %18683 = vmatprep.mubr.msk.f32.mxu0 %vm2217_vm2, %v24263_v14  ;;  %v24673_v14 = vld [vmem:[#allocation2 + $0x147] sm:$0xff] }
 0x3ec   :  { %19331 = vmatmul.mubr.msk.f32.gmra.mrb[92].mxu1 %vm2217_vm2, %v24657_v59 }
 0x3ed   :  { %19333 = vmatprep.mubr.msk.f32.mxu1 %vm2217_vm2, %v24661_v37 }
 0x3ee   :  { %18684 = vmatmul.mubr.msk.f32.gmra.mrb[208].mxu0 %vm2217_vm2, %v24267_v52  ;;  %v24681_v52 = vld [vmem:[#allocation2 + $0x14f] sm:$0xff] }
 0x3ef   :  { %18686 = vmatprep.mubr.msk.f32.mxu0 %vm2217_vm2, %v24275_v21  ;;  %v24685_v21 = vld [vmem:[#allocation2 + $0x157] sm:$0xff] }
 0x3f0   :  { %19334 = vmatmul.mubr.msk.f32.gmra.mrb[94].mxu1 %vm2217_vm2, %v24669_v6 }
 0x3f1   :  { %19336 = vmatprep.mubr.msk.f32.mxu1 %vm2217_vm2, %v24673_v14 }
 0x3f2   :  { %18687 = vmatmul.mubr.msk.f32.gmra.mrb[210].mxu0 %vm2217_vm2, %v24279_v22  ;;  %v24693_v22 = vld [vmem:[#allocation2 + $0x15f] sm:$0xff] }
 0x3f3   :  { %18689 = vmatprep.mubr.msk.f32.mxu0 %vm2217_vm2, %v24287_v41  ;;  %v24697_v41 = vld [vmem:[#allocation2 + $0x167] sm:$0xff] }
 0x3f4   :  { %19337 = vmatmul.mubr.msk.f32.gmra.mrb[96].mxu1 %vm2217_vm2, %v24681_v52 }
 0x3f5   :  { %19339 = vmatprep.mubr.msk.f32.mxu1 %vm2217_vm2, %v24685_v21 }
 0x3f6   :  { %18690 = vmatmul.mubr.msk.f32.gmra.mrb[212].mxu0 %vm2217_vm2, %v24291_v15  ;;  %v24705_v15 = vld [vmem:[#allocation2 + $0x16f] sm:$0xff] }
 0x3f7   :  { %18692 = vmatprep.mubr.msk.f32.mxu0 %vm2217_vm2, %v24299_v23  ;;  %v24709_v23 = vld [vmem:[#allocation2 + $0x177] sm:$0xff] }
 0x3f8   :  { %19340 = vmatmul.mubr.msk.f32.gmra.mrb[98].mxu1 %vm2217_vm2, %v24693_v22 }
 0x3f9   :  { %19342 = vmatprep.mubr.msk.f32.mxu1 %vm2217_vm2, %v24697_v41 }
 0x3fa   :  { %18693 = vmatmul.mubr.msk.f32.gmra.mrb[214].mxu0 %vm2217_vm2, %v24303_v61  ;;  %v24717_v61 = vld [vmem:[#allocation2 + $0x17f] sm:$0xff] }
 0x3fb   :  { %18695 = vmatprep.mubr.msk.f32.mxu0 %vm2217_vm2, %v24311_v36  ;;  %v24721_v36 = vld [vmem:[#allocation2 + $0x187] sm:$0xff] }
 0x3fc   :  { %19343 = vmatmul.mubr.msk.f32.gmra.mrb[100].mxu1 %vm2217_vm2, %v24705_v15 }
 0x3fd   :  { %19345 = vmatprep.mubr.msk.f32.mxu1 %vm2217_vm2, %v24709_v23 }
 0x3fe   :  { %18696 = vmatmul.mubr.msk.f32.gmra.mrb[216].mxu0 %vm2217_vm2, %v24315_v63  ;;  %v24729_v63 = vld [vmem:[#allocation2 + $0x18f] sm:$0xff] }
 0x3ff   :  { %18698 = vmatprep.mubr.msk.f32.mxu0 %vm2217_vm2, %v24323_v24  ;;  %v24733_v24 = vld [vmem:[#allocation2 + $0x197] sm:$0xff] }
 0x400   :  { %19346 = vmatmul.mubr.msk.f32.gmra.mrb[102].mxu1 %vm2217_vm2, %v24717_v61 }
 0x401   :  { %19348 = vmatprep.mubr.msk.f32.mxu1 %vm2217_vm2, %v24721_v36 }
 0x402   :  { %18699 = vmatmul.mubr.msk.f32.gmra.mrb[218].mxu0 %vm2217_vm2, %v24327_v13  ;;  %v24741_v13 = vld [vmem:[#allocation2 + $0x19f] sm:$0xff] }
 0x403   :  { %18701 = vmatprep.mubr.msk.f32.mxu0 %vm2217_vm2, %v24335_v35  ;;  %v24745_v35 = vld [vmem:[#allocation2 + $0x1a7] sm:$0xff] }
 0x404   :  { %19349 = vmatmul.mubr.msk.f32.gmra.mrb[104].mxu1 %vm2217_vm2, %v24729_v63 }
 0x405   :  { %19351 = vmatprep.mubr.msk.f32.mxu1 %vm2217_vm2, %v24733_v24 }
 0x406   :  { %18702 = vmatmul.mubr.msk.f32.gmra.mrb[220].mxu0 %vm2217_vm2, %v24339_v0  ;;  %v24753_v0 = vld [vmem:[#allocation2 + $0x1af] sm:$0xff] }
 0x407   :  { %18704 = vmatprep.mubr.msk.f32.mxu0 %vm2217_vm2, %v24347_v50  ;;  %v24757_v50 = vld [vmem:[#allocation2 + $0x1b7] sm:$0xff] }
 0x408   :  { %19352 = vmatmul.mubr.msk.f32.gmra.mrb[106].mxu1 %vm2217_vm2, %v24741_v13 }
 0x409   :  { %19354 = vmatprep.mubr.msk.f32.mxu1 %vm2217_vm2, %v24745_v35 }
 0x40a   :  { %18705 = vmatmul.mubr.msk.f32.gmra.mrb[222].mxu0 %vm2217_vm2, %v24351_v30  ;;  %v24765_v30 = vld [vmem:[#allocation2 + $0x1bf] sm:$0xff] }
 0x40b   :  { %18707 = vmatprep.mubr.msk.f32.mxu0 %vm2217_vm2, %v24359_v31  ;;  %26506 = vst [vmem:[#allocation35_spill] sm:$0xff] %v24765_v30  ;;  %v24769_v31 = vld [vmem:[#allocation2 + $0x1c7] sm:$0xff] }
 0x40c   :  { %19355 = vmatmul.mubr.msk.f32.gmra.mrb[108].mxu1 %vm2217_vm2, %v24753_v0  ;;  %26507 = vst [vmem:[#allocation32_spill] sm:$0xff] %v24769_v31 }
 0x40d   :  { %19357 = vmatprep.mubr.msk.f32.mxu1 %vm2217_vm2, %v24757_v50 }
 0x40e   :  { %18708 = vmatmul.mubr.msk.f32.gmra.mrb[224].mxu0 %vm2217_vm2, %v24363_v43  ;;  %v9540_v43 = vld [vmem:[#allocation2 + $0x1cf] sm:$0xff] }
 0x40f   :  { %18710 = vmatprep.mubr.msk.f32.mxu0 %vm2217_vm2, %v24371_v40  ;;  %v9541_v40 = vld [vmem:[#allocation2 + $0x1d7] sm:$0xff] }
 0x410   :  { %19358 = vmatmul.mubr.msk.f32.gmra.mrb[110].mxu1 %vm2217_vm2, %v24765_v30  ;;  %v16429_v30 = vld [vmem:[%s26380_s5 + $0x100] sm:$0xff] }
 0x411   :  { %19360 = vmatprep.mubr.msk.f32.mxu1 %vm2217_vm2, %v24769_v31 }
 0x412   :  { %18711 = vmatmul.mubr.msk.f32.gmra.mrb[226].mxu0 %vm2217_vm2, %v24375_v9  ;;  %v16430_v9 = vld [vmem:[%s26380_s5 + $0x108] sm:$0xff] }
 0x413   :  { %18713 = vmatprep.mubr.msk.f32.mxu0 %vm2217_vm2, %v24383_v11  ;;  %v9542_v11 = vld [vmem:[#allocation2 + $0x1df] sm:$0xff]  ;;  %v24789_v31 = vpack.c.bf16 %v16430_v9, %v16429_v30  ;;  %v9553_v9 = vld [vmem:[#allocation2 + $0x237] sm:$0xff] }
 0x414   :  { %19361 = vmatmul.mubr.msk.f32.gmra.mrb[112].mxu1 %vm2217_vm2, %v9540_v43  ;;  %v9543_v43 = vld [vmem:[#allocation2 + $0x1e7] sm:$0xff]  ;;  %v9546_v30 = vld [vmem:[#allocation2 + $0x1ff] sm:$0xff] }
 0x415   :  { %19363 = vmatprep.mubr.msk.f32.mxu1 %vm2217_vm2, %v9541_v40  ;;  %20074 = vmatprep.subr.bf16.mxu1 %v24789_v31  ;;  %v9547_v40 = vld [vmem:[#allocation2 + $0x207] sm:$0xff] }
 0x416   :  { %18714 = vmatmul.mubr.msk.f32.gmra.mrb[228].mxu0 %vm2217_vm2, %v24387_v38  ;;  %v9544_v38 = vld [vmem:[#allocation2 + $0x1ef] sm:$0xff] }
 0x417   :  { %18716 = vmatprep.mubr.msk.f32.mxu0 %vm2217_vm2, %v24395_v26  ;;  %v9545_v26 = vld [vmem:[#allocation2 + $0x1f7] sm:$0xff] }
 0x418   :  { %19364 = vmatmul.mubr.msk.f32.gmra.mrb[114].mxu1 %vm2217_vm2, %v9542_v11  ;;  %v9554_v11 = vld [vmem:[#allocation2 + $0x23f] sm:$0xff] }
 0x419   :  { %19366 = vmatprep.mubr.msk.f32.mxu1 %vm2217_vm2, %v9543_v43  ;;  %v9555_v43 = vld [vmem:[#allocation2 + $0x247] sm:$0xff] }
 0x41a   :  { %18717 = vmatmul.mubr.msk.f32.gmra.mrb[230].mxu0 %vm2217_vm2, %v24399_v1  ;;  %v9548_v1 = vld [vmem:[#allocation2 + $0x20f] sm:$0xff] }
 0x41b   :  { %18719 = vmatprep.mubr.msk.f32.mxu0 %vm2217_vm2, %v24407_v54  ;;  %v9549_v54 = vld [vmem:[#allocation2 + $0x217] sm:$0xff] }
 0x41c   :  { %19367 = vmatmul.mubr.msk.f32.gmra.mrb[0].mxu1 %vm2217_vm2, %v9544_v38  ;;  %v9557_v38 = vld [vmem:[#allocation2 + $0x257] sm:$0xff] }
 0x41d   :  { %19369 = vmatprep.mubr.msk.f32.mxu1 %vm2217_vm2, %v9545_v26  ;;  %v9558_v26 = vld [vmem:[#allocation2 + $0x25f] sm:$0xff] }
 0x41e   :  { %18720 = vmatmul.mubr.msk.f32.gmra.mrb[232].mxu0 %vm2217_vm2, %v24411_v58  ;;  %v9550_v58 = vld [vmem:[#allocation2 + $0x21f] sm:$0xff] }
 0x41f   :  { %18722 = vmatprep.mubr.msk.f32.mxu0 %vm2217_vm2, %v24419_v32  ;;  %v9551_v32 = vld [vmem:[#allocation2 + $0x227] sm:$0xff] }
 0x420   :  { %19370 = vmatmul.mubr.msk.f32.gmra.mrb[2].mxu1 %vm2217_vm2, %v9546_v30  ;;  %v9559_v30 = vld [vmem:[#allocation2 + $0x267] sm:$0xff] }
 0x421   :  { %19372 = vmatprep.mubr.msk.f32.mxu1 %vm2217_vm2, %v9547_v40  ;;  %v9565_v40 = vld [vmem:[#allocation2 + $0x297] sm:$0xff] }
 0x422   :  { %18723 = vmatmul.mubr.msk.f32.gmra.mrb[234].mxu0 %vm2217_vm2, %v24423_v53  ;;  %v5799_v53 = vld [vmem:[#allocation2 + $0x1f] sm:$0xff] }
 0x423   :  { %18725 = vmatprep.mubr.msk.f32.mxu0 %vm2217_vm2, %v24431_v57  ;;  %v9552_v57 = vld [vmem:[#allocation2 + $0x22f] sm:$0xff] }
 0x424   :  { %19373 = vmatmul.mubr.msk.f32.gmra.mrb[4].mxu1 %vm2217_vm2, %v9548_v1  ;;  %v9567_v1 = vld [vmem:[#allocation2 + $0x2a7] sm:$0xff] }
 0x425   :  { %19375 = vmatprep.mubr.msk.f32.mxu1 %vm2217_vm2, %v9549_v54  ;;  %v9569_v54 = vld [vmem:[#allocation2 + $0x2b7] sm:$0xff] }
 0x426   :  { %18726 = vmatmul.mubr.msk.f32.gmra.mrb[236].mxu0 %vm2217_vm2, %v24435_v55  ;;  %v5800_v55 = vld [vmem:[#allocation2 + $0x27] sm:$0xff] }
 0x427   :  { %18728 = vmatprep.mubr.msk.f32.mxu0 %vm2217_vm2, %v24443_v8  ;;  %v5801_v8 = vld [vmem:[#allocation2 + $0x2f] sm:$0xff] }
 0x428   :  { %19376 = vmatmul.mubr.msk.f32.gmra.mrb[6].mxu1 %vm2217_vm2, %v9550_v58  ;;  %v9571_v58 = vld [vmem:[#allocation2 + $0x2c7] sm:$0xff] }
 0x429   :  { %19378 = vmatprep.mubr.msk.f32.mxu1 %vm2217_vm2, %v9551_v32 }
 0x42a   :  { %18729 = vmatmul.mubr.msk.f32.gmra.mrb[238].mxu0 %vm2217_vm2, %v24447_v42  ;;  %v9556_v42 = vld [vmem:[#allocation2 + $0x24f] sm:$0xff] }
 0x42b   :  { %18739 = vmatprep.mubr.msk.f32.mxu0 %vm2217_vm2, %v5799_v53 }
 0x42c   :  { %19379 = vmatmul.mubr.msk.f32.gmra.mrb[8].mxu1 %vm2217_vm2, %v9552_v57 }
 0x42d   :  { %19381 = vmatprep.mubr.msk.f32.mxu1 %vm2217_vm2, %v9553_v9 }
 0x42e   :  { %18740 = vmatmul.mubr.msk.f32.vlgmr.msra.gmra.mrb[124].mxu0 %vm2217_vm2, %v5800_v55 }
 0x42f   :  { %18742 = vmatprep.mubr.msk.f32.mxu0 %vm2217_vm2, %v5801_v8 }
 0x430   :  { %19382 = vmatmul.mubr.msk.f32.gmra.mrb[10].mxu1 %vm2217_vm2, %v9554_v11  ;;  %v26518_v11 = vld [vmem:[#allocation35_spill] sm:$0xff] }
 0x431   :  { %19384 = vmatprep.mubr.msk.f32.mxu1 %vm2217_vm2, %v9555_v43  ;;  %v16432_v43 = vld [vmem:[%s26380_s5 + $0x118] sm:$0xff] }
 0x432   :  { %18743 = vmatmul.mubr.msk.f32.gmra.mrb[126].mxu0 %vm2217_vm2, %v24468_v34  ;;  %v9560_v34 = vld [vmem:[#allocation2 + $0x26f] sm:$0xff] }
 0x433   :  { %18745 = vmatprep.mubr.msk.f32.mxu0 %vm2217_vm2, %v24476_v27  ;;  %v9561_v27 = vld [vmem:[#allocation2 + $0x277] sm:$0xff] }
 0x434   :  { %19385 = vmatmul.mubr.msk.f32.gmra.mrb[12].mxu1 %vm2217_vm2, %v9556_v42  ;;  %v10719_v42 = vld [vmem:[#allocation2 + $0x38] sm:$0xff] }
 0x435   :  { %19387 = vmatprep.mubr.msk.f32.mxu1 %vm2217_vm2, %v9557_v38 }
 0x436   :  { %18746 = vmatmul.mubr.msk.f32.gmra.mrb[128].mxu0 %vm2217_vm2, %v24480_v60  ;;  %v9562_v60 = vld [vmem:[#allocation2 + $0x27f] sm:$0xff] }
 0x437   :  { %18748 = vmatprep.mubr.msk.f32.mxu0 %vm2217_vm2, %v24489_v47  ;;  %v9563_v47 = vld [vmem:[#allocation2 + $0x287] sm:$0xff] }
 0x438   :  { %19388 = vmatmul.mubr.msk.f32.gmra.mrb[14].mxu1 %vm2217_vm2, %v9558_v26  ;;  %v26521_v26 = vld [vmem:[#allocation32_spill] sm:$0xff] }
 0x439   :  { %19390 = vmatprep.mubr.msk.f32.mxu1 %vm2217_vm2, %v9559_v30 }
 0x43a   :  { %18749 = vmatmul.mubr.msk.f32.gmra.mrb[130].mxu0 %vm2217_vm2, %v24493_v19  ;;  %v26508_v19 = vld [vmem:[#allocation33_spill] sm:$0xff] }
 0x43b   :  { %18751 = vmatprep.mubr.msk.f32.mxu0 %vm2217_vm2, %v24501_v20  ;;  %v9564_v20 = vld [vmem:[#allocation2 + $0x28f] sm:$0xff] }
 0x43c   :  { %19391 = vmatmul.mubr.msk.f32.gmra.mrb[16].mxu1 %vm2217_vm2, %v9560_v34  ;;  %v10720_v34 = vld [vmem:[#allocation2 + $0x40] sm:$0xff] }
 0x43d   :  { %19393 = vmatprep.mubr.msk.f32.mxu1 %vm2217_vm2, %v9561_v27  ;;  %v10721_v27 = vld [vmem:[#allocation2 + $0x48] sm:$0xff] }
 0x43e   :  { %18752 = vmatmul.mubr.msk.f32.gmra.mrb[132].mxu0 %vm2217_vm2, %v24505_v2  ;;  %v26509_v2 = vld [vmem:[#allocation30_spill] sm:$0xff] }
 0x43f   :  { %18754 = vmatprep.mubr.msk.f32.mxu0 %vm2217_vm2, %v24513_v46  ;;  %v9566_v46 = vld [vmem:[#allocation2 + $0x29f] sm:$0xff] }
 0x440   :  { %19394 = vmatmul.mubr.msk.f32.gmra.mrb[18].mxu1 %vm2217_vm2, %v9562_v60 }
 0x441   :  { %19396 = vmatprep.mubr.msk.f32.mxu1 %vm2217_vm2, %v9563_v47 }
 0x442   :  { %18755 = vmatmul.mubr.msk.f32.gmra.mrb[134].mxu0 %vm2217_vm2, %v24517_v29  ;;  %v9568_v29 = vld [vmem:[#allocation2 + $0x2af] sm:$0xff] }
 0x443   :  { %18757 = vmatprep.mubr.msk.f32.mxu0 %vm2217_vm2, %v26508_v19  ;;  %v10722_v19 = vld [vmem:[#allocation2 + $0x50] sm:$0xff] }
 0x444   :  { %19397 = vmatmul.mubr.msk.f32.gmra.mrb[20].mxu1 %vm2217_vm2, %v9564_v20  ;;  %v10723_v20 = vld [vmem:[#allocation2 + $0x58] sm:$0xff] }
 0x445   :  { %19399 = vmatprep.mubr.msk.f32.mxu1 %vm2217_vm2, %v9565_v40 }
 0x446   :  { %18758 = vmatmul.mubr.msk.f32.gmra.mrb[136].mxu0 %vm2217_vm2, %v26509_v2 }
 0x447   :  { %18760 = vmatprep.mubr.msk.f32.mxu0 %vm2217_vm2, %v24537_v49  ;;  %v9570_v49 = vld [vmem:[#allocation2 + $0x2bf] sm:$0xff] }
 0x448   :  { %19400 = vmatmul.mubr.msk.f32.gmra.mrb[22].mxu1 %vm2217_vm2, %v9566_v46  ;;  %v10724_v46 = vld [vmem:[#allocation2 + $0x60] sm:$0xff] }
 0x449   :  { %19402 = vmatprep.mubr.msk.f32.mxu1 %vm2217_vm2, %v9567_v1 }
 0x44a   :  { %18761 = vmatmul.mubr.msk.f32.gmra.mrb[138].mxu0 %vm2217_vm2, %v24541_v25  ;;  %v9572_v25 = vld [vmem:[#allocation2 + $0x2cf] sm:$0xff] }
 0x44b   :  { %18763 = vmatprep.mubr.msk.f32.mxu0 %vm2217_vm2, %v24549_v51  ;;  %v9573_v51 = vld [vmem:[#allocation2 + $0x2d7] sm:$0xff] }
 0x44c   :  { %19403 = vmatmul.mubr.msk.f32.gmra.mrb[24].mxu1 %vm2217_vm2, %v9568_v29 }
 0x44d   :  { %19405 = vmatprep.mubr.msk.f32.mxu1 %vm2217_vm2, %v9569_v54  ;;  %v10726_v54 = vld [vmem:[#allocation2 + $0x70] sm:$0xff] }
 0x44e   :  { %18764 = vmatmul.mubr.msk.f32.gmra.mrb[140].mxu0 %vm2217_vm2, %v24553_v16  ;;  %v9574_v16 = vld [vmem:[#allocation2 + $0x2df] sm:$0xff] }
 0x44f   :  { %18766 = vmatprep.mubr.msk.f32.mxu0 %vm2217_vm2, %v24561_v45  ;;  %v9575_v45 = vld [vmem:[#allocation2 + $0x2e7] sm:$0xff] }
 0x450   :  { %19406 = vmatmul.mubr.msk.f32.gmra.mrb[26].mxu1 %vm2217_vm2, %v9570_v49  ;;  %v10727_v49 = vld [vmem:[#allocation2 + $0x78] sm:$0xff] }
 0x451   :  { %19408 = vmatprep.mubr.msk.f32.mxu1 %vm2217_vm2, %v9571_v58 }
 0x452   :  { %18767 = vmatmul.mubr.msk.f32.gmra.mrb[142].mxu0 %vm2217_vm2, %v24565_v28  ;;  %v9576_v28 = vld [vmem:[#allocation2 + $0x2ef] sm:$0xff] }
 0x453   :  { %18769 = vmatprep.mubr.msk.f32.mxu0 %vm2217_vm2, %v24573_v33  ;;  %v9577_v33 = vld [vmem:[#allocation2 + $0x2f7] sm:$0xff] }
 0x454   :  { %19409 = vmatmul.mubr.msk.f32.gmra.mrb[28].mxu1 %vm2217_vm2, %v9572_v25 }
 0x455   :  { %19411 = vmatprep.mubr.msk.f32.mxu1 %vm2217_vm2, %v9573_v51  ;;  %v10728_v51 = vld [vmem:[#allocation2 + $0x80] sm:$0xff] }
 0x456   :  { %18770 = vmatmul.mubr.msk.f32.gmra.mrb[144].mxu0 %vm2217_vm2, %v24577_v18  ;;  %v9578_v18 = vld [vmem:[#allocation2 + $0x2ff] sm:$0xff] }
 0x457   :  { %18772 = vmatprep.mubr.msk.f32.mxu0 %vm2217_vm2, %v24585_v17  ;;  %v9579_v17 = vld [vmem:[#allocation2 + $0x307] sm:$0xff] }
 0x458   :  { %19412 = vmatmul.mubr.msk.f32.gmra.mrb[30].mxu1 %vm2217_vm2, %v9574_v16  ;;  %v10729_v16 = vld [vmem:[#allocation2 + $0x88] sm:$0xff] }
 0x459   :  { %19414 = vmatprep.mubr.msk.f32.mxu1 %vm2217_vm2, %v9575_v45 }
 0x45a   :  { %18773 = vmatmul.mubr.msk.f32.gmra.mrb[146].mxu0 %vm2217_vm2, %v24589_v10  ;;  %v9580_v10 = vld [vmem:[#allocation2 + $0x30f] sm:$0xff] }
 0x45b   :  { %18775 = vmatprep.mubr.msk.f32.mxu0 %vm2217_vm2, %v24597_v62  ;;  %v9581_v62 = vld [vmem:[#allocation2 + $0x317] sm:$0xff] }
 0x45c   :  { %19415 = vmatmul.mubr.msk.f32.gmra.mrb[32].mxu1 %vm2217_vm2, %v9576_v28 }
 0x45d   :  { %19417 = vmatprep.mubr.msk.f32.mxu1 %vm2217_vm2, %v9577_v33  ;;  %v10730_v33 = vld [vmem:[#allocation2 + $0x90] sm:$0xff] }
 0x45e   :  { %18776 = vmatmul.mubr.msk.f32.gmra.mrb[148].mxu0 %vm2217_vm2, %v24601_v7  ;;  %v9582_v7 = vld [vmem:[#allocation2 + $0x31f] sm:$0xff] }
 0x45f   :  { %18778 = vmatprep.mubr.msk.f32.mxu0 %vm2217_vm2, %v24609_v3  ;;  %v9583_v3 = vld [vmem:[#allocation2 + $0x327] sm:$0xff] }
 0x460   :  { %19418 = vmatmul.mubr.msk.f32.gmra.mrb[34].mxu1 %vm2217_vm2, %v9578_v18  ;;  %v10731_v18 = vld [vmem:[#allocation2 + $0x98] sm:$0xff] }
 0x461   :  { %19420 = vmatprep.mubr.msk.f32.mxu1 %vm2217_vm2, %v9579_v17 }
 0x462   :  { %18779 = vmatmul.mubr.msk.f32.gmra.mrb[150].mxu0 %vm2217_vm2, %v24613_v48  ;;  %v9584_v48 = vld [vmem:[#allocation2 + $0x32f] sm:$0xff] }
 0x463   :  { %18781 = vmatprep.mubr.msk.f32.mxu0 %vm2217_vm2, %v24621_v4  ;;  %v9585_v4 = vld [vmem:[#allocation2 + $0x337] sm:$0xff] }
 0x464   :  { %19421 = vmatmul.mubr.msk.f32.gmra.mrb[36].mxu1 %vm2217_vm2, %v9580_v10 }
 0x465   :  { %19423 = vmatprep.mubr.msk.f32.mxu1 %vm2217_vm2, %v9581_v62  ;;  %v10732_v62 = vld [vmem:[#allocation2 + $0xa0] sm:$0xff] }
 0x466   :  { %18782 = vmatmul.mubr.msk.f32.gmra.mrb[152].mxu0 %vm2217_vm2, %v24625_v39  ;;  %v9586_v39 = vld [vmem:[#allocation2 + $0x33f] sm:$0xff] }
 0x467   :  { %18784 = vmatprep.mubr.msk.f32.mxu0 %vm2217_vm2, %v24633_v12  ;;  %v9587_v12 = vld [vmem:[#allocation2 + $0x347] sm:$0xff] }
 0x468   :  { %19424 = vmatmul.mubr.msk.f32.gmra.mrb[38].mxu1 %vm2217_vm2, %v9582_v7  ;;  %v10733_v7 = vld [vmem:[#allocation2 + $0xa8] sm:$0xff] }
 0x469   :  { %19426 = vmatprep.mubr.msk.f32.mxu1 %vm2217_vm2, %v9583_v3 }
 0x46a   :  { %18785 = vmatmul.mubr.msk.f32.gmra.mrb[154].mxu0 %vm2217_vm2, %v24637_v44  ;;  %v9588_v44 = vld [vmem:[#allocation2 + $0x34f] sm:$0xff] }
 0x46b   :  { %18787 = vmatprep.mubr.msk.f32.mxu0 %vm2217_vm2, %v24645_v5  ;;  %v9589_v5 = vld [vmem:[#allocation2 + $0x357] sm:$0xff] }
 0x46c   :  { %19427 = vmatmul.mubr.msk.f32.gmra.mrb[40].mxu1 %vm2217_vm2, %v9584_v48 }
 0x46d   :  { %19429 = vmatprep.mubr.msk.f32.mxu1 %vm2217_vm2, %v9585_v4  ;;  %v10734_v4 = vld [vmem:[#allocation2 + $0xb0] sm:$0xff] }
 0x46e   :  { %18788 = vmatmul.mubr.msk.f32.gmra.mrb[156].mxu0 %vm2217_vm2, %v24649_v56  ;;  %v9590_v56 = vld [vmem:[#allocation2 + $0x35f] sm:$0xff] }
 0x46f   :  { %18790 = vmatprep.mubr.msk.f32.mxu0 %vm2217_vm2, %v24657_v59  ;;  %v9591_v59 = vld [vmem:[#allocation2 + $0x367] sm:$0xff] }
 0x470   :  { %19430 = vmatmul.mubr.msk.f32.gmra.mrb[42].mxu1 %vm2217_vm2, %v9586_v39  ;;  %v10735_v39 = vld [vmem:[#allocation2 + $0xb8] sm:$0xff] }
 0x471   :  { %19432 = vmatprep.mubr.msk.f32.mxu1 %vm2217_vm2, %v9587_v12 }
 0x472   :  { %18791 = vmatmul.mubr.msk.f32.gmra.mrb[158].mxu0 %vm2217_vm2, %v24661_v37  ;;  %v9592_v37 = vld [vmem:[#allocation2 + $0x36f] sm:$0xff] }
 0x473   :  { %18793 = vmatprep.mubr.msk.f32.mxu0 %vm2217_vm2, %v24669_v6  ;;  %v9593_v6 = vld [vmem:[#allocation2 + $0x377] sm:$0xff] }
 0x474   :  { %19433 = vmatmul.mubr.msk.f32.gmra.mrb[44].mxu1 %vm2217_vm2, %v9588_v44 }
 0x475   :  { %19435 = vmatprep.mubr.msk.f32.mxu1 %vm2217_vm2, %v9589_v5  ;;  %v10736_v5 = vld [vmem:[#allocation2 + $0xc0] sm:$0xff] }
 0x476   :  { %18794 = vmatmul.mubr.msk.f32.gmra.mrb[160].mxu0 %vm2217_vm2, %v24673_v14  ;;  %v9594_v14 = vld [vmem:[#allocation2 + $0x37f] sm:$0xff] }
 0x477   :  { %18796 = vmatprep.mubr.msk.f32.mxu0 %vm2217_vm2, %v24681_v52  ;;  %v9595_v52 = vld [vmem:[#allocation2 + $0x387] sm:$0xff] }
 0x478   :  { %19436 = vmatmul.mubr.msk.f32.gmra.mrb[46].mxu1 %vm2217_vm2, %v9590_v56  ;;  %v10737_v56 = vld [vmem:[#allocation2 + $0xc8] sm:$0xff] }
 0x479   :  { %19438 = vmatprep.mubr.msk.f32.mxu1 %vm2217_vm2, %v9591_v59 }
 0x47a   :  { %18797 = vmatmul.mubr.msk.f32.gmra.mrb[162].mxu0 %vm2217_vm2, %v24685_v21  ;;  %v9596_v21 = vld [vmem:[#allocation2 + $0x38f] sm:$0xff] }
 0x47b   :  { %18799 = vmatprep.mubr.msk.f32.mxu0 %vm2217_vm2, %v24693_v22  ;;  %v9597_v22 = vld [vmem:[#allocation2 + $0x397] sm:$0xff] }
 0x47c   :  { %19439 = vmatmul.mubr.msk.f32.gmra.mrb[48].mxu1 %vm2217_vm2, %v9592_v37 }
 0x47d   :  { %19441 = vmatprep.mubr.msk.f32.mxu1 %vm2217_vm2, %v9593_v6  ;;  %v10738_v6 = vld [vmem:[#allocation2 + $0xd0] sm:$0xff] }
 0x47e   :  { %18800 = vmatmul.mubr.msk.f32.gmra.mrb[164].mxu0 %vm2217_vm2, %v24697_v41 }
 0x47f   :  { %18802 = vmatprep.mubr.msk.f32.mxu0 %vm2217_vm2, %v24705_v15 }
 0x480   :  { %19442 = vmatmul.mubr.msk.f32.gmra.mrb[50].mxu1 %vm2217_vm2, %v9594_v14  ;;  %v10739_v14 = vld [vmem:[#allocation2 + $0xd8] sm:$0xff] }
 0x481   :  { %19444 = vmatprep.mubr.msk.f32.mxu1 %vm2217_vm2, %v9595_v52 }
 0x482   :  { %18803 = vmatmul.mubr.msk.f32.gmra.mrb[166].mxu0 %vm2217_vm2, %v24709_v23  ;;  %v9598_v23 = vld [vmem:[#allocation2 + $0x39f] sm:$0xff] }
 0x483   :  { %18805 = vmatprep.mubr.msk.f32.mxu0 %vm2217_vm2, %v24717_v61  ;;  %v9599_v61 = vld [vmem:[#allocation2 + $0x3a7] sm:$0xff] }
 0x484   :  { %19445 = vmatmul.mubr.msk.f32.gmra.mrb[52].mxu1 %vm2217_vm2, %v9596_v21 }
 0x485   :  { %19447 = vmatprep.mubr.msk.f32.mxu1 %vm2217_vm2, %v9597_v22  ;;  %v24953_v41 = vpop.f32.mrb[178].mxu0  ;;  %v10740_v22 = vld [vmem:[#allocation2 + $0xe0] sm:$0xff] }
 0x486   :  { %26510 = vst [vmem:[#allocation36_spill] sm:$0xff] %v24953_v41  ;;  %v24955_v15 = vpop.f32.mrb[179].mxu0  ;;  %18806 = vmatmul.mubr.msk.f32.gmra.mrb[168].mxu0 %vm2217_vm2, %v24721_v36  ;;  %v9600_v36 = vld [vmem:[#allocation2 + $0x3af] sm:$0xff] }
 0x487   :  { %26511 = vst [vmem:[#allocation34_spill] sm:$0xff] %v24955_v15  ;;  %18808 = vmatprep.mubr.msk.f32.mxu0 %vm2217_vm2, %v24729_v63  ;;  %v9601_v63 = vld [vmem:[#allocation2 + $0x3b7] sm:$0xff]  ;;  %v10833_v15 = vld [vmem:[#allocation2 + $0x3c8] sm:$0xff] }
 0x488   :  { %19448 = vmatmul.mubr.msk.f32.gmra.mrb[54].mxu1 %vm2217_vm2, %v9598_v23  ;;  %v10741_v23 = vld [vmem:[#allocation2 + $0xe8] sm:$0xff] }
 0x489   :  { %19450 = vmatprep.mubr.msk.f32.mxu1 %vm2217_vm2, %v9599_v61  ;;  %v24963_v32 = vpop.f32.mrb[180].mxu0 }
 0x48a   :  { %26512 = vst [vmem:[#allocation17_spill] sm:$0xff] %v24963_v32  ;;  %v24965_v53 = vpop.f32.mrb[181].mxu0  ;;  %18809 = vmatmul.mubr.msk.f32.gmra.mrb[170].mxu0 %vm2217_vm2, %v24733_v24  ;;  %v9602_v24 = vld [vmem:[#allocation2 + $0x3bf] sm:$0xff] }
 0x48b   :  { %26513 = vst [vmem:[#allocation20_spill] sm:$0xff] %v24965_v53  ;;  %18811 = vmatprep.mubr.msk.f32.mxu0 %vm2217_vm2, %v24741_v13  ;;  %v9603_v13 = vld [vmem:[#allocation2 + $0x3c7] sm:$0xff] }
 0x48c   :  { %19451 = vmatmul.mubr.msk.f32.gmra.mrb[56].mxu1 %vm2217_vm2, %v9600_v36  ;;  %v10829_v53 = vld [vmem:[#allocation2 + $0x3a8] sm:$0xff]  ;;  %v10832_v32 = vld [vmem:[#allocation2 + $0x3c0] sm:$0xff] }
 0x48d   :  { %19453 = vmatprep.mubr.msk.f32.mxu1 %vm2217_vm2, %v9601_v63  ;;  %v24973_v57 = vpop.f32.mrb[182].mxu0  ;;  %v10742_v63 = vld [vmem:[#allocation2 + $0xf0] sm:$0xff] }
 0x48e   :  { %26514 = vst [vmem:[#allocation25_spill] sm:$0xff] %v24973_v57  ;;  %v24975_v9 = vpop.f32.mrb[183].mxu0  ;;  %18812 = vmatmul.mubr.msk.f32.gmra.mrb[172].mxu0 %vm2217_vm2, %v24745_v35  ;;  %v9604_v35 = vld [vmem:[#allocation2 + $0x3cf] sm:$0xff]  ;;  %v10828_v57 = vld [vmem:[#allocation2 + $0x3a0] sm:$0xff] }
 0x48f   :  { %26515 = vst [vmem:[#allocation22_spill] sm:$0xff] %v24975_v9  ;;  %18814 = vmatprep.mubr.msk.f32.mxu0 %vm2217_vm2, %v24753_v0  ;;  %v16431_v0 = vld [vmem:[%s26380_s5 + $0x110] sm:$0xff] }
 0x490   :  { %19454 = vmatmul.mubr.msk.f32.gmra.mrb[58].mxu1 %vm2217_vm2, %v9602_v24  ;;  %v20077_v30 = vpack.c.bf16 %v16432_v43, %v16431_v0  ;;  %v10743_v24 = vld [vmem:[#allocation2 + $0xf8] sm:$0xff]  ;;  %v10745_v0 = vld [vmem:[#allocation2 + $0x108] sm:$0xff]  ;;  %v10826_v9 = vld [vmem:[#allocation2 + $0x390] sm:$0xff] }
 0x491   :  { %19456 = vmatprep.mubr.msk.f32.mxu1 %vm2217_vm2, %v9603_v13  ;;  %v24983_v55 = vpop.f32.mrb[184].mxu0 }
 0x492   :  { %26516 = vst [vmem:[#allocation27_spill] sm:$0xff] %v24983_v55  ;;  %v24985_v8 = vpop.f32.mrb[185].mxu0  ;;  %18815 = vmatmul.mubr.msk.f32.gmra.mrb[174].mxu0 %vm2217_vm2, %v24757_v50 }
 0x493   :  { %26517 = vst [vmem:[#allocation24_spill] sm:$0xff] %v24985_v8  ;;  %18817 = vmatprep.mubr.msk.f32.mxu0 %vm2217_vm2, %v26518_v11  ;;  %v10824_v8 = vld [vmem:[#allocation2 + $0x380] sm:$0xff] }
 0x494   :  { %19457 = vmatmul.mubr.msk.f32.gmra.mrb[60].mxu1 %vm2217_vm2, %v9604_v35  ;;  %v10744_v35 = vld [vmem:[#allocation2 + $0x100] sm:$0xff] }
 0x495   :  { %19467 = vmatprep.mubr.msk.f32.mxu1 %vm2217_vm2, %v10719_v42  ;;  %v24999_v38 = vpop.f32.mrb[186].mxu0 }
 0x496   :  { %26519 = vst [vmem:[#allocation29_spill] sm:$0xff] %v24999_v38  ;;  %v25001_v50 = vpop.f32.mrb[187].mxu0  ;;  %18818 = vmatmul.mubr.msk.f32.gmra.mrb[176].mxu0 %vm2217_vm2, %v26521_v26  ;;  %v10746_v26 = vld [vmem:[#allocation2 + $0x110] sm:$0xff] }
 0x497   :  { %26520 = vst [vmem:[#allocation26_spill] sm:$0xff] %v25001_v50  ;;  %v10822_v50 = vld [vmem:[#allocation2 + $0x370] sm:$0xff] }
 0x498   :  { %19468 = vmatmul.mubr.msk.f32.vlgmr.msra.gmra.mrb[62].mxu1 %vm2217_vm2, %v10720_v34 }
 0x499   :  { %20076 = vmatpush3.bf16.msra.mxu1 %v24789_v31  ;;  %19470 = vmatprep.mubr.msk.f32.mxu1 %vm2217_vm2, %v10721_v27  ;;  %v25008_v60 = vpop.f32.mrb[188].mxu0  ;;  %v10725_v31 = vld [vmem:[#allocation2 + $0x68] sm:$0xff] }
 0x49a   :  { %26522 = vst [vmem:[#allocation31_spill] sm:$0xff] %v25008_v60  ;;  %v25010_v47 = vpop.f32.mrb[189].mxu0  ;;  %20078 = vmatprep.subr.bf16.mxu1 %v20077_v30 }
 0x49b   :  { %26523 = vst [vmem:[#allocation28_spill] sm:$0xff] %v25010_v47  ;;  %v10820_v47 = vld [vmem:[#allocation2 + $0x360] sm:$0xff] }
 0x49c   :  { %19471 = vmatmul.mubr.msk.f32.gmra.mrb[64].mxu1 %vm2217_vm2, %v10722_v19  ;;  %v10748_v19 = vld [vmem:[#allocation2 + $0x120] sm:$0xff] }
 0x49d   :  { %19473 = vmatprep.mubr.msk.f32.mxu1 %vm2217_vm2, %v10723_v20  ;;  %v25014_v40 = vpop.f32.mrb[190].mxu0  ;;  %20080 = vmatpush3.bf16.msra.mxu1 %v20077_v30  ;;  %v10747_v30 = vld [vmem:[#allocation2 + $0x118] sm:$0xff]  ;;  %v10749_v20 = vld [vmem:[#allocation2 + $0x128] sm:$0xff] }
 0x49e   :  { %26524 = vst [vmem:[#allocation33_spill] sm:$0xff] %v25014_v40  ;;  %v25016_v2 = vpop.f32.mrb[191].mxu0 }
 0x49f   :  { %26525 = vst [vmem:[#allocation30_spill] sm:$0xff] %v25016_v2  ;;  %v10818_v2 = vld [vmem:[#allocation2 + $0x350] sm:$0xff] }
 0x4a0   :  { %19474 = vmatmul.mubr.msk.f32.gmra.mrb[66].mxu1 %vm2217_vm2, %v10724_v46 }
 0x4a1   :  { %19476 = vmatprep.mubr.msk.f32.mxu1 %vm2217_vm2, %v10725_v31  ;;  %v25020_v1 = vpop.f32.mrb[192].mxu0 }
 0x4a2   :  { %26526 = vst [vmem:[#allocation35_spill] sm:$0xff] %v25020_v1  ;;  %v25022_v29 = vpop.f32.mrb[193].mxu0 }
 0x4a3   :  { %26527 = vst [vmem:[#allocation32_spill] sm:$0xff] %v25022_v29  ;;  %v10816_v29 = vld [vmem:[#allocation2 + $0x340] sm:$0xff] }
 0x4a4   :  { %19477 = vmatmul.mubr.msk.f32.gmra.mrb[68].mxu1 %vm2217_vm2, %v10726_v54  ;;  %v10750_v54 = vld [vmem:[#allocation2 + $0x130] sm:$0xff] }
 0x4a5   :  { %19479 = vmatprep.mubr.msk.f32.mxu1 %vm2217_vm2, %v10727_v49  ;;  %v25026_v58 = vpop.f32.mrb[194].mxu0  ;;  %v10751_v49 = vld [vmem:[#allocation2 + $0x138] sm:$0xff] }
 0x4a6   :  { %26528 = vst [vmem:[#allocation37_spill] sm:$0xff] %v25026_v58  ;;  %v25028_v25 = vpop.f32.mrb[195].mxu0 }
 0x4a7   :  { %26529 = vst [vmem:[#allocation38_spill] sm:$0xff] %v25028_v25  ;;  %v10814_v25 = vld [vmem:[#allocation2 + $0x330] sm:$0xff] }
 0x4a8   :  { %19480 = vmatmul.mubr.msk.f32.gmra.mrb[70].mxu1 %vm2217_vm2, %v10728_v51 }
 0x4a9   :  { %19482 = vmatprep.mubr.msk.f32.mxu1 %vm2217_vm2, %v10729_v16  ;;  %v25032_v45 = vpop.f32.mrb[196].mxu0 }
 0x4aa   :  { %26530 = vst [vmem:[#allocation39_spill] sm:$0xff] %v25032_v45  ;;  %v25034_v28 = vpop.f32.mrb[197].mxu0 }
 0x4ab   :  { %26531 = vst [vmem:[#allocation40_spill] sm:$0xff] %v25034_v28  ;;  %v10812_v28 = vld [vmem:[#allocation2 + $0x320] sm:$0xff] }
 0x4ac   :  { %19483 = vmatmul.mubr.msk.f32.gmra.mrb[72].mxu1 %vm2217_vm2, %v10730_v33  ;;  %v10752_v33 = vld [vmem:[#allocation2 + $0x140] sm:$0xff] }
 0x4ad   :  { %19485 = vmatprep.mubr.msk.f32.mxu1 %vm2217_vm2, %v10731_v18  ;;  %v25038_v17 = vpop.f32.mrb[198].mxu0  ;;  %v10753_v18 = vld [vmem:[#allocation2 + $0x148] sm:$0xff] }
 0x4ae   :  { %26532 = vst [vmem:[#allocation41_spill] sm:$0xff] %v25038_v17  ;;  %v25040_v10 = vpop.f32.mrb[199].mxu0 }
 0x4af   :  { %26533 = vst [vmem:[#allocation42_spill] sm:$0xff] %v25040_v10  ;;  %v10810_v10 = vld [vmem:[#allocation2 + $0x310] sm:$0xff] }
 0x4b0   :  { %19486 = vmatmul.mubr.msk.f32.gmra.mrb[74].mxu1 %vm2217_vm2, %v10732_v62 }
 0x4b1   :  { %19488 = vmatprep.mubr.msk.f32.mxu1 %vm2217_vm2, %v10733_v7  ;;  %v25044_v3 = vpop.f32.mrb[200].mxu0 }
 0x4b2   :  { %26534 = vst [vmem:[#allocation43_spill] sm:$0xff] %v25044_v3  ;;  %v25046_v48 = vpop.f32.mrb[201].mxu0 }
 0x4b3   :  { %26535 = vst [vmem:[#allocation44_spill] sm:$0xff] %v25046_v48  ;;  %v10808_v48 = vld [vmem:[#allocation2 + $0x300] sm:$0xff] }
 0x4b4   :  { %19489 = vmatmul.mubr.msk.f32.gmra.mrb[76].mxu1 %vm2217_vm2, %v10734_v4  ;;  %v10754_v4 = vld [vmem:[#allocation2 + $0x150] sm:$0xff] }
 0x4b5   :  { %19491 = vmatprep.mubr.msk.f32.mxu1 %vm2217_vm2, %v10735_v39  ;;  %v25050_v12 = vpop.f32.mrb[202].mxu0  ;;  %v10755_v39 = vld [vmem:[#allocation2 + $0x158] sm:$0xff] }
 0x4b6   :  { %26536 = vst [vmem:[#allocation45_spill] sm:$0xff] %v25050_v12  ;;  %v25052_v44 = vpop.f32.mrb[203].mxu0 }
 0x4b7   :  { %26537 = vst [vmem:[#allocation46_spill] sm:$0xff] %v25052_v44  ;;  %v10806_v44 = vld [vmem:[#allocation2 + $0x2f0] sm:$0xff] }
 0x4b8   :  { %19492 = vmatmul.mubr.msk.f32.gmra.mrb[78].mxu1 %vm2217_vm2, %v10736_v5 }
 0x4b9   :  { %19494 = vmatprep.mubr.msk.f32.mxu1 %vm2217_vm2, %v10737_v56  ;;  %v25056_v59 = vpop.f32.mrb[204].mxu0 }
 0x4ba   :  { %26538 = vst [vmem:[#allocation47_spill] sm:$0xff] %v25056_v59  ;;  %v25058_v37 = vpop.f32.mrb[205].mxu0 }
 0x4bb   :  { %26539 = vst [vmem:[#allocation48_spill] sm:$0xff] %v25058_v37  ;;  %v10804_v37 = vld [vmem:[#allocation2 + $0x2e0] sm:$0xff] }
 0x4bc   :  { %19495 = vmatmul.mubr.msk.f32.gmra.mrb[80].mxu1 %vm2217_vm2, %v10738_v6  ;;  %v10756_v6 = vld [vmem:[#allocation2 + $0x160] sm:$0xff] }
 0x4bd   :  { %19497 = vmatprep.mubr.msk.f32.mxu1 %vm2217_vm2, %v10739_v14  ;;  %v25062_v52 = vpop.f32.mrb[206].mxu0  ;;  %v10757_v14 = vld [vmem:[#allocation2 + $0x168] sm:$0xff] }
 0x4be   :  { %26540 = vst [vmem:[#allocation49_spill] sm:$0xff] %v25062_v52  ;;  %v25064_v21 = vpop.f32.mrb[207].mxu0 }
 0x4bf   :  { %26541 = vst [vmem:[#allocation50_spill] sm:$0xff] %v25064_v21  ;;  %v10802_v21 = vld [vmem:[#allocation2 + $0x2d0] sm:$0xff] }
 0x4c0   :  { %19498 = vmatmul.mubr.msk.f32.gmra.mrb[82].mxu1 %vm2217_vm2, %v10740_v22 }
 0x4c1   :  { %19500 = vmatprep.mubr.msk.f32.mxu1 %vm2217_vm2, %v10741_v23  ;;  %v25068_v61 = vpop.f32.mrb[208].mxu0 }
 0x4c2   :  { %26542 = vst [vmem:[#allocation51_spill] sm:$0xff] %v25068_v61  ;;  %v25070_v36 = vpop.f32.mrb[209].mxu0 }
 0x4c3   :  { %26543 = vst [vmem:[#allocation52_spill] sm:$0xff] %v25070_v36  ;;  %v10800_v36 = vld [vmem:[#allocation2 + $0x2c0] sm:$0xff] }
 0x4c4   :  { %19501 = vmatmul.mubr.msk.f32.gmra.mrb[84].mxu1 %vm2217_vm2, %v10742_v63  ;;  %v10758_v63 = vld [vmem:[#allocation2 + $0x170] sm:$0xff] }
 0x4c5   :  { %19503 = vmatprep.mubr.msk.f32.mxu1 %vm2217_vm2, %v10743_v24  ;;  %v25074_v13 = vpop.f32.mrb[210].mxu0  ;;  %v10759_v24 = vld [vmem:[#allocation2 + $0x178] sm:$0xff] }
 0x4c6   :  { %26544 = vst [vmem:[#allocation53_spill] sm:$0xff] %v25074_v13  ;;  %v25076_v11 = vpop.f32.mrb[211].mxu0 }
 0x4c7   :  { %26545 = vst [vmem:[#allocation54_spill] sm:$0xff] %v25076_v11  ;;  %v10798_v11 = vld [vmem:[#allocation2 + $0x2b0] sm:$0xff] }
 0x4c8   :  { %19504 = vmatmul.mubr.msk.f32.gmra.mrb[86].mxu1 %vm2217_vm2, %v10744_v35 }
 0x4c9   :  { %19506 = vmatprep.mubr.msk.f32.mxu1 %vm2217_vm2, %v10745_v0  ;;  %v25080_v43 = vpop.f32.mrb[212].mxu0 }
 0x4ca   :  { %26546 = vst [vmem:[#allocation55_spill] sm:$0xff] %v25080_v43  ;;  %v25082_v42 = vpop.f32.mrb[213].mxu0 }
 0x4cb   :  { %26547 = vst [vmem:[#allocation56_spill] sm:$0xff] %v25082_v42  ;;  %v10796_v42 = vld [vmem:[#allocation2 + $0x2a0] sm:$0xff] }
 0x4cc   :  { %19507 = vmatmul.mubr.msk.f32.gmra.mrb[88].mxu1 %vm2217_vm2, %v10746_v26  ;;  %v10760_v26 = vld [vmem:[#allocation2 + $0x180] sm:$0xff] }
 0x4cd   :  { %19509 = vmatprep.mubr.msk.f32.mxu1 %vm2217_vm2, %v10747_v30  ;;  %v25086_v34 = vpop.f32.mrb[214].mxu0  ;;  %v10761_v30 = vld [vmem:[#allocation2 + $0x188] sm:$0xff] }
 0x4ce   :  { %26548 = vst [vmem:[#allocation57_spill] sm:$0xff] %v25086_v34  ;;  %v25088_v27 = vpop.f32.mrb[215].mxu0 }
 0x4cf   :  { %26549 = vst [vmem:[#allocation58_spill] sm:$0xff] %v25088_v27  ;;  %v10794_v27 = vld [vmem:[#allocation2 + $0x290] sm:$0xff] }
 0x4d0   :  { %19510 = vmatmul.mubr.msk.f32.gmra.mrb[90].mxu1 %vm2217_vm2, %v10748_v19 }
 0x4d1   :  { %19512 = vmatprep.mubr.msk.f32.mxu1 %vm2217_vm2, %v10749_v20  ;;  %v25092_v46 = vpop.f32.mrb[216].mxu0 }
 0x4d2   :  { %26550 = vst [vmem:[#allocation59_spill] sm:$0xff] %v25092_v46  ;;  %v25094_v31 = vpop.f32.mrb[217].mxu0 }
 0x4d3   :  { %26551 = vst [vmem:[#allocation60_spill] sm:$0xff] %v25094_v31  ;;  %v10792_v31 = vld [vmem:[#allocation2 + $0x280] sm:$0xff] }
 0x4d4   :  { %19513 = vmatmul.mubr.msk.f32.gmra.mrb[92].mxu1 %vm2217_vm2, %v10750_v54  ;;  %v10762_v54 = vld [vmem:[#allocation2 + $0x190] sm:$0xff] }
 0x4d5   :  { %19515 = vmatprep.mubr.msk.f32.mxu1 %vm2217_vm2, %v10751_v49  ;;  %v25098_v51 = vpop.f32.mrb[218].mxu0  ;;  %v10763_v49 = vld [vmem:[#allocation2 + $0x198] sm:$0xff] }
 0x4d6   :  { %26552 = vst [vmem:[#allocation61_spill] sm:$0xff] %v25098_v51  ;;  %v25100_v16 = vpop.f32.mrb[219].mxu0 }
 0x4d7   :  { %26553 = vst [vmem:[#allocation62_spill] sm:$0xff] %v25100_v16  ;;  %v10790_v16 = vld [vmem:[#allocation2 + $0x270] sm:$0xff] }
 0x4d8   :  { %19516 = vmatmul.mubr.msk.f32.gmra.mrb[94].mxu1 %vm2217_vm2, %v10752_v33 }
 0x4d9   :  { %19518 = vmatprep.mubr.msk.f32.mxu1 %vm2217_vm2, %v10753_v18  ;;  %v25104_v62 = vpop.f32.mrb[220].mxu0 }
 0x4da   :  { %26554 = vst [vmem:[#allocation63_spill] sm:$0xff] %v25104_v62  ;;  %v25106_v7 = vpop.f32.mrb[221].mxu0 }
 0x4db   :  { %26555 = vst [vmem:[#allocation64_spill] sm:$0xff] %v25106_v7  ;;  %v10788_v7 = vld [vmem:[#allocation2 + $0x260] sm:$0xff] }
 0x4dc   :  { %19519 = vmatmul.mubr.msk.f32.gmra.mrb[96].mxu1 %vm2217_vm2, %v10754_v4  ;;  %v10764_v4 = vld [vmem:[#allocation2 + $0x1a0] sm:$0xff] }
 0x4dd   :  { %19521 = vmatprep.mubr.msk.f32.mxu1 %vm2217_vm2, %v10755_v39  ;;  %v25110_v5 = vpop.f32.mrb[222].mxu0  ;;  %v10765_v39 = vld [vmem:[#allocation2 + $0x1a8] sm:$0xff] }
 0x4de   :  { %26556 = vst [vmem:[#allocation65_spill] sm:$0xff] %v25110_v5  ;;  %v25112_v56 = vpop.f32.mrb[223].mxu0 }
 0x4df   :  { %26557 = vst [vmem:[#allocation66_spill] sm:$0xff] %v25112_v56  ;;  %v10786_v56 = vld [vmem:[#allocation2 + $0x250] sm:$0xff] }
 0x4e0   :  { %19522 = vmatmul.mubr.msk.f32.gmra.mrb[98].mxu1 %vm2217_vm2, %v10756_v6 }
 0x4e1   :  { %19524 = vmatprep.mubr.msk.f32.mxu1 %vm2217_vm2, %v10757_v14  ;;  %v25116_v22 = vpop.f32.mrb[224].mxu0 }
 0x4e2   :  { %26558 = vst [vmem:[#allocation67_spill] sm:$0xff] %v25116_v22  ;;  %v25118_v23 = vpop.f32.mrb[225].mxu0 }
 0x4e3   :  { %26559 = vst [vmem:[#allocation68_spill] sm:$0xff] %v25118_v23  ;;  %v10784_v23 = vld [vmem:[#allocation2 + $0x240] sm:$0xff] }
 0x4e4   :  { %19525 = vmatmul.mubr.msk.f32.gmra.mrb[100].mxu1 %vm2217_vm2, %v10758_v63  ;;  %v10766_v63 = vld [vmem:[#allocation2 + $0x1b0] sm:$0xff] }
 0x4e5   :  { %19527 = vmatprep.mubr.msk.f32.mxu1 %vm2217_vm2, %v10759_v24  ;;  %v25122_v35 = vpop.f32.mrb[226].mxu0  ;;  %v10767_v24 = vld [vmem:[#allocation2 + $0x1b8] sm:$0xff] }
 0x4e6   :  { %26560 = vst [vmem:[#allocation69_spill] sm:$0xff] %v25122_v35  ;;  %v25124_v0 = vpop.f32.mrb[227].mxu0 }
 0x4e7   :  { %26561 = vst [vmem:[#allocation70_spill] sm:$0xff] %v25124_v0  ;;  %v10782_v0 = vld [vmem:[#allocation2 + $0x230] sm:$0xff] }
 0x4e8   :  { %19528 = vmatmul.mubr.msk.f32.gmra.mrb[102].mxu1 %vm2217_vm2, %v10760_v26 }
 0x4e9   :  { %19530 = vmatprep.mubr.msk.f32.mxu1 %vm2217_vm2, %v10761_v30  ;;  %v25128_v19 = vpop.f32.mrb[228].mxu0 }
 0x4ea   :  { %26562 = vst [vmem:[#allocation71_spill] sm:$0xff] %v25128_v19  ;;  %v25130_v20 = vpop.f32.mrb[229].mxu0 }
 0x4eb   :  { %26563 = vst [vmem:[#allocation72_spill] sm:$0xff] %v25130_v20  ;;  %v10780_v20 = vld [vmem:[#allocation2 + $0x220] sm:$0xff] }
 0x4ec   :  { %19531 = vmatmul.mubr.msk.f32.gmra.mrb[104].mxu1 %vm2217_vm2, %v10762_v54  ;;  %v10768_v54 = vld [vmem:[#allocation2 + $0x1c0] sm:$0xff] }
 0x4ed   :  { %19533 = vmatprep.mubr.msk.f32.mxu1 %vm2217_vm2, %v10763_v49  ;;  %v25134_v33 = vpop.f32.mrb[230].mxu0  ;;  %v10769_v49 = vld [vmem:[#allocation2 + $0x1c8] sm:$0xff] }
 0x4ee   :  { %26564 = vst [vmem:[#allocation73_spill] sm:$0xff] %v25134_v33  ;;  %v25136_v18 = vpop.f32.mrb[231].mxu0 }
 0x4ef   :  { %26565 = vst [vmem:[#allocation74_spill] sm:$0xff] %v25136_v18  ;;  %v10778_v18 = vld [vmem:[#allocation2 + $0x210] sm:$0xff] }
 0x4f0   :  { %19534 = vmatmul.mubr.msk.f32.gmra.mrb[106].mxu1 %vm2217_vm2, %v10764_v4 }
 0x4f1   :  { %19536 = vmatprep.mubr.msk.f32.mxu1 %vm2217_vm2, %v10765_v39  ;;  %v25140_v6 = vpop.f32.mrb[232].mxu0 }
 0x4f2   :  { %26566 = vst [vmem:[#allocation75_spill] sm:$0xff] %v25140_v6  ;;  %v25142_v14 = vpop.f32.mrb[233].mxu0 }
 0x4f3   :  { %26567 = vst [vmem:[#allocation76_spill] sm:$0xff] %v25142_v14  ;;  %v10770_v14 = vld [vmem:[#allocation2 + $0x1d0] sm:$0xff] }
 0x4f4   :  { %19537 = vmatmul.mubr.msk.f32.gmra.mrb[108].mxu1 %vm2217_vm2, %v10766_v63  ;;  %v10771_v63 = vld [vmem:[#allocation2 + $0x1d8] sm:$0xff] }
 0x4f5   :  { %19539 = vmatprep.mubr.msk.f32.mxu1 %vm2217_vm2, %v10767_v24  ;;  %v25146_v26 = vpop.f32.mrb[234].mxu0 }
 0x4f6   :  { %26568 = vst [vmem:[#allocation77_spill] sm:$0xff] %v25146_v26  ;;  %v25148_v30 = vpop.f32.mrb[235].mxu0 }
 0x4f7   :  { %26569 = vst [vmem:[#allocation78_spill] sm:$0xff] %v25148_v30  ;;  %v10772_v30 = vld [vmem:[#allocation2 + $0x1e0] sm:$0xff] }
 0x4f8   :  { %19540 = vmatmul.mubr.msk.f32.gmra.mrb[110].mxu1 %vm2217_vm2, %v10768_v54  ;;  %v10773_v54 = vld [vmem:[#allocation2 + $0x1e8] sm:$0xff] }
 0x4f9   :  { %19542 = vmatprep.mubr.msk.f32.mxu1 %vm2217_vm2, %v10769_v49  ;;  %v25152_v4 = vpop.f32.mrb[236].mxu0 }
 0x4fa   :  { %26570 = vst [vmem:[#allocation79_spill] sm:$0xff] %v25152_v4  ;;  %v25154_v39 = vpop.f32.mrb[237].mxu0 }
 0x4fb   :  { %26571 = vst [vmem:[#allocation80_spill] sm:$0xff] %v25154_v39  ;;  %v10774_v39 = vld [vmem:[#allocation2 + $0x1f0] sm:$0xff] }
 0x4fc   :  { %19543 = vmatmul.mubr.msk.f32.gmra.mrb[112].mxu1 %vm2217_vm2, %v10770_v14  ;;  %v10775_v14 = vld [vmem:[#allocation2 + $0x1f8] sm:$0xff] }
 0x4fd   :  { %19545 = vmatprep.mubr.msk.f32.mxu1 %vm2217_vm2, %v10771_v63  ;;  %v25158_v24 = vpop.f32.mrb[238].mxu0 }
 0x4fe   :  { %26572 = vst [vmem:[#allocation81_spill] sm:$0xff] %v25158_v24  ;;  %v25160_v26 = vpop.f32.mrb[239].mxu0 }
 0x4ff   :  { %26573 = vst [vmem:[#allocation82_spill] sm:$0xff] %v25160_v26  ;;  %v10776_v26 = vld [vmem:[#allocation2 + $0x200] sm:$0xff] }
 0x500   :  { %19546 = vmatmul.mubr.msk.f32.gmra.mrb[114].mxu1 %vm2217_vm2, %v10772_v30  ;;  %v10777_v30 = vld [vmem:[#allocation2 + $0x208] sm:$0xff] }
 0x501   :  { %19548 = vmatprep.mubr.msk.f32.mxu1 %vm2217_vm2, %v10773_v54  ;;  %v25164_v49 = vpop.f32.mrb[124].mxu0 }
 0x502   :  { %v25166_v4 = vpop.f32.mrb[125].mxu0 }
 0x504   :  { %19549 = vmatmul.mubr.msk.f32.gmra.mrb[0].mxu1 %vm2217_vm2, %v10774_v39  ;;  %v10779_v39 = vld [vmem:[#allocation2 + $0x218] sm:$0xff] }
 0x505   :  { %19551 = vmatprep.mubr.msk.f32.mxu1 %vm2217_vm2, %v10775_v14  ;;  %v25170_v63 = vpop.f32.mrb[126].mxu0 }
 0x506   :  { %v25172_v24 = vpop.f32.mrb[127].mxu0 }
 0x508   :  { %19552 = vmatmul.mubr.msk.f32.gmra.mrb[2].mxu1 %vm2217_vm2, %v10776_v26  ;;  %v10781_v26 = vld [vmem:[#allocation2 + $0x228] sm:$0xff] }
 0x509   :  { %19554 = vmatprep.mubr.msk.f32.mxu1 %vm2217_vm2, %v10777_v30  ;;  %v25176_v54 = vpop.f32.mrb[128].mxu0 }
 0x50a   :  { %v25178_v6 = vpop.f32.mrb[129].mxu0 }
 0x50c   :  { %19555 = vmatmul.mubr.msk.f32.gmra.mrb[4].mxu1 %vm2217_vm2, %v10778_v18  ;;  %v10783_v18 = vld [vmem:[#allocation2 + $0x238] sm:$0xff] }
 0x50d   :  { %19557 = vmatprep.mubr.msk.f32.mxu1 %vm2217_vm2, %v10779_v39  ;;  %v25182_v14 = vpop.f32.mrb[130].mxu0 }
 0x50e   :  { %v25184_v33 = vpop.f32.mrb[131].mxu0 }
 0x510   :  { %19558 = vmatmul.mubr.msk.f32.gmra.mrb[6].mxu1 %vm2217_vm2, %v10780_v20  ;;  %v10785_v20 = vld [vmem:[#allocation2 + $0x248] sm:$0xff] }
 0x511   :  { %19560 = vmatprep.mubr.msk.f32.mxu1 %vm2217_vm2, %v10781_v26  ;;  %v25188_v30 = vpop.f32.mrb[132].mxu0 }
 0x512   :  { %v25190_v19 = vpop.f32.mrb[133].mxu0 }
 0x514   :  { %19561 = vmatmul.mubr.msk.f32.gmra.mrb[8].mxu1 %vm2217_vm2, %v10782_v0  ;;  %v10787_v0 = vld [vmem:[#allocation2 + $0x258] sm:$0xff] }
 0x515   :  { %19563 = vmatprep.mubr.msk.f32.mxu1 %vm2217_vm2, %v10783_v18  ;;  %v25194_v39 = vpop.f32.mrb[134].mxu0 }
 0x516   :  { %v25196_v35 = vpop.f32.mrb[135].mxu0 }
 0x518   :  { %19564 = vmatmul.mubr.msk.f32.gmra.mrb[10].mxu1 %vm2217_vm2, %v10784_v23  ;;  %v10789_v23 = vld [vmem:[#allocation2 + $0x268] sm:$0xff] }
 0x519   :  { %19566 = vmatprep.mubr.msk.f32.mxu1 %vm2217_vm2, %v10785_v20  ;;  %v25200_v26 = vpop.f32.mrb[136].mxu0 }
 0x51a   :  { %v25202_v22 = vpop.f32.mrb[137].mxu0 }
 0x51c   :  { %19567 = vmatmul.mubr.msk.f32.gmra.mrb[12].mxu1 %vm2217_vm2, %v10786_v56  ;;  %v10791_v56 = vld [vmem:[#allocation2 + $0x278] sm:$0xff] }
 0x51d   :  { %19569 = vmatprep.mubr.msk.f32.mxu1 %vm2217_vm2, %v10787_v0  ;;  %v25206_v18 = vpop.f32.mrb[138].mxu0 }
 0x51e   :  { %v25208_v5 = vpop.f32.mrb[139].mxu0 }
 0x520   :  { %19570 = vmatmul.mubr.msk.f32.gmra.mrb[14].mxu1 %vm2217_vm2, %v10788_v7  ;;  %v10793_v7 = vld [vmem:[#allocation2 + $0x288] sm:$0xff] }
 0x521   :  { %19572 = vmatprep.mubr.msk.f32.mxu1 %vm2217_vm2, %v10789_v23  ;;  %v25212_v20 = vpop.f32.mrb[140].mxu0 }
 0x522   :  { %v25214_v62 = vpop.f32.mrb[141].mxu0 }
 0x524   :  { %19573 = vmatmul.mubr.msk.f32.gmra.mrb[16].mxu1 %vm2217_vm2, %v10790_v16  ;;  %v10795_v16 = vld [vmem:[#allocation2 + $0x298] sm:$0xff] }
 0x525   :  { %19575 = vmatprep.mubr.msk.f32.mxu1 %vm2217_vm2, %v10791_v56  ;;  %v25218_v0 = vpop.f32.mrb[142].mxu0 }
 0x526   :  { %v25220_v51 = vpop.f32.mrb[143].mxu0 }
 0x528   :  { %19576 = vmatmul.mubr.msk.f32.gmra.mrb[18].mxu1 %vm2217_vm2, %v10792_v31  ;;  %v10797_v31 = vld [vmem:[#allocation2 + $0x2a8] sm:$0xff] }
 0x529   :  { %19578 = vmatprep.mubr.msk.f32.mxu1 %vm2217_vm2, %v10793_v7  ;;  %v25224_v23 = vpop.f32.mrb[144].mxu0 }
 0x52a   :  { %v25226_v46 = vpop.f32.mrb[145].mxu0 }
 0x52c   :  { %19579 = vmatmul.mubr.msk.f32.gmra.mrb[20].mxu1 %vm2217_vm2, %v10794_v27  ;;  %v10799_v27 = vld [vmem:[#allocation2 + $0x2b8] sm:$0xff] }
 0x52d   :  { %19581 = vmatprep.mubr.msk.f32.mxu1 %vm2217_vm2, %v10795_v16  ;;  %v25230_v56 = vpop.f32.mrb[146].mxu0 }
 0x52e   :  { %v25232_v34 = vpop.f32.mrb[147].mxu0 }
 0x530   :  { %19582 = vmatmul.mubr.msk.f32.gmra.mrb[22].mxu1 %vm2217_vm2, %v10796_v42  ;;  %v10801_v42 = vld [vmem:[#allocation2 + $0x2c8] sm:$0xff] }
 0x531   :  { %19584 = vmatprep.mubr.msk.f32.mxu1 %vm2217_vm2, %v10797_v31  ;;  %v25236_v7 = vpop.f32.mrb[148].mxu0 }
 0x532   :  { %v25238_v43 = vpop.f32.mrb[149].mxu0 }
 0x534   :  { %19585 = vmatmul.mubr.msk.f32.gmra.mrb[24].mxu1 %vm2217_vm2, %v10798_v11  ;;  %v10803_v11 = vld [vmem:[#allocation2 + $0x2d8] sm:$0xff] }
 0x535   :  { %19587 = vmatprep.mubr.msk.f32.mxu1 %vm2217_vm2, %v10799_v27  ;;  %v25242_v16 = vpop.f32.mrb[150].mxu0 }
 0x536   :  { %v25244_v13 = vpop.f32.mrb[151].mxu0 }
 0x538   :  { %19588 = vmatmul.mubr.msk.f32.gmra.mrb[26].mxu1 %vm2217_vm2, %v10800_v36  ;;  %v10805_v36 = vld [vmem:[#allocation2 + $0x2e8] sm:$0xff] }
 0x539   :  { %19590 = vmatprep.mubr.msk.f32.mxu1 %vm2217_vm2, %v10801_v42  ;;  %v25248_v31 = vpop.f32.mrb[152].mxu0 }
 0x53a   :  { %v25250_v61 = vpop.f32.mrb[153].mxu0 }
 0x53c   :  { %19591 = vmatmul.mubr.msk.f32.gmra.mrb[28].mxu1 %vm2217_vm2, %v10802_v21  ;;  %v10807_v21 = vld [vmem:[#allocation2 + $0x2f8] sm:$0xff] }
 0x53d   :  { %19593 = vmatprep.mubr.msk.f32.mxu1 %vm2217_vm2, %v10803_v11  ;;  %v25254_v27 = vpop.f32.mrb[154].mxu0 }
 0x53e   :  { %v25256_v52 = vpop.f32.mrb[155].mxu0 }
 0x540   :  { %19594 = vmatmul.mubr.msk.f32.gmra.mrb[30].mxu1 %vm2217_vm2, %v10804_v37  ;;  %v10809_v37 = vld [vmem:[#allocation2 + $0x308] sm:$0xff] }
 0x541   :  { %19596 = vmatprep.mubr.msk.f32.mxu1 %vm2217_vm2, %v10805_v36  ;;  %v25260_v42 = vpop.f32.mrb[156].mxu0 }
 0x542   :  { %v25262_v59 = vpop.f32.mrb[157].mxu0 }
 0x544   :  { %19597 = vmatmul.mubr.msk.f32.gmra.mrb[32].mxu1 %vm2217_vm2, %v10806_v44  ;;  %v10811_v44 = vld [vmem:[#allocation2 + $0x318] sm:$0xff] }
 0x545   :  { %19599 = vmatprep.mubr.msk.f32.mxu1 %vm2217_vm2, %v10807_v21  ;;  %v25266_v11 = vpop.f32.mrb[158].mxu0 }
 0x546   :  { %v25268_v12 = vpop.f32.mrb[159].mxu0 }
 0x548   :  { %19600 = vmatmul.mubr.msk.f32.gmra.mrb[34].mxu1 %vm2217_vm2, %v10808_v48  ;;  %v10813_v48 = vld [vmem:[#allocation2 + $0x328] sm:$0xff] }
 0x549   :  { %19602 = vmatprep.mubr.msk.f32.mxu1 %vm2217_vm2, %v10809_v37  ;;  %v25272_v36 = vpop.f32.mrb[160].mxu0 }
 0x54a   :  { %v25274_v3 = vpop.f32.mrb[161].mxu0 }
 0x54c   :  { %19603 = vmatmul.mubr.msk.f32.gmra.mrb[36].mxu1 %vm2217_vm2, %v10810_v10  ;;  %v10815_v10 = vld [vmem:[#allocation2 + $0x338] sm:$0xff] }
 0x54d   :  { %19605 = vmatprep.mubr.msk.f32.mxu1 %vm2217_vm2, %v10811_v44  ;;  %v25278_v21 = vpop.f32.mrb[162].mxu0 }
 0x54e   :  { %v25280_v17 = vpop.f32.mrb[163].mxu0 }
 0x550   :  { %19606 = vmatmul.mubr.msk.f32.gmra.mrb[38].mxu1 %vm2217_vm2, %v10812_v28  ;;  %v10817_v28 = vld [vmem:[#allocation2 + $0x348] sm:$0xff] }
 0x551   :  { %19608 = vmatprep.mubr.msk.f32.mxu1 %vm2217_vm2, %v10813_v48  ;;  %v25284_v37 = vpop.f32.mrb[164].mxu0 }
 0x552   :  { %v25286_v45 = vpop.f32.mrb[165].mxu0 }
 0x554   :  { %19609 = vmatmul.mubr.msk.f32.gmra.mrb[40].mxu1 %vm2217_vm2, %v10814_v25  ;;  %v10819_v25 = vld [vmem:[#allocation2 + $0x358] sm:$0xff] }
 0x555   :  { %19611 = vmatprep.mubr.msk.f32.mxu1 %vm2217_vm2, %v10815_v10  ;;  %v25290_v44 = vpop.f32.mrb[166].mxu0 }
 0x556   :  { %v25292_v58 = vpop.f32.mrb[167].mxu0 }
 0x558   :  { %19612 = vmatmul.mubr.msk.f32.gmra.mrb[42].mxu1 %vm2217_vm2, %v10816_v29  ;;  %v10821_v29 = vld [vmem:[#allocation2 + $0x368] sm:$0xff] }
 0x559   :  { %19614 = vmatprep.mubr.msk.f32.mxu1 %vm2217_vm2, %v10817_v28  ;;  %v25296_v48 = vpop.f32.mrb[168].mxu0 }
 0x55a   :  { %v25298_v1 = vpop.f32.mrb[169].mxu0 }
 0x55c   :  { %19615 = vmatmul.mubr.msk.f32.gmra.mrb[44].mxu1 %vm2217_vm2, %v10818_v2  ;;  %v10823_v2 = vld [vmem:[#allocation2 + $0x378] sm:$0xff] }
 0x55d   :  { %19617 = vmatprep.mubr.msk.f32.mxu1 %vm2217_vm2, %v10819_v25  ;;  %v25302_v10 = vpop.f32.mrb[170].mxu0 }
 0x55e   :  { %v25304_v40 = vpop.f32.mrb[171].mxu0 }
 0x560   :  { %19618 = vmatmul.mubr.msk.f32.gmra.mrb[46].mxu1 %vm2217_vm2, %v10820_v47  ;;  %v10825_v47 = vld [vmem:[#allocation2 + $0x388] sm:$0xff] }
 0x561   :  { %19620 = vmatprep.mubr.msk.f32.mxu1 %vm2217_vm2, %v10821_v29  ;;  %v25308_v28 = vpop.f32.mrb[172].mxu0 }
 0x562   :  { %v25310_v60 = vpop.f32.mrb[173].mxu0 }
 0x564   :  { %19621 = vmatmul.mubr.msk.f32.gmra.mrb[48].mxu1 %vm2217_vm2, %v10822_v50  ;;  %v10827_v50 = vld [vmem:[#allocation2 + $0x398] sm:$0xff] }
 0x565   :  { %19623 = vmatprep.mubr.msk.f32.mxu1 %vm2217_vm2, %v10823_v2  ;;  %v25314_v25 = vpop.f32.mrb[174].mxu0  ;;  %v13534_v2 = vld [vmem:[%s26383_s7] sm:$0xff] }
 0x566   :  { %v25316_v38 = vpop.f32.mrb[175].mxu0 }
 0x567   :  { %26574 = vst [vmem:[#allocation83_spill] sm:$0xff] %v25316_v38 }
 0x568   :  { %19624 = vmatmul.mubr.msk.f32.gmra.mrb[50].mxu1 %vm2217_vm2, %v10824_v8  ;;  %v13535_v8 = vld [vmem:[%s26383_s7 + $0x8] sm:$0xff] }
 0x569   :  { %19626 = vmatprep.mubr.msk.f32.mxu1 %vm2217_vm2, %v10825_v47  ;;  %v25320_v29 = vpop.f32.mrb[176].mxu0  ;;  %v20081_v47 = vpack.c.bf16 %v13535_v8, %v13534_v2  ;;  %v10834_v2 = vld [vmem:[#allocation2 + $0x3d0] sm:$0xff] }
 0x56a   :  { %26575 = vst [vmem:[#allocation84_spill] sm:$0xff] %v25320_v29  ;;  %v25322_v55 = vpop.f32.mrb[177].mxu0  ;;  %v11951_v8 = vld [vmem:[#allocation2 + $0x49] sm:$0xff] }
 0x56b   :  { %26576 = vst [vmem:[#allocation85_spill] sm:$0xff] %v25322_v55  ;;  %20082 = vmatprep.subr.bf16.mxu0 %v20081_v47  ;;  %v12058_v55 = vld [vmem:[#allocation2 + $0x3a1] sm:$0xff] }
 0x56c   :  { %19627 = vmatmul.mubr.msk.f32.gmra.mrb[52].mxu1 %vm2217_vm2, %v10826_v9  ;;  %20084 = vmatpush3.bf16.msra.mxu0 %v20081_v47  ;;  %v10830_v9 = vld [vmem:[#allocation2 + $0x3b0] sm:$0xff] }
 0x56d   :  { %19629 = vmatprep.mubr.msk.f32.mxu1 %vm2217_vm2, %v10827_v50  ;;  %v10831_v50 = vld [vmem:[#allocation2 + $0x3b8] sm:$0xff] }
 0x56e   :  { %v11952_v47 = vld [vmem:[#allocation2 + $0x51] sm:$0xff] }
 0x570   :  { %19630 = vmatmul.mubr.msk.f32.gmra.mrb[54].mxu1 %vm2217_vm2, %v10828_v57  ;;  %v11949_v57 = vld [vmem:[#allocation2 + $0x39] sm:$0xff] }
 0x571   :  { %19632 = vmatprep.mubr.msk.f32.mxu1 %vm2217_vm2, %v10829_v53  ;;  %v11950_v53 = vld [vmem:[#allocation2 + $0x41] sm:$0xff] }
 0x574   :  { %19633 = vmatmul.mubr.msk.f32.gmra.mrb[56].mxu1 %vm2217_vm2, %v10830_v9  ;;  %v11953_v9 = vld [vmem:[#allocation2 + $0x59] sm:$0xff] }
 0x575   :  { %19635 = vmatprep.mubr.msk.f32.mxu1 %vm2217_vm2, %v10831_v50  ;;  %v11956_v50 = vld [vmem:[#allocation2 + $0x71] sm:$0xff] }
 0x578   :  { %19636 = vmatmul.mubr.msk.f32.gmra.mrb[58].mxu1 %vm2217_vm2, %v10832_v32  ;;  %v11954_v32 = vld [vmem:[#allocation2 + $0x61] sm:$0xff] }
 0x579   :  { %19638 = vmatprep.mubr.msk.f32.mxu1 %vm2217_vm2, %v10833_v15  ;;  %v11955_v15 = vld [vmem:[#allocation2 + $0x69] sm:$0xff] }
 0x57c   :  { %19639 = vmatmul.mubr.msk.f32.gmra.mrb[60].mxu1 %vm2217_vm2, %v10834_v2  ;;  %v11957_v2 = vld [vmem:[#allocation2 + $0x79] sm:$0xff] }
 0x57d   :  { %19649 = vmatprep.mubr.msk.f32.mxu1 %vm2217_vm2, %v11949_v57  ;;  %v11958_v57 = vld [vmem:[#allocation2 + $0x81] sm:$0xff] }
 0x580   :  { %19650 = vmatmul.mubr.msk.f32.vlgmr.msra.gmra.mrb[62].mxu1 %vm2217_vm2, %v11950_v53  ;;  %v11959_v53 = vld [vmem:[#allocation2 + $0x89] sm:$0xff] }
 0x581   :  { %19652 = vmatprep.mubr.msk.f32.mxu1 %vm2217_vm2, %v11951_v8  ;;  %v11960_v8 = vld [vmem:[#allocation2 + $0x91] sm:$0xff] }
 0x584   :  { %19653 = vmatmul.mubr.msk.f32.gmra.mrb[64].mxu1 %vm2217_vm2, %v11952_v47  ;;  %v11961_v47 = vld [vmem:[#allocation2 + $0x99] sm:$0xff] }
 0x585   :  { %19655 = vmatprep.mubr.msk.f32.mxu1 %vm2217_vm2, %v11953_v9  ;;  %v11962_v9 = vld [vmem:[#allocation2 + $0xa1] sm:$0xff] }
 0x588   :  { %19656 = vmatmul.mubr.msk.f32.gmra.mrb[66].mxu1 %vm2217_vm2, %v11954_v32  ;;  %v11963_v32 = vld [vmem:[#allocation2 + $0xa9] sm:$0xff] }
 0x589   :  { %19658 = vmatprep.mubr.msk.f32.mxu1 %vm2217_vm2, %v11955_v15  ;;  %v11964_v15 = vld [vmem:[#allocation2 + $0xb1] sm:$0xff] }
 0x58c   :  { %19659 = vmatmul.mubr.msk.f32.gmra.mrb[68].mxu1 %vm2217_vm2, %v11956_v50  ;;  %v11965_v50 = vld [vmem:[#allocation2 + $0xb9] sm:$0xff] }
 0x58d   :  { %19661 = vmatprep.mubr.msk.f32.mxu1 %vm2217_vm2, %v11957_v2  ;;  %v11966_v2 = vld [vmem:[#allocation2 + $0xc1] sm:$0xff] }
 0x590   :  { %19662 = vmatmul.mubr.msk.f32.gmra.mrb[70].mxu1 %vm2217_vm2, %v11958_v57  ;;  %v11967_v57 = vld [vmem:[#allocation2 + $0xc9] sm:$0xff] }
 0x591   :  { %19664 = vmatprep.mubr.msk.f32.mxu1 %vm2217_vm2, %v11959_v53  ;;  %v11968_v53 = vld [vmem:[#allocation2 + $0xd1] sm:$0xff] }
 0x594   :  { %19665 = vmatmul.mubr.msk.f32.gmra.mrb[72].mxu1 %vm2217_vm2, %v11960_v8  ;;  %v11969_v8 = vld [vmem:[#allocation2 + $0xd9] sm:$0xff] }
 0x595   :  { %19667 = vmatprep.mubr.msk.f32.mxu1 %vm2217_vm2, %v11961_v47  ;;  %v13536_v47 = vld [vmem:[%s26383_s7 + $0x10] sm:$0xff] }
 0x598   :  { %19668 = vmatmul.mubr.msk.f32.gmra.mrb[74].mxu1 %vm2217_vm2, %v11962_v9  ;;  %v13537_v9 = vld [vmem:[%s26383_s7 + $0x18] sm:$0xff] }
 0x599   :  { %19670 = vmatprep.mubr.msk.f32.mxu1 %vm2217_vm2, %v11963_v32  ;;  %v20085_v32 = vpack.c.bf16 %v13537_v9, %v13536_v47  ;;  %v11976_v47 = vld [vmem:[#allocation2 + $0x111] sm:$0xff]  ;;  %v11977_v9 = vld [vmem:[#allocation2 + $0x119] sm:$0xff] }
 0x59b   :  { %20086 = vmatprep.subr.bf16.mxu0 %v20085_v32 }
 0x59c   :  { %19671 = vmatmul.mubr.msk.f32.gmra.mrb[76].mxu1 %vm2217_vm2, %v11964_v15  ;;  %v11970_v15 = vld [vmem:[#allocation2 + $0xe1] sm:$0xff]  ;;  %20088 = vmatpush3.bf16.msra.mxu0 %v20085_v32  ;;  %v11979_v32 = vld [vmem:[#allocation2 + $0x129] sm:$0xff] }
 0x59d   :  { %19673 = vmatprep.mubr.msk.f32.mxu1 %vm2217_vm2, %v11965_v50  ;;  %v11971_v50 = vld [vmem:[#allocation2 + $0xe9] sm:$0xff] }
 0x5a0   :  { %19674 = vmatmul.mubr.msk.f32.gmra.mrb[78].mxu1 %vm2217_vm2, %v11966_v2  ;;  %v11972_v2 = vld [vmem:[#allocation2 + $0xf1] sm:$0xff] }
 0x5a1   :  { %19676 = vmatprep.mubr.msk.f32.mxu1 %vm2217_vm2, %v11967_v57  ;;  %v11973_v57 = vld [vmem:[#allocation2 + $0xf9] sm:$0xff] }
 0x5a4   :  { %19677 = vmatmul.mubr.msk.f32.gmra.mrb[80].mxu1 %vm2217_vm2, %v11968_v53  ;;  %v11974_v53 = vld [vmem:[#allocation2 + $0x101] sm:$0xff] }
 0x5a5   :  { %19679 = vmatprep.mubr.msk.f32.mxu1 %vm2217_vm2, %v11969_v8  ;;  %v11975_v8 = vld [vmem:[#allocation2 + $0x109] sm:$0xff] }
 0x5a8   :  { %19680 = vmatmul.mubr.msk.f32.gmra.mrb[82].mxu1 %vm2217_vm2, %v11970_v15  ;;  %v11978_v15 = vld [vmem:[#allocation2 + $0x121] sm:$0xff] }
 0x5a9   :  { %19682 = vmatprep.mubr.msk.f32.mxu1 %vm2217_vm2, %v11971_v50  ;;  %v11980_v50 = vld [vmem:[#allocation2 + $0x131] sm:$0xff] }
 0x5ac   :  { %19683 = vmatmul.mubr.msk.f32.gmra.mrb[84].mxu1 %vm2217_vm2, %v11972_v2  ;;  %v11981_v2 = vld [vmem:[#allocation2 + $0x139] sm:$0xff] }
 0x5ad   :  { %19685 = vmatprep.mubr.msk.f32.mxu1 %vm2217_vm2, %v11973_v57  ;;  %v11982_v57 = vld [vmem:[#allocation2 + $0x141] sm:$0xff] }
 0x5b0   :  { %19686 = vmatmul.mubr.msk.f32.gmra.mrb[86].mxu1 %vm2217_vm2, %v11974_v53  ;;  %v11983_v53 = vld [vmem:[#allocation2 + $0x149] sm:$0xff] }
 0x5b1   :  { %19688 = vmatprep.mubr.msk.f32.mxu1 %vm2217_vm2, %v11975_v8  ;;  %v11984_v8 = vld [vmem:[#allocation2 + $0x151] sm:$0xff] }
 0x5b4   :  { %19689 = vmatmul.mubr.msk.f32.gmra.mrb[88].mxu1 %vm2217_vm2, %v11976_v47  ;;  %v11985_v47 = vld [vmem:[#allocation2 + $0x159] sm:$0xff] }
 0x5b5   :  { %19691 = vmatprep.mubr.msk.f32.mxu1 %vm2217_vm2, %v11977_v9  ;;  %v11986_v9 = vld [vmem:[#allocation2 + $0x161] sm:$0xff] }
 0x5b8   :  { %19692 = vmatmul.mubr.msk.f32.gmra.mrb[90].mxu1 %vm2217_vm2, %v11978_v15  ;;  %v11987_v15 = vld [vmem:[#allocation2 + $0x169] sm:$0xff] }
 0x5b9   :  { %19694 = vmatprep.mubr.msk.f32.mxu1 %vm2217_vm2, %v11979_v32  ;;  %v11988_v32 = vld [vmem:[#allocation2 + $0x171] sm:$0xff] }
 0x5bc   :  { %19695 = vmatmul.mubr.msk.f32.gmra.mrb[92].mxu1 %vm2217_vm2, %v11980_v50  ;;  %v11989_v50 = vld [vmem:[#allocation2 + $0x179] sm:$0xff] }
 0x5bd   :  { %19697 = vmatprep.mubr.msk.f32.mxu1 %vm2217_vm2, %v11981_v2  ;;  %v11990_v2 = vld [vmem:[#allocation2 + $0x181] sm:$0xff] }
 0x5c0   :  { %19698 = vmatmul.mubr.msk.f32.gmra.mrb[94].mxu1 %vm2217_vm2, %v11982_v57  ;;  %v11991_v57 = vld [vmem:[#allocation2 + $0x189] sm:$0xff] }
 0x5c1   :  { %19700 = vmatprep.mubr.msk.f32.mxu1 %vm2217_vm2, %v11983_v53  ;;  %v11992_v53 = vld [vmem:[#allocation2 + $0x191] sm:$0xff] }
 0x5c4   :  { %19701 = vmatmul.mubr.msk.f32.gmra.mrb[96].mxu1 %vm2217_vm2, %v11984_v8  ;;  %v11993_v8 = vld [vmem:[#allocation2 + $0x199] sm:$0xff] }
 0x5c5   :  { %19703 = vmatprep.mubr.msk.f32.mxu1 %vm2217_vm2, %v11985_v47  ;;  %v11994_v47 = vld [vmem:[#allocation2 + $0x1a1] sm:$0xff] }
 0x5c8   :  { %19704 = vmatmul.mubr.msk.f32.gmra.mrb[98].mxu1 %vm2217_vm2, %v11986_v9  ;;  %v11995_v9 = vld [vmem:[#allocation2 + $0x1a9] sm:$0xff] }
 0x5c9   :  { %19706 = vmatprep.mubr.msk.f32.mxu1 %vm2217_vm2, %v11987_v15  ;;  %v11996_v15 = vld [vmem:[#allocation2 + $0x1b1] sm:$0xff] }
 0x5cc   :  { %19707 = vmatmul.mubr.msk.f32.gmra.mrb[100].mxu1 %vm2217_vm2, %v11988_v32  ;;  %v11997_v32 = vld [vmem:[#allocation2 + $0x1b9] sm:$0xff] }
 0x5cd   :  { %19709 = vmatprep.mubr.msk.f32.mxu1 %vm2217_vm2, %v11989_v50  ;;  %v11998_v50 = vld [vmem:[#allocation2 + $0x1c1] sm:$0xff] }
 0x5d0   :  { %19710 = vmatmul.mubr.msk.f32.gmra.mrb[102].mxu1 %vm2217_vm2, %v11990_v2  ;;  %v11999_v2 = vld [vmem:[#allocation2 + $0x1c9] sm:$0xff] }
 0x5d1   :  { %19712 = vmatprep.mubr.msk.f32.mxu1 %vm2217_vm2, %v11991_v57  ;;  %v12000_v57 = vld [vmem:[#allocation2 + $0x1d1] sm:$0xff] }
 0x5d4   :  { %19713 = vmatmul.mubr.msk.f32.gmra.mrb[104].mxu1 %vm2217_vm2, %v11992_v53  ;;  %v12001_v53 = vld [vmem:[#allocation2 + $0x1d9] sm:$0xff] }
 0x5d5   :  { %19715 = vmatprep.mubr.msk.f32.mxu1 %vm2217_vm2, %v11993_v8  ;;  %v12002_v8 = vld [vmem:[#allocation2 + $0x1e1] sm:$0xff] }
 0x5d8   :  { %19716 = vmatmul.mubr.msk.f32.gmra.mrb[106].mxu1 %vm2217_vm2, %v11994_v47  ;;  %v12003_v47 = vld [vmem:[#allocation2 + $0x1e9] sm:$0xff] }
 0x5d9   :  { %19718 = vmatprep.mubr.msk.f32.mxu1 %vm2217_vm2, %v11995_v9  ;;  %v12004_v9 = vld [vmem:[#allocation2 + $0x1f1] sm:$0xff] }
 0x5dc   :  { %19719 = vmatmul.mubr.msk.f32.gmra.mrb[108].mxu1 %vm2217_vm2, %v11996_v15  ;;  %v12005_v15 = vld [vmem:[#allocation2 + $0x1f9] sm:$0xff] }
 0x5dd   :  { %19721 = vmatprep.mubr.msk.f32.mxu1 %vm2217_vm2, %v11997_v32  ;;  %v12006_v32 = vld [vmem:[#allocation2 + $0x201] sm:$0xff] }
 0x5e0   :  { %19722 = vmatmul.mubr.msk.f32.gmra.mrb[110].mxu1 %vm2217_vm2, %v11998_v50  ;;  %v12007_v50 = vld [vmem:[#allocation2 + $0x209] sm:$0xff] }
 0x5e1   :  { %19724 = vmatprep.mubr.msk.f32.mxu1 %vm2217_vm2, %v11999_v2  ;;  %v12008_v2 = vld [vmem:[#allocation2 + $0x211] sm:$0xff] }
 0x5e4   :  { %19725 = vmatmul.mubr.msk.f32.gmra.mrb[112].mxu1 %vm2217_vm2, %v12000_v57  ;;  %v12009_v57 = vld [vmem:[#allocation2 + $0x219] sm:$0xff] }
 0x5e5   :  { %19727 = vmatprep.mubr.msk.f32.mxu1 %vm2217_vm2, %v12001_v53  ;;  %v12010_v53 = vld [vmem:[#allocation2 + $0x221] sm:$0xff] }
 0x5e8   :  { %19728 = vmatmul.mubr.msk.f32.gmra.mrb[114].mxu1 %vm2217_vm2, %v12002_v8  ;;  %v12011_v8 = vld [vmem:[#allocation2 + $0x229] sm:$0xff] }
 0x5e9   :  { %19730 = vmatprep.mubr.msk.f32.mxu1 %vm2217_vm2, %v12003_v47  ;;  %v12012_v47 = vld [vmem:[#allocation2 + $0x231] sm:$0xff] }
 0x5ec   :  { %19731 = vmatmul.mubr.msk.f32.gmra.mrb[0].mxu1 %vm2217_vm2, %v12004_v9  ;;  %v12013_v9 = vld [vmem:[#allocation2 + $0x239] sm:$0xff] }
 0x5ed   :  { %19733 = vmatprep.mubr.msk.f32.mxu1 %vm2217_vm2, %v12005_v15  ;;  %v12014_v15 = vld [vmem:[#allocation2 + $0x241] sm:$0xff] }
 0x5f0   :  { %19734 = vmatmul.mubr.msk.f32.gmra.mrb[2].mxu1 %vm2217_vm2, %v12006_v32  ;;  %v12015_v32 = vld [vmem:[#allocation2 + $0x249] sm:$0xff] }
 0x5f1   :  { %19736 = vmatprep.mubr.msk.f32.mxu1 %vm2217_vm2, %v12007_v50  ;;  %v12016_v50 = vld [vmem:[#allocation2 + $0x251] sm:$0xff] }
 0x5f4   :  { %19737 = vmatmul.mubr.msk.f32.gmra.mrb[4].mxu1 %vm2217_vm2, %v12008_v2  ;;  %v12017_v2 = vld [vmem:[#allocation2 + $0x259] sm:$0xff] }
 0x5f5   :  { %19739 = vmatprep.mubr.msk.f32.mxu1 %vm2217_vm2, %v12009_v57  ;;  %v12018_v57 = vld [vmem:[#allocation2 + $0x261] sm:$0xff] }
 0x5f8   :  { %19740 = vmatmul.mubr.msk.f32.gmra.mrb[6].mxu1 %vm2217_vm2, %v12010_v53  ;;  %v12019_v53 = vld [vmem:[#allocation2 + $0x269] sm:$0xff] }
 0x5f9   :  { %19742 = vmatprep.mubr.msk.f32.mxu1 %vm2217_vm2, %v12011_v8  ;;  %v12020_v8 = vld [vmem:[#allocation2 + $0x271] sm:$0xff] }
 0x5fc   :  { %19743 = vmatmul.mubr.msk.f32.gmra.mrb[8].mxu1 %vm2217_vm2, %v12012_v47  ;;  %v12021_v47 = vld [vmem:[#allocation2 + $0x279] sm:$0xff] }
 0x5fd   :  { %19745 = vmatprep.mubr.msk.f32.mxu1 %vm2217_vm2, %v12013_v9  ;;  %v12022_v9 = vld [vmem:[#allocation2 + $0x281] sm:$0xff] }
 0x600   :  { %19746 = vmatmul.mubr.msk.f32.gmra.mrb[10].mxu1 %vm2217_vm2, %v12014_v15  ;;  %v12023_v15 = vld [vmem:[#allocation2 + $0x289] sm:$0xff] }
 0x601   :  { %19748 = vmatprep.mubr.msk.f32.mxu1 %vm2217_vm2, %v12015_v32  ;;  %v12024_v32 = vld [vmem:[#allocation2 + $0x291] sm:$0xff] }
 0x604   :  { %19749 = vmatmul.mubr.msk.f32.gmra.mrb[12].mxu1 %vm2217_vm2, %v12016_v50  ;;  %v12025_v50 = vld [vmem:[#allocation2 + $0x299] sm:$0xff] }
 0x605   :  { %19751 = vmatprep.mubr.msk.f32.mxu1 %vm2217_vm2, %v12017_v2  ;;  %v12026_v2 = vld [vmem:[#allocation2 + $0x2a1] sm:$0xff] }
 0x608   :  { %19752 = vmatmul.mubr.msk.f32.gmra.mrb[14].mxu1 %vm2217_vm2, %v12018_v57  ;;  %v12027_v57 = vld [vmem:[#allocation2 + $0x2a9] sm:$0xff] }
 0x609   :  { %19754 = vmatprep.mubr.msk.f32.mxu1 %vm2217_vm2, %v12019_v53  ;;  %v12028_v53 = vld [vmem:[#allocation2 + $0x2b1] sm:$0xff] }
 0x60c   :  { %19755 = vmatmul.mubr.msk.f32.gmra.mrb[16].mxu1 %vm2217_vm2, %v12020_v8  ;;  %v12029_v8 = vld [vmem:[#allocation2 + $0x2b9] sm:$0xff] }
 0x60d   :  { %19757 = vmatprep.mubr.msk.f32.mxu1 %vm2217_vm2, %v12021_v47  ;;  %v12030_v47 = vld [vmem:[#allocation2 + $0x2c1] sm:$0xff] }
 0x610   :  { %19758 = vmatmul.mubr.msk.f32.gmra.mrb[18].mxu1 %vm2217_vm2, %v12022_v9  ;;  %v12031_v9 = vld [vmem:[#allocation2 + $0x2c9] sm:$0xff] }
 0x611   :  { %19760 = vmatprep.mubr.msk.f32.mxu1 %vm2217_vm2, %v12023_v15  ;;  %v12032_v15 = vld [vmem:[#allocation2 + $0x2d1] sm:$0xff] }
 0x614   :  { %19761 = vmatmul.mubr.msk.f32.gmra.mrb[20].mxu1 %vm2217_vm2, %v12024_v32  ;;  %v12033_v32 = vld [vmem:[#allocation2 + $0x2d9] sm:$0xff] }
 0x615   :  { %19763 = vmatprep.mubr.msk.f32.mxu1 %vm2217_vm2, %v12025_v50  ;;  %v12034_v50 = vld [vmem:[#allocation2 + $0x2e1] sm:$0xff] }
 0x618   :  { %19764 = vmatmul.mubr.msk.f32.gmra.mrb[22].mxu1 %vm2217_vm2, %v12026_v2  ;;  %v12035_v2 = vld [vmem:[#allocation2 + $0x2e9] sm:$0xff] }
 0x619   :  { %19766 = vmatprep.mubr.msk.f32.mxu1 %vm2217_vm2, %v12027_v57  ;;  %v12036_v57 = vld [vmem:[#allocation2 + $0x2f1] sm:$0xff] }
 0x61c   :  { %19767 = vmatmul.mubr.msk.f32.gmra.mrb[24].mxu1 %vm2217_vm2, %v12028_v53  ;;  %v12037_v53 = vld [vmem:[#allocation2 + $0x2f9] sm:$0xff] }
 0x61d   :  { %19769 = vmatprep.mubr.msk.f32.mxu1 %vm2217_vm2, %v12029_v8  ;;  %v12038_v8 = vld [vmem:[#allocation2 + $0x301] sm:$0xff] }
 0x620   :  { %19770 = vmatmul.mubr.msk.f32.gmra.mrb[26].mxu1 %vm2217_vm2, %v12030_v47  ;;  %v12039_v47 = vld [vmem:[#allocation2 + $0x309] sm:$0xff] }
 0x621   :  { %19772 = vmatprep.mubr.msk.f32.mxu1 %vm2217_vm2, %v12031_v9  ;;  %v12040_v9 = vld [vmem:[#allocation2 + $0x311] sm:$0xff] }
 0x624   :  { %19773 = vmatmul.mubr.msk.f32.gmra.mrb[28].mxu1 %vm2217_vm2, %v12032_v15  ;;  %v12041_v15 = vld [vmem:[#allocation2 + $0x319] sm:$0xff] }
 0x625   :  { %19775 = vmatprep.mubr.msk.f32.mxu1 %vm2217_vm2, %v12033_v32  ;;  %v12042_v32 = vld [vmem:[#allocation2 + $0x321] sm:$0xff] }
 0x628   :  { %19776 = vmatmul.mubr.msk.f32.gmra.mrb[30].mxu1 %vm2217_vm2, %v12034_v50  ;;  %v12043_v50 = vld [vmem:[#allocation2 + $0x329] sm:$0xff] }
 0x629   :  { %19778 = vmatprep.mubr.msk.f32.mxu1 %vm2217_vm2, %v12035_v2  ;;  %v12044_v2 = vld [vmem:[#allocation2 + $0x331] sm:$0xff] }
 0x62c   :  { %19779 = vmatmul.mubr.msk.f32.gmra.mrb[32].mxu1 %vm2217_vm2, %v12036_v57  ;;  %v12045_v57 = vld [vmem:[#allocation2 + $0x339] sm:$0xff] }
 0x62d   :  { %19781 = vmatprep.mubr.msk.f32.mxu1 %vm2217_vm2, %v12037_v53  ;;  %v12046_v53 = vld [vmem:[#allocation2 + $0x341] sm:$0xff] }
 0x630   :  { %19782 = vmatmul.mubr.msk.f32.gmra.mrb[34].mxu1 %vm2217_vm2, %v12038_v8  ;;  %v12047_v8 = vld [vmem:[#allocation2 + $0x349] sm:$0xff] }
 0x631   :  { %19784 = vmatprep.mubr.msk.f32.mxu1 %vm2217_vm2, %v12039_v47  ;;  %v12048_v47 = vld [vmem:[#allocation2 + $0x351] sm:$0xff] }
 0x634   :  { %19785 = vmatmul.mubr.msk.f32.gmra.mrb[36].mxu1 %vm2217_vm2, %v12040_v9  ;;  %v12049_v9 = vld [vmem:[#allocation2 + $0x359] sm:$0xff] }
 0x635   :  { %19787 = vmatprep.mubr.msk.f32.mxu1 %vm2217_vm2, %v12041_v15  ;;  %v12050_v15 = vld [vmem:[#allocation2 + $0x361] sm:$0xff] }
 0x638   :  { %19788 = vmatmul.mubr.msk.f32.gmra.mrb[38].mxu1 %vm2217_vm2, %v12042_v32  ;;  %v12051_v32 = vld [vmem:[#allocation2 + $0x369] sm:$0xff] }
 0x639   :  { %19790 = vmatprep.mubr.msk.f32.mxu1 %vm2217_vm2, %v12043_v50  ;;  %v12052_v50 = vld [vmem:[#allocation2 + $0x371] sm:$0xff] }
 0x63c   :  { %19791 = vmatmul.mubr.msk.f32.gmra.mrb[40].mxu1 %vm2217_vm2, %v12044_v2  ;;  %v12053_v2 = vld [vmem:[#allocation2 + $0x379] sm:$0xff] }
 0x63d   :  { %19793 = vmatprep.mubr.msk.f32.mxu1 %vm2217_vm2, %v12045_v57  ;;  %v12054_v57 = vld [vmem:[#allocation2 + $0x381] sm:$0xff] }
 0x640   :  { %19794 = vmatmul.mubr.msk.f32.gmra.mrb[42].mxu1 %vm2217_vm2, %v12046_v53  ;;  %v12055_v53 = vld [vmem:[#allocation2 + $0x389] sm:$0xff] }
 0x641   :  { %19796 = vmatprep.mubr.msk.f32.mxu1 %vm2217_vm2, %v12047_v8 }
 0x644   :  { %19797 = vmatmul.mubr.msk.f32.gmra.mrb[44].mxu1 %vm2217_vm2, %v12048_v47  ;;  %v25455_v47 = vld [vmem:[%s26384_s6] ss:$0 sm:$0xff] }
 0x645   :  { %19799 = vmatprep.mubr.msk.f32.mxu1 %vm2217_vm2, %v12049_v9  ;;  %v12056_v9 = vld [vmem:[#allocation2 + $0x391] sm:$0xff] }
 0x648   :  { %19800 = vmatmul.mubr.msk.f32.gmra.mrb[46].mxu1 %vm2217_vm2, %v12050_v15 }
 0x649   :  { %19802 = vmatprep.mubr.msk.f32.mxu1 %vm2217_vm2, %v12051_v32 }
 0x64c   :  { %19803 = vmatmul.mubr.msk.f32.gmra.mrb[48].mxu1 %vm2217_vm2, %v12052_v50  ;;  %v12057_v50 = vld [vmem:[#allocation2 + $0x399] sm:$0xff] }
 0x64d   :  { %19805 = vmatprep.mubr.msk.f32.mxu1 %vm2217_vm2, %v12053_v2 }
 0x650   :  { %19806 = vmatmul.mubr.msk.f32.gmra.mrb[50].mxu1 %vm2217_vm2, %v12054_v57 }
 0x651   :  { %19808 = vmatprep.mubr.msk.f32.mxu1 %vm2217_vm2, %v12055_v53 }
 0x653   :  { %v19651_v8 = vpop.f32.mrb[62].mxu1 }
 0x654   :  { %v20093_v15 = vadd.f32 %v19651_v8, %v25164_v49  ;;  %v12484_v32 = vpop.f32.mrb[63].mxu1  ;;  %19809 = vmatmul.mubr.msk.f32.gmra.mrb[52].mxu1 %vm2217_vm2, %v12056_v9  ;;  %v12059_v49 = vld [vmem:[#allocation2 + $0x3a9] sm:$0xff] }
 0x655   :  { %v20094_v2 = vadd.f32 %v12484_v32, %v25166_v4  ;;  %19811 = vmatprep.mubr.msk.f32.mxu1 %vm2217_vm2, %v12057_v50 }
 0x656   :  { %v13187_v57 = vadd.f32 %v20093_v15, %v25455_v47 }
 0x657   :  { %v13186_v53 = vadd.f32 %v20094_v2, %v25455_v47  ;;  %v19654_v41 = vpop.f32.mrb[64].mxu1  ;;  %v12060_v2 = vld [vmem:[#allocation2 + $0x3b1] sm:$0xff] }
 0x658   :  { %v20095_v29 = vadd.f32 %v19654_v41, %v25170_v63  ;;  %v12494_v38 = vpop.f32.mrb[65].mxu1  ;;  %19812 = vmatmul.mubr.msk.f32.gmra.mrb[54].mxu1 %vm2217_vm2, %v12058_v55  ;;  %v13303_v4 = vmax.f32 %v13187_v57, 0.0  ;;  %v12061_v55 = vld [vmem:[#allocation2 + $0x3b9] sm:$0xff] }
 0x659   :  { %v13302_v8 = vmax.f32 %v13186_v53, 0.0  ;;  %v20096_v9 = vadd.f32 %v12494_v38, %v25172_v24  ;;  %19814 = vmatprep.mubr.msk.f32.mxu1 %vm2217_vm2, %v12059_v49 }
 0x65a   :  { %v13189_v32 = vadd.f32 %v20095_v29, %v25455_v47 }
 0x65b   :  { %v13188_v15 = vadd.f32 %v20096_v9, %v25455_v47  ;;  %v19657_v50 = vpop.f32.mrb[66].mxu1  ;;  %19831 = vmatprep.mubr.msk.f32.mxu0 %vm2217_vm2, %v13302_v8 }
 0x65c   :  { %v20097_v41 = vadd.f32 %v19657_v50, %v25176_v54  ;;  %v12504_v63 = vpop.f32.mrb[67].mxu1  ;;  %19815 = vmatmul.mubr.msk.f32.gmra.mrb[56].mxu1 %vm2217_vm2, %v12060_v2  ;;  %19832 = vmatmul.mubr.msk.f32.vlgmr.msra.gmra.mrb[240].mxu0 %vm2217_vm2, %v13303_v4  ;;  %v13305_v29 = vmax.f32 %v13189_v32, 0.0  ;;  %v12062_v54 = vld [vmem:[#allocation2 + $0x3c1] sm:$0xff]  ;;  %v12063_v4 = vld [vmem:[#allocation2 + $0x3c9] sm:$0xff] }
 0x65d   :  { %v13304_v38 = vmax.f32 %v13188_v15, 0.0  ;;  %v20098_v24 = vadd.f32 %v12504_v63, %v25178_v6  ;;  %19817 = vmatprep.mubr.msk.f32.mxu1 %vm2217_vm2, %v12061_v55 }
 0x65e   :  { %v13191_v57 = vadd.f32 %v20097_v41, %v25455_v47 }
 0x65f   :  { %v13190_v53 = vadd.f32 %v20098_v24, %v25455_v47  ;;  %v19660_v49 = vpop.f32.mrb[68].mxu1  ;;  %19834 = vmatprep.mubr.msk.f32.mxu0 %vm2217_vm2, %v13304_v38 }
 0x660   :  { %v20099_v8 = vadd.f32 %v19660_v49, %v25182_v14  ;;  %v12514_v9 = vpop.f32.mrb[69].mxu1  ;;  %19818 = vmatmul.mubr.msk.f32.gmra.mrb[58].mxu1 %vm2217_vm2, %v12062_v54  ;;  %19835 = vmatmul.mubr.msk.f32.gmra.mrb[242].mxu0 %vm2217_vm2, %v13305_v29  ;;  %v13307_v32 = vmax.f32 %v13191_v57, 0.0  ;;  %v12064_v14 = vld [vmem:[#allocation2 + $0x3d1] sm:$0xff] }
 0x661   :  { %v13306_v6 = vmax.f32 %v13190_v53, 0.0  ;;  %v20100_v15 = vadd.f32 %v12514_v9, %v25184_v33  ;;  %19820 = vmatprep.mubr.msk.f32.mxu1 %vm2217_vm2, %v12063_v4 }
 0x662   :  { %v13193_v50 = vadd.f32 %v20099_v8, %v25455_v47 }
 0x663   :  { %v13192_v2 = vadd.f32 %v20100_v15, %v25455_v47  ;;  %v19663_v41 = vpop.f32.mrb[70].mxu1  ;;  %19837 = vmatprep.mubr.msk.f32.mxu0 %vm2217_vm2, %v13306_v6 }
 0x664   :  { %v20101_v63 = vadd.f32 %v19663_v41, %v25188_v30  ;;  %v12524_v55 = vpop.f32.mrb[71].mxu1  ;;  %19821 = vmatmul.mubr.msk.f32.gmra.mrb[60].mxu1 %vm2217_vm2, %v12064_v14  ;;  %19838 = vmatmul.mubr.msk.f32.gmra.mrb[244].mxu0 %vm2217_vm2, %v13307_v32  ;;  %v13309_v24 = vmax.f32 %v13193_v50, 0.0 }
 0x665   :  { %v13308_v38 = vmax.f32 %v13192_v2, 0.0  ;;  %v20102_v33 = vadd.f32 %v12524_v55, %v25190_v19 }
 0x666   :  { %v13195_v29 = vadd.f32 %v20101_v63, %v25455_v47 }
 0x667   :  { %v13194_v57 = vadd.f32 %v20102_v33, %v25455_v47  ;;  %v19666_v53 = vpop.f32.mrb[72].mxu1  ;;  %19840 = vmatprep.mubr.msk.f32.mxu0 %vm2217_vm2, %v13308_v38 }
 0x668   :  { %v20103_v49 = vadd.f32 %v19666_v53, %v25194_v39  ;;  %v12534_v54 = vpop.f32.mrb[73].mxu1  ;;  %19841 = vmatmul.mubr.msk.f32.gmra.mrb[246].mxu0 %vm2217_vm2, %v13309_v24  ;;  %v13311_v9 = vmax.f32 %v13195_v29, 0.0 }
 0x669   :  { %v13310_v30 = vmax.f32 %v13194_v57, 0.0  ;;  %v20104_v8 = vadd.f32 %v12534_v54, %v25196_v35 }
 0x66a   :  { %v13197_v4 = vadd.f32 %v20103_v49, %v25455_v47 }
 0x66b   :  { %v13196_v19 = vadd.f32 %v20104_v8, %v25455_v47  ;;  %v19669_v6 = vpop.f32.mrb[74].mxu1  ;;  %19843 = vmatprep.mubr.msk.f32.mxu0 %vm2217_vm2, %v13310_v30 }
 0x66c   :  { %v20105_v15 = vadd.f32 %v19669_v6, %v25200_v26  ;;  %v12544_v32 = vpop.f32.mrb[75].mxu1  ;;  %19844 = vmatmul.mubr.msk.f32.gmra.mrb[248].mxu0 %vm2217_vm2, %v13311_v9  ;;  %v13313_v2 = vmax.f32 %v13197_v4, 0.0 }
 0x66d   :  { %v13312_v39 = vmax.f32 %v13196_v19, 0.0  ;;  %v20106_v50 = vadd.f32 %v12544_v32, %v25202_v22 }
 0x66e   :  { %v13199_v41 = vadd.f32 %v20105_v15, %v25455_v47 }
 0x66f   :  { %v13198_v35 = vadd.f32 %v20106_v50, %v25455_v47  ;;  %v19672_v14 = vpop.f32.mrb[76].mxu1  ;;  %19846 = vmatprep.mubr.msk.f32.mxu0 %vm2217_vm2, %v13312_v39 }
 0x670   :  { %v20107_v63 = vadd.f32 %v19672_v14, %v25206_v18  ;;  %v12554_v55 = vpop.f32.mrb[77].mxu1  ;;  %19847 = vmatmul.mubr.msk.f32.gmra.mrb[250].mxu0 %vm2217_vm2, %v13313_v2  ;;  %v13315_v33 = vmax.f32 %v13199_v41, 0.0 }
 0x671   :  { %v13314_v26 = vmax.f32 %v13198_v35, 0.0  ;;  %v20108_v38 = vadd.f32 %v12554_v55, %v25208_v5 }
 0x672   :  { %v13201_v24 = vadd.f32 %v20107_v63, %v25455_v47 }
 0x673   :  { %v13200_v22 = vadd.f32 %v20108_v38, %v25455_v47  ;;  %v19675_v29 = vpop.f32.mrb[78].mxu1  ;;  %19849 = vmatprep.mubr.msk.f32.mxu0 %vm2217_vm2, %v13314_v26 }
 0x674   :  { %v20109_v57 = vadd.f32 %v19675_v29, %v25212_v20  ;;  %v12564_v53 = vpop.f32.mrb[79].mxu1  ;;  %19850 = vmatmul.mubr.msk.f32.gmra.mrb[252].mxu0 %vm2217_vm2, %v13315_v33  ;;  %v13317_v54 = vmax.f32 %v13201_v24, 0.0 }
 0x675   :  { %v13316_v18 = vmax.f32 %v13200_v22, 0.0  ;;  %v20110_v49 = vadd.f32 %v12564_v53, %v25214_v62 }
 0x676   :  { %v13203_v30 = vadd.f32 %v20109_v57, %v25455_v47 }
 0x677   :  { %v13202_v5 = vadd.f32 %v20110_v49, %v25455_v47  ;;  %v19678_v8 = vpop.f32.mrb[80].mxu1  ;;  %19852 = vmatprep.mubr.msk.f32.mxu0 %vm2217_vm2, %v13316_v18 }
 0x678   :  { %v20111_v9 = vadd.f32 %v19678_v8, %v25218_v0  ;;  %v12574_v4 = vpop.f32.mrb[81].mxu1  ;;  %19853 = vmatmul.mubr.msk.f32.gmra.mrb[254].mxu0 %vm2217_vm2, %v13317_v54  ;;  %v13319_v6 = vmax.f32 %v13203_v30, 0.0 }
 0x679   :  { %v13318_v20 = vmax.f32 %v13202_v5, 0.0  ;;  %v20112_v19 = vadd.f32 %v12574_v4, %v25220_v51 }
 0x67a   :  { %v13205_v15 = vadd.f32 %v20111_v9, %v25455_v47 }
 0x67b   :  { %v13204_v62 = vadd.f32 %v20112_v19, %v25455_v47  ;;  %v19681_v32 = vpop.f32.mrb[82].mxu1  ;;  %19855 = vmatprep.mubr.msk.f32.mxu0 %vm2217_vm2, %v13318_v20 }
 0x67c   :  { %v20113_v39 = vadd.f32 %v19681_v32, %v25224_v23  ;;  %v12584_v50 = vpop.f32.mrb[83].mxu1  ;;  %19856 = vmatmul.mubr.msk.f32.gmra.mrb[0].mxu0 %vm2217_vm2, %v13319_v6  ;;  %v13321_v41 = vmax.f32 %v13205_v15, 0.0 }
 0x67d   :  { %v13320_v0 = vmax.f32 %v13204_v62, 0.0  ;;  %v20114_v2 = vadd.f32 %v12584_v50, %v25226_v46 }
 0x67e   :  { %v13207_v35 = vadd.f32 %v20113_v39, %v25455_v47 }
 0x67f   :  { %v13206_v51 = vadd.f32 %v20114_v2, %v25455_v47  ;;  %v19684_v14 = vpop.f32.mrb[84].mxu1  ;;  %19858 = vmatprep.mubr.msk.f32.mxu0 %vm2217_vm2, %v13320_v0 }
 0x680   :  { %v20115_v63 = vadd.f32 %v19684_v14, %v25230_v56  ;;  %v12594_v55 = vpop.f32.mrb[85].mxu1  ;;  %19859 = vmatmul.mubr.msk.f32.gmra.mrb[2].mxu0 %vm2217_vm2, %v13321_v41  ;;  %v13323_v38 = vmax.f32 %v13207_v35, 0.0 }
 0x681   :  { %v13322_v23 = vmax.f32 %v13206_v51, 0.0  ;;  %v20116_v26 = vadd.f32 %v12594_v55, %v25232_v34 }
 0x682   :  { %v13209_v33 = vadd.f32 %v20115_v63, %v25455_v47 }
 0x683   :  { %v13208_v46 = vadd.f32 %v20116_v26, %v25455_v47  ;;  %v19687_v24 = vpop.f32.mrb[86].mxu1  ;;  %19861 = vmatprep.mubr.msk.f32.mxu0 %vm2217_vm2, %v13322_v23 }
 0x684   :  { %v20117_v22 = vadd.f32 %v19687_v24, %v25236_v7  ;;  %v12604_v29 = vpop.f32.mrb[87].mxu1  ;;  %19862 = vmatmul.mubr.msk.f32.gmra.mrb[4].mxu0 %vm2217_vm2, %v13323_v38  ;;  %v13325_v53 = vmax.f32 %v13209_v33, 0.0 }
 0x685   :  { %v13324_v56 = vmax.f32 %v13208_v46, 0.0  ;;  %v20118_v57 = vadd.f32 %v12604_v29, %v25238_v43 }
 0x686   :  { %v13211_v18 = vadd.f32 %v20117_v22, %v25455_v47 }
 0x687   :  { %v13210_v34 = vadd.f32 %v20118_v57, %v25455_v47  ;;  %v19690_v49 = vpop.f32.mrb[88].mxu1  ;;  %19864 = vmatprep.mubr.msk.f32.mxu0 %vm2217_vm2, %v13324_v56 }
 0x688   :  { %v20119_v54 = vadd.f32 %v19690_v49, %v25242_v16  ;;  %v12614_v30 = vpop.f32.mrb[89].mxu1  ;;  %19865 = vmatmul.mubr.msk.f32.gmra.mrb[6].mxu0 %vm2217_vm2, %v13325_v53  ;;  %v13327_v8 = vmax.f32 %v13211_v18, 0.0 }
 0x689   :  { %v13326_v7 = vmax.f32 %v13210_v34, 0.0  ;;  %v20120_v5 = vadd.f32 %v12614_v30, %v25244_v13 }
 0x68a   :  { %v13213_v9 = vadd.f32 %v20119_v54, %v25455_v47 }
 0x68b   :  { %v13212_v43 = vadd.f32 %v20120_v5, %v25455_v47  ;;  %v19693_v4 = vpop.f32.mrb[90].mxu1  ;;  %19867 = vmatprep.mubr.msk.f32.mxu0 %vm2217_vm2, %v13326_v7 }
 0x68c   :  { %v20121_v20 = vadd.f32 %v19693_v4, %v25248_v31  ;;  %v12624_v19 = vpop.f32.mrb[91].mxu1  ;;  %19868 = vmatmul.mubr.msk.f32.gmra.mrb[8].mxu0 %vm2217_vm2, %v13327_v8  ;;  %v13329_v15 = vmax.f32 %v13213_v9, 0.0 }
 0x68d   :  { %v13328_v16 = vmax.f32 %v13212_v43, 0.0  ;;  %v20122_v6 = vadd.f32 %v12624_v19, %v25250_v61 }
 0x68e   :  { %v13215_v62 = vadd.f32 %v20121_v20, %v25455_v47 }
 0x68f   :  { %v13214_v13 = vadd.f32 %v20122_v6, %v25455_v47  ;;  %v19696_v32 = vpop.f32.mrb[92].mxu1  ;;  %19870 = vmatprep.mubr.msk.f32.mxu0 %vm2217_vm2, %v13328_v16 }
 0x690   :  { %v20123_v39 = vadd.f32 %v19696_v32, %v25254_v27  ;;  %v12634_v50 = vpop.f32.mrb[93].mxu1  ;;  %19871 = vmatmul.mubr.msk.f32.gmra.mrb[10].mxu0 %vm2217_vm2, %v13329_v15  ;;  %v13331_v2 = vmax.f32 %v13215_v62, 0.0 }
 0x691   :  { %v13330_v31 = vmax.f32 %v13214_v13, 0.0  ;;  %v20124_v0 = vadd.f32 %v12634_v50, %v25256_v52 }
 0x692   :  { %v13217_v41 = vadd.f32 %v20123_v39, %v25455_v47 }
 0x693   :  { %v13216_v61 = vadd.f32 %v20124_v0, %v25455_v47  ;;  %v19699_v35 = vpop.f32.mrb[94].mxu1  ;;  %19873 = vmatprep.mubr.msk.f32.mxu0 %vm2217_vm2, %v13330_v31 }
 0x694   :  { %v20125_v51 = vadd.f32 %v19699_v35, %v25260_v42  ;;  %v12644_v14 = vpop.f32.mrb[95].mxu1  ;;  %19874 = vmatmul.mubr.msk.f32.gmra.mrb[12].mxu0 %vm2217_vm2, %v13331_v2  ;;  %v13333_v55 = vmax.f32 %v13217_v41, 0.0 }
 0x695   :  { %v13332_v27 = vmax.f32 %v13216_v61, 0.0  ;;  %v20126_v63 = vadd.f32 %v12644_v14, %v25262_v59 }
 0x696   :  { %v13219_v23 = vadd.f32 %v20125_v51, %v25455_v47 }
 0x697   :  { %v13218_v52 = vadd.f32 %v20126_v63, %v25455_v47  ;;  %v19702_v26 = vpop.f32.mrb[96].mxu1  ;;  %19876 = vmatprep.mubr.msk.f32.mxu0 %vm2217_vm2, %v13332_v27 }
 0x698   :  { %v20127_v38 = vadd.f32 %v19702_v26, %v25266_v11  ;;  %v12654_v33 = vpop.f32.mrb[97].mxu1  ;;  %19877 = vmatmul.mubr.msk.f32.gmra.mrb[14].mxu0 %vm2217_vm2, %v13333_v55  ;;  %v13335_v24 = vmax.f32 %v13219_v23, 0.0 }
 0x699   :  { %v13334_v42 = vmax.f32 %v13218_v52, 0.0  ;;  %v20128_v46 = vadd.f32 %v12654_v33, %v25268_v12 }
 0x69a   :  { %v13221_v22 = vadd.f32 %v20127_v38, %v25455_v47 }
 0x69b   :  { %v13220_v59 = vadd.f32 %v20128_v46, %v25455_v47  ;;  %v19705_v29 = vpop.f32.mrb[98].mxu1  ;;  %19879 = vmatprep.mubr.msk.f32.mxu0 %vm2217_vm2, %v13334_v42 }
 0x69c   :  { %v20129_v56 = vadd.f32 %v19705_v29, %v25272_v36  ;;  %v12664_v57 = vpop.f32.mrb[99].mxu1  ;;  %19880 = vmatmul.mubr.msk.f32.gmra.mrb[16].mxu0 %vm2217_vm2, %v13335_v24  ;;  %v13337_v18 = vmax.f32 %v13221_v22, 0.0 }
 0x69d   :  { %v13336_v11 = vmax.f32 %v13220_v59, 0.0  ;;  %v20130_v53 = vadd.f32 %v12664_v57, %v25274_v3  ;;  %v26577_v59 = vld [vmem:[#allocation83_spill] sm:$0xff] }
 0x69e   :  { %v13223_v34 = vadd.f32 %v20129_v56, %v25455_v47 }
 0x69f   :  { %v13222_v12 = vadd.f32 %v20130_v53, %v25455_v47  ;;  %v19708_v49 = vpop.f32.mrb[100].mxu1  ;;  %19882 = vmatprep.mubr.msk.f32.mxu0 %vm2217_vm2, %v13336_v11  ;;  %v26578_v53 = vld [vmem:[#allocation84_spill] sm:$0xff] }
 0x6a0   :  { %v20131_v54 = vadd.f32 %v19708_v49, %v25278_v21  ;;  %v12674_v30 = vpop.f32.mrb[101].mxu1  ;;  %19883 = vmatmul.mubr.msk.f32.gmra.mrb[18].mxu0 %vm2217_vm2, %v13337_v18  ;;  %v13339_v5 = vmax.f32 %v13223_v34, 0.0 }
 0x6a1   :  { %v13338_v36 = vmax.f32 %v13222_v12, 0.0  ;;  %v20132_v7 = vadd.f32 %v12674_v30, %v25280_v17  ;;  %v26579_v12 = vld [vmem:[#allocation85_spill] sm:$0xff] }
 0x6a2   :  { %v13225_v8 = vadd.f32 %v20131_v54, %v25455_v47 }
 0x6a3   :  { %v13224_v3 = vadd.f32 %v20132_v7, %v25455_v47  ;;  %v19711_v9 = vpop.f32.mrb[102].mxu1  ;;  %19885 = vmatprep.mubr.msk.f32.mxu0 %vm2217_vm2, %v13338_v36 }
 0x6a4   :  { %v20133_v43 = vadd.f32 %v19711_v9, %v25284_v37  ;;  %v12684_v4 = vpop.f32.mrb[103].mxu1  ;;  %19886 = vmatmul.mubr.msk.f32.gmra.mrb[20].mxu0 %vm2217_vm2, %v13339_v5  ;;  %v13341_v19 = vmax.f32 %v13225_v8, 0.0  ;;  %v26580_v5 = vld [vmem:[#allocation36_spill] sm:$0xff] }
 0x6a5   :  { %v13340_v21 = vmax.f32 %v13224_v3, 0.0  ;;  %v20134_v20 = vadd.f32 %v12684_v4, %v25286_v45 }
 0x6a6   :  { %v13227_v16 = vadd.f32 %v20133_v43, %v25455_v47  ;;  %v26581_v43 = vld [vmem:[#allocation34_spill] sm:$0xff] }
 0x6a7   :  { %v13226_v17 = vadd.f32 %v20134_v20, %v25455_v47  ;;  %v19714_v6 = vpop.f32.mrb[104].mxu1  ;;  %19888 = vmatprep.mubr.msk.f32.mxu0 %vm2217_vm2, %v13340_v21 }
 0x6a8   :  { %v20135_v15 = vadd.f32 %v19714_v6, %v25290_v44  ;;  %v12694_v62 = vpop.f32.mrb[105].mxu1  ;;  %19889 = vmatmul.mubr.msk.f32.gmra.mrb[22].mxu0 %vm2217_vm2, %v13341_v19  ;;  %v13343_v32 = vmax.f32 %v13227_v16, 0.0 }
 0x6a9   :  { %v13342_v37 = vmax.f32 %v13226_v17, 0.0  ;;  %v20136_v13 = vadd.f32 %v12694_v62, %v25292_v58  ;;  %v26582_v17 = vld [vmem:[#allocation17_spill] sm:$0xff] }
 0x6aa   :  { %v13229_v39 = vadd.f32 %v20135_v15, %v25455_v47 }
 0x6ab   :  { %v13228_v45 = vadd.f32 %v20136_v13, %v25455_v47  ;;  %v19717_v50 = vpop.f32.mrb[106].mxu1  ;;  %19891 = vmatprep.mubr.msk.f32.mxu0 %vm2217_vm2, %v13342_v37  ;;  %v26583_v37 = vld [vmem:[#allocation20_spill] sm:$0xff] }
 0x6ac   :  { %v20137_v31 = vadd.f32 %v19717_v50, %v25296_v48  ;;  %v12704_v0 = vpop.f32.mrb[107].mxu1  ;;  %19892 = vmatmul.mubr.msk.f32.gmra.mrb[24].mxu0 %vm2217_vm2, %v13343_v32  ;;  %v13345_v41 = vmax.f32 %v13229_v39, 0.0 }
 0x6ad   :  { %v13344_v44 = vmax.f32 %v13228_v45, 0.0  ;;  %v20138_v2 = vadd.f32 %v12704_v0, %v25298_v1 }
 0x6ae   :  { %v13231_v61 = vadd.f32 %v20137_v31, %v25455_v47  ;;  %v26584_v31 = vld [vmem:[#allocation25_spill] sm:$0xff] }
 0x6af   :  { %v13230_v58 = vadd.f32 %v20138_v2, %v25455_v47  ;;  %v19720_v35 = vpop.f32.mrb[108].mxu1  ;;  %19894 = vmatprep.mubr.msk.f32.mxu0 %vm2217_vm2, %v13344_v44 }
 0x6b0   :  { %v20139_v51 = vadd.f32 %v19720_v35, %v25302_v10  ;;  %v12714_v14 = vpop.f32.mrb[109].mxu1  ;;  %19895 = vmatmul.mubr.msk.f32.gmra.mrb[26].mxu0 %vm2217_vm2, %v13345_v41  ;;  %v13347_v63 = vmax.f32 %v13231_v61, 0.0  ;;  %v26585_v41 = vld [vmem:[#allocation22_spill] sm:$0xff] }
 0x6b1   :  { %v13346_v48 = vmax.f32 %v13230_v58, 0.0  ;;  %v20140_v27 = vadd.f32 %v12714_v14, %v25304_v40 }
 0x6b2   :  { %v13233_v55 = vadd.f32 %v20139_v51, %v25455_v47 }
 0x6b3   :  { %v13232_v1 = vadd.f32 %v20140_v27, %v25455_v47  ;;  %v19723_v23 = vpop.f32.mrb[110].mxu1  ;;  %19897 = vmatprep.mubr.msk.f32.mxu0 %vm2217_vm2, %v13346_v48  ;;  %v26586_v48 = vld [vmem:[#allocation27_spill] sm:$0xff] }
 0x6b4   :  { %v20141_v52 = vadd.f32 %v19723_v23, %v25308_v28  ;;  %v12724_v26 = vpop.f32.mrb[111].mxu1  ;;  %19898 = vmatmul.mubr.msk.f32.gmra.mrb[28].mxu0 %vm2217_vm2, %v13347_v63  ;;  %v13349_v33 = vmax.f32 %v13233_v55, 0.0 }
 0x6b5   :  { %v13348_v10 = vmax.f32 %v13232_v1, 0.0  ;;  %v20142_v38 = vadd.f32 %v12724_v26, %v25310_v60  ;;  %v26587_v1 = vld [vmem:[#allocation24_spill] sm:$0xff] }
 0x6b6   :  { %v13235_v42 = vadd.f32 %v20141_v52, %v25455_v47 }
 0x6b7   :  { %v13234_v40 = vadd.f32 %v20142_v38, %v25455_v47  ;;  %v19726_v46 = vpop.f32.mrb[112].mxu1  ;;  %19900 = vmatprep.mubr.msk.f32.mxu0 %vm2217_vm2, %v13348_v10 }
 0x6b8   :  { %v20143_v24 = vadd.f32 %v19726_v46, %v25314_v25  ;;  %v12734_v22 = vpop.f32.mrb[113].mxu1  ;;  %19901 = vmatmul.mubr.msk.f32.gmra.mrb[30].mxu0 %vm2217_vm2, %v13349_v33  ;;  %v13351_v56 = vmax.f32 %v13235_v42, 0.0  ;;  %v26588_v33 = vld [vmem:[#allocation29_spill] sm:$0xff] }
 0x6b9   :  { %v13350_v28 = vmax.f32 %v13234_v40, 0.0  ;;  %v20144_v29 = vadd.f32 %v12734_v22, %v26577_v59 }
 0x6ba   :  { %v13237_v57 = vadd.f32 %v20143_v24, %v25455_v47  ;;  %v26589_v24 = vld [vmem:[#allocation26_spill] sm:$0xff] }
 0x6bb   :  { %v13236_v60 = vadd.f32 %v20144_v29, %v25455_v47  ;;  %v19729_v11 = vpop.f32.mrb[114].mxu1  ;;  %19903 = vmatprep.mubr.msk.f32.mxu0 %vm2217_vm2, %v13350_v28 }
 0x6bc   :  { %v20145_v18 = vadd.f32 %v19729_v11, %v26578_v53  ;;  %v12744_v34 = vpop.f32.mrb[115].mxu1  ;;  %19904 = vmatmul.mubr.msk.f32.gmra.mrb[32].mxu0 %vm2217_vm2, %v13351_v56  ;;  %v13353_v54 = vmax.f32 %v13237_v57, 0.0  ;;  %v26590_v57 = vld [vmem:[#allocation31_spill] sm:$0xff] }
 0x6bd   :  { %v13352_v25 = vmax.f32 %v13236_v60, 0.0  ;;  %v20146_v49 = vadd.f32 %v12744_v34, %v26579_v12 }
 0x6be   :  { %v13239_v30 = vadd.f32 %v20145_v18, %v25455_v47  ;;  %v26591_v18 = vld [vmem:[#allocation28_spill] sm:$0xff] }
 0x6bf   :  { %v13238_v36 = vadd.f32 %v20146_v49, %v25455_v47  ;;  %v19732_v7 = vpop.f32.mrb[0].mxu1  ;;  %19906 = vmatprep.mubr.msk.f32.mxu0 %vm2217_vm2, %v13352_v25 }
 0x6c0   :  { %v20147_v8 = vadd.f32 %v19732_v7, %v26580_v5  ;;  %v12754_v3 = vpop.f32.mrb[1].mxu1  ;;  %19907 = vmatmul.mubr.msk.f32.gmra.mrb[34].mxu0 %vm2217_vm2, %v13353_v54  ;;  %v13355_v21 = vmax.f32 %v13239_v30, 0.0  ;;  %v26592_v30 = vld [vmem:[#allocation33_spill] sm:$0xff] }
 0x6c1   :  { %v13354_v9 = vmax.f32 %v13238_v36, 0.0  ;;  %v20148_v4 = vadd.f32 %v12754_v3, %v26581_v43 }
 0x6c2   :  { %v13241_v20 = vadd.f32 %v20147_v8, %v25455_v47  ;;  %v26593_v8 = vld [vmem:[#allocation30_spill] sm:$0xff] }
 0x6c3   :  { %v13240_v19 = vadd.f32 %v20148_v4, %v25455_v47  ;;  %v19735_v16 = vpop.f32.mrb[2].mxu1  ;;  %19909 = vmatprep.mubr.msk.f32.mxu0 %vm2217_vm2, %v13354_v9 }
 0x6c4   :  { %v20149_v6 = vadd.f32 %v19735_v16, %v26582_v17  ;;  %v12764_v15 = vpop.f32.mrb[3].mxu1  ;;  %19910 = vmatmul.mubr.msk.f32.gmra.mrb[36].mxu0 %vm2217_vm2, %v13355_v21  ;;  %v13357_v32 = vmax.f32 %v13241_v20, 0.0  ;;  %v26594_v20 = vld [vmem:[#allocation35_spill] sm:$0xff] }
 0x6c5   :  { %v13356_v62 = vmax.f32 %v13240_v19, 0.0  ;;  %v20150_v13 = vadd.f32 %v12764_v15, %v26583_v37 }
 0x6c6   :  { %v13243_v39 = vadd.f32 %v20149_v6, %v25455_v47  ;;  %v26595_v6 = vld [vmem:[#allocation32_spill] sm:$0xff] }
 0x6c7   :  { %v13242_v45 = vadd.f32 %v20150_v13, %v25455_v47  ;;  %v19738_v50 = vpop.f32.mrb[4].mxu1  ;;  %19912 = vmatprep.mubr.msk.f32.mxu0 %vm2217_vm2, %v13356_v62 }
 0x6c8   :  { %v20151_v0 = vadd.f32 %v19738_v50, %v26584_v31  ;;  %v12774_v44 = vpop.f32.mrb[5].mxu1  ;;  %19913 = vmatmul.mubr.msk.f32.gmra.mrb[38].mxu0 %vm2217_vm2, %v13357_v32  ;;  %v13359_v58 = vmax.f32 %v13243_v39, 0.0  ;;  %v26596_v39 = vld [vmem:[#allocation37_spill] sm:$0xff] }
 0x6c9   :  { %v13358_v2 = vmax.f32 %v13242_v45, 0.0  ;;  %v20152_v61 = vadd.f32 %v12774_v44, %v26585_v41 }
 0x6ca   :  { %v13245_v35 = vadd.f32 %v20151_v0, %v25455_v47  ;;  %v26597_v0 = vld [vmem:[#allocation38_spill] sm:$0xff] }
 0x6cb   :  { %v13244_v51 = vadd.f32 %v20152_v61, %v25455_v47  ;;  %v19741_v14 = vpop.f32.mrb[6].mxu1  ;;  %19915 = vmatprep.mubr.msk.f32.mxu0 %vm2217_vm2, %v13358_v2 }
 0x6cc   :  { %v20153_v27 = vadd.f32 %v19741_v14, %v26586_v48  ;;  %v12784_v63 = vpop.f32.mrb[7].mxu1  ;;  %19916 = vmatmul.mubr.msk.f32.gmra.mrb[40].mxu0 %vm2217_vm2, %v13359_v58  ;;  %v13361_v52 = vmax.f32 %v13245_v35, 0.0  ;;  %v26598_v35 = vld [vmem:[#allocation39_spill] sm:$0xff] }
 0x6cd   :  { %v13360_v55 = vmax.f32 %v13244_v51, 0.0  ;;  %v20154_v23 = vadd.f32 %v12784_v63, %v26587_v1 }
 0x6ce   :  { %v13247_v26 = vadd.f32 %v20153_v27, %v25455_v47  ;;  %v26599_v27 = vld [vmem:[#allocation40_spill] sm:$0xff] }
 0x6cf   :  { %v13246_v10 = vadd.f32 %v20154_v23, %v25455_v47  ;;  %v19744_v38 = vpop.f32.mrb[8].mxu1  ;;  %19918 = vmatprep.mubr.msk.f32.mxu0 %vm2217_vm2, %v13360_v55 }
 0x6d0   :  { %v20155_v42 = vadd.f32 %v19744_v38, %v26588_v33  ;;  %v12794_v40 = vpop.f32.mrb[9].mxu1  ;;  %19919 = vmatmul.mubr.msk.f32.gmra.mrb[42].mxu0 %vm2217_vm2, %v13361_v52  ;;  %v13363_v28 = vmax.f32 %v13247_v26, 0.0  ;;  %v26600_v26 = vld [vmem:[#allocation41_spill] sm:$0xff] }
 0x6d1   :  { %v13362_v46 = vmax.f32 %v13246_v10, 0.0  ;;  %v20156_v22 = vadd.f32 %v12794_v40, %v26589_v24 }
 0x6d2   :  { %v13249_v59 = vadd.f32 %v20155_v42, %v25455_v47  ;;  %v26601_v42 = vld [vmem:[#allocation42_spill] sm:$0xff] }
 0x6d3   :  { %v13248_v29 = vadd.f32 %v20156_v22, %v25455_v47  ;;  %v19747_v56 = vpop.f32.mrb[10].mxu1  ;;  %19921 = vmatprep.mubr.msk.f32.mxu0 %vm2217_vm2, %v13362_v46 }
 0x6d4   :  { %v20157_v60 = vadd.f32 %v19747_v56, %v26590_v57  ;;  %v12804_v11 = vpop.f32.mrb[11].mxu1  ;;  %19922 = vmatmul.mubr.msk.f32.gmra.mrb[44].mxu0 %vm2217_vm2, %v13363_v28  ;;  %v13365_v25 = vmax.f32 %v13249_v59, 0.0  ;;  %v26602_v59 = vld [vmem:[#allocation43_spill] sm:$0xff] }
 0x6d5   :  { %v13364_v53 = vmax.f32 %v13248_v29, 0.0  ;;  %v20158_v34 = vadd.f32 %v12804_v11, %v26591_v18 }
 0x6d6   :  { %v13251_v12 = vadd.f32 %v20157_v60, %v25455_v47  ;;  %v26603_v60 = vld [vmem:[#allocation44_spill] sm:$0xff] }
 0x6d7   :  { %v13250_v49 = vadd.f32 %v20158_v34, %v25455_v47  ;;  %v19750_v54 = vpop.f32.mrb[12].mxu1  ;;  %19924 = vmatprep.mubr.msk.f32.mxu0 %vm2217_vm2, %v13364_v53 }
 0x6d8   :  { %v20159_v36 = vadd.f32 %v19750_v54, %v26592_v30  ;;  %v12814_v7 = vpop.f32.mrb[13].mxu1  ;;  %19925 = vmatmul.mubr.msk.f32.gmra.mrb[46].mxu0 %vm2217_vm2, %v13365_v25  ;;  %v13367_v9 = vmax.f32 %v13251_v12, 0.0  ;;  %v26604_v12 = vld [vmem:[#allocation45_spill] sm:$0xff]  ;;  %v25699_v30 = vpop.permute.xlu1 %14628 }
 0x6d9   :  { %v13366_v5 = vmax.f32 %v13250_v49, 0.0  ;;  %v20160_v3 = vadd.f32 %v12814_v7, %v26593_v8  ;;  %v26605_v7 = vld [vmem:[#allocation46_spill] sm:$0xff]  ;;  %v25702_v8 = vpop.permute.xlu0 %14623 }
 0x6da   :  { %v13253_v43 = vadd.f32 %v20159_v36, %v25455_v47 }
 0x6db   :  { %v13252_v4 = vadd.f32 %v20160_v3, %v25455_v47  ;;  %v19753_v21 = vpop.f32.mrb[14].mxu1  ;;  %19927 = vmatprep.mubr.msk.f32.mxu0 %vm2217_vm2, %v13366_v5 }
 0x6dc   :  { %v20161_v19 = vadd.f32 %v19753_v21, %v26594_v20  ;;  %v12824_v16 = vpop.f32.mrb[15].mxu1  ;;  %19928 = vmatmul.mubr.msk.f32.gmra.mrb[48].mxu0 %vm2217_vm2, %v13367_v9  ;;  %v13369_v62 = vmax.f32 %v13253_v43, 0.0  ;;  %v26606_v21 = vld [vmem:[#allocation47_spill] sm:$0xff] }
 0x6dd   :  { %v13368_v17 = vmax.f32 %v13252_v4, 0.0  ;;  %v20162_v15 = vadd.f32 %v12824_v16, %v26595_v6 }
 0x6de   :  { %v13255_v37 = vadd.f32 %v20161_v19, %v25455_v47 }
 0x6df   :  { %v13254_v13 = vadd.f32 %v20162_v15, %v25455_v47  ;;  %v19756_v32 = vpop.f32.mrb[16].mxu1  ;;  %19930 = vmatprep.mubr.msk.f32.mxu0 %vm2217_vm2, %v13368_v17  ;;  %v26607_v17 = vld [vmem:[#allocation48_spill] sm:$0xff] }
 0x6e0   :  { %v20163_v45 = vadd.f32 %v19756_v32, %v26596_v39  ;;  %v12834_v50 = vpop.f32.mrb[17].mxu1  ;;  %19931 = vmatmul.mubr.msk.f32.gmra.mrb[50].mxu0 %vm2217_vm2, %v13369_v62  ;;  %v13371_v2 = vmax.f32 %v13255_v37, 0.0  ;;  %v25711_v37 = vpop.permute.xlu1 %14638 }
 0x6e1   :  { %v13370_v31 = vmax.f32 %v13254_v13, 0.0  ;;  %v20164_v44 = vadd.f32 %v12834_v50, %v26597_v0  ;;  %v25715_v39 = vpop.permute.xlu0 %14633 }
 0x6e2   :  { %v13257_v41 = vadd.f32 %v20163_v45, %v25455_v47  ;;  %v26608_v45 = vld [vmem:[#allocation49_spill] sm:$0xff] }
 0x6e3   :  { %v13256_v61 = vadd.f32 %v20164_v44, %v25455_v47  ;;  %v19759_v58 = vpop.f32.mrb[18].mxu1  ;;  %19933 = vmatprep.mubr.msk.f32.mxu0 %vm2217_vm2, %v13370_v31  ;;  %v26609_v44 = vld [vmem:[#allocation50_spill] sm:$0xff] }
 0x6e4   :  { %v20165_v51 = vadd.f32 %v19759_v58, %v26598_v35  ;;  %v12844_v14 = vpop.f32.mrb[19].mxu1  ;;  %19934 = vmatmul.mubr.msk.f32.gmra.mrb[52].mxu0 %vm2217_vm2, %v13371_v2  ;;  %v13373_v55 = vmax.f32 %v13257_v41, 0.0 }
 0x6e5   :  { %v13372_v48 = vmax.f32 %v13256_v61, 0.0  ;;  %v20166_v63 = vadd.f32 %v12844_v14, %v26599_v27  ;;  %v25725_v27 = vpop.permute.xlu1 %14648 }
 0x6e6   :  { %v13259_v1 = vadd.f32 %v20165_v51, %v25455_v47  ;;  %v26610_v51 = vld [vmem:[#allocation51_spill] sm:$0xff] }
 0x6e7   :  { %v13258_v23 = vadd.f32 %v20166_v63, %v25455_v47  ;;  %v19762_v52 = vpop.f32.mrb[20].mxu1  ;;  %19936 = vmatprep.mubr.msk.f32.mxu0 %vm2217_vm2, %v13372_v48 }
 0x6e8   :  { %v20167_v10 = vadd.f32 %v19762_v52, %v26600_v26  ;;  %v12854_v38 = vpop.f32.mrb[21].mxu1  ;;  %19937 = vmatmul.mubr.msk.f32.gmra.mrb[54].mxu0 %vm2217_vm2, %v13373_v55  ;;  %v13375_v46 = vmax.f32 %v13259_v1, 0.0  ;;  %v26611_v55 = vld [vmem:[#allocation52_spill] sm:$0xff] }
 0x6e9   :  { %v13374_v33 = vmax.f32 %v13258_v23, 0.0  ;;  %v20168_v40 = vadd.f32 %v12854_v38, %v26601_v42  ;;  %v25728_v23 = vpop.permute.xlu0 %14643 }
 0x6ea   :  { %v13261_v24 = vadd.f32 %v20167_v10, %v25455_v47 }
 0x6eb   :  { %v13260_v22 = vadd.f32 %v20168_v40, %v25455_v47  ;;  %v19765_v28 = vpop.f32.mrb[22].mxu1  ;;  %19939 = vmatprep.mubr.msk.f32.mxu0 %vm2217_vm2, %v13374_v33  ;;  %v26612_v33 = vld [vmem:[#allocation53_spill] sm:$0xff] }
 0x6ec   :  { %v20169_v29 = vadd.f32 %v19765_v28, %v26602_v59  ;;  %v12864_v56 = vpop.f32.mrb[23].mxu1  ;;  %19940 = vmatmul.mubr.msk.f32.gmra.mrb[56].mxu0 %vm2217_vm2, %v13375_v46  ;;  %v13377_v53 = vmax.f32 %v13261_v24, 0.0  ;;  %v26613_v24 = vld [vmem:[#allocation54_spill] sm:$0xff] }
 0x6ed   :  { %v13376_v57 = vmax.f32 %v13260_v22, 0.0  ;;  %v20170_v11 = vadd.f32 %v12864_v56, %v26603_v60  ;;  %v25741_v60 = vpop.permute.xlu0 %14653 }
 0x6ee   :  { %v13263_v18 = vadd.f32 %v20169_v29, %v25455_v47  ;;  %v25737_v29 = vpop.permute.xlu1 %14658 }
 0x6ef   :  { %v13262_v34 = vadd.f32 %v20170_v11, %v25455_v47  ;;  %v19768_v25 = vpop.f32.mrb[24].mxu1  ;;  %19942 = vmatprep.mubr.msk.f32.mxu0 %vm2217_vm2, %v13376_v57  ;;  %v26614_v11 = vld [vmem:[#allocation55_spill] sm:$0xff] }
 0x6f0   :  { %v20171_v49 = vadd.f32 %v19768_v25, %v26604_v12  ;;  %v12874_v54 = vpop.f32.mrb[25].mxu1  ;;  %19943 = vmatmul.mubr.msk.f32.gmra.mrb[58].mxu0 %vm2217_vm2, %v13377_v53  ;;  %v13379_v3 = vmax.f32 %v13263_v18, 0.0  ;;  %v26615_v25 = vld [vmem:[#allocation56_spill] sm:$0xff] }
 0x6f1   :  { %v13378_v36 = vmax.f32 %v13262_v34, 0.0  ;;  %v20172_v5 = vadd.f32 %v12874_v54, %v26605_v7 }
 0x6f2   :  { %v13265_v9 = vadd.f32 %v20171_v49, %v25455_v47 }
 0x6f3   :  { %v13264_v43 = vadd.f32 %v20172_v5, %v25455_v47  ;;  %v19771_v4 = vpop.f32.mrb[26].mxu1  ;;  %19945 = vmatprep.mubr.msk.f32.mxu0 %vm2217_vm2, %v13378_v36  ;;  %v26616_v5 = vld [vmem:[#allocation57_spill] sm:$0xff] }
 0x6f4   :  { %v20173_v20 = vadd.f32 %v19771_v4, %v26606_v21  ;;  %v12884_v19 = vpop.f32.mrb[27].mxu1  ;;  %19946 = vmatmul.mubr.msk.f32.gmra.mrb[60].mxu0 %vm2217_vm2, %v13379_v3  ;;  %v13381_v15 = vmax.f32 %v13265_v9, 0.0  ;;  %v26617_v21 = vld [vmem:[#allocation58_spill] sm:$0xff] }
 0x6f5   :  { %v13380_v16 = vmax.f32 %v13264_v43, 0.0  ;;  %v20174_v6 = vadd.f32 %v12884_v19, %v26607_v17  ;;  %v25751_v43 = vpop.permute.xlu1 %14668  ;;  %v25754_v19 = vpop.permute.xlu0 %14663 }
 0x6f6   :  { %v13267_v62 = vadd.f32 %v20173_v20, %v25455_v47 }
 0x6f7   :  { %v13266_v13 = vadd.f32 %v20174_v6, %v25455_v47  ;;  %v19774_v32 = vpop.f32.mrb[28].mxu1  ;;  %19948 = vmatprep.mubr.msk.f32.mxu0 %vm2217_vm2, %v13380_v16 }
 0x6f8   :  { %v20175_v50 = vadd.f32 %v19774_v32, %v26608_v45  ;;  %v12894_v31 = vpop.f32.mrb[29].mxu1  ;;  %19949 = vmatmul.mubr.msk.f32.gmra.mrb[62].mxu0 %vm2217_vm2, %v13381_v15  ;;  %v13383_v41 = vmax.f32 %v13267_v62, 0.0  ;;  %v26618_v62 = vld [vmem:[#allocation59_spill] sm:$0xff] }
 0x6f9   :  { %v13382_v0 = vmax.f32 %v13266_v13, 0.0  ;;  %v20176_v2 = vadd.f32 %v12894_v31, %v26609_v44 }
 0x6fa   :  { %v13269_v61 = vadd.f32 %v20175_v50, %v25455_v47  ;;  %v26619_v50 = vld [vmem:[#allocation60_spill] sm:$0xff] }
 0x6fb   :  { %v13268_v58 = vadd.f32 %v20176_v2, %v25455_v47  ;;  %v19777_v35 = vpop.f32.mrb[30].mxu1  ;;  %19951 = vmatprep.mubr.msk.f32.mxu0 %vm2217_vm2, %v13382_v0  ;;  %v25763_v2 = vpop.permute.xlu1 %14678 }
 0x6fc   :  { %v20177_v14 = vadd.f32 %v19777_v35, %v26610_v51  ;;  %v12904_v48 = vpop.f32.mrb[31].mxu1  ;;  %19952 = vmatmul.mubr.msk.f32.gmra.mrb[64].mxu0 %vm2217_vm2, %v13383_v41  ;;  %v13385_v52 = vmax.f32 %v13269_v61, 0.0  ;;  %v26620_v35 = vld [vmem:[#allocation61_spill] sm:$0xff] }
 0x6fd   :  { %v13384_v63 = vmax.f32 %v13268_v58, 0.0  ;;  %v20178_v1 = vadd.f32 %v12904_v48, %v26611_v55  ;;  %v25767_v58 = vpop.permute.xlu0 %14673 }
 0x6fe   :  { %v13271_v26 = vadd.f32 %v20177_v14, %v25455_v47 }
 0x6ff   :  { %v13270_v10 = vadd.f32 %v20178_v1, %v25455_v47  ;;  %v19780_v38 = vpop.f32.mrb[32].mxu1  ;;  %19954 = vmatprep.mubr.msk.f32.mxu0 %vm2217_vm2, %v13384_v63  ;;  %v26621_v63 = vld [vmem:[#allocation62_spill] sm:$0xff] }
 0x700   :  { %v20179_v42 = vadd.f32 %v19780_v38, %v26612_v33  ;;  %v12914_v40 = vpop.f32.mrb[33].mxu1  ;;  %19955 = vmatmul.mubr.msk.f32.gmra.mrb[66].mxu0 %vm2217_vm2, %v13385_v52  ;;  %v13387_v28 = vmax.f32 %v13271_v26, 0.0  ;;  %v26622_v38 = vld [vmem:[#allocation63_spill] sm:$0xff] }
 0x701   :  { %v13386_v46 = vmax.f32 %v13270_v10, 0.0  ;;  %v20180_v22 = vadd.f32 %v12914_v40, %v26613_v24  ;;  %v25777_v40 = vpop.permute.xlu1 %14688  ;;  %v26623_v24 = vld [vmem:[#allocation64_spill] sm:$0xff] }
 0x702   :  { %v13273_v59 = vadd.f32 %v20179_v42, %v25455_v47 }
 0x703   :  { %v13272_v56 = vadd.f32 %v20180_v22, %v25455_v47  ;;  %v19783_v57 = vpop.f32.mrb[34].mxu1  ;;  %19957 = vmatprep.mubr.msk.f32.mxu0 %vm2217_vm2, %v13386_v46 }
 0x704   :  { %v20181_v53 = vadd.f32 %v19783_v57, %v26614_v11  ;;  %v12924_v18 = vpop.f32.mrb[35].mxu1  ;;  %19958 = vmatmul.mubr.msk.f32.gmra.mrb[68].mxu0 %vm2217_vm2, %v13387_v28  ;;  %v13389_v49 = vmax.f32 %v13273_v59, 0.0  ;;  %v25780_v28 = vpop.permute.xlu0 %14683 }
 0x705   :  { %v13388_v34 = vmax.f32 %v13272_v56, 0.0  ;;  %v20182_v12 = vadd.f32 %v12924_v18, %v26615_v25 }
 0x706   :  { %v13275_v54 = vadd.f32 %v20181_v53, %v25455_v47  ;;  %v26624_v53 = vld [vmem:[#allocation65_spill] sm:$0xff] }
 0x707   :  { %v13274_v36 = vadd.f32 %v20182_v12, %v25455_v47  ;;  %v19786_v7 = vpop.f32.mrb[36].mxu1  ;;  %19960 = vmatprep.mubr.msk.f32.mxu0 %vm2217_vm2, %v13388_v34  ;;  %v26625_v12 = vld [vmem:[#allocation66_spill] sm:$0xff] }
 0x708   :  { %v20183_v3 = vadd.f32 %v19786_v7, %v26616_v5  ;;  %v12934_v9 = vpop.f32.mrb[37].mxu1  ;;  %19961 = vmatmul.mubr.msk.f32.gmra.mrb[70].mxu0 %vm2217_vm2, %v13389_v49  ;;  %v13391_v16 = vmax.f32 %v13275_v54, 0.0  ;;  %v25794_v7 = vpop.permute.xlu1 %14698 }
 0x709   :  { %v13390_v4 = vmax.f32 %v13274_v36, 0.0  ;;  %v20184_v20 = vadd.f32 %v12934_v9, %v26617_v21  ;;  %v25798_v9 = vpop.permute.xlu0 %14693 }
 0x70a   :  { %v13277_v17 = vadd.f32 %v20183_v3, %v25455_v47 }
 0x70b   :  { %v13276_v6 = vadd.f32 %v20184_v20, %v25455_v47  ;;  %v19789_v15 = vpop.f32.mrb[38].mxu1  ;;  %19963 = vmatprep.mubr.msk.f32.mxu0 %vm2217_vm2, %v13390_v4  ;;  %v26626_v4 = vld [vmem:[#allocation67_spill] sm:$0xff] }
 0x70c   :  { %v20185_v13 = vadd.f32 %v19789_v15, %v26618_v62  ;;  %v12944_v32 = vpop.f32.mrb[39].mxu1  ;;  %19964 = vmatmul.mubr.msk.f32.gmra.mrb[72].mxu0 %vm2217_vm2, %v13391_v16  ;;  %v13393_v0 = vmax.f32 %v13277_v17, 0.0  ;;  %v26627_v17 = vld [vmem:[#allocation68_spill] sm:$0xff] }
 0x70d   :  { %v13392_v45 = vmax.f32 %v13276_v6, 0.0  ;;  %v20186_v31 = vadd.f32 %v12944_v32, %v26619_v50 }
 0x70e   :  { %v13279_v44 = vadd.f32 %v20185_v13, %v25455_v47 }
 0x70f   :  { %v13278_v41 = vadd.f32 %v20186_v31, %v25455_v47  ;;  %v19792_v61 = vpop.f32.mrb[40].mxu1  ;;  %19966 = vmatprep.mubr.msk.f32.mxu0 %vm2217_vm2, %v13392_v45  ;;  %v26628_v45 = vld [vmem:[#allocation69_spill] sm:$0xff] }
 0x710   :  { %v20187_v51 = vadd.f32 %v19792_v61, %v26620_v35  ;;  %v12954_v14 = vpop.f32.mrb[41].mxu1  ;;  %19967 = vmatmul.mubr.msk.f32.gmra.mrb[74].mxu0 %vm2217_vm2, %v13393_v0  ;;  %v13395_v1 = vmax.f32 %v13279_v44, 0.0  ;;  %v25808_v0 = vpop.permute.xlu1 %14708 }
 0x711   :  { %v13394_v48 = vmax.f32 %v13278_v41, 0.0  ;;  %v20188_v55 = vadd.f32 %v12954_v14, %v26621_v63  ;;  %v26629_v41 = vld [vmem:[#allocation70_spill] sm:$0xff]  ;;  %v25811_v35 = vpop.permute.xlu0 %14703 }
 0x712   :  { %v13281_v52 = vadd.f32 %v20187_v51, %v25455_v47 }
 0x713   :  { %v13280_v26 = vadd.f32 %v20188_v55, %v25455_v47  ;;  %v19795_v10 = vpop.f32.mrb[42].mxu1  ;;  %19969 = vmatprep.mubr.msk.f32.mxu0 %vm2217_vm2, %v13394_v48  ;;  %v25785_v47 = vld [vmem:[%s26384_s6] ss:$0 sm:$0xff] }
 0x714   :  { %v20189_v33 = vadd.f32 %v19795_v10, %v26622_v38  ;;  %v12964_v42 = vpop.f32.mrb[43].mxu1  ;;  %19970 = vmatmul.mubr.msk.f32.gmra.mrb[76].mxu0 %vm2217_vm2, %v13395_v1  ;;  %v13397_v59 = vmax.f32 %v13281_v52, 0.0  ;;  %v26630_v55 = vld [vmem:[#allocation71_spill] sm:$0xff]  ;;  %v26631_v10 = vld [vmem:[#allocation72_spill] sm:$0xff] }
 0x715   :  { %v13396_v46 = vmax.f32 %v13280_v26, 0.0  ;;  %v20190_v22 = vadd.f32 %v12964_v42, %v26623_v24 }
 0x716   :  { %v13283_v56 = vadd.f32 %v25785_v47, %v20189_v33 }
 0x717   :  { %v13282_v57 = vadd.f32 %v25785_v47, %v20190_v22  ;;  %v19798_v11 = vpop.f32.mrb[44].mxu1  ;;  %19972 = vmatprep.mubr.msk.f32.mxu0 %vm2217_vm2, %v13396_v46  ;;  %v25820_v46 = vpop.permute.xlu1 %14718 }
 0x718   :  { %v20191_v18 = vadd.f32 %v19798_v11, %v26624_v53  ;;  %v12974_v34 = vpop.f32.mrb[45].mxu1  ;;  %19973 = vmatmul.mubr.msk.f32.gmra.mrb[78].mxu0 %vm2217_vm2, %v13397_v59  ;;  %v13399_v54 = vmax.f32 %v13283_v56, 0.0  ;;  %v25824_v59 = vpop.permute.xlu0 %14713  ;;  %v26632_v56 = vld [vmem:[#allocation73_spill] sm:$0xff] }
 0x719   :  { %v13398_v25 = vmax.f32 %v13282_v57, 0.0  ;;  %v20192_v49 = vadd.f32 %v12974_v34, %v26625_v12 }
 0x71a   :  { %v13285_v36 = vadd.f32 %v25785_v47, %v20191_v18  ;;  %v26633_v18 = vld [vmem:[#allocation74_spill] sm:$0xff] }
 0x71b   :  { %v13284_v5 = vadd.f32 %v25785_v47, %v20192_v49  ;;  %v19801_v3 = vpop.f32.mrb[46].mxu1  ;;  %19975 = vmatprep.mubr.msk.f32.mxu0 %vm2217_vm2, %v13398_v25 }
 0x71c   :  { %v20193_v21 = vadd.f32 %v19801_v3, %v26626_v4  ;;  %v12984_v20 = vpop.f32.mrb[47].mxu1  ;;  %19976 = vmatmul.mubr.msk.f32.gmra.mrb[80].mxu0 %vm2217_vm2, %v13399_v54  ;;  %v13401_v15 = vmax.f32 %v13285_v36, 0.0  ;;  %v26634_v36 = vld [vmem:[#allocation75_spill] sm:$0xff] }
 0x71d   :  { %v13400_v16 = vmax.f32 %v13284_v5, 0.0  ;;  %v20194_v6 = vadd.f32 %v12984_v20, %v26627_v17  ;;  %v25837_v17 = vpop.permute.xlu0 %14723 }
 0x71e   :  { %v13287_v62 = vadd.f32 %v25785_v47, %v20193_v21  ;;  %v26635_v21 = vld [vmem:[#allocation76_spill] sm:$0xff] }
 0x71f   :  { %v13286_v13 = vadd.f32 %v25785_v47, %v20194_v6  ;;  %v19804_v32 = vpop.f32.mrb[48].mxu1  ;;  %19978 = vmatprep.mubr.msk.f32.mxu0 %vm2217_vm2, %v13400_v16  ;;  %v25835_v16 = vpop.permute.xlu1 %14728 }
 0x720   :  { %v20195_v50 = vadd.f32 %v19804_v32, %v26628_v45  ;;  %v12994_v31 = vpop.f32.mrb[49].mxu1  ;;  %19979 = vmatmul.mubr.msk.f32.gmra.mrb[82].mxu0 %vm2217_vm2, %v13401_v15  ;;  %v13403_v51 = vmax.f32 %v13287_v62, 0.0  ;;  %v26636_v45 = vld [vmem:[#allocation77_spill] sm:$0xff] }
 0x721   :  { %v13402_v44 = vmax.f32 %v13286_v13, 0.0  ;;  %v20196_v61 = vadd.f32 %v12994_v31, %v26629_v41  ;;  %v26637_v31 = vld [vmem:[#allocation5_spill] sm:$0xff] }
 0x722   :  { %v13289_v14 = vadd.f32 %v25785_v47, %v20195_v50 }
 0x723   :  { %v13288_v48 = vadd.f32 %v25785_v47, %v20196_v61  ;;  %v19807_v63 = vpop.f32.mrb[50].mxu1  ;;  %19981 = vmatprep.mubr.msk.f32.mxu0 %vm2217_vm2, %v13402_v44 }
 0x724   :  { %v20197_v1 = vadd.f32 %v19807_v63, %v26630_v55  ;;  %v13004_v52 = vpop.f32.mrb[51].mxu1  ;;  %19982 = vmatmul.mubr.msk.f32.gmra.mrb[84].mxu0 %vm2217_vm2, %v13403_v51  ;;  %v13405_v33 = vmax.f32 %v13289_v14, 0.0  ;;  %v26638_v14 = vld [vmem:[#allocation78_spill] sm:$0xff]  ;;  %v26639_v63 = vld [vmem:[#allocation3_spill] sm:$0xff] }
 0x725   :  { %v13404_v26 = vmax.f32 %v13288_v48, 0.0  ;;  %v20198_v38 = vadd.f32 %v13004_v52, %v26631_v10 }
 0x726   :  { %v13291_v42 = vadd.f32 %v25785_v47, %v20197_v1 }
 0x727   :  { %v13290_v24 = vadd.f32 %v25785_v47, %v20198_v38  ;;  %v19810_v22 = vpop.f32.mrb[52].mxu1  ;;  %19984 = vmatprep.mubr.msk.f32.mxu0 %vm2217_vm2, %v13404_v26 }
 0x728   :  { %v20199_v57 = vadd.f32 %v19810_v22, %v26632_v56  ;;  %v13014_v11 = vpop.f32.mrb[53].mxu1  ;;  %19985 = vmatmul.mubr.msk.f32.gmra.mrb[86].mxu0 %vm2217_vm2, %v13405_v33  ;;  %v13407_v25 = vmax.f32 %v13291_v42, 0.0  ;;  %v26640_v33 = vld [vmem:[#allocation79_spill] sm:$0xff] }
 0x729   :  { %v13406_v53 = vmax.f32 %v13290_v24, 0.0  ;;  %v20200_v34 = vadd.f32 %v13014_v11, %v26633_v18  ;;  %v26641_v24 = vld [vmem:[#allocation7_spill] sm:$0xff]  ;;  %v25859_v11 = vpop.permute.xlu1 %14738  ;;  %v26642_v18 = vld [vmem:[#allocation80_spill] sm:$0xff] }
 0x72a   :  { %v13293_v12 = vadd.f32 %v25785_v47, %v20199_v57 }
 0x72b   :  { %v13292_v49 = vadd.f32 %v25785_v47, %v20200_v34  ;;  %v19813_v54 = vpop.f32.mrb[54].mxu1  ;;  %19987 = vmatprep.mubr.msk.f32.mxu0 %vm2217_vm2, %v13406_v53 }
 0x72c   :  { %v20201_v5 = vadd.f32 %v19813_v54, %v26634_v36  ;;  %v13024_v3 = vpop.f32.mrb[55].mxu1  ;;  %19988 = vmatmul.mubr.msk.f32.gmra.mrb[88].mxu0 %vm2217_vm2, %v13407_v25  ;;  %v13409_v6 = vmax.f32 %v13293_v12, 0.0  ;;  %v26643_v25 = vld [vmem:[#allocation4_spill] sm:$0xff] }
 0x72d   :  { %v13408_v4 = vmax.f32 %v13292_v49, 0.0  ;;  %v20202_v20 = vadd.f32 %v13024_v3, %v26635_v21  ;;  %v25863_v49 = vpop.permute.xlu0 %14733  ;;  %v26644_v21 = vld [vmem:[#allocation81_spill] sm:$0xff] }
 0x72e   :  { %v13295_v15 = vadd.f32 %v25785_v47, %v20201_v5 }
 0x72f   :  { %v13294_v62 = vadd.f32 %v25785_v47, %v20202_v20  ;;  %v19816_v13 = vpop.f32.mrb[56].mxu1  ;;  %v19833_v32 = vpop.f32.mrb[240].mxu0  ;;  %19990 = vmatprep.mubr.msk.f32.mxu0 %vm2217_vm2, %v13408_v4 }
 0x730   :  { %v20203_v50 = vadd.f32 %v19816_v13, %v26636_v45  ;;  %v15112_v44 = vadd.f32 %v19833_v32, %v26637_v31  ;;  %v13034_v41 = vpop.f32.mrb[57].mxu1  ;;  %v13952_v61 = vpop.f32.mrb[241].mxu0  ;;  %19991 = vmatmul.mubr.msk.f32.gmra.mrb[90].mxu0 %vm2217_vm2, %v13409_v6  ;;  %v13411_v1 = vmax.f32 %v13295_v15, 0.0  ;;  %v26645_v6 = vld [vmem:[#allocation9_spill] sm:$0xff]  ;;  %v26646_v45 = vld [vmem:[#allocation82_spill] sm:$0xff] }
 0x731   :  { %v13410_v51 = vmax.f32 %v13294_v62, 0.0  ;;  %v20204_v48 = vadd.f32 %v13034_v41, %v26638_v14  ;;  %v15111_v55 = vadd.f32 %v26639_v63, %v13952_v61  ;;  %v26647_v31 = vld [vmem:[#allocation6_spill] sm:$0xff]  ;;  %v25890_v63 = vpop.permute.xlu0 %14743 }
 0x732   :  { %v13297_v52 = vadd.f32 %v25785_v47, %v20203_v50  ;;  %15228 = vst [vmem:[%s26385_s8 + $0x8] sm:$0xff] %v15112_v44 }
 0x733   :  { %v13296_v26 = vadd.f32 %v25785_v47, %v20204_v48  ;;  %15227 = vst [vmem:[%s26385_s8] sm:$0xff] %v15111_v55  ;;  %v19819_v10 = vpop.f32.mrb[58].mxu1  ;;  %v19836_v38 = vpop.f32.mrb[242].mxu0  ;;  %19993 = vmatprep.mubr.msk.f32.mxu0 %vm2217_vm2, %v13410_v51  ;;  %v26648_v55 = vld [vmem:[#allocation11_spill] sm:$0xff] }
 0x734   :  { %v20205_v42 = vadd.f32 %v19819_v10, %v26640_v33  ;;  %v15114_v22 = vadd.f32 %v19836_v38, %v26641_v24  ;;  %v13044_v56 = vpop.f32.mrb[59].mxu1  ;;  %v13962_v57 = vpop.f32.mrb[243].mxu0  ;;  %19994 = vmatmul.mubr.msk.f32.gmra.mrb[92].mxu0 %vm2217_vm2, %v13411_v1  ;;  %v13413_v54 = vmax.f32 %v13297_v52, 0.0  ;;  %v26649_v10 = vld [vmem:[#allocation8_spill] sm:$0xff] }
 0x735   :  { %v13412_v53 = vmax.f32 %v13296_v26, 0.0  ;;  %v20206_v34 = vadd.f32 %v13044_v56, %v26642_v18  ;;  %v15113_v12 = vadd.f32 %v26643_v25, %v13962_v57  ;;  %v25883_v51 = vpop.permute.xlu1 %14748  ;;  %v26651_v57 = vld [vmem:[#allocation10_spill] sm:$0xff]  ;;  %v25907_v18 = vpop.permute.xlu0 %14753  ;;  %v26652_v25 = vld [vmem:[#allocation15_spill] sm:$0xff] }
 0x736   :  { %v13299_v36 = vadd.f32 %v25785_v47, %v20205_v42  ;;  %15230 = vst [vmem:[%s26385_s8 + $0x18] sm:$0xff] %v15114_v22  ;;  %v26650_v42 = vld [vmem:[#allocation13_spill] sm:$0xff] }
 0x737   :  { %v13298_v5 = vadd.f32 %v25785_v47, %v20206_v34  ;;  %15229 = vst [vmem:[%s26385_s8 + $0x10] sm:$0xff] %v15113_v12  ;;  %v19822_v3 = vpop.f32.mrb[60].mxu1  ;;  %v19839_v4 = vpop.f32.mrb[244].mxu0  ;;  %19996 = vmatprep.mubr.msk.f32.mxu0 %vm2217_vm2, %v13412_v53 }
 0x738   :  { %v20207_v20 = vadd.f32 %v19822_v3, %v26644_v21  ;;  %v15116_v15 = vadd.f32 %v19839_v4, %v26645_v6  ;;  %v13054_v62 = vpop.f32.mrb[61].mxu1  ;;  %v13972_v13 = vpop.f32.mrb[245].mxu0  ;;  %19997 = vmatmul.mubr.msk.f32.gmra.mrb[94].mxu0 %vm2217_vm2, %v13413_v54  ;;  %v13415_v41 = vmax.f32 %v13299_v36, 0.0  ;;  %v26653_v36 = vld [vmem:[#allocation12_spill] sm:$0xff] }
 0x739   :  { %v13414_v32 = vmax.f32 %v13298_v5, 0.0  ;;  %v20208_v50 = vadd.f32 %v13054_v62, %v26646_v45  ;;  %v15115_v44 = vadd.f32 %v26647_v31, %v13972_v13  ;;  %v25904_v56 = vpop.permute.xlu1 %14758  ;;  %v25925_v21 = vpop.permute.xlu0 %14763  ;;  %v26655_v62 = vld [vmem:[#allocation14_spill] sm:$0xff]  ;;  %v26656_v45 = vld [vmem:[#allocation21_spill] sm:$0xff] }
 0x73a   :  { %v13301_v61 = vadd.f32 %v25785_v47, %v20207_v20  ;;  %15232 = vst [vmem:[%s26385_s8 + $0x28] sm:$0xff] %v15116_v15  ;;  %v26654_v20 = vld [vmem:[#allocation18_spill] sm:$0xff] }
 0x73b   :  { %v13300_v14 = vadd.f32 %v25785_v47, %v20208_v50  ;;  %15231 = vst [vmem:[%s26385_s8 + $0x20] sm:$0xff] %v15115_v44  ;;  %v19842_v48 = vpop.f32.mrb[246].mxu0  ;;  %19999 = vmatprep.mubr.msk.f32.mxu0 %vm2217_vm2, %v13414_v32 }
 0x73c   :  { %v15118_v1 = vadd.f32 %v19842_v48, %v26648_v55  ;;  %v13982_v52 = vpop.f32.mrb[247].mxu0  ;;  %20000 = vmatmul.mubr.msk.f32.gmra.mrb[96].mxu0 %vm2217_vm2, %v13415_v41  ;;  %v13417_v33 = vmax.f32 %v13301_v61, 0.0  ;;  %v26657_v41 = vld [vmem:[#allocation16_spill] sm:$0xff]  ;;  %v26658_v55 = vld [vmem:[#allocation23_spill] sm:$0xff] }
 0x73d   :  { %v13416_v26 = vmax.f32 %v13300_v14, 0.0  ;;  %v15117_v38 = vadd.f32 %v26649_v10, %v13982_v52  ;;  %v25920_v3 = vpop.permute.xlu1 %14768  ;;  %v25939_v14 = vpop.permute.xlu0 %14773 }
 0x73e   :  { %15234 = vst [vmem:[%s26385_s8 + $0x38] sm:$0xff] %v15118_v1 }
 0x73f   :  { %15233 = vst [vmem:[%s26385_s8 + $0x30] sm:$0xff] %v15117_v38  ;;  %v19845_v47 = vpop.f32.mrb[248].mxu0  ;;  %20002 = vmatprep.mubr.msk.f32.mxu0 %vm2217_vm2, %v13416_v26  ;;  %v26659_v26 = vld [vmem:[#allocation19_spill] sm:$0xff] }
 0x740   :  { %v15120_v24 = vadd.f32 %v19845_v47, %v26650_v42  ;;  %v13992_v22 = vpop.f32.mrb[249].mxu0  ;;  %20003 = vmatmul.mubr.msk.f32.gmra.mrb[98].mxu0 %vm2217_vm2, %v13417_v33 }
 0x741   :  { %v15119_v53 = vadd.f32 %v26651_v57, %v13992_v22  ;;  %v25936_v44 = vpop.permute.xlu1 %14778  ;;  %v25957_v47 = vpop.permute.xlu0 %14783 }
 0x742   :  { %15236 = vst [vmem:[%s26385_s8 + $0x48] sm:$0xff] %v15120_v24 }
 0x743   :  { %15235 = vst [vmem:[%s26385_s8 + $0x40] sm:$0xff] %v15119_v53  ;;  %v19848_v34 = vpop.f32.mrb[250].mxu0 }
 0x744   :  { %v15122_v12 = vadd.f32 %v19848_v34, %v26652_v25  ;;  %v14002_v54 = vpop.f32.mrb[251].mxu0 }
 0x745   :  { %v15121_v5 = vadd.f32 %v26653_v36, %v14002_v54  ;;  %v25952_v38 = vpop.permute.xlu1 %14788 }
 0x746   :  { %15238 = vst [vmem:[%s26385_s8 + $0x58] sm:$0xff] %v15122_v12 }
 0x747   :  { %15237 = vst [vmem:[%s26385_s8 + $0x50] sm:$0xff] %v15121_v5  ;;  %v19851_v4 = vpop.f32.mrb[252].mxu0 }
 0x748   :  { %v15124_v6 = vadd.f32 %v19851_v4, %v26654_v20  ;;  %v14012_v15 = vpop.f32.mrb[253].mxu0 }
 0x749   :  { %v15123_v13 = vadd.f32 %v26655_v62, %v14012_v15  ;;  %v25968_v25 = vpop.permute.xlu1 %14798 }
 0x74a   :  { %15240 = vst [vmem:[%s26385_s8 + $0x68] sm:$0xff] %v15124_v6 }
 0x74b   :  { %15239 = vst [vmem:[%s26385_s8 + $0x60] sm:$0xff] %v15123_v13  ;;  %v19854_v32 = vpop.f32.mrb[254].mxu0 }
 0x74c   :  { %v15126_v50 = vadd.f32 %v19854_v32, %v26656_v45  ;;  %v14022_v31 = vpop.f32.mrb[255].mxu0 }
 0x74d   :  { %v15125_v61 = vadd.f32 %v26657_v41, %v14022_v31 }
 0x74e   :  { %15242 = vst [vmem:[%s26385_s8 + $0x78] sm:$0xff] %v15126_v50 }
 0x74f   :  { %15241 = vst [vmem:[%s26385_s8 + $0x70] sm:$0xff] %v15125_v61  ;;  %v19857_v48 = vpop.f32.mrb[0].mxu0 }
 0x750   :  { %v15128_v1 = vadd.f32 %v19857_v48, %v26658_v55  ;;  %v14032_v52 = vpop.f32.mrb[1].mxu0 }
 0x751   :  { %v15127_v10 = vadd.f32 %v26659_v26, %v14032_v52 }
 0x752   :  { %15244 = vst [vmem:[%s26385_s8 + $0x88] sm:$0xff] %v15128_v1 }
 0x753   :  { %15243 = vst [vmem:[%s26385_s8 + $0x80] sm:$0xff] %v15127_v10  ;;  %v19860_v33 = vpop.f32.mrb[2].mxu0 }
 0x754   :  { %v15130_v42 = vadd.f32 %v19860_v33, %v25699_v30  ;;  %v14042_v24 = vpop.f32.mrb[3].mxu0  ;;  %v25971_v30 = vpop.permute.xlu0 %14793 }
 0x755   :  { %v15129_v22 = vadd.f32 %v25702_v8, %v14042_v24 }
 0x756   :  { %15246 = vst [vmem:[%s26385_s8 + $0x98] sm:$0xff] %v15130_v42 }
 0x757   :  { %15245 = vst [vmem:[%s26385_s8 + $0x90] sm:$0xff] %v15129_v22  ;;  %v19863_v57 = vpop.f32.mrb[4].mxu0 }
 0x758   :  { %v15132_v53 = vadd.f32 %v19863_v57, %v25711_v37  ;;  %v14052_v34 = vpop.f32.mrb[5].mxu0  ;;  %v25989_v4 = vpop.permute.xlu0 %14803 }
 0x759   :  { %v15131_v12 = vadd.f32 %v25715_v39, %v14052_v34  ;;  %v25984_v39 = vpop.permute.xlu1 %14808 }
 0x75a   :  { %15248 = vst [vmem:[%s26385_s8 + $0xa8] sm:$0xff] %v15132_v53 }
 0x75b   :  { %15247 = vst [vmem:[%s26385_s8 + $0xa0] sm:$0xff] %v15131_v12  ;;  %v19866_v8 = vpop.f32.mrb[6].mxu0 }
 0x75c   :  { %v15134_v54 = vadd.f32 %v19866_v8, %v25725_v27  ;;  %v14062_v36 = vpop.f32.mrb[7].mxu0 }
 0x75d   :  { %v15133_v37 = vadd.f32 %v25728_v23, %v14062_v36  ;;  %v26000_v13 = vpop.permute.xlu1 %14818 }
 0x75e   :  { %15250 = vst [vmem:[%s26385_s8 + $0xb8] sm:$0xff] %v15134_v54 }
 0x75f   :  { %15249 = vst [vmem:[%s26385_s8 + $0xb0] sm:$0xff] %v15133_v37  ;;  %v19869_v5 = vpop.f32.mrb[8].mxu0 }
 0x760   :  { %v15136_v20 = vadd.f32 %v19869_v5, %v25737_v29  ;;  %v14072_v6 = vpop.f32.mrb[9].mxu0  ;;  %v26003_v29 = vpop.permute.xlu0 %14813 }
 0x761   :  { %v15135_v27 = vadd.f32 %v25741_v60, %v14072_v6 }
 0x762   :  { %15252 = vst [vmem:[%s26385_s8 + $0xc8] sm:$0xff] %v15136_v20 }
 0x763   :  { %15251 = vst [vmem:[%s26385_s8 + $0xc0] sm:$0xff] %v15135_v27  ;;  %v19872_v23 = vpop.f32.mrb[10].mxu0 }
 0x764   :  { %v15138_v15 = vadd.f32 %v19872_v23, %v25751_v43  ;;  %v14082_v62 = vpop.f32.mrb[11].mxu0  ;;  %v26021_v41 = vpop.permute.xlu0 %14823 }
 0x765   :  { %v15137_v32 = vadd.f32 %v25754_v19, %v14082_v62  ;;  %v26016_v19 = vpop.permute.xlu1 %14828 }
 0x766   :  { %15254 = vst [vmem:[%s26385_s8 + $0xd8] sm:$0xff] %v15138_v15 }
 0x767   :  { %15253 = vst [vmem:[%s26385_s8 + $0xd0] sm:$0xff] %v15137_v32  ;;  %v19875_v60 = vpop.f32.mrb[12].mxu0 }
 0x768   :  { %v15140_v45 = vadd.f32 %v19875_v60, %v25763_v2  ;;  %v14092_v50 = vpop.f32.mrb[13].mxu0 }
 0x769   :  { %v15139_v43 = vadd.f32 %v25767_v58, %v14092_v50  ;;  %v26032_v52 = vpop.permute.xlu1 %14838 }
 0x76a   :  { %15256 = vst [vmem:[%s26385_s8 + $0xe8] sm:$0xff] %v15140_v45 }
 0x76b   :  { %15255 = vst [vmem:[%s26385_s8 + $0xe0] sm:$0xff] %v15139_v43  ;;  %v19878_v31 = vpop.f32.mrb[14].mxu0 }
 0x76c   :  { %v15142_v61 = vadd.f32 %v19878_v31, %v25777_v40  ;;  %v14102_v48 = vpop.f32.mrb[15].mxu0  ;;  %v26035_v40 = vpop.permute.xlu0 %14833 }
 0x76d   :  { %v15141_v2 = vadd.f32 %v25780_v28, %v14102_v48 }
 0x76e   :  { %15258 = vst [vmem:[%s26385_s8 + $0xf8] sm:$0xff] %v15142_v61 }
 0x76f   :  { %15257 = vst [vmem:[%s26385_s8 + $0xf0] sm:$0xff] %v15141_v2  ;;  %v19881_v58 = vpop.f32.mrb[16].mxu0 }
 0x770   :  { %v15144_v55 = vadd.f32 %v19881_v58, %v25794_v7  ;;  %v14112_v1 = vpop.f32.mrb[17].mxu0  ;;  %v26053_v24 = vpop.permute.xlu0 %14843 }
 0x771   :  { %v15143_v26 = vadd.f32 %v25798_v9, %v14112_v1  ;;  %v26048_v9 = vpop.permute.xlu1 %14848 }
 0x772   :  { %15260 = vst [vmem:[%s26385_s8 + $0x108] sm:$0xff] %v15144_v55 }
 0x773   :  { %15259 = vst [vmem:[%s26385_s8 + $0x100] sm:$0xff] %v15143_v26  ;;  %v19884_v28 = vpop.f32.mrb[18].mxu0 }
 0x774   :  { %v15146_v10 = vadd.f32 %v19884_v28, %v25808_v0  ;;  %v14122_v33 = vpop.f32.mrb[19].mxu0 }
 0x775   :  { %v15145_v7 = vadd.f32 %v25811_v35, %v14122_v33  ;;  %v26064_v12 = vpop.permute.xlu1 %14858 }
 0x776   :  { %15262 = vst [vmem:[%s26385_s8 + $0x118] sm:$0xff] %v15146_v10 }
 0x777   :  { %15261 = vst [vmem:[%s26385_s8 + $0x110] sm:$0xff] %v15145_v7  ;;  %v19887_v42 = vpop.f32.mrb[20].mxu0 }
 0x778   :  { %v15148_v22 = vadd.f32 %v19887_v42, %v25820_v46  ;;  %v14132_v57 = vpop.f32.mrb[21].mxu0  ;;  %v26067_v46 = vpop.permute.xlu0 %14853 }
 0x779   :  { %v15147_v0 = vadd.f32 %v25824_v59, %v14132_v57 }
 0x77a   :  { %15264 = vst [vmem:[%s26385_s8 + $0x128] sm:$0xff] %v15148_v22 }
 0x77b   :  { %15263 = vst [vmem:[%s26385_s8 + $0x120] sm:$0xff] %v15147_v0  ;;  %v19890_v35 = vpop.f32.mrb[22].mxu0 }
 0x77c   :  { %v15150_v53 = vadd.f32 %v19890_v35, %v25835_v16  ;;  %v14142_v34 = vpop.f32.mrb[23].mxu0  ;;  %v26085_v5 = vpop.permute.xlu0 %14863 }
 0x77d   :  { %v15149_v8 = vadd.f32 %v25837_v17, %v14142_v34  ;;  %v26080_v17 = vpop.permute.xlu1 %14868 }
 0x77e   :  { %15266 = vst [vmem:[%s26385_s8 + $0x138] sm:$0xff] %v15150_v53 }
 0x77f   :  { %15265 = vst [vmem:[%s26385_s8 + $0x130] sm:$0xff] %v15149_v8  ;;  %v19893_v59 = vpop.f32.mrb[24].mxu0 }
 0x780   :  { %v15152_v54 = vadd.f32 %v19893_v59, %v25859_v11  ;;  %v14152_v36 = vpop.f32.mrb[25].mxu0 }
 0x781   :  { %v15151_v16 = vadd.f32 %v25863_v49, %v14152_v36  ;;  %v26096_v15 = vpop.permute.xlu1 %14878 }
 0x782   :  { %15268 = vst [vmem:[%s26385_s8 + $0x148] sm:$0xff] %v15152_v54 }
 0x783   :  { %15267 = vst [vmem:[%s26385_s8 + $0x140] sm:$0xff] %v15151_v16  ;;  %v19896_v37 = vpop.f32.mrb[26].mxu0 }
 0x784   :  { %v15154_v20 = vadd.f32 %v19896_v37, %v25883_v51  ;;  %v14162_v6 = vpop.f32.mrb[27].mxu0  ;;  %v26099_v51 = vpop.permute.xlu0 %14873 }
 0x785   :  { %v15153_v11 = vadd.f32 %v25890_v63, %v14162_v6 }
 0x786   :  { %15270 = vst [vmem:[%s26385_s8 + $0x158] sm:$0xff] %v15154_v20 }
 0x787   :  { %15269 = vst [vmem:[%s26385_s8 + $0x150] sm:$0xff] %v15153_v11  ;;  %v19899_v49 = vpop.f32.mrb[28].mxu0 }
 0x788   :  { %v15156_v27 = vadd.f32 %v19899_v49, %v25904_v56  ;;  %v14172_v23 = vpop.f32.mrb[29].mxu0  ;;  %v26117_v50 = vpop.permute.xlu0 %14883 }
 0x789   :  { %v15155_v62 = vadd.f32 %v25907_v18, %v14172_v23  ;;  %v26112_v18 = vpop.permute.xlu1 %14888 }
 0x78a   :  { %15272 = vst [vmem:[%s26385_s8 + $0x168] sm:$0xff] %v15156_v27 }
 0x78b   :  { %15271 = vst [vmem:[%s26385_s8 + $0x160] sm:$0xff] %v15155_v62  ;;  %v19902_v63 = vpop.f32.mrb[30].mxu0 }
 0x78c   :  { %v15158_v32 = vadd.f32 %v19902_v63, %v25920_v3  ;;  %v14182_v60 = vpop.f32.mrb[31].mxu0 }
 0x78d   :  { %v15157_v56 = vadd.f32 %v25925_v21, %v14182_v60  ;;  %v26128_v2 = vpop.permute.xlu1 %14898 }
 0x78e   :  { %15274 = vst [vmem:[%s26385_s8 + $0x178] sm:$0xff] %v15158_v32 }
 0x78f   :  { %15273 = vst [vmem:[%s26385_s8 + $0x170] sm:$0xff] %v15157_v56  ;;  %v19905_v45 = vpop.f32.mrb[32].mxu0 }
 0x790   :  { %v15160_v43 = vadd.f32 %v19905_v45, %v25936_v44  ;;  %v14192_v31 = vpop.f32.mrb[33].mxu0  ;;  %v26131_v44 = vpop.permute.xlu0 %14893 }
 0x791   :  { %v15159_v3 = vadd.f32 %v25939_v14, %v14192_v31 }
 0x792   :  { %15276 = vst [vmem:[%s26385_s8 + $0x188] sm:$0xff] %v15160_v43 }
 0x793   :  { %15275 = vst [vmem:[%s26385_s8 + $0x180] sm:$0xff] %v15159_v3  ;;  %v19908_v21 = vpop.f32.mrb[34].mxu0 }
 0x794   :  { %v15162_v61 = vadd.f32 %v19908_v21, %v25952_v38  ;;  %v14202_v48 = vpop.f32.mrb[35].mxu0  ;;  %v26149_v28 = vpop.permute.xlu0 %14903 }
 0x795   :  { %v15161_v58 = vadd.f32 %v25957_v47, %v14202_v48  ;;  %v26144_v47 = vpop.permute.xlu1 %14908 }
 0x796   :  { %15278 = vst [vmem:[%s26385_s8 + $0x198] sm:$0xff] %v15162_v61 }
 0x797   :  { %15277 = vst [vmem:[%s26385_s8 + $0x190] sm:$0xff] %v15161_v58  ;;  %v19911_v14 = vpop.f32.mrb[36].mxu0 }
 0x798   :  { %v15164_v55 = vadd.f32 %v19911_v14, %v25968_v25  ;;  %v14212_v1 = vpop.f32.mrb[37].mxu0 }
 0x799   :  { %v15163_v38 = vadd.f32 %v25971_v30, %v14212_v1  ;;  %v26160_v22 = vpop.permute.xlu1 %14918 }
 0x79a   :  { %15280 = vst [vmem:[%s26385_s8 + $0x1a8] sm:$0xff] %v15164_v55 }
 0x79b   :  { %15279 = vst [vmem:[%s26385_s8 + $0x1a0] sm:$0xff] %v15163_v38  ;;  %v19914_v26 = vpop.f32.mrb[38].mxu0 }
 0x79c   :  { %v15166_v10 = vadd.f32 %v19914_v26, %v25984_v39  ;;  %v14222_v33 = vpop.f32.mrb[39].mxu0  ;;  %v26163_v39 = vpop.permute.xlu0 %14913 }
 0x79d   :  { %v15165_v25 = vadd.f32 %v25989_v4, %v14222_v33 }
 0x79e   :  { %15282 = vst [vmem:[%s26385_s8 + $0x1b8] sm:$0xff] %v15166_v10 }
 0x79f   :  { %15281 = vst [vmem:[%s26385_s8 + $0x1b0] sm:$0xff] %v15165_v25  ;;  %v19917_v30 = vpop.f32.mrb[40].mxu0 }
 0x7a0   :  { %v15168_v7 = vadd.f32 %v19917_v30, %v26000_v13  ;;  %v14232_v42 = vpop.f32.mrb[41].mxu0  ;;  %v26181_v34 = vpop.permute.xlu0 %14923 }
 0x7a1   :  { %v15167_v57 = vadd.f32 %v26003_v29, %v14232_v42  ;;  %v26176_v29 = vpop.permute.xlu1 %14928 }
 0x7a2   :  { %15284 = vst [vmem:[%s26385_s8 + $0x1c8] sm:$0xff] %v15168_v7 }
 0x7a3   :  { %15283 = vst [vmem:[%s26385_s8 + $0x1c0] sm:$0xff] %v15167_v57  ;;  %v19920_v4 = vpop.f32.mrb[42].mxu0 }
 0x7a4   :  { %v15170_v0 = vadd.f32 %v19920_v4, %v26016_v19  ;;  %v14242_v35 = vpop.f32.mrb[43].mxu0 }
 0x7a5   :  { %v15169_v13 = vadd.f32 %v26021_v41, %v14242_v35  ;;  %v26192_v16 = vpop.permute.xlu1 %14938 }
 0x7a6   :  { %15286 = vst [vmem:[%s26385_s8 + $0x1d8] sm:$0xff] %v15170_v0 }
 0x7a7   :  { %15285 = vst [vmem:[%s26385_s8 + $0x1d0] sm:$0xff] %v15169_v13  ;;  %v19923_v53 = vpop.f32.mrb[44].mxu0 }
 0x7a8   :  { %v15172_v8 = vadd.f32 %v19923_v53, %v26032_v52  ;;  %v14252_v59 = vpop.f32.mrb[45].mxu0  ;;  %v26195_v52 = vpop.permute.xlu0 %14933 }
 0x7a9   :  { %v15171_v19 = vadd.f32 %v26035_v40, %v14252_v59 }
 0x7aa   :  { %15288 = vst [vmem:[%s26385_s8 + $0x1e8] sm:$0xff] %v15172_v8 }
 0x7ab   :  { %15287 = vst [vmem:[%s26385_s8 + $0x1e0] sm:$0xff] %v15171_v19  ;;  %v19926_v41 = vpop.f32.mrb[46].mxu0 }
 0x7ac   :  { %v15174_v54 = vadd.f32 %v19926_v41, %v26048_v9  ;;  %v14262_v36 = vpop.f32.mrb[47].mxu0  ;;  %v14944_v49 = vpop.permute.xlu0 %14943 }
 0x7ad   :  { %v15173_v37 = vadd.f32 %v26053_v24, %v14262_v36  ;;  %v14949_v24 = vpop.permute.xlu1 %14948 }
 0x7ae   :  { %15290 = vst [vmem:[%s26385_s8 + $0x1f8] sm:$0xff] %v15174_v54 }
 0x7af   :  { %15289 = vst [vmem:[%s26385_s8 + $0x1f0] sm:$0xff] %v15173_v37  ;;  %v19929_v40 = vpop.f32.mrb[48].mxu0 }
 0x7b0   :  { %v15176_v20 = vadd.f32 %v19929_v40, %v26064_v12  ;;  %v14272_v6 = vpop.f32.mrb[49].mxu0  ;;  %v14954_v56 = vpop.permute.xlu0 %14953 }
 0x7b1   :  { %v15175_v9 = vadd.f32 %v26067_v46, %v14272_v6  ;;  %v14959_v32 = vpop.permute.xlu1 %14958 }
 0x7b2   :  { %15292 = vst [vmem:[%s26385_s8 + $0x208] sm:$0xff] %v15176_v20 }
 0x7b3   :  { %15291 = vst [vmem:[%s26385_s8 + $0x200] sm:$0xff] %v15175_v9  ;;  %v19932_v11 = vpop.f32.mrb[50].mxu0 }
 0x7b4   :  { %v15178_v27 = vadd.f32 %v19932_v11, %v26080_v17  ;;  %v14282_v23 = vpop.f32.mrb[51].mxu0  ;;  %v14964_v31 = vpop.permute.xlu0 %14963 }
 0x7b5   :  { %v15177_v62 = vadd.f32 %v26085_v5, %v14282_v23 }
 0x7b6   :  { %15294 = vst [vmem:[%s26385_s8 + $0x218] sm:$0xff] %v15178_v27 }
 0x7b7   :  { %15293 = vst [vmem:[%s26385_s8 + $0x210] sm:$0xff] %v15177_v62  ;;  %v19935_v12 = vpop.f32.mrb[52].mxu0 }
 0x7b8   :  { %v15180_v46 = vadd.f32 %v19935_v12, %v26096_v15  ;;  %v14292_v63 = vpop.f32.mrb[53].mxu0  ;;  %v14969_v15 = vpop.permute.xlu1 %14968 }
 0x7b9   :  { %v15179_v60 = vadd.f32 %v26099_v51, %v14292_v63  ;;  %v14974_v55 = vpop.permute.xlu0 %14973 }
 0x7ba   :  { %15296 = vst [vmem:[%s26385_s8 + $0x228] sm:$0xff] %v15180_v46 }
 0x7bb   :  { %15295 = vst [vmem:[%s26385_s8 + $0x220] sm:$0xff] %v15179_v60  ;;  %v19938_v17 = vpop.f32.mrb[54].mxu0 }
 0x7bc   :  { %v15182_v5 = vadd.f32 %v19938_v17, %v26112_v18  ;;  %v14302_v45 = vpop.f32.mrb[55].mxu0  ;;  %v14979_v58 = vpop.permute.xlu1 %14978 }
 0x7bd   :  { %v15181_v43 = vadd.f32 %v26117_v50, %v14302_v45 }
 0x7be   :  { %15298 = vst [vmem:[%s26385_s8 + $0x238] sm:$0xff] %v15182_v5 }
 0x7bf   :  { %15297 = vst [vmem:[%s26385_s8 + $0x230] sm:$0xff] %v15181_v43  ;;  %v19941_v51 = vpop.f32.mrb[56].mxu0 }
 0x7c0   :  { %v15184_v3 = vadd.f32 %v19941_v51, %v26128_v2  ;;  %v14312_v21 = vpop.f32.mrb[57].mxu0 }
 0x7c1   :  { %v15183_v61 = vadd.f32 %v26131_v44, %v14312_v21 }
 0x7c2   :  { %15300 = vst [vmem:[%s26385_s8 + $0x248] sm:$0xff] %v15184_v3 }
 0x7c3   :  { %15299 = vst [vmem:[%s26385_s8 + $0x240] sm:$0xff] %v15183_v61  ;;  %v19944_v18 = vpop.f32.mrb[58].mxu0 }
 0x7c4   :  { %v15186_v50 = vadd.f32 %v19944_v18, %v26144_v47  ;;  %v14322_v48 = vpop.f32.mrb[59].mxu0  ;;  %v14989_v47 = vpop.permute.xlu1 %14988 }
 0x7c5   :  { %v15185_v14 = vadd.f32 %v26149_v28, %v14322_v48  ;;  %v14984_v28 = vpop.permute.xlu0 %14983 }
 0x7c6   :  { %15302 = vst [vmem:[%s26385_s8 + $0x258] sm:$0xff] %v15186_v50 }
 0x7c7   :  { %15301 = vst [vmem:[%s26385_s8 + $0x250] sm:$0xff] %v15185_v14  ;;  %v19947_v2 = vpop.f32.mrb[60].mxu0 }
 0x7c8   :  { %v15188_v44 = vadd.f32 %v19947_v2, %v26160_v22  ;;  %v14332_v1 = vpop.f32.mrb[61].mxu0  ;;  %v14999_v22 = vpop.permute.xlu1 %14998 }
 0x7c9   :  { %v15187_v38 = vadd.f32 %v26163_v39, %v14332_v1  ;;  %v14994_v39 = vpop.permute.xlu0 %14993 }
 0x7ca   :  { %15304 = vst [vmem:[%s26385_s8 + $0x268] sm:$0xff] %v15188_v44 }
 0x7cb   :  { %15303 = vst [vmem:[%s26385_s8 + $0x260] sm:$0xff] %v15187_v38  ;;  %v19950_v26 = vpop.f32.mrb[62].mxu0 }
 0x7cc   :  { %v15190_v10 = vadd.f32 %v19950_v26, %v26176_v29  ;;  %v14342_v33 = vpop.f32.mrb[63].mxu0  ;;  %v15009_v29 = vpop.permute.xlu1 %15008 }
 0x7cd   :  { %v15189_v25 = vadd.f32 %v26181_v34, %v14342_v33  ;;  %v15004_v34 = vpop.permute.xlu0 %15003 }
 0x7ce   :  { %15306 = vst [vmem:[%s26385_s8 + $0x278] sm:$0xff] %v15190_v10 }
 0x7cf   :  { %15305 = vst [vmem:[%s26385_s8 + $0x270] sm:$0xff] %v15189_v25  ;;  %v19953_v30 = vpop.f32.mrb[64].mxu0 }
 0x7d0   :  { %v15192_v7 = vadd.f32 %v19953_v30, %v26192_v16  ;;  %v14352_v42 = vpop.f32.mrb[65].mxu0  ;;  %v15019_v16 = vpop.permute.xlu1 %15018 }
 0x7d1   :  { %v15191_v57 = vadd.f32 %v26195_v52, %v14352_v42  ;;  %v15014_v52 = vpop.permute.xlu0 %15013 }
 0x7d2   :  { %15308 = vst [vmem:[%s26385_s8 + $0x288] sm:$0xff] %v15192_v7 }
 0x7d3   :  { %15307 = vst [vmem:[%s26385_s8 + $0x280] sm:$0xff] %v15191_v57  ;;  %v19956_v4 = vpop.f32.mrb[66].mxu0 }
 0x7d4   :  { %v15194_v0 = vadd.f32 %v19956_v4, %v14949_v24  ;;  %v14362_v35 = vpop.f32.mrb[67].mxu0  ;;  %v15029_v24 = vpop.permute.xlu1 %15028 }
 0x7d5   :  { %v15193_v13 = vadd.f32 %v14944_v49, %v14362_v35  ;;  %v15024_v49 = vpop.permute.xlu0 %15023 }
 0x7d6   :  { %15310 = vst [vmem:[%s26385_s8 + $0x298] sm:$0xff] %v15194_v0 }
 0x7d7   :  { %15309 = vst [vmem:[%s26385_s8 + $0x290] sm:$0xff] %v15193_v13  ;;  %v19959_v53 = vpop.f32.mrb[68].mxu0 }
 0x7d8   :  { %v15196_v8 = vadd.f32 %v19959_v53, %v14959_v32  ;;  %v14372_v59 = vpop.f32.mrb[69].mxu0  ;;  %v15039_v32 = vpop.permute.xlu1 %15038 }
 0x7d9   :  { %v15195_v19 = vadd.f32 %v14954_v56, %v14372_v59  ;;  %v15034_v56 = vpop.permute.xlu0 %15033 }
 0x7da   :  { %15312 = vst [vmem:[%s26385_s8 + $0x2a8] sm:$0xff] %v15196_v8 }
 0x7db   :  { %15311 = vst [vmem:[%s26385_s8 + $0x2a0] sm:$0xff] %v15195_v19  ;;  %v19962_v41 = vpop.f32.mrb[70].mxu0 }
 0x7dc   :  { %v15198_v54 = vadd.f32 %v19962_v41, %v14969_v15  ;;  %v14382_v36 = vpop.f32.mrb[71].mxu0  ;;  %v15049_v15 = vpop.permute.xlu1 %15048 }
 0x7dd   :  { %v15197_v37 = vadd.f32 %v14964_v31, %v14382_v36  ;;  %v15044_v31 = vpop.permute.xlu0 %15043 }
 0x7de   :  { %15314 = vst [vmem:[%s26385_s8 + $0x2b8] sm:$0xff] %v15198_v54 }
 0x7df   :  { %15313 = vst [vmem:[%s26385_s8 + $0x2b0] sm:$0xff] %v15197_v37  ;;  %v19965_v40 = vpop.f32.mrb[72].mxu0 }
 0x7e0   :  { %v15200_v20 = vadd.f32 %v19965_v40, %v14979_v58  ;;  %v14392_v6 = vpop.f32.mrb[73].mxu0  ;;  %v15059_v58 = vpop.permute.xlu1 %15058 }
 0x7e1   :  { %v15199_v9 = vadd.f32 %v14974_v55, %v14392_v6  ;;  %v15054_v55 = vpop.permute.xlu0 %15053 }
 0x7e2   :  { %15316 = vst [vmem:[%s26385_s8 + $0x2c8] sm:$0xff] %v15200_v20 }
 0x7e3   :  { %15315 = vst [vmem:[%s26385_s8 + $0x2c0] sm:$0xff] %v15199_v9  ;;  %v19968_v11 = vpop.f32.mrb[74].mxu0 }
 0x7e4   :  { %v15202_v27 = vadd.f32 %v19968_v11, %v14989_v47  ;;  %v14402_v23 = vpop.f32.mrb[75].mxu0  ;;  %v15069_v47 = vpop.permute.xlu1 %15068 }
 0x7e5   :  { %v15201_v62 = vadd.f32 %v14984_v28, %v14402_v23  ;;  %v15064_v28 = vpop.permute.xlu0 %15063 }
 0x7e6   :  { %15318 = vst [vmem:[%s26385_s8 + $0x2d8] sm:$0xff] %v15202_v27 }
 0x7e7   :  { %15317 = vst [vmem:[%s26385_s8 + $0x2d0] sm:$0xff] %v15201_v62  ;;  %v19971_v12 = vpop.f32.mrb[76].mxu0 }
 0x7e8   :  { %v15204_v46 = vadd.f32 %v19971_v12, %v14999_v22  ;;  %v14412_v63 = vpop.f32.mrb[77].mxu0  ;;  %v15079_v22 = vpop.permute.xlu1 %15078 }
 0x7e9   :  { %v15203_v60 = vadd.f32 %v14994_v39, %v14412_v63  ;;  %v15074_v39 = vpop.permute.xlu0 %15073 }
 0x7ea   :  { %15320 = vst [vmem:[%s26385_s8 + $0x2e8] sm:$0xff] %v15204_v46 }
 0x7eb   :  { %15319 = vst [vmem:[%s26385_s8 + $0x2e0] sm:$0xff] %v15203_v60  ;;  %v19974_v17 = vpop.f32.mrb[78].mxu0 }
 0x7ec   :  { %v15206_v5 = vadd.f32 %v19974_v17, %v15009_v29  ;;  %v14422_v45 = vpop.f32.mrb[79].mxu0  ;;  %v15089_v29 = vpop.permute.xlu1 %15088 }
 0x7ed   :  { %v15205_v43 = vadd.f32 %v15004_v34, %v14422_v45  ;;  %v15084_v34 = vpop.permute.xlu0 %15083 }
 0x7ee   :  { %15322 = vst [vmem:[%s26385_s8 + $0x2f8] sm:$0xff] %v15206_v5 }
 0x7ef   :  { %15321 = vst [vmem:[%s26385_s8 + $0x2f0] sm:$0xff] %v15205_v43  ;;  %v19977_v51 = vpop.f32.mrb[80].mxu0 }
 0x7f0   :  { %v15208_v3 = vadd.f32 %v19977_v51, %v15019_v16  ;;  %v14432_v21 = vpop.f32.mrb[81].mxu0  ;;  %v15099_v16 = vpop.permute.xlu1 %15098 }
 0x7f1   :  { %v15207_v61 = vadd.f32 %v15014_v52, %v14432_v21  ;;  %v15094_v52 = vpop.permute.xlu0 %15093 }
 0x7f2   :  { %15324 = vst [vmem:[%s26385_s8 + $0x308] sm:$0xff] %v15208_v3 }
 0x7f3   :  { %15323 = vst [vmem:[%s26385_s8 + $0x300] sm:$0xff] %v15207_v61  ;;  %v19980_v18 = vpop.f32.mrb[82].mxu0 }
 0x7f4   :  { %v15210_v50 = vadd.f32 %v19980_v18, %v15029_v24  ;;  %v14442_v48 = vpop.f32.mrb[83].mxu0  ;;  %v15109_v24 = vpop.permute.xlu1 %15108 }
 0x7f5   :  { %v15209_v14 = vadd.f32 %v15024_v49, %v14442_v48  ;;  %v15104_v49 = vpop.permute.xlu0 %15103 }
 0x7f6   :  { %15326 = vst [vmem:[%s26385_s8 + $0x318] sm:$0xff] %v15210_v50 }
 0x7f7   :  { %15325 = vst [vmem:[%s26385_s8 + $0x310] sm:$0xff] %v15209_v14  ;;  %v19983_v2 = vpop.f32.mrb[84].mxu0 }
 0x7f8   :  { %v15212_v44 = vadd.f32 %v19983_v2, %v15039_v32  ;;  %v14452_v1 = vpop.f32.mrb[85].mxu0 }
 0x7f9   :  { %v15211_v38 = vadd.f32 %v15034_v56, %v14452_v1 }
 0x7fa   :  { %15328 = vst [vmem:[%s26385_s8 + $0x328] sm:$0xff] %v15212_v44 }
 0x7fb   :  { %15327 = vst [vmem:[%s26385_s8 + $0x320] sm:$0xff] %v15211_v38  ;;  %v19986_v26 = vpop.f32.mrb[86].mxu0 }
 0x7fc   :  { %v15214_v10 = vadd.f32 %v19986_v26, %v15049_v15  ;;  %v14462_v33 = vpop.f32.mrb[87].mxu0 }
 0x7fd   :  { %v15213_v25 = vadd.f32 %v15044_v31, %v14462_v33 }
 0x7fe   :  { %15330 = vst [vmem:[%s26385_s8 + $0x338] sm:$0xff] %v15214_v10 }
 0x7ff   :  { %15329 = vst [vmem:[%s26385_s8 + $0x330] sm:$0xff] %v15213_v25  ;;  %v19989_v30 = vpop.f32.mrb[88].mxu0 }
 0x800   :  { %v15216_v7 = vadd.f32 %v19989_v30, %v15059_v58  ;;  %v14472_v42 = vpop.f32.mrb[89].mxu0 }
 0x801   :  { %v15215_v57 = vadd.f32 %v15054_v55, %v14472_v42 }
 0x802   :  { %15332 = vst [vmem:[%s26385_s8 + $0x348] sm:$0xff] %v15216_v7 }
 0x803   :  { %15331 = vst [vmem:[%s26385_s8 + $0x340] sm:$0xff] %v15215_v57  ;;  %v19992_v4 = vpop.f32.mrb[90].mxu0 }
 0x804   :  { %v15218_v0 = vadd.f32 %v19992_v4, %v15069_v47  ;;  %v14482_v35 = vpop.f32.mrb[91].mxu0 }
 0x805   :  { %v15217_v13 = vadd.f32 %v15064_v28, %v14482_v35 }
 0x806   :  { %15334 = vst [vmem:[%s26385_s8 + $0x358] sm:$0xff] %v15218_v0 }
 0x807   :  { %15333 = vst [vmem:[%s26385_s8 + $0x350] sm:$0xff] %v15217_v13  ;;  %v19995_v53 = vpop.f32.mrb[92].mxu0 }
 0x808   :  { %v15220_v8 = vadd.f32 %v19995_v53, %v15079_v22  ;;  %v14492_v59 = vpop.f32.mrb[93].mxu0 }
 0x809   :  { %v15219_v19 = vadd.f32 %v15074_v39, %v14492_v59 }
 0x80a   :  { %15336 = vst [vmem:[%s26385_s8 + $0x368] sm:$0xff] %v15220_v8 }
 0x80b   :  { %15335 = vst [vmem:[%s26385_s8 + $0x360] sm:$0xff] %v15219_v19  ;;  %v19998_v41 = vpop.f32.mrb[94].mxu0 }
 0x80c   :  { %v15222_v54 = vadd.f32 %v19998_v41, %v15089_v29  ;;  %v14502_v36 = vpop.f32.mrb[95].mxu0 }
 0x80d   :  { %v15221_v37 = vadd.f32 %v15084_v34, %v14502_v36 }
 0x80e   :  { %15338 = vst [vmem:[%s26385_s8 + $0x378] sm:$0xff] %v15222_v54 }
 0x80f   :  { %15337 = vst [vmem:[%s26385_s8 + $0x370] sm:$0xff] %v15221_v37  ;;  %v20001_v40 = vpop.f32.mrb[96].mxu0 }
 0x810   :  { %v15224_v20 = vadd.f32 %v20001_v40, %v15099_v16  ;;  %v14512_v6 = vpop.f32.mrb[97].mxu0 }
 0x811   :  { %v15223_v9 = vadd.f32 %v15094_v52, %v14512_v6 }
 0x812   :  { %15340 = vst [vmem:[%s26385_s8 + $0x388] sm:$0xff] %v15224_v20 }
 0x813   :  { %15339 = vst [vmem:[%s26385_s8 + $0x380] sm:$0xff] %v15223_v9  ;;  %v20004_v11 = vpop.f32.mrb[98].mxu0 }
 0x814   :  { %v15226_v27 = vadd.f32 %v20004_v11, %v15109_v24  ;;  %v14522_v23 = vpop.f32.mrb[99].mxu0 }
 0x815   :  { %v15225_v62 = vadd.f32 %v15104_v49, %v14522_v23 }
 0x816   :  { %15342 = vst [vmem:[%s26385_s8 + $0x398] sm:$0xff] %v15226_v27 }
 0x817   :  { %15341 = vst [vmem:[%s26385_s8 + $0x390] sm:$0xff] %v15225_v62 }

</bundles_post_ra>
